<compile_context>
chip_gen: v7x
topology: tpu7x:2x2x1
jax: 0.10.0
libtpu: 0.0.40
codegen_flags: <defaults>
</compile_context>

<pallas_src>
import math

import jax
import jax.numpy as jnp
import numpy as np
from jax.experimental import pallas as pl
from jax.experimental.pallas import tpu as pltpu

TILE = 2048                          # rays (lanes) processed per grid step
NUM_FREQS = 4                        # positional-encoding frequencies 2^0..2^3
EMBED_DIM = 4 + 2 * 4 * NUM_FREQS    # 36 : sin(16) | cos(16) | [u,v,s,t]
HIDDEN = 64
CODE_DIM = 32
HEAD_DIM = CODE_DIM + 1              # 33 : [color_code(32) | epi(1)]
HEAD_PAD = 40                        # head rows padded to a sublane multiple
RGB_PAD = 8                          # rgb rows padded to a sublane multiple
HALF_PI = math.pi / 2.0


# -------------------------- shared embedding math --------------------------
def _embed_full(uv, st):
    """uv, st: (N,2) f32 -> (N,36) positional encoding (row layout, reference).

    Column order: sin(2^i*[u,v,s,t]) for i=0..3, cos(...), then raw [u,v,s,t].
    The kernel computes the same thing with features on the sublane axis."""
    uvst = jnp.concatenate([uv, st], axis=-1)                          # (N,4)
    scaled = jnp.concatenate([uvst * (2.0 ** i) for i in range(NUM_FREQS)],
                             axis=-1)                                  # (N,16)
    return jnp.concatenate([jnp.sin(scaled), jnp.cos(scaled), uvst], axis=-1)


def _uv_column_mask():
    """1.0 for columns of the 36-wide embedding that depend on uv, else 0."""
    mask = np.zeros((EMBED_DIM,), np.float32)
    for blk_start in (0, 4 * NUM_FREQS):              # sin block, cos block
        for k in range(4 * NUM_FREQS):
            if k % 4 < 2:                              # coord index 0/1 == u/v
                mask[blk_start + k] = 1.0
    mask[2 * 4 * NUM_FREQS + 0] = 1.0                  # raw u
    mask[2 * 4 * NUM_FREQS + 1] = 1.0                  # raw v
    return mask


# ------------------------------ Pallas kernel ------------------------------
def _nelf_field_kernel(uv_ref, st_ref, color_ref,
                       w1_ref, b1_ref, w2_ref, b2_ref,
                       wh_ref, bh_ref, w3_ref, b3_ref, wr_ref, br_ref,
                       out_ref):
    # ---- positional embedding, feature-major: (36, T) ----------------------
    uvst = jnp.concatenate([uv_ref[...], st_ref[...]], axis=0)        # (4, T)
    scaled = jnp.concatenate([uvst * (2.0 ** i) for i in range(NUM_FREQS)],
                             axis=0)                                  # (16, T)
    full_e = jnp.concatenate([jnp.sin(scaled), jnp.cos(scaled), uvst],
                             axis=0)                                  # (36, T)
    e_b = full_e.astype(jnp.bfloat16)

    # ---- trunk MLP (bf16 operands, f32 accumulation) -----------------------
    h = jnp.dot(w1_ref[...], e_b, preferred_element_type=jnp.float32)  # (64,T)
    h = jnp.maximum(h + b1_ref[...], 0.0)
    h = jnp.dot(w2_ref[...], h.astype(jnp.bfloat16),
                preferred_element_type=jnp.float32)
    h = jnp.maximum(h + b2_ref[...], 0.0)

    # ---- fused head: rows [color_code(32) | epi(1) | zero-pad] -------------
    head = jnp.dot(wh_ref[...], h.astype(jnp.bfloat16),
                   preferred_element_type=jnp.float32) + bh_ref[...]   # (40,T)
    code = head[:CODE_DIM, :]                                          # (32,T)
    epi_pre = head[CODE_DIM:CODE_DIM + 1, :]                           # (1, T)

    # ---- rgb head == field.forward_with_color_code(color_code, uv_embeds) --
    # w3's st-embedding rows are zero and its epi row was dropped in the
    # wrapper, so this single matmul sees exactly [color_code | uv embeds].
    h3_in = jnp.concatenate([code, full_e], axis=0).astype(jnp.bfloat16)  # (68,T)
    h3 = jnp.dot(w3_ref[...], h3_in, preferred_element_type=jnp.float32)
    h3 = jnp.maximum(h3 + b3_ref[...], 0.0)
    rgb_pre = jnp.dot(wr_ref[...], h3.astype(jnp.bfloat16),
                      preferred_element_type=jnp.float32) + br_ref[...]   # (8,T)

    rgb = jax.nn.sigmoid(rgb_pre[:3, :])                               # (3, T)
    epi = jax.nn.sigmoid(epi_pre) * HALF_PI                            # (1, T)

    # Per-ray squared error for im2mse; reduced (and un-padded) in the wrapper.
    diff = rgb - color_ref[...]
    err = jnp.sum(diff * diff, axis=0, keepdims=True)                  # (1, T)

    # Single packed, lane-dense output stream: rows [rgb(3) | epi(1) | err(1)].
    out_ref[...] = jnp.concatenate([rgb, epi, err], axis=0)            # (5, T)


# ------------------------------ parameters ---------------------------------
def init_params(seed=0):
    key = jax.random.PRNGKey(seed)
    ks = jax.random.split(key, 6)

    def w(k, shape):
        return jax.random.normal(k, shape, jnp.float32) / jnp.sqrt(shape[0])

    uv_mask = jnp.asarray(_uv_column_mask())[:, None]              # (36, 1)
    w3_code = w(ks[3], (HEAD_DIM, HIDDEN)).at[CODE_DIM].set(0.0)   # epi row zero
    w3_uv = w(ks[4], (EMBED_DIM, HIDDEN)) * uv_mask                # uv embeds only
    return {
        'w1': w(ks[0], (EMBED_DIM, HIDDEN)),
        'b1': jnp.zeros((1, HIDDEN), jnp.float32),
        'w2': w(ks[1], (HIDDEN, HIDDEN)),
        'b2': jnp.zeros((1, HIDDEN), jnp.float32),
        'wh': w(ks[2], (HIDDEN, HEAD_DIM)),          # [color_code | epi]
        'bh': jnp.zeros((1, HEAD_DIM), jnp.float32),
        'w3': jnp.concatenate([w3_code, w3_uv], axis=0),   # (69, 64)
        'b3': jnp.zeros((1, HIDDEN), jnp.float32),
        'wr': w(ks[5], (HIDDEN, 3)),
        'br': jnp.zeros((1, 3), jnp.float32),
    }


# -------------------------------- wrapper -----------------------------------
def nelf_epi_forward(params, uv, st, rays_color):
    """Reproduces NeLFEPI.forward_render eval path (batch_ray_forward branch):
    returns {'color_map': (b,n,3), 'epi_map': (b,n,1), 'rec_loss': scalar}."""
    b, n, _ = uv.shape
    N = b * n
    n_pad = pl.cdiv(N, TILE) * TILE
    pad = n_pad - N

    # Feature-major inputs: (feat, N) with rays on the lane axis.
    uv_t = uv.reshape(-1, 2).astype(jnp.float32).T
    st_t = st.reshape(-1, 2).astype(jnp.float32).T
    color_t = rays_color.reshape(-1, 3).astype(jnp.float32).T
    if pad:
        uv_t = jnp.pad(uv_t, ((0, 0), (0, pad)))
        st_t = jnp.pad(st_t, ((0, 0), (0, pad)))
        color_t = jnp.pad(color_t, ((0, 0), (0, pad)))

    # Weights transposed to (out_feat, in_feat), cast to bf16 for the MXU;
    # biases as (out_feat, 1) columns.  Head / rgb weights zero-padded on the
    # out_feat axis to a sublane multiple.
    w1t = params['w1'].T.astype(jnp.bfloat16)                           # (64,36)
    b1c = params['b1'].reshape(HIDDEN, 1)
    w2t = params['w2'].T.astype(jnp.bfloat16)                           # (64,64)
    b2c = params['b2'].reshape(HIDDEN, 1)
    wht = (jnp.zeros((HEAD_PAD, HIDDEN), jnp.float32)
           .at[:HEAD_DIM].set(params['wh'].T)).astype(jnp.bfloat16)     # (40,64)
    bhc = (jnp.zeros((HEAD_PAD, 1), jnp.float32)
           .at[:HEAD_DIM].set(params['bh'].reshape(HEAD_DIM, 1)))
    w3_eff = jnp.concatenate([params['w3'][:CODE_DIM],                  # drop the
                              params['w3'][HEAD_DIM:]], axis=0)         # zero epi row
    w3t = w3_eff.T.astype(jnp.bfloat16)                                 # (64,68)
    b3c = params['b3'].reshape(HIDDEN, 1)
    wrt = (jnp.zeros((RGB_PAD, HIDDEN), jnp.float32)
           .at[:3].set(params['wr'].T)).astype(jnp.bfloat16)            # (8,64)
    brc = (jnp.zeros((RGB_PAD, 1), jnp.float32)
           .at[:3].set(params['br'].reshape(3, 1)))

    param_arrays = [w1t, b1c, w2t, b2c, wht, bhc, w3t, b3c, wrt, brc]

    def lane_spec(rows):
        return pl.BlockSpec((rows, TILE), lambda i: (0, i))

    def full_spec(a):
        return pl.BlockSpec(a.shape, lambda i: (0, 0))

    packed = pl.pallas_call(
        _nelf_field_kernel,
        out_shape=jax.ShapeDtypeStruct((5, n_pad), jnp.float32),
        grid_spec=pltpu.PrefetchScalarGridSpec(
            num_scalar_prefetch=0,
            grid=(n_pad // TILE,),
            in_specs=[lane_spec(2), lane_spec(2), lane_spec(3)]
                     + [full_spec(a) for a in param_arrays],
            out_specs=pl.BlockSpec((5, TILE), lambda i: (0, i)),
        ),
        compiler_params=pltpu.CompilerParams(
            dimension_semantics=("parallel",)),
    )(uv_t, st_t, color_t, *param_arrays)

    packed = packed[:, :N]
    rgb = packed[:3, :].T                              # (N, 3)
    epi = packed[3, :][:, None]                        # (N, 1)
    rec_loss = jnp.sum(packed[4, :]) / (N * 3)         # im2mse
    return {
        'color_map': rgb.reshape(b, n, 3),
        'epi_map': epi.reshape(b, n, 1),
        'rec_loss': rec_loss,
    }


# ------------------------- pure-JAX reference check ------------------------
def _reference(params, uv, st, rays_color):
    b, n, _ = uv.shape
    e = _embed_full(uv.reshape(-1, 2).astype(jnp.float32),
                    st.reshape(-1, 2).astype(jnp.float32))
    h = jnp.maximum(e @ params['w1'] + params['b1'], 0.0)
    h = jnp.maximum(h @ params['w2'] + params['b2'], 0.0)
    head = h @ params['wh'] + params['bh']
    epi = jax.nn.sigmoid(head[:, CODE_DIM:CODE_DIM + 1]) * HALF_PI
    h3 = jnp.maximum(jnp.concatenate([head, e], axis=-1) @ params['w3']
                     + params['b3'], 0.0)
    rgb = jax.nn.sigmoid(h3 @ params['wr'] + params['br'])
    rec = jnp.mean((rgb - rays_color.reshape(-1, 3)) ** 2)
    return rgb.reshape(b, n, 3), epi.reshape(b, n, 1), rec


if __name__ == "__main__":
    b, n = 2, 3000          # N = 6000 rays -> padded to 3 tiles of 2048
    key = jax.random.PRNGKey(0)
    k_uv, k_st, k_c = jax.random.split(key, 3)
    uv = jax.random.uniform(k_uv, (b, n, 2), jnp.float32, -1.0, 1.0)
    st = jax.random.uniform(k_st, (b, n, 2), jnp.float32, -1.0, 1.0)
    rays_color = jax.random.uniform(k_c, (b, n, 3), jnp.float32)

    params = init_params(0)

    fwd = jax.jit(nelf_epi_forward)
    out = fwd(params, uv, st, rays_color)
    jax.block_until_ready(out)

    ref_rgb, ref_epi, ref_rec = _reference(params, uv, st, rays_color)
    # Kernel uses bf16 matmul operands with f32 accumulation; compare against
    # the f32 reference with a 1e-2 tolerance.
    np.testing.assert_allclose(np.asarray(out['color_map']), np.asarray(ref_rgb),
                               rtol=1e-2, atol=1e-2)
    np.testing.assert_allclose(np.asarray(out['epi_map']), np.asarray(ref_epi),
                               rtol=1e-2, atol=1e-2)
    np.testing.assert_allclose(np.asarray(out['rec_loss']), np.asarray(ref_rec),
                               rtol=1e-2, atol=1e-2)

    assert out['color_map'].shape == (b, n, 3)
    assert out['epi_map'].shape == (b, n, 1)
    print("KERNEL_OK")
</pallas_src>

<mosaic_0001>
module attributes {stable_mosaic.version = 11 : i64} {
  func.func @_nelf_field_kernel(%arg0: i32, %arg1: memref<2x2048xf32, #tpu.memory_space<vmem>>, %arg2: memref<2x2048xf32, #tpu.memory_space<vmem>>, %arg3: memref<3x2048xf32, #tpu.memory_space<vmem>>, %arg4: memref<64x36xbf16, #tpu.memory_space<vmem>>, %arg5: memref<64x1xf32, #tpu.memory_space<vmem>>, %arg6: memref<64x64xbf16, #tpu.memory_space<vmem>>, %arg7: memref<64x1xf32, #tpu.memory_space<vmem>>, %arg8: memref<40x64xbf16, #tpu.memory_space<vmem>>, %arg9: memref<40x1xf32, #tpu.memory_space<vmem>>, %arg10: memref<64x68xbf16, #tpu.memory_space<vmem>>, %arg11: memref<64x1xf32, #tpu.memory_space<vmem>>, %arg12: memref<8x64xbf16, #tpu.memory_space<vmem>>, %arg13: memref<8x1xf32, #tpu.memory_space<vmem>>, %arg14: memref<5x2048xf32, #tpu.memory_space<vmem>>) attributes {dimension_semantics = [#tpu.dimension_semantics<parallel>], iteration_bounds = array<i64: 3>, scalar_prefetch = 0 : i64, scratch_operands = 0 : i64, tpu.core_type = #tpu.core_type<tc>, window_params = [{transform_indices = @transform_0, window_bounds = array<i64: 2, 2048>}, {transform_indices = @transform_1, window_bounds = array<i64: 2, 2048>}, {transform_indices = @transform_2, window_bounds = array<i64: 3, 2048>}, {pipeline_mode = #tpu.pipeline_mode<synchronous>, transform_indices = @transform_3, window_bounds = array<i64: 64, 36>}, {pipeline_mode = #tpu.pipeline_mode<synchronous>, transform_indices = @transform_4, window_bounds = array<i64: 64, 1>}, {pipeline_mode = #tpu.pipeline_mode<synchronous>, transform_indices = @transform_5, window_bounds = array<i64: 64, 64>}, {pipeline_mode = #tpu.pipeline_mode<synchronous>, transform_indices = @transform_6, window_bounds = array<i64: 64, 1>}, {pipeline_mode = #tpu.pipeline_mode<synchronous>, transform_indices = @transform_7, window_bounds = array<i64: 40, 64>}, {pipeline_mode = #tpu.pipeline_mode<synchronous>, transform_indices = @transform_8, window_bounds = array<i64: 40, 1>}, {pipeline_mode = #tpu.pipeline_mode<synchronous>, transform_indices = @transform_9, window_bounds = array<i64: 64, 68>}, {pipeline_mode = #tpu.pipeline_mode<synchronous>, transform_indices = @transform_10, window_bounds = array<i64: 64, 1>}, {pipeline_mode = #tpu.pipeline_mode<synchronous>, transform_indices = @transform_11, window_bounds = array<i64: 8, 64>}, {pipeline_mode = #tpu.pipeline_mode<synchronous>, transform_indices = @transform_12, window_bounds = array<i64: 8, 1>}, {transform_indices = @transform_13, window_bounds = array<i64: 5, 2048>}]} {
    %c0 = arith.constant 0 : index
    %c0_0 = arith.constant 0 : index
    %0 = vector.load %arg1[%c0, %c0_0] : memref<2x2048xf32, #tpu.memory_space<vmem>>, vector<2x2048xf32>
    %c0_1 = arith.constant 0 : index
    %c0_2 = arith.constant 0 : index
    %1 = vector.load %arg2[%c0_1, %c0_2] : memref<2x2048xf32, #tpu.memory_space<vmem>>, vector<2x2048xf32>
    %2 = tpu.concatenate %0, %1 in 0 : vector<2x2048xf32>, vector<2x2048xf32> -> vector<4x2048xf32>
    %cst = arith.constant 1.000000e+00 : f32
    %3 = vector.broadcast %cst : f32 to vector<4x2048xf32>
    %4 = arith.mulf %2, %3 : vector<4x2048xf32>
    %cst_3 = arith.constant 2.000000e+00 : f32
    %5 = vector.broadcast %cst_3 : f32 to vector<4x2048xf32>
    %6 = arith.mulf %2, %5 : vector<4x2048xf32>
    %cst_4 = arith.constant 4.000000e+00 : f32
    %7 = vector.broadcast %cst_4 : f32 to vector<4x2048xf32>
    %8 = arith.mulf %2, %7 : vector<4x2048xf32>
    %cst_5 = arith.constant 8.000000e+00 : f32
    %9 = vector.broadcast %cst_5 : f32 to vector<4x2048xf32>
    %10 = arith.mulf %2, %9 : vector<4x2048xf32>
    %11 = tpu.concatenate %4, %6, %8, %10 in 0 : vector<4x2048xf32>, vector<4x2048xf32>, vector<4x2048xf32>, vector<4x2048xf32> -> vector<16x2048xf32>
    %12 = math.sin %11 : vector<16x2048xf32>
    %13 = math.cos %11 : vector<16x2048xf32>
    %14 = tpu.concatenate %12, %13, %2 in 0 : vector<16x2048xf32>, vector<16x2048xf32>, vector<4x2048xf32> -> vector<36x2048xf32>
    %15 = arith.truncf %14 : vector<36x2048xf32> to vector<36x2048xbf16>
    %c0_6 = arith.constant 0 : index
    %c0_7 = arith.constant 0 : index
    %16 = vector.load %arg4[%c0_6, %c0_7] : memref<64x36xbf16, #tpu.memory_space<vmem>>, vector<64x36xbf16>
    %cst_8 = arith.constant dense<0.000000e+00> : vector<64x2048xf32>
    %17 = tpu.matmul %16, %15, %cst_8 {dimension_numbers = #tpu.dot_dimension_numbers<[1], [0], [0], [1], [0, 0, 1, 1], [], []>} : vector<64x36xbf16>, vector<36x2048xbf16>, vector<64x2048xf32> -> vector<64x2048xf32>
    %c0_9 = arith.constant 0 : index
    %c0_10 = arith.constant 0 : index
    %18 = vector.load %arg5[%c0_9, %c0_10] : memref<64x1xf32, #tpu.memory_space<vmem>>, vector<64x1xf32>
    %19 = vector.broadcast %18 : vector<64x1xf32> to vector<64x2048xf32>
    %20 = arith.addf %17, %19 : vector<64x2048xf32>
    %cst_11 = arith.constant 0.000000e+00 : f32
    %21 = vector.broadcast %cst_11 : f32 to vector<64x2048xf32>
    %22 = arith.maximumf %20, %21 : vector<64x2048xf32>
    %c0_12 = arith.constant 0 : index
    %c0_13 = arith.constant 0 : index
    %23 = vector.load %arg6[%c0_12, %c0_13] : memref<64x64xbf16, #tpu.memory_space<vmem>>, vector<64x64xbf16>
    %24 = arith.truncf %22 : vector<64x2048xf32> to vector<64x2048xbf16>
    %cst_14 = arith.constant dense<0.000000e+00> : vector<64x2048xf32>
    %25 = tpu.matmul %23, %24, %cst_14 {dimension_numbers = #tpu.dot_dimension_numbers<[1], [0], [0], [1], [0, 0, 1, 1], [], []>} : vector<64x64xbf16>, vector<64x2048xbf16>, vector<64x2048xf32> -> vector<64x2048xf32>
    %c0_15 = arith.constant 0 : index
    %c0_16 = arith.constant 0 : index
    %26 = vector.load %arg7[%c0_15, %c0_16] : memref<64x1xf32, #tpu.memory_space<vmem>>, vector<64x1xf32>
    %27 = vector.broadcast %26 : vector<64x1xf32> to vector<64x2048xf32>
    %28 = arith.addf %25, %27 : vector<64x2048xf32>
    %cst_17 = arith.constant 0.000000e+00 : f32
    %29 = vector.broadcast %cst_17 : f32 to vector<64x2048xf32>
    %30 = arith.maximumf %28, %29 : vector<64x2048xf32>
    %c0_18 = arith.constant 0 : index
    %c0_19 = arith.constant 0 : index
    %31 = vector.load %arg8[%c0_18, %c0_19] : memref<40x64xbf16, #tpu.memory_space<vmem>>, vector<40x64xbf16>
    %32 = arith.truncf %30 : vector<64x2048xf32> to vector<64x2048xbf16>
    %cst_20 = arith.constant dense<0.000000e+00> : vector<40x2048xf32>
    %33 = tpu.matmul %31, %32, %cst_20 {dimension_numbers = #tpu.dot_dimension_numbers<[1], [0], [0], [1], [0, 0, 1, 1], [], []>} : vector<40x64xbf16>, vector<64x2048xbf16>, vector<40x2048xf32> -> vector<40x2048xf32>
    %c0_21 = arith.constant 0 : index
    %c0_22 = arith.constant 0 : index
    %34 = vector.load %arg9[%c0_21, %c0_22] : memref<40x1xf32, #tpu.memory_space<vmem>>, vector<40x1xf32>
    %35 = vector.broadcast %34 : vector<40x1xf32> to vector<40x2048xf32>
    %36 = arith.addf %33, %35 : vector<40x2048xf32>
    %37 = vector.extract_strided_slice %36 {offsets = [0, 0], sizes = [32, 2048], strides = [1, 1]} : vector<40x2048xf32> to vector<32x2048xf32>
    %38 = vector.extract_strided_slice %36 {offsets = [32, 0], sizes = [1, 2048], strides = [1, 1]} : vector<40x2048xf32> to vector<1x2048xf32>
    %39 = tpu.concatenate %37, %14 in 0 : vector<32x2048xf32>, vector<36x2048xf32> -> vector<68x2048xf32>
    %40 = arith.truncf %39 : vector<68x2048xf32> to vector<68x2048xbf16>
    %c0_23 = arith.constant 0 : index
    %c0_24 = arith.constant 0 : index
    %41 = vector.load %arg10[%c0_23, %c0_24] : memref<64x68xbf16, #tpu.memory_space<vmem>>, vector<64x68xbf16>
    %cst_25 = arith.constant dense<0.000000e+00> : vector<64x2048xf32>
    %42 = tpu.matmul %41, %40, %cst_25 {dimension_numbers = #tpu.dot_dimension_numbers<[1], [0], [0], [1], [0, 0, 1, 1], [], []>} : vector<64x68xbf16>, vector<68x2048xbf16>, vector<64x2048xf32> -> vector<64x2048xf32>
    %c0_26 = arith.constant 0 : index
    %c0_27 = arith.constant 0 : index
    %43 = vector.load %arg11[%c0_26, %c0_27] : memref<64x1xf32, #tpu.memory_space<vmem>>, vector<64x1xf32>
    %44 = vector.broadcast %43 : vector<64x1xf32> to vector<64x2048xf32>
    %45 = arith.addf %42, %44 : vector<64x2048xf32>
    %cst_28 = arith.constant 0.000000e+00 : f32
    %46 = vector.broadcast %cst_28 : f32 to vector<64x2048xf32>
    %47 = arith.maximumf %45, %46 : vector<64x2048xf32>
    %c0_29 = arith.constant 0 : index
    %c0_30 = arith.constant 0 : index
    %48 = vector.load %arg12[%c0_29, %c0_30] : memref<8x64xbf16, #tpu.memory_space<vmem>>, vector<8x64xbf16>
    %49 = arith.truncf %47 : vector<64x2048xf32> to vector<64x2048xbf16>
    %cst_31 = arith.constant dense<0.000000e+00> : vector<8x2048xf32>
    %50 = tpu.matmul %48, %49, %cst_31 {dimension_numbers = #tpu.dot_dimension_numbers<[1], [0], [0], [1], [0, 0, 1, 1], [], []>} : vector<8x64xbf16>, vector<64x2048xbf16>, vector<8x2048xf32> -> vector<8x2048xf32>
    %c0_32 = arith.constant 0 : index
    %c0_33 = arith.constant 0 : index
    %51 = vector.load %arg13[%c0_32, %c0_33] : memref<8x1xf32, #tpu.memory_space<vmem>>, vector<8x1xf32>
    %52 = vector.broadcast %51 : vector<8x1xf32> to vector<8x2048xf32>
    %53 = arith.addf %50, %52 : vector<8x2048xf32>
    %54 = vector.extract_strided_slice %53 {offsets = [0, 0], sizes = [3, 2048], strides = [1, 1]} : vector<8x2048xf32> to vector<3x2048xf32>
    %55 = arith.negf %54 : vector<3x2048xf32>
    %56 = math.exp %55 : vector<3x2048xf32>
    %cst_34 = arith.constant 1.000000e+00 : f32
    %57 = vector.broadcast %cst_34 : f32 to vector<3x2048xf32>
    %58 = arith.addf %57, %56 : vector<3x2048xf32>
    %59 = arith.divf %57, %58 : vector<3x2048xf32>
    %60 = arith.negf %38 : vector<1x2048xf32>
    %61 = math.exp %60 : vector<1x2048xf32>
    %cst_35 = arith.constant 1.000000e+00 : f32
    %62 = vector.broadcast %cst_35 : f32 to vector<1x2048xf32>
    %63 = arith.addf %62, %61 : vector<1x2048xf32>
    %64 = arith.divf %62, %63 : vector<1x2048xf32>
    %cst_36 = arith.constant 1.57079637 : f32
    %65 = vector.broadcast %cst_36 : f32 to vector<1x2048xf32>
    %66 = arith.mulf %64, %65 : vector<1x2048xf32>
    %c0_37 = arith.constant 0 : index
    %c0_38 = arith.constant 0 : index
    %67 = vector.load %arg3[%c0_37, %c0_38] : memref<3x2048xf32, #tpu.memory_space<vmem>>, vector<3x2048xf32>
    %68 = arith.subf %59, %67 : vector<3x2048xf32>
    %69 = arith.mulf %68, %68 : vector<3x2048xf32>
    %cst_39 = arith.constant dense<0.000000e+00> : vector<2048xf32>
    %70 = vector.multi_reduction <add>, %69, %cst_39 [0] : vector<3x2048xf32> to vector<2048xf32>
    %71 = vector.shape_cast %70 : vector<2048xf32> to vector<1x2048xf32>
    %72 = tpu.concatenate %59, %66, %71 in 0 : vector<3x2048xf32>, vector<1x2048xf32>, vector<1x2048xf32> -> vector<5x2048xf32>
    %c0_40 = arith.constant 0 : index
    %c0_41 = arith.constant 0 : index
    %73 = vector.load %arg14[%c0_40, %c0_41] : memref<5x2048xf32, #tpu.memory_space<vmem>>, vector<5x2048xf32>
    tpu.vector_store %arg14[%c0_40, %c0_41], %72 {strides = array<i32>} : memref<5x2048xf32, #tpu.memory_space<vmem>>, vector<5x2048xf32>,
    return
  }
  func.func @transform_0(%arg0: i32) -> (i32, i32) {
    %c0_i32 = arith.constant 0 : i32
    %c0_i32_0 = arith.constant 0 : i32
    return %c0_i32, %arg0 : i32, i32
  }
  func.func @transform_1(%arg0: i32) -> (i32, i32) {
    %c0_i32 = arith.constant 0 : i32
    %c0_i32_0 = arith.constant 0 : i32
    return %c0_i32, %arg0 : i32, i32
  }
  func.func @transform_2(%arg0: i32) -> (i32, i32) {
    %c0_i32 = arith.constant 0 : i32
    %c0_i32_0 = arith.constant 0 : i32
    return %c0_i32, %arg0 : i32, i32
  }
  func.func @transform_3(%arg0: i32) -> (i32, i32) {
    %c0_i32 = arith.constant 0 : i32
    %c0_i32_0 = arith.constant 0 : i32
    %c0_i32_1 = arith.constant 0 : i32
    return %c0_i32, %c0_i32_0 : i32, i32
  }
  func.func @transform_4(%arg0: i32) -> (i32, i32) {
    %c0_i32 = arith.constant 0 : i32
    %c0_i32_0 = arith.constant 0 : i32
    %c0_i32_1 = arith.constant 0 : i32
    return %c0_i32, %c0_i32_0 : i32, i32
  }
  func.func @transform_5(%arg0: i32) -> (i32, i32) {
    %c0_i32 = arith.constant 0 : i32
    %c0_i32_0 = arith.constant 0 : i32
    %c0_i32_1 = arith.constant 0 : i32
    return %c0_i32, %c0_i32_0 : i32, i32
  }
  func.func @transform_6(%arg0: i32) -> (i32, i32) {
    %c0_i32 = arith.constant 0 : i32
    %c0_i32_0 = arith.constant 0 : i32
    %c0_i32_1 = arith.constant 0 : i32
    return %c0_i32, %c0_i32_0 : i32, i32
  }
  func.func @transform_7(%arg0: i32) -> (i32, i32) {
    %c0_i32 = arith.constant 0 : i32
    %c0_i32_0 = arith.constant 0 : i32
    %c0_i32_1 = arith.constant 0 : i32
    return %c0_i32, %c0_i32_0 : i32, i32
  }
  func.func @transform_8(%arg0: i32) -> (i32, i32) {
    %c0_i32 = arith.constant 0 : i32
    %c0_i32_0 = arith.constant 0 : i32
    %c0_i32_1 = arith.constant 0 : i32
    return %c0_i32, %c0_i32_0 : i32, i32
  }
  func.func @transform_9(%arg0: i32) -> (i32, i32) {
    %c0_i32 = arith.constant 0 : i32
    %c0_i32_0 = arith.constant 0 : i32
    %c0_i32_1 = arith.constant 0 : i32
    return %c0_i32, %c0_i32_0 : i32, i32
  }
  func.func @transform_10(%arg0: i32) -> (i32, i32) {
    %c0_i32 = arith.constant 0 : i32
    %c0_i32_0 = arith.constant 0 : i32
    %c0_i32_1 = arith.constant 0 : i32
    return %c0_i32, %c0_i32_0 : i32, i32
  }
  func.func @transform_11(%arg0: i32) -> (i32, i32) {
    %c0_i32 = arith.constant 0 : i32
    %c0_i32_0 = arith.constant 0 : i32
    %c0_i32_1 = arith.constant 0 : i32
    return %c0_i32, %c0_i32_0 : i32, i32
  }
  func.func @transform_12(%arg0: i32) -> (i32, i32) {
    %c0_i32 = arith.constant 0 : i32
    %c0_i32_0 = arith.constant 0 : i32
    %c0_i32_1 = arith.constant 0 : i32
    return %c0_i32, %c0_i32_0 : i32, i32
  }
  func.func @transform_13(%arg0: i32) -> (i32, i32) {
    %c0_i32 = arith.constant 0 : i32
    %c0_i32_0 = arith.constant 0 : i32
    return %c0_i32, %arg0 : i32, i32
  }
}

</mosaic_0001>

<bundles_post_ra>
// kernel: squeeze.0
= control target key start
LH: loop header
LB: loop body
LE: loop exit
PB: predicated region body
PF: predicated region fallthrough
CT: control target
= control target key end

     0   :  { %vm5_vm0 = vcmask 457728   ;;  %s463_s18 = smov 72   ;;  %s528_s0 = inlined_call_operand.vmem [shape: f32[6000], index: 0, kind: input, shape index: {}]   ;;  %s529_s1 = inlined_call_operand.hbm [shape: f32[2,3000,1], index: 1, kind: output, shape index: {}]  }
   0x1   :  { %v430_v0 = vld [vmem:[%s528_s0 + $0x2e] sm:$0x1]   ;;  %v431_v1 = vld [vmem:[%s528_s0 + $0x18] sm:$0xff]   ;;  %v427_v5 = vld [vmem:[%s528_s0 + $0x17] sm:$0x1]  }
   0x2   :  { %v434_v2 = vld [vmem:[%s528_s0 + $0x1f] sm:$0xff]   ;;  %v28_v3 = vsel %vm5_vm0, %v431_v1, %v430_v0  ;;  %v435_v4 = vld [vmem:[%s528_s0 + $0x28] sm:$0x7f]   ;;  %v432_v6 = vld [vmem:[%s528_s0 + $0x17] sm:$0xff]   ;;  %7 = vst.msk [vmem:[#allocation2 + $0xb8] sm:$0x1] %vm5_vm0, %v427_v5  }
   0x3   :  { %29 = vrot.lane.b32.xlu0 %v28_v3, %s463_s18  ;;  %v62_v7 = vsel %vm5_vm0, %v435_v4, %v434_v2  ;;  %v433_v8 = vld [vmem:[%s528_s0 + $0x20] sm:$0xff]  }
   0x4   :  { %2 = vsyncpa [#allocation1], 0  ;;  %63 = vrot.lane.b32.xlu1 %v62_v7, %s463_s18  ;;  %v44_v9 = vsel %vm5_vm0, %v433_v8, %v432_v6  ;;  %v8_v10 = vld [vmem:[%s528_s0] sm:$0xff]   ;;  %v428_v11 = vld [vmem:[%s528_s0 + $0x8] sm:$0xff]   ;;  %vm34_vm1 = vcmask 1048128   ;;  %vm47_vm2 = vcmask 588800  }
   0x5   :  { %v429_v12 = vld [vmem:[%s528_s0 + $0x10] sm:$0x7f]   ;;  %v436_v13 = vld [vmem:[%s528_s0 + $0x27] sm:$0x7f]   ;;  %s464_s0 = smov [#allocation0]  }
   0x6   :  { %9 = vst [vmem:[#allocation2] ss:$8 sm:$0xf] %v8_v10   ;;  %10 = vst [vmem:[#allocation2] ss:$8 sm:$0xf0] %v8_v10  }
   0x7   :  { %14 = vst [vmem:[#allocation2 + $0x40] ss:$8 sm:$0xf] %v428_v11   ;;  %16 = vst [vmem:[#allocation2 + $0x40] ss:$8 sm:$0xf0] %v428_v11   ;;  %45 = vrot.lane.b32.xlu0 %v44_v9, %s463_s18 }
   0x8   :  { %20 = vst [vmem:[#allocation2 + $0x80] ss:$8 sm:$0xf] %v429_v12   ;;  %22 = vst [vmem:[#allocation2 + $0x80] ss:$8 sm:$0x70] %v429_v12   ;;  %77 = vrot.lane.b32.xlu1 %v436_v13, %s463_s18 }
   0x9   :  { %v222_v14 = vld [vmem:[#allocation2 + $0xb8] sm:$0x1]  ;;  %s513_s29 = sshll.u32 %s464_s0, 4  ;;  %s376_s29 = int_to_ptr.vmem [resolvable:$true] %s513_s29 }
   0xa   :  { %226 = vst [vmem:[#allocation0 + $0x17] sm:$0x1] %v222_v14  ;;  %s439_s30 = scalar_lea.vmem %s376_s29, 768  ;;  %p444_p1 = scmp.lt.s32.totalorder %s376_s29, %s376_s29 }
   0xb   :  { %p440_p0 = scmp.ne.s32.totalorder %s376_s29, %s439_s30  ;;  %p445_p2 = scmp.lt.s32.totalorder %s439_s30, %s439_s30 }
   0xd   :  { %v87_v15 = vld [vmem:[#allocation2] sm:$0x1]  ;;  %v91_v16 = vld [vmem:[#allocation2 + $0x8] sm:$0x1]  ;;  %v96_v17 = vld [vmem:[#allocation2 + $0x10] sm:$0x1]  ;;  %p446_p3 = por %p445_p2, %p444_p1 }
   0xe   :  { %89 = vst [vmem:[#allocation0] sm:$0x1] %v87_v15  ;;  %94 = vst [vmem:[#allocation0 + $0x1] sm:$0x1] %v91_v16  ;;  %v102_v18 = vld [vmem:[#allocation2 + $0x18] sm:$0x1] }
   0xf   :  { %100 = vst [vmem:[#allocation0 + $0x2] sm:$0x1] %v96_v17  ;;  %v108_v19 = vld [vmem:[#allocation2 + $0x20] sm:$0x1]  ;;  %v114_v20 = vld [vmem:[#allocation2 + $0x28] sm:$0x1]  ;;  %p447_p4 = pnand %p446_p3, %p440_p0 }
  0x10   :  { %106 = vst [vmem:[#allocation0 + $0x3] sm:$0x1] %v102_v18  ;;  %112 = vst [vmem:[#allocation0 + $0x4] sm:$0x1] %v108_v19  ;;  %v120_v21 = vld [vmem:[#allocation2 + $0x30] sm:$0x1] }
  0x11   :  { %118 = vst [vmem:[#allocation0 + $0x5] sm:$0x1] %v114_v20  ;;  %v126_v22 = vld [vmem:[#allocation2 + $0x38] sm:$0x1]  ;;  %v132_v23 = vld [vmem:[#allocation2 + $0x40] sm:$0x1] }
  0x12   :  { %124 = vst [vmem:[#allocation0 + $0x6] sm:$0x1] %v120_v21  ;;  %130 = vst [vmem:[#allocation0 + $0x7] sm:$0x1] %v126_v22  ;;  %v138_v24 = vld [vmem:[#allocation2 + $0x48] sm:$0x1] }
  0x13   :  { %136 = vst [vmem:[#allocation0 + $0x8] sm:$0x1] %v132_v23  ;;  %v144_v25 = vld [vmem:[#allocation2 + $0x50] sm:$0x1]  ;;  %v150_v26 = vld [vmem:[#allocation2 + $0x58] sm:$0x1] }
  0x14   :  { %142 = vst [vmem:[#allocation0 + $0x9] sm:$0x1] %v138_v24  ;;  %148 = vst [vmem:[#allocation0 + $0xa] sm:$0x1] %v144_v25  ;;  %v156_v27 = vld [vmem:[#allocation2 + $0x60] sm:$0x1] }
  0x15   :  { %154 = vst [vmem:[#allocation0 + $0xb] sm:$0x1] %v150_v26  ;;  %v162_v28 = vld [vmem:[#allocation2 + $0x68] sm:$0x1]  ;;  %v168_v29 = vld [vmem:[#allocation2 + $0x70] sm:$0x1] }
  0x16   :  { %160 = vst [vmem:[#allocation0 + $0xc] sm:$0x1] %v156_v27  ;;  %166 = vst [vmem:[#allocation0 + $0xd] sm:$0x1] %v162_v28  ;;  %v174_v30 = vld [vmem:[#allocation2 + $0x78] sm:$0x1] }
  0x17   :  { %172 = vst [vmem:[#allocation0 + $0xe] sm:$0x1] %v168_v29  ;;  %v180_v31 = vld [vmem:[#allocation2 + $0x80] sm:$0x1]  ;;  %v186_v32 = vld [vmem:[#allocation2 + $0x88] sm:$0x1] }
  0x18   :  { %178 = vst [vmem:[#allocation0 + $0xf] sm:$0x1] %v174_v30  ;;  %184 = vst [vmem:[#allocation0 + $0x10] sm:$0x1] %v180_v31  ;;  %v192_v33 = vld [vmem:[#allocation2 + $0x90] sm:$0x1] }
  0x19   :  { %190 = vst [vmem:[#allocation0 + $0x11] sm:$0x1] %v186_v32  ;;  %v198_v34 = vld [vmem:[#allocation2 + $0x98] sm:$0x1]  ;;  %v204_v35 = vld [vmem:[#allocation2 + $0xa0] sm:$0x1] }
  0x1a   :  { %196 = vst [vmem:[#allocation0 + $0x12] sm:$0x1] %v192_v33  ;;  %202 = vst [vmem:[#allocation0 + $0x13] sm:$0x1] %v198_v34  ;;  %v210_v36 = vld [vmem:[#allocation2 + $0xa8] sm:$0x1] }
  0x1b   :  { %208 = vst [vmem:[#allocation0 + $0x14] sm:$0x1] %v204_v35  ;;  %v216_v37 = vld [vmem:[#allocation2 + $0xb0] sm:$0x1]  ;;  %214 = vst [vmem:[#allocation0 + $0x15] sm:$0x1] %v210_v36 }
  0x1c   :  { %220 = vst [vmem:[#allocation0 + $0x16] sm:$0x1] %v216_v37 }
  0x75   :  { %v30_v38 = vpop.permute.xlu0 %29  }
  0x76   :  { %33 = vst.msk [vmem:[#allocation2 + $0x178] sm:$0x1] %vm5_vm0, %v30_v38   ;;  %v64_v39 = vpop.permute.xlu1 %63  }
  0x77   :  { %36 = vst.msk [vmem:[#allocation2 + $0xc0] ss:$8 sm:$0xf] %vm34_vm1, %v30_v38   ;;  %38 = vst.msk [vmem:[#allocation2 + $0xc0] ss:$8 sm:$0xf0] %vm34_vm1, %v30_v38  }
  0x78   :  { %72 = vst.msk [vmem:[#allocation2 + $0x140] ss:$8 sm:$0xf] %vm34_vm1, %v64_v39   ;;  %74 = vst.msk [vmem:[#allocation2 + $0x140] ss:$8 sm:$0x70] %vm34_vm1, %v64_v39  }
  0x79   :  { %v46_v40 = vpop.permute.xlu0 %45  }
  0x7a   :  { %49 = vst.msk [vmem:[#allocation2 + $0xc0] ss:$8 sm:$0xf] %vm47_vm2, %v46_v40   ;;  %51 = vst.msk [vmem:[#allocation2 + $0xc0] ss:$8 sm:$0xf0] %vm47_vm2, %v46_v40   ;;  %v78_v41 = vpop.permute.xlu1 %77  }
  0x7b   :  { %54 = vst.msk [vmem:[#allocation2 + $0x100] ss:$8 sm:$0xf] %vm34_vm1, %v46_v40   ;;  %56 = vst.msk [vmem:[#allocation2 + $0x100] ss:$8 sm:$0xf0] %vm34_vm1, %v46_v40  }
  0x7c   :  { %67 = vst.msk [vmem:[#allocation2 + $0x100] ss:$8 sm:$0xf] %vm47_vm2, %v64_v39   ;;  %69 = vst.msk [vmem:[#allocation2 + $0x100] ss:$8 sm:$0xf0] %vm47_vm2, %v64_v39  }
  0x7d   :  { %81 = vst.msk [vmem:[#allocation2 + $0x140] ss:$8 sm:$0xf] %vm47_vm2, %v78_v41   ;;  %83 = vst.msk [vmem:[#allocation2 + $0x140] ss:$8 sm:$0x70] %vm47_vm2, %v78_v41  }
  0x7e   :  { %v366_v42 = vld [vmem:[#allocation2 + $0x178] sm:$0x1] }
  0x7f   :  { %370 = vst [vmem:[#allocation0 + $0x2f] sm:$0x1] %v366_v42 }
  0x81   :  { %v228_v43 = vld [vmem:[#allocation2 + $0xc0] sm:$0x1]  ;;  %v234_v44 = vld [vmem:[#allocation2 + $0xc8] sm:$0x1]  ;;  %v240_v45 = vld [vmem:[#allocation2 + $0xd0] sm:$0x1] }
  0x82   :  { %232 = vst [vmem:[#allocation0 + $0x18] sm:$0x1] %v228_v43  ;;  %238 = vst [vmem:[#allocation0 + $0x19] sm:$0x1] %v234_v44  ;;  %v246_v46 = vld [vmem:[#allocation2 + $0xd8] sm:$0x1] }
  0x83   :  { %244 = vst [vmem:[#allocation0 + $0x1a] sm:$0x1] %v240_v45  ;;  %v252_v47 = vld [vmem:[#allocation2 + $0xe0] sm:$0x1]  ;;  %v258_v48 = vld [vmem:[#allocation2 + $0xe8] sm:$0x1] }
  0x84   :  { %250 = vst [vmem:[#allocation0 + $0x1b] sm:$0x1] %v246_v46  ;;  %256 = vst [vmem:[#allocation0 + $0x1c] sm:$0x1] %v252_v47  ;;  %v264_v49 = vld [vmem:[#allocation2 + $0xf0] sm:$0x1] }
  0x85   :  { %262 = vst [vmem:[#allocation0 + $0x1d] sm:$0x1] %v258_v48  ;;  %v270_v50 = vld [vmem:[#allocation2 + $0xf8] sm:$0x1]  ;;  %v324_v51 = vld [vmem:[#allocation2 + $0x140] sm:$0x1] }
  0x86   :  { %268 = vst [vmem:[#allocation0 + $0x1e] sm:$0x1] %v264_v49  ;;  %274 = vst [vmem:[#allocation0 + $0x1f] sm:$0x1] %v270_v50  ;;  %v330_v52 = vld [vmem:[#allocation2 + $0x148] sm:$0x1] }
  0x87   :  { %328 = vst [vmem:[#allocation0 + $0x28] sm:$0x1] %v324_v51  ;;  %v336_v53 = vld [vmem:[#allocation2 + $0x150] sm:$0x1]  ;;  %v342_v54 = vld [vmem:[#allocation2 + $0x158] sm:$0x1] }
  0x88   :  { %334 = vst [vmem:[#allocation0 + $0x29] sm:$0x1] %v330_v52  ;;  %340 = vst [vmem:[#allocation0 + $0x2a] sm:$0x1] %v336_v53  ;;  %v348_v55 = vld [vmem:[#allocation2 + $0x160] sm:$0x1] }
  0x89   :  { %346 = vst [vmem:[#allocation0 + $0x2b] sm:$0x1] %v342_v54  ;;  %v354_v56 = vld [vmem:[#allocation2 + $0x168] sm:$0x1]  ;;  %v360_v57 = vld [vmem:[#allocation2 + $0x170] sm:$0x1] }
  0x8a   :  { %352 = vst [vmem:[#allocation0 + $0x2c] sm:$0x1] %v348_v55  ;;  %358 = vst [vmem:[#allocation0 + $0x2d] sm:$0x1] %v354_v56  ;;  %v276_v58 = vld [vmem:[#allocation2 + $0x100] sm:$0x1] }
  0x8b   :  { %364 = vst [vmem:[#allocation0 + $0x2e] sm:$0x1] %v360_v57  ;;  %v282_v59 = vld [vmem:[#allocation2 + $0x108] sm:$0x1]  ;;  %v288_v60 = vld [vmem:[#allocation2 + $0x110] sm:$0x1] }
  0x8c   :  { %v294_v61 = vld [vmem:[#allocation2 + $0x118] sm:$0x1]  ;;  %v300_v62 = vld [vmem:[#allocation2 + $0x120] sm:$0x1]  ;;  %v306_v63 = vld [vmem:[#allocation2 + $0x128] sm:$0x1] }
  0x8d   :  { %280 = vst [vmem:[#allocation0 + $0x20] sm:$0x1] %v276_v58  ;;  %286 = vst [vmem:[#allocation0 + $0x21] sm:$0x1] %v282_v59  ;;  %v312_v0 = vld [vmem:[#allocation2 + $0x130] sm:$0x1] }
  0x8e   :  { %292 = vst [vmem:[#allocation0 + $0x22] sm:$0x1] %v288_v60  ;;  %v318_v1 = vld [vmem:[#allocation2 + $0x138] sm:$0x1]  ;;  %298 = vst [vmem:[#allocation0 + $0x23] sm:$0x1] %v294_v61 }
  0x8f   :  { %304 = vst [vmem:[#allocation0 + $0x24] sm:$0x1] %v300_v62  ;;  %310 = vst [vmem:[#allocation0 + $0x25] sm:$0x1] %v306_v63 }
  0x90   :  { %316 = vst [vmem:[#allocation0 + $0x26] sm:$0x1] %v312_v0  ;;  %322 = vst [vmem:[#allocation0 + $0x27] sm:$0x1] %v318_v1 }
  0x91   :  { %450 = shalt.err (!%p447_p4)
}
  0x92   :  { %s451_s4 = scalar_lea.hbm %s529_s1, 768 }
  0x93   :  { %p452_p5 = scmp.ne.s32.totalorder %s529_s1, %s451_s4  ;;  %p455_p6 = scmp.lt.u32.totalorder %s451_s4, %s529_s1 }
  0x95   :  { %p457_p7 = pnand %p455_p6, %p452_p5 }
  0x97   :  { %460 = shalt.err (!%p457_p7)
}
  0x98   :  { %378 = dma.vmem_to_hbm [thread:$0]  %s376_s29, 768, %s529_s1, [#allocation1]  }
  0x99   :  { %461 = dma.done.wait [#allocation1], 768  }
  0x9a   :  { %462 = vsyncadd [#allocation1], 4294966528 }
  0x9b   :  { %380 = vsyncpa [#allocation1], 1 }

// kernel: nelf_epi_forward.1
= control target key start
LH: loop header
LB: loop body
LE: loop exit
PB: predicated region body
PF: predicated region fallthrough
CT: control target
= control target key end

     0   :  { %s12655_s25 = smov 0   ;;  %s18437_s0 = inlined_call_operand.vmem [shape: f32[2,6144], index: 0, kind: input, shape index: {}]   ;;  %s18438_s1 = inlined_call_operand.vmem [shape: f32[2,6144], index: 1, kind: input, shape index: {}]   ;;  %s18439_s2 = inlined_call_operand.vmem [shape: f32[3,6144], index: 2, kind: input, shape index: {}]   ;;  %s18440_s3 = inlined_call_operand.vmem [shape: bf16[64,36], index: 3, kind: input, shape index: {}]   ;;  %s18441_s4 = inlined_call_operand.vmem [shape: f32[64,1], index: 4, kind: input, shape index: {}]   ;;  %s18442_s5 = inlined_call_operand.vmem [shape: bf16[64,64], index: 5, kind: input, shape index: {}]   ;;  %s18443_s6 = inlined_call_operand.vmem [shape: f32[64,1], index: 6, kind: input, shape index: {}]   ;;  %s18444_s7 = inlined_call_operand.vmem [shape: bf16[40,64], index: 7, kind: input, shape index: {}]   ;;  %s18445_s8 = inlined_call_operand.vmem [shape: f32[40,1], index: 8, kind: input, shape index: {}]   ;;  %s18446_s9 = inlined_call_operand.vmem [shape: bf16[64,68], index: 9, kind: input, shape index: {}]   ;;  %s18447_s10 = inlined_call_operand.vmem [shape: f32[64,1], index: 10, kind: input, shape index: {}]   ;;  %s18448_s11 = inlined_call_operand.vmem [shape: bf16[8,64], index: 11, kind: input, shape index: {}]   ;;  %s18449_s12 = inlined_call_operand.vmem [shape: f32[8,1], index: 12, kind: input, shape index: {}]   ;;  %s18450_s13 = inlined_call_operand.vmem [shape: f32[5,6144], index: 13, kind: output, shape index: {}]  }
   0x1 LB: > { %s11658_s26 = sadd.s32 4294967295, %s12575_s25   ;;  %p11662_p0 = scmp.ge.s32.totalorder %s12575_s25, 1  ;;  %s12575_s25 = sphi %s12655_s25, %s23_s25  }
   0x2   : > { %p410_p1 = scmp.lt.s32.totalorder %s12575_s25, 4 }
   0x4   : > { %p411_p2 = pnand %p11662_p0, %p410_p1 }
   0x6   : > { %414 = sbr.rel (%p411_p2) target bundleno = 2243 (0x8c3), region = 72 }
   0xd   : > { %s11663_s27 = sshll.u32 %s11658_s26, 4  ;;  %v505_v0 = vlaneseq  ;;  %v12577_v1 = vmov 1983009808   ;;  %vm18451_vm0 = vcmask 1041408   ;;  %vm18452_vm1 = vcmask 1043456  }
   0xe   : > { %p465_p3 = scmp.lt.s32.totalorder %s11663_s27, 47  ;;  %v503_v2 = vunpack.c.l.s4 %v12577_v1  ;;  %v18457_v62 = vmov 683565275  }
   0xf   : > { %v506_v3 = vshrl.u32 %v505_v0, 7  ;;  %v18459_v0 = vmov 2475754826  }
  0x10   : > { %s19042_s27 = smov (!%p465_p3, %s11663_s27), 47  ;;  %v504_v4 = vunpack.c.0.s8 %v503_v2  ;;  %v18464_v2 = vmov 2131351028  }
  0x11   : > { %s11664_s28 = sshll.u32 %s19042_s27, 1  ;;  %s11670_s16 = sshll.u32 %s19042_s27, 3 }
  0x12   : > { %v12666_v5 = vsub.s32 %v504_v4, %v506_v3  ;;  %s12671_s14 = scalar_lea.vmem %s18437_s0, %s11664_s28  ;;  %s12676_s17 = scalar_lea.vmem %s18438_s1, %s11664_s28  ;;  %v18462_v4 = vmov 2102212464  }
  0x13   : > { %v489_v6 = vld [vmem:[%s12671_s14] sm:$0xff]  ;;  %s11668_s28 = sshll.u32 %s19042_s27, 2 }
  0x14   : > { %v493_v7 = vld [vmem:[%s12676_s17] sm:$0xff]  ;;  %v508_v8 = vrot.slane %v489_v6, %v12666_v5  ;;  %v501_v10 = vcombine.high %v489_v6, %v489_v6  ;;  %s18286_s15 = scalar_lea.vmem %s18439_s2, %s11668_s28 }
  0x15   : > { %v589_v9 = vcombine.low %v493_v7, %v493_v7  ;;  %v603_v11 = vrot.slane %v493_v7, %v12666_v5  ;;  %v18482_v7 = vmov 920167782  }
  0x16   : > { %v516_v12 = vcombine.high %v508_v8, %v508_v8  ;;  %v515_v14 = vrot.slane %v501_v10, %v12666_v5 }
  0x17   : > { %v596_v13 = vrot.slane %v589_v9, %v12666_v5  ;;  %v605_v15 = vcombine.high %v603_v11, %v603_v11 }
  0x18   : > { %v517_v17 = vcombine.high %v515_v14, %v515_v14  ;;  %v12688_v19 = vsel %vm18451_vm0, %v515_v14, %v603_v11 }
  0x19   : > { %v604_v16 = vcombine.high %v596_v13, %v596_v13  ;;  %v12685_v18 = vsel %vm18451_vm0, %v508_v8, %v596_v13 }
  0x1a   : > { %v12694_v21 = vsel %vm18451_vm0, %v517_v17, %v605_v15  ;;  %v18466_v15 = vmov 1326507024  }
  0x1b   : > { %v12691_v20 = vsel %vm18451_vm0, %v516_v12, %v604_v16  ;;  %v693_v25 = vmul.f32 2.0, %v12694_v21  ;;  %v12721_v43 = vmul.f32 8.0, %v12694_v21  ;;  %v12724_v51 = vmul.f32 4.0, %v12694_v21 }
  0x1c   : > { %v691_v22 = vmul.f32 2.0, %v12691_v20  ;;  %v707_v23 = vmul.f32 4.0, %v12691_v20  ;;  %v723_v24 = vmul.f32 8.0, %v12691_v20 }
  0x1d   : > { %v757_v28 = vrot.slane %v693_v25, 4  ;;  %v805_v52 = vrot.slane %v12721_v43, 4 }
  0x1e   : > { %v755_v26 = vrot.slane %v691_v22, 4  ;;  %v803_v27 = vrot.slane %v723_v24, 4 }
  0x1f   : > { %v12713_v35 = vsel %vm18452_vm1, %v12694_v21, %v757_v28 }
  0x20   : > { %v12702_v29 = vsel %vm18452_vm1, %v12691_v20, %v755_v26  ;;  %v12705_v30 = vsel %vm18452_vm1, %v707_v23, %v803_v27  ;;  %v1182_v41 = vand.u32 2139095040, %v12713_v35  ;;  %v1179_v56 = vand.u32 2147483647, %v12713_v35 }
  0x21   : > { %v971_v31 = vand.u32 2147483647, %v12702_v29  ;;  %v974_v32 = vand.u32 2139095040, %v12702_v29  ;;  %v2635_v33 = vand.u32 2147483647, %v12705_v30  ;;  %v2638_v34 = vand.u32 2139095040, %v12705_v30 }
  0x22   : > { %v1183_v45 = vshrl.u32 %v1182_v41, 23 }
  0x23   : > { %v975_v36 = vshrl.u32 %v974_v32, 23  ;;  %v978_v37 = vand.u32 8388607, %v971_v31  ;;  %v2639_v38 = vshrl.u32 %v2638_v34, 23  ;;  %v2642_v39 = vand.u32 8388607, %v2635_v33 }
  0x24   : > { %v11683_v49 = vadd.s32 4294967169, %v1183_v45  ;;  %vm12821_vm15 = vcmp.le.f32.partialorder %v971_v31, 0.7853982 }
  0x25   : > { %v11675_v40 = vadd.s32 4294967169, %v975_v36  ;;  %v11739_v42 = vadd.s32 4294967169, %v2639_v38  ;;  %v979_v46 = vor.u32 8388608, %v978_v37  ;;  %v2643_v47 = vor.u32 8388608, %v2642_v39 }
  0x26   : > { %v12732_v60 = vadd.s32 1, %v11683_v49 }
  0x27   : > { %v981_v44 = vadd.s32 1, %v11675_v40  ;;  %v2645_v48 = vadd.s32 1, %v11739_v42  ;;  %v12728_v57 = vshll.u32 %v979_v46, 8  ;;  %v12730_v59 = vshll.u32 %v2643_v47, 8 }
  0x28   : > { %vm1190_vm13 = vcmp.gt.s32.totalorder %v12732_v60, 0 }
  0x29   : > { %vm982_vm2 = vcmp.gt.s32.totalorder %v981_v44, 0  ;;  %vm2646_vm3 = vcmp.gt.s32.totalorder %v2645_v48, 0 }
  0x2a   : > { %v983_v50 = vsel %vm982_vm2, %v981_v44, 0  ;;  %v2647_v55 = vsel %vm2646_vm3, %v2645_v48, 0  ;;  %vm973_vm2 = vcmp.lt.s32.totalorder %v12702_v29, 0 }
  0x2b   : > { %v984_v53 = vshrl.u32 %v983_v50, 5  ;;  %v985_v54 = vand.u32 31, %v983_v50  ;;  %v2649_v58 = vand.u32 31, %v2647_v55  ;;  %v12739_v9 = vshrl.u32 %v2647_v55, 5 }
  0x2d   : > { %v986_v61 = vsub.s32 32, %v985_v54  ;;  %v988_v63 = vshll.u32 %v18457_v62, %v985_v54  ;;  %v991_v1 = vshll.u32 %v18459_v0, %v985_v54  ;;  %v994_v3 = vshll.u32 %v18464_v2, %v985_v54 }
  0x2e   : > { %v997_v6 = vshll.u32 %v18462_v4, %v985_v54  ;;  %v1000_v8 = vshll.u32 %v18482_v7, %v985_v54  ;;  %vm1003_vm4 = vcmp.lt.s32.totalorder %v984_v53, 1  ;;  %vm1004_vm5 = vcmp.lt.s32.totalorder %v984_v53, 2 }
  0x2f   : > { %v987_v10 = vshrl.u32 %v18457_v62, %v986_v61  ;;  %v989_v11 = vshrl.u32 %v18459_v0, %v986_v61  ;;  %v992_v12 = vshrl.u32 %v18464_v2, %v986_v61  ;;  %v995_v13 = vshrl.u32 %v18462_v4, %v986_v61 }
  0x30   : > { %v998_v14 = vshrl.u32 %v18482_v7, %v986_v61  ;;  %v1001_v16 = vshrl.u32 %v18466_v15, %v986_v61  ;;  %vm1006_vm6 = vcmp.lt.s32.totalorder %v984_v53, 4  ;;  %v2650_v24 = vsub.s32 32, %v2649_v58 }
  0x31   : > { %v990_v17 = vor.u32 %v989_v11, %v988_v63  ;;  %v993_v22 = vor.u32 %v992_v12, %v991_v1  ;;  %v996_v23 = vor.u32 %v995_v13, %v994_v3  ;;  %vm1005_vm7 = vcmp.lt.s32.totalorder %v984_v53, 3 }
  0x32   : > { %v999_v25 = vor.u32 %v998_v14, %v997_v6  ;;  %v1002_v26 = vor.u32 %v1001_v16, %v1000_v8  ;;  %v2652_v27 = vshll.u32 %v18457_v62, %v2649_v58  ;;  %v2655_v40 = vshll.u32 %v18459_v0, %v2649_v58 }
  0x33   : > { %v1007_v28 = vsel %vm1003_vm4, %v987_v10, %v990_v17  ;;  %v1008_v32 = vsel %vm1006_vm6, %v996_v23, 2102212464  ;;  %v1011_v34 = vsel %vm1003_vm4, %v990_v17, %v993_v22  ;;  %v1015_v36 = vsel %vm1003_vm4, %v993_v22, %v996_v23 }
  0x34   : > { %v1009_v37 = vsel %vm1005_vm7, %v993_v22, %v1008_v32  ;;  %v1012_v38 = vsel %vm1006_vm6, %v999_v25, 920167782  ;;  %v1016_v39 = vsel %vm1006_vm6, %v1002_v26, 1326507024  ;;  %v2651_v44 = vshrl.u32 %v18457_v62, %v2650_v24 }
  0x35   : > { %v1013_v41 = vsel %vm1005_vm7, %v996_v23, %v1012_v38  ;;  %v1017_v42 = vsel %vm1005_vm7, %v999_v25, %v1016_v39  ;;  %v2653_v45 = vshrl.u32 %v18459_v0, %v2650_v24  ;;  %v1010_v46 = vsel %vm1004_vm5, %v1007_v28, %v1009_v37 }
  0x36   : > { %v1014_v47 = vsel %vm1004_vm5, %v1011_v34, %v1013_v41  ;;  %v1018_v48 = vsel %vm1004_vm5, %v1015_v36, %v1017_v42  ;;  %v2656_v49 = vshrl.u32 %v18464_v2, %v2650_v24  ;;  %v2658_v3 = vshll.u32 %v18464_v2, %v2649_v58 }
  0x37   : > { %v12759_v50 = vmul.u32.u64.low %v12728_v57, %v1018_v48  ;;  %v12760_v54 = vmul.u32.u64.high %v12728_v57, %v1018_v48, %v12759_v50  ;;  %v12763_v55 = vmul.u32.u64.low %v12728_v57, %v1014_v47  ;;  %v12764_v61 = vmul.u32.u64.high %v12728_v57, %v1014_v47, %v12763_v55 }
  0x38   : > { %v2654_v63 = vor.u32 %v2653_v45, %v2652_v27  ;;  %v2657_v1 = vor.u32 %v2656_v49, %v2655_v40  ;;  %v2659_v6 = vshrl.u32 %v18462_v4, %v2650_v24  ;;  %v2661_v53 = vshll.u32 %v18462_v4, %v2649_v58 }
  0x39   : > { %v2662_v8 = vshrl.u32 %v18482_v7, %v2650_v24  ;;  %v2664_v10 = vshll.u32 %v18482_v7, %v2649_v58  ;;  %v2665_v11 = vshrl.u32 %v18466_v15, %v2650_v24  ;;  %v1026_v12 = vmul.u32 %v12728_v57, %v1010_v46 }
  0x3a   : > { %v2660_v13 = vor.u32 %v2659_v6, %v2658_v3  ;;  %vm2667_vm8 = vcmp.lt.s32.totalorder %v12739_v9, 1  ;;  %vm2668_vm9 = vcmp.lt.s32.totalorder %v12739_v9, 2  ;;  %vm1028_vm10 = vc.u32 %v12760_v54, %v12763_v55 }
  0x3b   : > { %v1029_v14 = vadd.s32 1, %v12764_v61  ;;  %v2663_v16 = vor.u32 %v2662_v8, %v2661_v53  ;;  %vm2669_vm11 = vcmp.lt.s32.totalorder %v12739_v9, 3  ;;  %v2666_v17 = vor.u32 %v2665_v11, %v2664_v10 }
  0x3c   : > { %vm2670_vm12 = vcmp.lt.s32.totalorder %v12739_v9, 4  ;;  %v2671_v58 = vsel %vm2667_vm8, %v2651_v44, %v2654_v63  ;;  %v2675_v22 = vsel %vm2667_vm8, %v2654_v63, %v2657_v1  ;;  %v2679_v25 = vsel %vm2667_vm8, %v2657_v1, %v2660_v13 }
  0x3d   : > { %v1030_v57 = vsel %vm1028_vm10, %v1029_v14, %v12764_v61  ;;  %v2672_v23 = vsel %vm2670_vm12, %v2660_v13, 2102212464  ;;  %v2676_v24 = vsel %vm2670_vm12, %v2663_v16, 920167782  ;;  %v2680_v32 = vsel %vm2670_vm12, %v2666_v17, 1326507024 }
  0x3e   : > { %v1031_v26 = vadd.s32 %v1030_v57, %v1026_v12  ;;  %v2673_v27 = vsel %vm2669_vm11, %v2657_v1, %v2672_v23  ;;  %v2677_v28 = vsel %vm2669_vm11, %v2660_v13, %v2676_v24  ;;  %v2681_v37 = vsel %vm2669_vm11, %v2663_v16, %v2680_v32 }
  0x3f   : > { %v2674_v34 = vsel %vm2668_vm9, %v2671_v58, %v2673_v27  ;;  %v2678_v36 = vsel %vm2668_vm9, %v2675_v22, %v2677_v28  ;;  %v2682_v39 = vsel %vm2668_vm9, %v2679_v25, %v2681_v37  ;;  %v12801_v45 = vsel %vm18452_vm1, %v12724_v51, %v805_v52 }
  0x40   : > { %v1032_v38 = vadd.s32 536870912, %v1031_v26  ;;  %v12790_v40 = vmul.u32.u64.low %v12730_v59, %v2678_v36  ;;  %v12791_v41 = vmul.u32.u64.high %v12730_v59, %v2678_v36, %v12790_v40  ;;  %v690_v46 = vmul.f32 2.0, %v12685_v18 }
  0x41   : > { %v12794_v42 = vmul.u32.u64.low %v12730_v59, %v2682_v39  ;;  %v12795_v44 = vmul.u32.u64.high %v12730_v59, %v2682_v39, %v12794_v42  ;;  %v1191_v9 = vsel %vm1190_vm13, %v12732_v60, 0  ;;  %v2690_v48 = vmul.u32 %v12730_v59, %v2674_v34 }
  0x42   : > { %v1033_v47 = vshrl.u32 %v1032_v38, 30  ;;  %v1186_v49 = vand.u32 8388607, %v1179_v56  ;;  %v2693_v61 = vadd.s32 1, %v12791_v41  ;;  %v2846_v63 = vand.u32 2139095040, %v12801_v45 }
  0x43   : > { %vm2692_vm14 = vc.u32 %v12795_v44, %v12790_v40  ;;  %v1193_v43 = vand.u32 31, %v1191_v9  ;;  %v754_v51 = vrot.slane %v690_v46, 4  ;;  %v12813_v59 = vmul.f32 8.0, %v12685_v18 }
  0x44   : > { %v1034_v50 = vshll.u32 %v1033_v47, 30  ;;  %v2694_v1 = vsel %vm2692_vm14, %v2693_v61, %v12791_v41  ;;  %v1187_v6 = vor.u32 8388608, %v1186_v49  ;;  %v2847_v53 = vshrl.u32 %v2846_v63, 23 }
  0x45   : > { %v2695_v3 = vadd.s32 %v2694_v1, %v2690_v48  ;;  %v1057_v8 = vsub.s32 4, %v1033_v47  ;;  %v1194_v11 = vsub.s32 32, %v1193_v43  ;;  %v12817_v12 = vsel %vm18452_vm1, %v12685_v18, %v754_v51 }
  0x46   : > { %v1035_v52 = vsub.s32 %v1031_v26, %v1034_v50  ;;  %v2843_v16 = vand.u32 2147483647, %v12801_v45  ;;  %v1027_v17 = vadd.s32 %v12763_v55, %v12760_v54  ;;  %v12829_v22 = vshrl.u32 %v1191_v9, 5 }
  0x47   : > { %v2696_v10 = vadd.s32 536870912, %v2695_v3  ;;  %v12831_v57 = vshll.u32 %v1187_v6, 8  ;;  %v1196_v24 = vshll.u32 %v18457_v62, %v1193_v43  ;;  %v1199_v31 = vshll.u32 %v18459_v0, %v1193_v43 }
  0x48   : > { %v1037_v60 = vsub.s32 0, %v1035_v52  ;;  %v11747_v25 = vadd.s32 4294967169, %v2847_v53  ;;  %v1058_v26 = vsel %vm973_vm2, %v1057_v8, %v1033_v47  ;;  %v1197_v28 = vshrl.u32 %v18459_v0, %v1194_v11 }
  0x49   : > { %v2697_v58 = vshrl.u32 %v2696_v10, 30  ;;  %v1200_v32 = vshrl.u32 %v18464_v2, %v1194_v11  ;;  %v2691_v55 = vadd.s32 %v12790_v40, %v12795_v44  ;;  %v1202_v34 = vshll.u32 %v18464_v2, %v1193_v43 }
  0x4a   : > { %v11676_v14 = vmin.u32 %v1037_v60, %v1035_v52  ;;  %v1203_v36 = vshrl.u32 %v18462_v4, %v1194_v11  ;;  %v1195_v38 = vshrl.u32 %v18457_v62, %v1194_v11  ;;  %v1205_v39 = vshll.u32 %v18462_v4, %v1193_v43 }
  0x4b   : > { %v2698_v27 = vshll.u32 %v2697_v58, 30  ;;  %v1206_v41 = vshrl.u32 %v18482_v7, %v1194_v11  ;;  %v1060_v42 = vsel %vm12821_vm15, 0, %v1058_v26  ;;  %vm2637_vm4 = vcmp.lt.s32.totalorder %v12705_v30, 0 }
  0x4c   : > { %v1039_v23 = vclz %v11676_v14  ;;  %v1208_v40 = vshll.u32 %v18482_v7, %v1193_v43  ;;  %v1209_v44 = vshrl.u32 %v18466_v15, %v1194_v11  ;;  %v1198_v9 = vor.u32 %v1197_v28, %v1196_v24 }
  0x4d   : > { %v12842_v37 = vsub.s32 %v2695_v3, %v2698_v27  ;;  %v1201_v48 = vor.u32 %v1200_v32, %v1199_v31  ;;  %v1204_v63 = vor.u32 %v1203_v36, %v1202_v34  ;;  %v1207_v1 = vor.u32 %v1206_v41, %v1205_v39 }
  0x4e   : > { %v11677_v54 = vadd.s32 4294967294, %v1039_v23  ;;  %vm1211_vm5 = vcmp.lt.s32.totalorder %v12829_v22, 1  ;;  %vm1214_vm6 = vcmp.lt.s32.totalorder %v12829_v22, 4  ;;  %v1210_v6 = vor.u32 %v1209_v44, %v1208_v40 }
  0x4f   : > { %v2701_v47 = vsub.s32 0, %v12842_v37  ;;  %v1216_v60 = vsel %vm1214_vm6, %v1204_v63, 2102212464  ;;  %v2721_v8 = vsub.s32 4, %v2697_v58  ;;  %vm1212_vm7 = vcmp.lt.s32.totalorder %v12829_v22, 2 }
  0x50   : > { %vm11678_vm3 = vcmp.lt.s32.totalorder %v11677_v54, 0  ;;  %vm1213_vm8 = vcmp.lt.s32.totalorder %v12829_v22, 3  ;;  %v1215_v11 = vsel %vm1211_vm5, %v1195_v38, %v1198_v9  ;;  %v1219_v14 = vsel %vm1211_vm5, %v1198_v9, %v1201_v48 }
  0x51   : > { %v1042_v46 = vsel %vm11678_vm3, 0, %v11677_v54  ;;  %v11740_v51 = vmin.u32 %v2701_v47, %v12842_v37  ;;  %vm12866_vm9 = vcmp.le.f32.partialorder %v2635_v33, 0.7853982  ;;  %v1217_v24 = vsel %vm1213_vm8, %v1201_v48, %v1216_v60 }
  0x52   : > { %v1043_v49 = vsub.s32 32, %v1042_v46  ;;  %v1044_v50 = vshll.u32 %v1035_v52, %v1042_v46  ;;  %v1047_v61 = vsub.s32 4294967266, %v1042_v46  ;;  %v1220_v31 = vsel %vm1214_vm6, %v1207_v1, 920167782 }
  0x53   : > { %v2703_v53 = vclz %v11740_v51  ;;  %v1223_v26 = vsel %vm1211_vm5, %v1201_v48, %v1204_v63  ;;  %v1221_v32 = vsel %vm1213_vm8, %v1204_v63, %v1220_v31  ;;  %v1224_v33 = vsel %vm1214_vm6, %v1210_v6, 1326507024 }
  0x54   : > { %v1045_v3 = vshrl.u32 %v1027_v17, %v1043_v49  ;;  %v1048_v43 = vadd.s32 127, %v1047_v61  ;;  %v2722_v54 = vsel %vm2637_vm4, %v2721_v8, %v2697_v58  ;;  %v1222_v34 = vsel %vm1212_vm7, %v1219_v14, %v1221_v32 }
  0x55   : > { %v11741_v23 = vadd.s32 4294967294, %v2703_v53  ;;  %v1225_v36 = vsel %vm1213_vm8, %v1207_v1, %v1224_v33  ;;  %v2853_v40 = vadd.s32 1, %v11747_v25  ;;  %v1218_v9 = vsel %vm1212_vm7, %v1215_v11, %v1217_v24 }
  0x56   : > { %v1046_v52 = vor.u32 %v1045_v3, %v1044_v50  ;;  %v1049_v10 = vshll.u32 %v1048_v43, 23  ;;  %v1226_v41 = vsel %vm1212_vm7, %v1223_v26, %v1225_v36  ;;  %v1064_v1 = vadd.s32 3, %v1060_v42 }
  0x57   : > { %vm11742_vm10 = vcmp.lt.s32.totalorder %v11741_v23, 0  ;;  %v12892_v48 = vmul.u32.u64.low %v12831_v57, %v1226_v41  ;;  %v12893_v49 = vmul.u32.u64.high %v12831_v57, %v1226_v41, %v12892_v48  ;;  %vm2854_vm11 = vcmp.gt.s32.totalorder %v2853_v40, 0 }
  0x58   : > { %v1050_v27 = vor.u32 4788187, %v1049_v10  ;;  %v1053_v28 = vcvt.s32.f32 %v1046_v52  ;;  %v2706_v39 = vsel %vm11742_vm10, 0, %v11741_v23  ;;  %v2855_v22 = vsel %vm2854_vm11, %v2853_v40, 0 }
  0x59   : > { %v2707_v44 = vsub.s32 32, %v2706_v39  ;;  %v2708_v46 = vshll.u32 %v12842_v37, %v2706_v39  ;;  %v2711_v47 = vsub.s32 4294967266, %v2706_v39  ;;  %v12902_v37 = vand.u32 8388607, %v2843_v16 }
  0x5a   : > { %v1051_v38 = vand.u32 2147483647, %v1050_v27  ;;  %v12896_v63 = vmul.u32.u64.low %v12831_v57, %v1222_v34  ;;  %v12897_v51 = vmul.u32.u64.high %v12831_v57, %v1222_v34, %v12896_v63  ;;  %v12904_v6 = vand.u32 3, %v1060_v42 }
  0x5b   : > { %v2709_v50 = vshrl.u32 %v2691_v55, %v2707_v44  ;;  %v2712_v61 = vadd.s32 127, %v2711_v47  ;;  %v2857_v60 = vand.u32 31, %v2855_v22  ;;  %v2724_v53 = vsel %vm12866_vm9, 0, %v2722_v54 }
  0x5c   : > { %v1054_v58 = vmul.f32 %v1053_v28, %v1051_v38  ;;  %v1234_v8 = vmul.u32 %v12831_v57, %v1218_v9  ;;  %vm1236_vm12 = vc.u32 %v12893_v49, %v12896_v63  ;;  %v1237_v42 = vadd.s32 1, %v12897_v51 }
  0x5d   : > { %v2710_v3 = vor.u32 %v2709_v50, %v2708_v46  ;;  %v2713_v43 = vshll.u32 %v2712_v61, 23  ;;  %v2851_v14 = vor.u32 8388608, %v12902_v37  ;;  %v2858_v23 = vsub.s32 32, %v2857_v60 }
  0x5e   : > { %v1055_v25 = vxor.u32 2147483648, %v1054_v58  ;;  %v867_v24 = vand.u32 2147483647, %v12817_v12  ;;  %v12919_v31 = vand.u32 3, %v1064_v1  ;;  %v1238_v26 = vsel %vm1236_vm12, %v1237_v42, %v12897_v51 }
  0x5f   : > { %v2714_v10 = vor.u32 4788187, %v2713_v43  ;;  %v2717_v11 = vcvt.s32.f32 %v2710_v3  ;;  %v2728_v27 = vadd.s32 3, %v2724_v53  ;;  %vm4396_vm13 = vcmp.eq.s32.totalorder %v12904_v6, 2 }
  0x60   : > { %v1056_v55 = vsel %vm973_vm2, %v1055_v25, %v1054_v58  ;;  %v1239_v13 = vadd.s32 %v1238_v26, %v1234_v8  ;;  %v12923_v28 = vshrl.u32 %v2855_v22, 5  ;;  %v2860_v32 = vshll.u32 %v18457_v62, %v2857_v60 }
  0x61   : > { %v1059_v52 = vsel %vm12821_vm15, %v12702_v29, %v1056_v55  ;;  %v2715_v57 = vand.u32 2147483647, %v2714_v10  ;;  %vm4393_vm14 = vcmp.eq.s32.totalorder %v12904_v6, 0  ;;  %v2863_v54 = vshll.u32 %v18459_v0, %v2857_v60 }
  0x62   : > { %12297 = vcosq.f32 %v1059_v52  ;;  %v2869_v34 = vshll.u32 %v18462_v4, %v2857_v60  ;;  %v2870_v36 = vshrl.u32 %v18482_v7, %v2858_v23  ;;  %vm4392_vm15 = vcmp.lt.s32.totalorder %v12904_v6, 2 }
  0x63   : > { %12299 = vsinq.f32 %v1059_v52  ;;  %v2718_v33 = vmul.f32 %v2717_v11, %v2715_v57  ;;  %v1240_v38 = vadd.s32 536870912, %v1239_v13  ;;  %v2861_v39 = vshrl.u32 %v18459_v0, %v2858_v23 }
  0x64   : > { %v2864_v41 = vshrl.u32 %v18464_v2, %v2858_v23  ;;  %v2866_v40 = vshll.u32 %v18464_v2, %v2857_v60  ;;  %v2867_v46 = vshrl.u32 %v18462_v4, %v2858_v23  ;;  %v2872_v47 = vshll.u32 %v18482_v7, %v2857_v60 }
  0x65   : > { %v2719_v44 = vxor.u32 2147483648, %v2718_v33  ;;  %v2873_v9 = vshrl.u32 %v18466_v15, %v2858_v23  ;;  %vm1067_vm2 = vcmp.eq.s32.totalorder %v12919_v31, 0  ;;  %vm1070_vm3 = vcmp.eq.s32.totalorder %v12919_v31, 2 }
  0x66   : > { %v12939_v58 = vand.u32 3, %v2724_v53  ;;  %v12941_v48 = vshrl.u32 %v1240_v38, 30  ;;  %v2871_v50 = vor.u32 %v2870_v36, %v2869_v34  ;;  %vm1063_vm5 = vweird.f32 %v12702_v29 }
  0x67   : > { %v2720_v61 = vsel %vm2637_vm4, %v2719_v44, %v2718_v33  ;;  %v12946_v51 = vand.u32 3, %v2728_v27  ;;  %vm2878_vm6 = vcmp.lt.s32.totalorder %v12923_v28, 4  ;;  %v870_v25 = vand.u32 2139095040, %v12817_v12 }
  0x68   : > { %v2723_v1 = vsel %vm12866_vm9, %v12705_v30, %v2720_v61  ;;  %v1242_v37 = vshll.u32 %v12941_v48, 30  ;;  %v2862_v22 = vor.u32 %v2861_v39, %v2860_v32  ;;  %v2865_v3 = vor.u32 %v2864_v41, %v2863_v54 }
  0x69   : > { %vm1066_vm7 = vcmp.lt.s32.totalorder %v12919_v31, 2  ;;  %12301 = vcosq.f32 %v2723_v1  ;;  %v2868_v43 = vor.u32 %v2867_v46, %v2866_v40  ;;  %v2874_v60 = vor.u32 %v2873_v9, %v2872_v47 }
  0x6a   : > { %vm2875_vm4 = vcmp.lt.s32.totalorder %v12923_v28, 1  ;;  %12303 = vsinq.f32 %v2723_v1  ;;  %v12956_v53 = vsub.s32 %v1239_v13, %v1242_v37  ;;  %vm2877_vm8 = vcmp.lt.s32.totalorder %v12923_v28, 3 }
  0x6b   : > { %v2884_v17 = vsel %vm2878_vm6, %v2871_v50, 920167782  ;;  %vm6044_vm9 = vcmp.eq.s32.totalorder %v12939_v58, 2  ;;  %v2859_v10 = vshrl.u32 %v18457_v62, %v2858_v23  ;;  %v12963_v11 = vshll.u32 %v2851_v14, 8 }
  0x6c   : > { %v12298_v55 = vpop.eup %12297  ;;  %vm6041_vm10 = vcmp.eq.s32.totalorder %v12939_v58, 0  ;;  %v1245_v57 = vsub.s32 0, %v12956_v53  ;;  %vm2876_vm11 = vcmp.lt.s32.totalorder %v12923_v28, 2  ;;  %v2880_v26 = vsel %vm2878_vm6, %v2868_v43, 2102212464 }
  0x6d   : > { %v12300_v8 = vpop.eup %12299  ;;  %v1071_v52 = vxor.u32 2147483648, %v12298_v55  ;;  %vm2730_vm12 = vcmp.lt.s32.totalorder %v12946_v51, 2  ;;  %vm6040_vm0 = vcmp.lt.s32.totalorder %v12939_v58, 2  ;;  %v2883_v14 = vsel %vm2875_vm4, %v2862_v22, %v2865_v3 }
  0x6e   : > { %v1068_v42 = vxor.u32 2147483648, %v12300_v8  ;;  %v2885_v23 = vsel %vm2877_vm8, %v2868_v43, %v2884_v17  ;;  %v2888_v13 = vsel %vm2878_vm6, %v2874_v60, 1326507024  ;;  %vm2727_vm1 = vweird.f32 %v12705_v30 }
  0x6f   : > { %v4398_v27 = vsel %vm4396_vm13, %v1071_v52, %v12300_v8  ;;  %v11684_v33 = vmin.u32 %v1245_v57, %v12956_v53  ;;  %v2887_v54 = vsel %vm2875_vm4, %v2865_v3, %v2868_v43  ;;  %v871_v34 = vshrl.u32 %v870_v25, 23 }
  0x70   : > { %v4395_v32 = vsel %vm4393_vm14, %v12298_v55, %v1068_v42  ;;  %v2879_v38 = vsel %vm2875_vm4, %v2859_v10, %v2862_v22  ;;  %v2881_v39 = vsel %vm2877_vm8, %v2865_v3, %v2880_v26  ;;  %v2889_v41 = vsel %vm2877_vm8, %v2871_v50, %v2888_v13 }
  0x71   : > { %v4399_v36 = vsel %vm4392_vm15, %v4395_v32, %v4398_v27  ;;  %vm2731_vm13 = vcmp.eq.s32.totalorder %v12946_v51, 0  ;;  %v1247_v44 = vclz %v11684_v33  ;;  %v2886_v6 = vsel %vm2876_vm11, %v2883_v14, %v2885_v23 }
  0x72   : > { %v12997_v40 = vsel %vm1063_vm5, nan, %v4399_v36  ;;  %v1069_v46 = vsel %vm1067_vm2, %v12298_v55, %v1068_v42  ;;  %v1072_v47 = vsel %vm1070_vm3, %v1071_v52, %v12300_v8  ;;  %vm2734_vm14 = vcmp.eq.s32.totalorder %v12946_v51, 2 }
  0x73   : > { %v2890_v9 = vsel %vm2876_vm11, %v2887_v54, %v2889_v41  ;;  %v11685_v50 = vadd.s32 4294967294, %v1247_v44  ;;  %v2882_v61 = vsel %vm2876_vm11, %v2879_v38, %v2881_v39  ;;  %v12302_v37 = vpop.eup %12301  ;;  %v1235_v22 = vadd.s32 %v12896_v63, %v12893_v49 }
  0x74   : > { %v13011_v25 = vmul.u32.u64.low %v12963_v11, %v2890_v9  ;;  %v13012_v1 = vmul.u32.u64.high %v12963_v11, %v2890_v9, %v13011_v25  ;;  %v13017_v3 = vmul.u32.u64.low %v12963_v11, %v2886_v6  ;;  %v13018_v43 = vmul.u32.u64.high %v12963_v11, %v2886_v6, %v13017_v3  ;;  %v12304_v55 = vpop.eup %12303 }
  0x75   : > { %v11671_v60 = vadd.s32 4294967169, %v871_v34  ;;  %v1073_v17 = vsel %vm1066_vm7, %v1069_v46, %v1072_v47  ;;  %v2735_v28 = vxor.u32 2147483648, %v12302_v37  ;;  %vm11686_vm15 = vcmp.lt.s32.totalorder %v11685_v50, 0 }
  0x76   : > { %v1265_v8 = vsub.s32 4, %v12941_v48  ;;  %v2732_v52 = vxor.u32 2147483648, %v12304_v55  ;;  %v1250_v10 = vsel %vm11686_vm15, 0, %v11685_v50  ;;  %v2898_v42 = vmul.u32 %v12963_v11, %v2882_v61 }
  0x77   : > { %v877_v57 = vadd.s32 1, %v11671_v60  ;;  %v2736_v49 = vsel %vm2734_vm14, %v2735_v28, %v12304_v55  ;;  %v6046_v63 = vsel %vm6044_vm9, %v2735_v28, %v12304_v55  ;;  %v1251_v26 = vsub.s32 32, %v1250_v10 }
  0x78   : > { %v1252_v27 = vshll.u32 %v12956_v53, %v1250_v10  ;;  %v1074_v31 = vsel %vm1063_vm5, nan, %v1073_v17  ;;  %v2733_v14 = vsel %vm2731_vm13, %v12302_v37, %v2732_v52  ;;  %v6043_v23 = vsel %vm6041_vm10, %v12302_v37, %v2732_v52 }
  0x79   : > { %v1255_v11 = vsub.s32 4294967266, %v1250_v10  ;;  %v2737_v13 = vsel %vm2730_vm12, %v2733_v14, %v2736_v49  ;;  %v6047_v32 = vsel %vm6040_vm0, %v6043_v23, %v6046_v63  ;;  %v1253_v33 = vshrl.u32 %v1235_v22, %v1251_v26 }
  0x7a   : > { %vm2900_vm2 = vc.u32 %v13012_v1, %v13017_v3  ;;  %v2738_v29 = vsel %vm2727_vm1, nan, %v2737_v13  ;;  %v13046_v53 = vsel %vm2727_vm1, nan, %v6047_v32  ;;  %v2901_v34 = vadd.s32 1, %v13018_v43 }
  0x7b   : > { %v1256_v54 = vadd.s32 127, %v1255_v11  ;;  %v13049_v36 = vpack.c.bf16 %v2738_v29, %v1074_v31  ;;  %vm1181_vm3 = vcmp.lt.s32.totalorder %v12713_v35, 0  ;;  %v1254_v58 = vor.u32 %v1253_v33, %v1252_v27 }
  0x7c   : > { %vm878_vm0 = vcmp.gt.s32.totalorder %v877_v57, 0  ;;  %v2902_v38 = vsel %vm2900_vm2, %v2901_v34, %v13018_v43  ;;  %v874_v39 = vand.u32 8388607, %v867_v24  ;;  %v1266_v30 = vsel %vm1181_vm3, %v1265_v8, %v12941_v48 }
  0x7d   : > { %18568 = vst [vmem:[#allocation2_spill] sm:$0xff] %v13049_v36  ;;  %v1257_v51 = vshll.u32 %v1256_v54, 23  ;;  %v879_v41 = vsel %vm878_vm0, %v877_v57, 0  ;;  %7676 = vmatprep.subr.bf16.mxu0 %v13049_v36  ;;  %v2903_v44 = vadd.s32 %v2902_v38, %v2898_v42  ;;  %v1261_v47 = vcvt.s32.f32 %v1254_v58 }
  0x7e   : > { %v881_v6 = vand.u32 31, %v879_v41  ;;  %v706_v9 = vmul.f32 4.0, %v12685_v18  ;;  %vm13062_vm1 = vcmp.le.f32.partialorder %v1179_v56, 0.7853982  ;;  %v802_v25 = vrot.slane %v12813_v59, 4 }
  0x7f   : > { %v1258_v46 = vor.u32 4788187, %v1257_v51  ;;  %v2904_v61 = vadd.s32 536870912, %v2903_v44  ;;  %v1268_v48 = vsel %vm13062_vm1, 0, %v1266_v30  ;;  %v875_v43 = vor.u32 8388608, %v874_v39 }
  0x80   : > { %v882_v37 = vsub.s32 32, %v881_v6  ;;  %v13070_v60 = vmul.f32 2.0, %v12688_v19  ;;  %v884_v17 = vshll.u32 %v18457_v62, %v881_v6  ;;  %v887_v56 = vshll.u32 %v18459_v0, %v881_v6 }
  0x81   : > { %v1259_v22 = vand.u32 2147483647, %v1258_v46  ;;  %v13072_v55 = vshrl.u32 %v2904_v61, 30  ;;  %v893_v28 = vshll.u32 %v18462_v4, %v881_v6  ;;  %vm18571_vm5 = vcmask 1043456  }
  0x82   : > { %v885_v59 = vshrl.u32 %v18459_v0, %v882_v37  ;;  %v888_v52 = vshrl.u32 %v18464_v2, %v882_v37  ;;  %v894_v10 = vshrl.u32 %v18482_v7, %v882_v37  ;;  %v13082_v57 = vsel %vm18571_vm5, %v706_v9, %v802_v25 }
  0x83   : > { %v1262_v8 = vmul.f32 %v1261_v47, %v1259_v22  ;;  %v2906_v42 = vshll.u32 %v13072_v55, 30  ;;  %v880_v49 = vshrl.u32 %v879_v41, 5  ;;  %v890_v63 = vshll.u32 %v18464_v2, %v881_v6 }
  0x84   : > { %v891_v27 = vshrl.u32 %v18462_v4, %v882_v37  ;;  %v896_v31 = vshll.u32 %v18482_v7, %v881_v6  ;;  %v897_v14 = vshrl.u32 %v18466_v15, %v882_v37  ;;  %v1272_v23 = vadd.s32 3, %v1268_v48 }
  0x85   : > { %v1263_v26 = vxor.u32 2147483648, %v1262_v8  ;;  %v13088_v11 = vsub.s32 %v2903_v44, %v2906_v42  ;;  %v13090_v13 = vand.u32 3, %v1268_v48  ;;  %v13092_v32 = vshll.u32 %v875_v43, 8 }
  0x86   : > { %v886_v29 = vor.u32 %v885_v59, %v884_v17  ;;  %v889_v54 = vor.u32 %v888_v52, %v887_v56  ;;  %v895_v34 = vor.u32 %v894_v10, %v893_v28  ;;  %vm2845_vm6 = vcmp.lt.s32.totalorder %v12801_v45, 0 }
  0x87   : > { %v1264_v33 = vsel %vm1181_vm3, %v1263_v26, %v1262_v8  ;;  %v2909_v51 = vsub.s32 0, %v13088_v11  ;;  %vm899_vm7 = vcmp.lt.s32.totalorder %v880_v49, 1  ;;  %vm902_vm4 = vcmp.lt.s32.totalorder %v880_v49, 4 }
  0x88   : > { %v1267_v58 = vsel %vm13062_vm1, %v12713_v35, %v1264_v33  ;;  %v883_v38 = vshrl.u32 %v18457_v62, %v882_v37  ;;  %v892_v39 = vor.u32 %v891_v27, %v890_v63  ;;  %v898_v41 = vor.u32 %v897_v14, %v896_v31 }
  0x89   : > { %12305 = vcosq.f32 %v1267_v58  ;;  %v11748_v30 = vmin.u32 %v2909_v51, %v13088_v11  ;;  %vm901_vm8 = vcmp.lt.s32.totalorder %v880_v49, 3  ;;  %v2534_v44 = vand.u32 2139095040, %v13082_v57 }
  0x8a   : > { %12307 = vsinq.f32 %v1267_v58  ;;  %vm13106_vm9 = vcmp.le.f32.partialorder %v2843_v16, 0.7853982  ;;  %vm900_vm10 = vcmp.lt.s32.totalorder %v880_v49, 2  ;;  %v904_v46 = vsel %vm902_vm4, %v892_v39, 2102212464 }
  0x8b   : > { %v907_v47 = vsel %vm899_vm7, %v886_v29, %v889_v54  ;;  %v908_v9 = vsel %vm902_vm4, %v895_v34, 920167782  ;;  %v13113_v50 = vand.u32 3, %v1272_v23  ;;  %v2911_v61 = vclz %v11748_v30 }
  0x8c   : > { %v2929_v25 = vsub.s32 4, %v13072_v55  ;;  %v2531_v37 = vand.u32 2147483647, %v13082_v57  ;;  %vm4598_vm11 = vcmp.lt.s32.totalorder %v13090_v13, 2  ;;  %v903_v16 = vsel %vm899_vm7, %v883_v38, %v886_v29 }
  0x8d   : > { %v909_v22 = vsel %vm901_vm8, %v892_v39, %v908_v9  ;;  %v911_v48 = vsel %vm899_vm7, %v889_v54, %v892_v39  ;;  %v912_v43 = vsel %vm902_vm4, %v898_v41, 1326507024  ;;  %v11749_v17 = vadd.s32 4294967294, %v2911_v61 }
  0x8e   : > { %v905_v56 = vsel %vm901_vm8, %v889_v54, %v904_v46  ;;  %v910_v28 = vsel %vm900_vm10, %v907_v47, %v909_v22  ;;  %v913_v8 = vsel %vm901_vm8, %v895_v34, %v912_v43  ;;  %v2535_v42 = vshrl.u32 %v2534_v44, 23 }
  0x8f   : > { %v914_v59 = vsel %vm900_vm10, %v911_v48, %v913_v8  ;;  %v13127_v52 = vmul.u32.u64.low %v13092_v32, %v910_v28  ;;  %v13128_v10 = vmul.u32.u64.high %v13092_v32, %v910_v28, %v13127_v52  ;;  %v2899_v63 = vadd.s32 %v13017_v3, %v13012_v1 }
  0x90   : > { %vm11750_vm12 = vcmp.lt.s32.totalorder %v11749_v17, 0  ;;  %v13134_v26 = vmul.u32.u64.low %v13092_v32, %v914_v59  ;;  %v13135_v27 = vmul.u32.u64.high %v13092_v32, %v914_v59, %v13134_v26  ;;  %v2930_v14 = vsel %vm2845_vm6, %v2929_v25, %v13072_v55 }
  0x91   : > { %v2914_v31 = vsel %vm11750_vm12, 0, %v11749_v17  ;;  %vm4599_vm13 = vcmp.eq.s32.totalorder %v13090_v13, 0  ;;  %v11735_v23 = vadd.s32 4294967169, %v2535_v42  ;;  %v906_v34 = vsel %vm900_vm10, %v903_v16, %v905_v56 }
  0x92   : > { %v2915_v33 = vsub.s32 32, %v2914_v31  ;;  %v2916_v29 = vshll.u32 %v13088_v11, %v2914_v31  ;;  %v2919_v54 = vsub.s32 4294967266, %v2914_v31  ;;  %vm4602_vm14 = vcmp.eq.s32.totalorder %v13090_v13, 2 }
  0x93   : > { %v13143_v1 = vpop.eup %12305  ;;  %v925_v3 = vadd.s32 1, %v13128_v10  ;;  %v2538_v58 = vand.u32 8388607, %v2531_v37  ;;  %v2541_v51 = vadd.s32 1, %v11735_v23  ;;  %v2932_v49 = vsel %vm13106_vm9, 0, %v2930_v14 }
  0x94   : > { %v13149_v55 = vpop.eup %12307  ;;  %v1279_v38 = vxor.u32 2147483648, %v13143_v1  ;;  %v2917_v39 = vshrl.u32 %v2899_v63, %v2915_v33  ;;  %v2920_v41 = vadd.s32 127, %v2919_v54  ;;  %v922_v30 = vmul.u32 %v13092_v32, %v906_v34 }
  0x95   : > { %v1276_v11 = vxor.u32 2147483648, %v13149_v55  ;;  %vm924_vm15 = vc.u32 %v13135_v27, %v13127_v52  ;;  %vm2542_vm2 = vcmp.gt.s32.totalorder %v2541_v51, 0  ;;  %v756_v9 = vrot.slane %v13070_v60, 4 }
  0x96   : > { %v2918_v44 = vor.u32 %v2917_v39, %v2916_v29  ;;  %v2921_v46 = vshll.u32 %v2920_v41, 23  ;;  %v4604_v47 = vsel %vm4602_vm14, %v1279_v38, %v13149_v55  ;;  %v2936_v61 = vadd.s32 3, %v2932_v49 }
  0x97   : > { %v4601_v25 = vsel %vm4599_vm13, %v13143_v1, %v1276_v11  ;;  %v926_v16 = vsel %vm924_vm15, %v925_v3, %v13128_v10  ;;  %v2543_v32 = vsel %vm2542_vm2, %v2541_v51, 0  ;;  %vm1271_vm3 = vweird.f32 %v12713_v35 }
  0x98   : > { %v2922_v22 = vor.u32 4788187, %v2921_v46  ;;  %v2925_v48 = vcvt.s32.f32 %v2918_v44  ;;  %v4605_v43 = vsel %vm4598_vm11, %v4601_v25, %v4604_v47  ;;  %vm1275_vm0 = vcmp.eq.s32.totalorder %v13113_v50, 0 }
  0x99   : > { %v13172_v60 = vsel %vm1271_vm3, nan, %v4605_v43  ;;  %v927_v17 = vadd.s32 %v926_v16, %v922_v30  ;;  %v2539_v56 = vor.u32 8388608, %v2538_v58  ;;  %vm1278_vm1 = vcmp.eq.s32.totalorder %v13113_v50, 2 }
  0x9a   : > { %v2923_v28 = vand.u32 2147483647, %v2922_v22  ;;  %v13175_v8 = vand.u32 3, %v2932_v49  ;;  %v2545_v59 = vand.u32 31, %v2543_v32  ;;  %v13177_v10 = vand.u32 3, %v2936_v61 }
  0x9b   : > { %v928_v42 = vadd.s32 536870912, %v927_v17  ;;  %v13179_v63 = vshrl.u32 %v2543_v32, 5  ;;  %v13183_v13 = vsel %vm18571_vm5, %v12688_v19, %v756_v9  ;;  %vm1274_vm7 = vcmp.lt.s32.totalorder %v13113_v50, 2 }
  0x9c   : > { %v2926_v26 = vmul.f32 %v2925_v48, %v2923_v28  ;;  %v2546_v31 = vsub.s32 32, %v2545_v59  ;;  %v2548_v14 = vshll.u32 %v18457_v62, %v2545_v59  ;;  %v2551_v23 = vshll.u32 %v18459_v0, %v2545_v59 }
  0x9d   : > { %v13188_v33 = vshrl.u32 %v928_v42, 30  ;;  %v2554_v29 = vshll.u32 %v18464_v2, %v2545_v59  ;;  %v2557_v54 = vshll.u32 %v18462_v4, %v2545_v59  ;;  %v13192_v34 = vshll.u32 %v2539_v56, 8 }
  0x9e   : > { %v2927_v3 = vxor.u32 2147483648, %v2926_v26  ;;  %v2549_v58 = vshrl.u32 %v18459_v0, %v2546_v31  ;;  %v2552_v51 = vshrl.u32 %v18464_v2, %v2546_v31  ;;  %v2560_v39 = vshll.u32 %v18482_v7, %v2545_v59 }
  0x9f   : > { %v930_v41 = vshll.u32 %v13188_v33, 30  ;;  %v2555_v49 = vshrl.u32 %v18462_v4, %v2546_v31  ;;  %v2558_v30 = vshrl.u32 %v18482_v7, %v2546_v31  ;;  %vm2563_vm4 = vcmp.lt.s32.totalorder %v13179_v63, 1 }
  0xa0   : > { %v2928_v44 = vsel %vm2845_vm6, %v2927_v3, %v2926_v26  ;;  %v2550_v46 = vor.u32 %v2549_v58, %v2548_v14  ;;  %v2553_v47 = vor.u32 %v2552_v51, %v2551_v23  ;;  %v2561_v9 = vshrl.u32 %v18466_v15, %v2546_v31 }
  0xa1   : > { %v2931_v61 = vsel %vm13106_vm9, %v12801_v45, %v2928_v44  ;;  %v13207_v25 = vsub.s32 %v927_v17, %v930_v41  ;;  %v2556_v16 = vor.u32 %v2555_v49, %v2554_v29  ;;  %vm2564_vm8 = vcmp.lt.s32.totalorder %v13179_v63, 2 }
  0xa2   : > { %12309 = vcosq.f32 %v2931_v61  ;;  %v2559_v32 = vor.u32 %v2558_v30, %v2557_v54  ;;  %v2562_v22 = vor.u32 %v2561_v9, %v2560_v39  ;;  %vm2565_vm10 = vcmp.lt.s32.totalorder %v13179_v63, 3 }
  0xa3   : > { %12311 = vsinq.f32 %v2931_v61  ;;  %v933_v48 = vsub.s32 0, %v13207_v25  ;;  %v2547_v43 = vshrl.u32 %v18457_v62, %v2546_v31  ;;  %vm2566_vm6 = vcmp.lt.s32.totalorder %v13179_v63, 4 }
  0xa4   : > { %v1277_v6 = vsel %vm1275_vm0, %v13143_v1, %v1276_v11  ;;  %v1280_v17 = vsel %vm1278_vm1, %v1279_v38, %v13149_v55  ;;  %v2571_v56 = vsel %vm2563_vm4, %v2550_v46, %v2553_v47  ;;  %v2572_v28 = vsel %vm2566_vm6, %v2559_v32, 920167782 }
  0xa5   : > { %vm6247_vm9 = vcmp.eq.s32.totalorder %v13175_v8, 0  ;;  %v11672_v59 = vmin.u32 %v933_v48, %v13207_v25  ;;  %v2568_v42 = vsel %vm2566_vm6, %v2556_v16, 2102212464  ;;  %v2573_v26 = vsel %vm2565_vm10, %v2556_v16, %v2572_v28 }
  0xa6   : > { %v1078_v11 = vand.u32 2139095040, %v13183_v13  ;;  %vm6246_vm11 = vcmp.lt.s32.totalorder %v13175_v8, 2  ;;  %vm6250_vm12 = vcmp.eq.s32.totalorder %v13175_v8, 2  ;;  %v2574_v1 = vsel %vm2564_vm8, %v2571_v56, %v2573_v26 }
  0xa7   : > { %v2575_v55 = vsel %vm2563_vm4, %v2553_v47, %v2556_v16  ;;  %v2576_v38 = vsel %vm2566_vm6, %v2562_v22, 1326507024  ;;  %v1281_v31 = vsel %vm1274_vm7, %v1277_v6, %v1280_v17  ;;  %vm2935_vm13 = vweird.f32 %v12801_v45 }
  0xa8   : > { %vm2938_vm14 = vcmp.lt.s32.totalorder %v13177_v10, 2  ;;  %v935_v14 = vclz %v11672_v59  ;;  %v2567_v23 = vsel %vm2563_vm4, %v2547_v43, %v2550_v46  ;;  %v2569_v29 = vsel %vm2565_vm10, %v2553_v47, %v2568_v42 }
  0xa9   : > { %v2577_v54 = vsel %vm2565_vm10, %v2559_v32, %v2576_v38  ;;  %v13246_v3 = vmul.u32.u64.low %v13192_v34, %v2574_v1  ;;  %v13247_v58 = vmul.u32.u64.high %v13192_v34, %v2574_v1, %v13246_v3  ;;  %vm2939_vm15 = vcmp.eq.s32.totalorder %v13177_v10, 0 }
  0xaa   : > { %v11673_v50 = vadd.s32 4294967294, %v935_v14  ;;  %v2578_v51 = vsel %vm2564_vm8, %v2575_v55, %v2577_v54  ;;  %v1079_v39 = vshrl.u32 %v1078_v11, 23  ;;  %vm2942_vm2 = vcmp.eq.s32.totalorder %v13177_v10, 2 }
  0xab   : > { %v13255_v41 = vmul.u32.u64.low %v13192_v34, %v2578_v51  ;;  %v13256_v49 = vmul.u32.u64.high %v13192_v34, %v2578_v51, %v13255_v41  ;;  %v1075_v30 = vand.u32 2147483647, %v13183_v13  ;;  %v1282_v44 = vsel %vm1271_vm3, nan, %v1281_v31 }
  0xac   : > { %v923_v46 = vadd.s32 %v13127_v52, %v13135_v27  ;;  %vm11674_vm0 = vcmp.lt.s32.totalorder %v11673_v50, 0  ;;  %v2570_v47 = vsel %vm2564_vm8, %v2567_v23, %v2569_v29  ;;  %v12310_v9 = vpop.eup %12309  ;;  %v953_v16 = vsub.s32 4, %v13188_v33 }
  0xad   : > { %v938_v61 = vsel %vm11674_vm0, 0, %v11673_v50  ;;  %v2589_v32 = vadd.s32 1, %v13247_v58  ;;  %v11679_v22 = vadd.s32 4294967169, %v1079_v39  ;;  %v12312_v48 = vpop.eup %12311  ;;  %v2943_v43 = vxor.u32 2147483648, %v12310_v9 }
  0xae   : > { %v939_v6 = vsub.s32 32, %v938_v61  ;;  %v940_v35 = vshll.u32 %v13207_v25, %v938_v61  ;;  %v943_v17 = vsub.s32 4294967266, %v938_v61  ;;  %v2940_v56 = vxor.u32 2147483648, %v12312_v48 }
  0xaf   : > { %v2586_v52 = vmul.u32 %v13192_v34, %v2570_v47  ;;  %vm2588_vm3 = vc.u32 %v13256_v49, %v13246_v3  ;;  %v1085_v27 = vadd.s32 1, %v11679_v22  ;;  %v2944_v63 = vsel %vm2942_vm2, %v2943_v43, %v12312_v48 }
  0xb0   : > { %v6252_v28 = vsel %vm6250_vm12, %v2943_v43, %v12312_v48  ;;  %v941_v59 = vshrl.u32 %v923_v46, %v939_v6  ;;  %v944_v42 = vadd.s32 127, %v943_v17  ;;  %v2941_v26 = vsel %vm2939_vm15, %v12310_v9, %v2940_v56 }
  0xb1   : > { %v6249_v25 = vsel %vm6247_vm9, %v12310_v9, %v2940_v56  ;;  %v2590_v34 = vsel %vm2588_vm3, %v2589_v32, %v13247_v58  ;;  %vm1086_vm1 = vcmp.gt.s32.totalorder %v1085_v27, 0  ;;  %v2945_v11 = vsel %vm2938_vm14, %v2941_v26, %v2944_v63 }
  0xb2   : > { %v6253_v1 = vsel %vm6246_vm11, %v6249_v25, %v6252_v28  ;;  %v942_v55 = vor.u32 %v941_v59, %v940_v35  ;;  %v945_v38 = vshll.u32 %v944_v42, 23  ;;  %v2946_v31 = vsel %vm2935_vm13, nan, %v2945_v11 }
  0xb3   : > { %v13288_v14 = vsel %vm2935_vm13, nan, %v6253_v1  ;;  %v2591_v23 = vadd.s32 %v2590_v34, %v2586_v52  ;;  %v1087_v29 = vsel %vm1086_vm1, %v1085_v27, 0  ;;  %v13290_v54 = vpack.c.bf16 %v2946_v31, %v1282_v44 }
  0xb4   : > { %v946_v58 = vor.u32 4788187, %v945_v38  ;;  %v949_v50 = vcvt.s32.f32 %v942_v55  ;;  %v1089_v51 = vand.u32 31, %v1087_v29  ;;  %vm13295_vm5 = vcmp.le.f32.partialorder %v867_v24, 0.7853982 }
  0xb5   : > { %18574 = vst [vmem:[#allocation3_spill] sm:$0xff] %v13290_v54  ;;  %v2592_v10 = vadd.s32 536870912, %v2591_v23  ;;  %7749 = vmatprep.subr.bf16.mxu1 %v13290_v54  ;;  %vm869_vm7 = vcmp.lt.s32.totalorder %v12817_v12, 0  ;;  %v724_v39 = vmul.f32 8.0, %v12688_v19  ;;  %v1082_v46 = vand.u32 8388607, %v1075_v30 }
  0xb6   : > { %v947_v45 = vand.u32 2147483647, %v946_v58  ;;  %v954_v41 = vsel %vm869_vm7, %v953_v16, %v13188_v33  ;;  %v1090_v47 = vsub.s32 32, %v1089_v51  ;;  %v1088_v24 = vshrl.u32 %v1087_v29, 5 }
  0xb7   : > { %v13304_v44 = vshrl.u32 %v2592_v10, 30  ;;  %v1092_v61 = vshll.u32 %v18457_v62, %v1089_v51  ;;  %v1095_v32 = vshll.u32 %v18459_v0, %v1089_v51  ;;  %v1098_v43 = vshll.u32 %v18464_v2, %v1089_v51 }
  0xb8   : > { %v950_v9 = vmul.f32 %v949_v50, %v947_v45  ;;  %v1093_v48 = vshrl.u32 %v18459_v0, %v1090_v47  ;;  %v1101_v33 = vshll.u32 %v18462_v4, %v1089_v51  ;;  %v1096_v6 = vshrl.u32 %v18464_v2, %v1090_v47 }
  0xb9   : > { %v2594_v22 = vshll.u32 %v13304_v44, 30  ;;  %v1099_v35 = vshrl.u32 %v18462_v4, %v1090_v47  ;;  %v1102_v17 = vshrl.u32 %v18482_v7, %v1090_v47  ;;  %v708_v52 = vmul.f32 4.0, %v12688_v19 }
  0xba   : > { %v951_v16 = vxor.u32 2147483648, %v950_v9  ;;  %v1104_v27 = vshll.u32 %v18482_v7, %v1089_v51  ;;  %v1105_v63 = vshrl.u32 %v18466_v15, %v1090_v47  ;;  %v956_v59 = vsel %vm13295_vm5, 0, %v954_v41 }
  0xbb   : > { %v13317_v56 = vsub.s32 %v2591_v23, %v2594_v22  ;;  %v804_v42 = vrot.slane %v724_v39, 4  ;;  %v1083_v26 = vor.u32 8388608, %v1082_v46  ;;  %v1091_v11 = vshrl.u32 %v18457_v62, %v1090_v47 }
  0xbc   : > { %v952_v28 = vsel %vm869_vm7, %v951_v16, %v950_v9  ;;  %vm1107_vm4 = vcmp.lt.s32.totalorder %v1088_v24, 1  ;;  %v1094_v1 = vor.u32 %v1093_v48, %v1092_v61  ;;  %v1097_v55 = vor.u32 %v1096_v6, %v1095_v32 }
  0xbd   : > { %v955_v25 = vsel %vm13295_vm5, %v12817_v12, %v952_v28  ;;  %v2597_v34 = vsub.s32 0, %v13317_v56  ;;  %v1100_v38 = vor.u32 %v1099_v35, %v1098_v43  ;;  %v1103_v31 = vor.u32 %v1102_v17, %v1101_v33 }
  0xbe   : > { %12313 = vcosq.f32 %v955_v25  ;;  %v1106_v29 = vor.u32 %v1105_v63, %v1104_v27  ;;  %vm1110_vm8 = vcmp.lt.s32.totalorder %v1088_v24, 4  ;;  %v960_v58 = vadd.s32 3, %v956_v59 }
  0xbf   : > { %v11736_v23 = vmin.u32 %v2597_v34, %v13317_v56  ;;  %vm18577_vm10 = vcmask 1043456   ;;  %vm1109_vm6 = vcmp.lt.s32.totalorder %v1088_v24, 3  ;;  %v1112_v10 = vsel %vm1110_vm8, %v1100_v38, 2102212464 }
  0xc0   : > { %v13333_v50 = vsel %vm18577_vm10, %v708_v52, %v804_v42  ;;  %12315 = vsinq.f32 %v955_v25  ;;  %vm1108_vm9 = vcmp.lt.s32.totalorder %v1088_v24, 2  ;;  %v1123_v8 = vshll.u32 %v1083_v26, 8 }
  0xc1   : > { %v2599_v51 = vclz %v11736_v23  ;;  %v1111_v45 = vsel %vm1107_vm4, %v1091_v11, %v1094_v1  ;;  %v1115_v39 = vsel %vm1107_vm4, %v1094_v1, %v1097_v55  ;;  %v1116_v41 = vsel %vm1110_vm8, %v1103_v31, 920167782 }
  0xc2   : > { %v1119_v46 = vsel %vm1107_vm4, %v1097_v55, %v1100_v38  ;;  %v1113_v9 = vsel %vm1109_vm6, %v1097_v55, %v1112_v10  ;;  %v1117_v61 = vsel %vm1109_vm6, %v1100_v38, %v1116_v41  ;;  %v1120_v32 = vsel %vm1110_vm8, %v1106_v29, 1326507024 }
  0xc3   : > { %v11737_v47 = vadd.s32 4294967294, %v2599_v51  ;;  %v2587_v22 = vadd.s32 %v13246_v3, %v13256_v49  ;;  %v2617_v48 = vsub.s32 4, %v13304_v44  ;;  %v1118_v43 = vsel %vm1108_vm9, %v1115_v39, %v1117_v61 }
  0xc4   : > { %v1121_v33 = vsel %vm1109_vm6, %v1103_v31, %v1120_v32  ;;  %v13349_v6 = vmul.u32.u64.low %v1123_v8, %v1118_v43  ;;  %v13350_v35 = vmul.u32.u64.high %v1123_v8, %v1118_v43, %v13349_v6  ;;  %v1114_v52 = vsel %vm1108_vm9, %v1111_v45, %v1113_v9 }
  0xc5   : > { %vm11738_vm11 = vcmp.lt.s32.totalorder %v11737_v47, 0  ;;  %v1122_v16 = vsel %vm1108_vm9, %v1119_v46, %v1121_v33  ;;  %v2742_v42 = vand.u32 2139095040, %v13333_v50  ;;  %v961_v26 = vand.u32 3, %v960_v58 }
  0xc6   : > { %v2602_v17 = vsel %vm11738_vm11, 0, %v11737_v47  ;;  %v13354_v27 = vmul.u32.u64.low %v1123_v8, %v1122_v16  ;;  %v13355_v63 = vmul.u32.u64.high %v1123_v8, %v1122_v16, %v13354_v27  ;;  %vm2533_vm12 = vcmp.lt.s32.totalorder %v13082_v57, 0 }
  0xc7   : > { %v2603_v3 = vsub.s32 32, %v2602_v17  ;;  %v2604_v49 = vshll.u32 %v13317_v56, %v2602_v17  ;;  %v2607_v28 = vsub.s32 4294967266, %v2602_v17  ;;  %v13362_v25 = vpack.c.bf16 %v13046_v53, %v12997_v40 }
  0xc8   : > { %v13366_v24 = vpack.c.bf16 %v13288_v14, %v13172_v60  ;;  %v12314_v34 = vpop.eup %12313  ;;  %v4288_v55 = vand.u32 3, %v956_v59  ;;  %v1133_v56 = vadd.s32 1, %v13350_v35  ;;  %v2618_v38 = vsel %vm2533_vm12, %v2617_v48, %v13304_v44 }
  0xc9   : > { %18578 = vst [vmem:[#allocation4_spill] sm:$0xff] %v13362_v25  ;;  %v2605_v11 = vshrl.u32 %v2587_v22, %v2603_v3  ;;  %v2608_v1 = vadd.s32 127, %v2607_v28  ;;  %v1130_v31 = vmul.u32 %v1123_v8, %v1114_v52  ;;  %vm1132_vm13 = vc.u32 %v13355_v63, %v13349_v6 }
  0xca   : > { %18579 = vst [vmem:[#allocation5_spill] sm:$0xff] %v13366_v24  ;;  %v2743_v40 = vshrl.u32 %v2742_v42, 23  ;;  %v12316_v53 = vpop.eup %12315  ;;  %vm13376_vm14 = vcmp.le.f32.partialorder %v2531_v37, 0.7853982  ;;  %vm962_vm15 = vcmp.lt.s32.totalorder %v961_v26, 2  ;;  %v967_v23 = vxor.u32 2147483648, %v12314_v34 }
  0xcb   : > { %v2606_v14 = vor.u32 %v2605_v11, %v2604_v49  ;;  %v2609_v59 = vshll.u32 %v2608_v1, 23  ;;  %v1134_v29 = vsel %vm1132_vm13, %v1133_v56, %v13350_v35  ;;  %vm966_vm2 = vcmp.eq.s32.totalorder %v961_v26, 2 }
  0xcc   : > { %v11743_v58 = vadd.s32 4294967169, %v2743_v40  ;;  %v2620_v51 = vsel %vm13376_vm14, 0, %v2618_v38  ;;  %vm963_vm0 = vcmp.eq.s32.totalorder %v961_v26, 0  ;;  %v964_v8 = vxor.u32 2147483648, %v12316_v53 }
  0xcd   : > { %v2610_v44 = vor.u32 4788187, %v2609_v59  ;;  %v2613_v10 = vcvt.s32.f32 %v2606_v14  ;;  %vm4293_vm3 = vcmp.eq.s32.totalorder %v4288_v55, 2  ;;  %v1135_v37 = vadd.s32 %v1134_v29, %v1130_v31 }
  0xce   : > { %vm4289_vm1 = vcmp.lt.s32.totalorder %v4288_v55, 2  ;;  %vm4290_vm5 = vcmp.eq.s32.totalorder %v4288_v55, 0  ;;  %v2749_v39 = vadd.s32 1, %v11743_v58  ;;  %v968_v41 = vsel %vm966_vm2, %v967_v23, %v12316_v53 }
  0xcf   : > { %v2611_v45 = vand.u32 2147483647, %v2610_v44  ;;  %v2624_v46 = vadd.s32 3, %v2620_v51  ;;  %v1136_v47 = vadd.s32 536870912, %v1135_v37  ;;  %v2739_v9 = vand.u32 2147483647, %v13333_v50 }
  0xd0   : > { %v4295_v32 = vsel %vm4293_vm3, %v967_v23, %v12316_v53  ;;  %vm2750_vm7 = vcmp.gt.s32.totalorder %v2749_v39, 0  ;;  %v965_v22 = vsel %vm963_vm0, %v12314_v34, %v964_v8  ;;  %v4292_v48 = vsel %vm4290_vm5, %v12314_v34, %v964_v8 }
  0xd1   : > { %v2614_v61 = vmul.f32 %v2613_v10, %v2611_v45  ;;  %v13384_v43 = vshrl.u32 %v1136_v47, 30  ;;  %v2751_v33 = vsel %vm2750_vm7, %v2749_v39, 0  ;;  %v18454_v16 = vmov 0  }
  0xd2   : > { %7708 = vmatprep.mubr.bf16.mxu0 %v18454_v16  ;;  %7781 = vmatprep.mubr.bf16.mxu1 %v18454_v16  ;;  %vm959_vm4 = vweird.f32 %v12817_v12  ;;  %v13389_v17 = vand.u32 3, %v2620_v51  ;;  %v2753_v52 = vand.u32 31, %v2751_v33  ;;  %v13393_v27 = vand.u32 3, %v2624_v46 }
  0xd3   : > { %v2615_v35 = vxor.u32 2147483648, %v2614_v61  ;;  %12264 = vset.pattern.permute.xlu0 %v18454_v16  ;;  %12265 = vset.pattern.permute.xlu1 %v18454_v16  ;;  %v13397_v3 = vadd.s32 %v13349_v6, %v13355_v63  ;;  %v1138_v49 = vshll.u32 %v13384_v43, 30  ;;  %v2746_v28 = vand.u32 8388607, %v2739_v9 }
  0xd4   : > { %v969_v42 = vsel %vm962_vm15, %v965_v22, %v968_v41  ;;  %v4296_v11 = vsel %vm4289_vm1, %v4292_v48, %v4295_v32  ;;  %v2754_v1 = vsub.s32 32, %v2753_v52  ;;  %v2756_v6 = vshll.u32 %v18457_v62, %v2753_v52 }
  0xd5   : > { %v2616_v34 = vsel %vm2533_vm12, %v2615_v35, %v2614_v61  ;;  %v13409_v38 = vsub.s32 %v1135_v37, %v1138_v49  ;;  %v2759_v63 = vshll.u32 %v18459_v0, %v2753_v52  ;;  %v2752_v31 = vshrl.u32 %v2751_v33, 5  ;;  %v13438_v61 = vld [vmem:[%s12671_s14 + $0x8] sm:$0xff] }
  0xd6   : > { %v2619_v56 = vsel %vm13376_vm14, %v13082_v57, %v2616_v34  ;;  %v2757_v26 = vshrl.u32 %v18459_v0, %v2754_v1  ;;  %v2762_v40 = vshll.u32 %v18464_v2, %v2753_v52  ;;  %v2747_v53 = vor.u32 8388608, %v2746_v28 }
  0xd7   : > { %12317 = vcosq.f32 %v2619_v56  ;;  %v1141_v55 = vsub.s32 0, %v13409_v38  ;;  %v2760_v14 = vshrl.u32 %v18464_v2, %v2754_v1  ;;  %vm2630_vm8 = vcmp.eq.s32.totalorder %v13393_v27, 2 }
  0xd8   : > { %12319 = vsinq.f32 %v2619_v56  ;;  %vm5941_vm10 = vcmp.eq.s32.totalorder %v13389_v17, 2  ;;  %v2755_v60 = vshrl.u32 %v18457_v62, %v2754_v1  ;;  %v2763_v59 = vshrl.u32 %v18462_v4, %v2754_v1 }
  0xd9   : > { %v2765_v23 = vshll.u32 %v18462_v4, %v2753_v52  ;;  %v2766_v29 = vshrl.u32 %v18482_v7, %v2754_v1  ;;  %vm2627_vm6 = vcmp.eq.s32.totalorder %v13393_v27, 0  ;;  %vm5938_vm9 = vcmp.eq.s32.totalorder %v13389_v17, 0 }
  0xda   : > { %v11680_v58 = vmin.u32 %v1141_v55, %v13409_v38  ;;  %v2758_v44 = vor.u32 %v2757_v26, %v2756_v6  ;;  %v2761_v10 = vor.u32 %v2760_v14, %v2759_v63  ;;  %v2768_v51 = vshll.u32 %v18482_v7, %v2753_v52  ;;  %v494_v52 = vld [vmem:[%s12676_s17 + $0x8] sm:$0xff] }
  0xdb   : > { %vm2626_vm11 = vcmp.lt.s32.totalorder %v13393_v27, 2  ;;  %vm5937_vm12 = vcmp.lt.s32.totalorder %v13389_v17, 2  ;;  %v2764_v8 = vor.u32 %v2763_v59, %v2762_v40  ;;  %v2767_v37 = vor.u32 %v2766_v29, %v2765_v23 }
  0xdc   : > { %v2769_v45 = vshrl.u32 %v18466_v15, %v2754_v1  ;;  %vm2771_vm13 = vcmp.lt.s32.totalorder %v2752_v31, 1  ;;  %v970_v39 = vsel %vm959_vm4, nan, %v969_v42  ;;  %vm2623_vm14 = vweird.f32 %v13082_v57 }
  0xdd   : > { %v4297_v41 = vsel %vm959_vm4, nan, %v4296_v11  ;;  %v1143_v46 = vclz %v11680_v58  ;;  %v13435_v47 = vshll.u32 %v2747_v53, 8  ;;  %vm2773_vm15 = vcmp.lt.s32.totalorder %v2752_v31, 3 }
  0xde   : > { %v2770_v32 = vor.u32 %v2769_v45, %v2768_v51  ;;  %vm2774_vm2 = vcmp.lt.s32.totalorder %v2752_v31, 4  ;;  %v13442_v22 = vrot.slane %v13438_v61, %v12666_v5  ;;  %vm2772_vm0 = vcmp.lt.s32.totalorder %v2752_v31, 2 }
  0xdf   : > { %v11681_v48 = vadd.s32 4294967294, %v1143_v46  ;;  %v2776_v33 = vsel %vm2774_vm2, %v2764_v8, 2102212464  ;;  %v2779_v35 = vsel %vm2771_vm13, %v2758_v44, %v2761_v10  ;;  %v2775_v12 = vsel %vm2771_vm13, %v2755_v60, %v2758_v44 }
  0xe0   : > { %v2780_v49 = vsel %vm2774_vm2, %v2767_v37, 920167782  ;;  %v2783_v28 = vsel %vm2771_vm13, %v2761_v10, %v2764_v8  ;;  %v2784_v42 = vsel %vm2774_vm2, %v2770_v32, 1326507024  ;;  %v2777_v34 = vsel %vm2773_vm15, %v2761_v10, %v2776_v33 }
  0xe1   : > { %vm11682_vm3 = vcmp.lt.s32.totalorder %v11681_v48, 0  ;;  %v2781_v11 = vsel %vm2773_vm15, %v2764_v8, %v2780_v49  ;;  %v2785_v1 = vsel %vm2773_vm15, %v2767_v37, %v2784_v42  ;;  %v12318_v56 = vpop.eup %12317  ;;  %v606_v40 = vcombine.low %v494_v52, %v494_v52 }
  0xe2   : > { %v1146_v6 = vsel %vm11682_vm3, 0, %v11681_v48  ;;  %v2782_v63 = vsel %vm2772_vm0, %v2779_v35, %v2781_v11  ;;  %v2786_v26 = vsel %vm2772_vm0, %v2783_v28, %v2785_v1  ;;  %v12320_v55 = vpop.eup %12319  ;;  %v2631_v53 = vxor.u32 2147483648, %v12318_v56 }
  0xe3   : > { %v1147_v14 = vsub.s32 32, %v1146_v6  ;;  %v1148_v60 = vshll.u32 %v13409_v38, %v1146_v6  ;;  %v1151_v59 = vsub.s32 4294967266, %v1146_v6  ;;  %v2628_v23 = vxor.u32 2147483648, %v12320_v55 }
  0xe4   : > { %v2778_v29 = vsel %vm2772_vm0, %v2775_v12, %v2777_v34  ;;  %v13453_v58 = vmul.u32.u64.low %v13435_v47, %v2786_v26  ;;  %v13454_v44 = vmul.u32.u64.high %v13435_v47, %v2786_v26, %v13453_v58  ;;  %v2632_v10 = vsel %vm2630_vm8, %v2631_v53, %v12320_v55 }
  0xe5   : > { %v5943_v51 = vsel %vm5941_vm10, %v2631_v53, %v12320_v55  ;;  %v1149_v8 = vshrl.u32 %v13397_v3, %v1147_v14  ;;  %v1152_v37 = vadd.s32 127, %v1151_v59  ;;  %v2629_v38 = vsel %vm2627_vm6, %v12318_v56, %v2628_v23 }
  0xe6   : > { %v5940_v31 = vsel %vm5938_vm9, %v12318_v56, %v2628_v23  ;;  %v13466_v45 = vmul.u32.u64.low %v13435_v47, %v2782_v63  ;;  %v13467_v46 = vmul.u32.u64.high %v13435_v47, %v2782_v63, %v13466_v45  ;;  %v2633_v32 = vsel %vm2626_vm11, %v2629_v38, %v2632_v10  ;;  %v13533_v10 = vld [vmem:[%s18440_s3] sm:$0xff]  }
  0xe7   : > { %v5944_v48 = vsel %vm5937_vm12, %v5940_v31, %v5943_v51  ;;  %v1150_v33 = vor.u32 %v1149_v8, %v1148_v60  ;;  %v1153_v3 = vshll.u32 %v1152_v37, 23  ;;  %v2634_v35 = vsel %vm2623_vm14, nan, %v2633_v32 }
  0xe8   : > { %v5945_v12 = vsel %vm2623_vm14, nan, %v5944_v48  ;;  %v2794_v49 = vmul.u32 %v13435_v47, %v2778_v29  ;;  %v518_v28 = vcombine.high %v13438_v61, %v13438_v61  ;;  %v13481_v42 = vpack.c.bf16 %v2634_v35, %v970_v39 }
  0xe9   : > { %v1154_v27 = vor.u32 4788187, %v1153_v3  ;;  %v1157_v34 = vcvt.s32.f32 %v1150_v33  ;;  %vm2796_vm1 = vc.u32 %v13454_v44, %v13466_v45  ;;  %v1161_v17 = vsub.s32 4, %v13384_v43 }
  0xea   : > { %18582 = vst [vmem:[#allocation6_spill] sm:$0xff] %v13481_v42  ;;  %v2797_v11 = vadd.s32 1, %v13467_v46  ;;  %v13489_v57 = vpack.c.bf16 %v12691_v20, %v12691_v20  ;;  %7677 = vmatpush1.bf16.msra.mxu0 %v13481_v42  ;;  %v13492_v1 = vpack.c.bf16 %v5945_v12, %v4297_v41  ;;  %v533_v39 = vcombine.high %v13442_v22, %v13442_v22 }
  0xeb   : > { %v1155_v47 = vand.u32 2147483647, %v1154_v27  ;;  %v613_v61 = vrot.slane %v606_v40, %v12666_v5  ;;  %7678 = vmatprep.subr.bf16.mxu0 %v13362_v25  ;;  %v7523_v6 = vpack.c.bf16 %v12685_v18, %v12685_v18  ;;  %v532_v20 = vrot.slane %v518_v28, %v12666_v5 }
  0xec   : > { %18583 = vst [vmem:[#allocation7_spill] sm:$0xff] %v13489_v57  ;;  %18584 = vst [vmem:[#allocation8_spill] sm:$0xff] %v13492_v1  ;;  %v2798_v56 = vsel %vm2796_vm1, %v2797_v11, %v13467_v46  ;;  %v620_v63 = vrot.slane %v494_v52, %v12666_v5  ;;  %vm1077_vm5 = vcmp.lt.s32.totalorder %v13183_v13, 0  ;;  %vm18585_vm7 = vcmask 1041408  }
  0xed   : > { %v1158_v41 = vmul.f32 %v1157_v34, %v1155_v47  ;;  %v2799_v26 = vadd.s32 %v2798_v56, %v2794_v49  ;;  %v621_v55 = vcombine.high %v613_v61, %v613_v61  ;;  %v1162_v40 = vsel %vm1077_vm5, %v1161_v17, %v13384_v43  ;;  %vm18586_vm4 = vmmov %vm18585_vm7  ;;  %v13572_v56 = vld [vmem:[%s18440_s3 + $0x8] sm:$0xff]  }
  0xee   : > { %v13509_v53 = vsel %vm18585_vm7, %v13442_v22, %v613_v61  ;;  %v13512_v14 = vsel %vm18586_vm4, %v532_v20, %v620_v63  ;;  %vm1076_vm8 = vcmp.le.f32.partialorder %v1075_v30, 0.7853982  ;;  %7679 = vmatpush1.bf16.msra.mxu0 %v13492_v1  ;;  %vm18588_vm10 = vmmov %vm18586_vm4  ;;  %vm18496_vm11 = vcmask 293888  }
  0xef   : > { %18587 = vst [vmem:[#allocation9_spill] sm:$0xff] %v13512_v14  ;;  %v1159_v18 = vxor.u32 2147483648, %v1158_v41  ;;  %v2800_v52 = vadd.s32 536870912, %v2799_v26  ;;  %v13518_v60 = vsel %vm18588_vm10, %v533_v39, %v621_v55  ;;  %vm18589_vm6 = vmmov %vm18586_vm4  ;;  %v1164_v23 = vsel %vm1076_vm8, 0, %v1162_v40 }
  0xf0   : > { %11931 = vmatprep.subr.msk.bf16.mxu0 %vm18589_vm6, %v13489_v57  ;;  %vm18590_vm9 = vmmov %vm18586_vm4  ;;  %v695_v22 = vmul.f32 2.0, %v13518_v60  ;;  %v727_v59 = vmul.f32 8.0, %v13518_v60  ;;  %v711_v51 = vmul.f32 4.0, %v13518_v60  ;;  %v1168_v46 = vadd.s32 3, %v1164_v23 }
  0xf1   : > { %v13523_v43 = vsel %vm18590_vm9, %v7523_v6, 0  ;;  %v1160_v30 = vsel %vm1077_vm5, %v1159_v18, %v1158_v41  ;;  %v2801_v29 = vshrl.u32 %v2800_v52, 30  ;;  %vm18592_vm12 = vcmask 1043456   ;;  %vm18594_vm15 = vmmov %vm18586_vm4 }
  0xf2   : > { %18591 = vst [vmem:[#allocation10_spill] sm:$0xff] %v13523_v43  ;;  %v1163_v58 = vsel %vm1076_vm8, %v13183_v13, %v1160_v30  ;;  %v759_v8 = vrot.slane %v695_v22, 4  ;;  %7681 = vmatpush1.bf16.msra.mxu0 %v13523_v43  ;;  %v807_v31 = vrot.slane %v727_v59, 4  ;;  %v534_v48 = vcombine.high %v532_v20, %v532_v20  ;;  %vm18593_vm14 = vmmov %vm18592_vm12 }
  0xf3   : > { %12321 = vcosq.f32 %v1163_v58  ;;  %v2802_v37 = vshll.u32 %v2801_v29, 30  ;;  %v2825_v38 = vsub.s32 4, %v2801_v29  ;;  %v622_v33 = vcombine.high %v620_v63, %v620_v63 }
  0xf4   : > { %v13539_v32 = vsel %vm18592_vm12, %v13518_v60, %v759_v8  ;;  %12323 = vsinq.f32 %v1163_v58  ;;  %vm2741_vm13 = vcmp.lt.s32.totalorder %v13333_v50, 0  ;;  %v13553_v27 = vsel %vm18593_vm14, %v711_v51, %v807_v31 }
  0xf5   : > { %v13541_v3 = vsub.s32 %v2799_v26, %v2802_v37  ;;  %11932 = vmatmul.mubr.msk.bf16.vlgmr.msra.gmra.mrb[0].mxu0 %vm18496_vm11, %v13533_v10  ;;  %v18456_v35 = vand.u32 2147483647, %v13539_v32  ;;  %v1390_v12 = vand.u32 2139095040, %v13539_v32  ;;  %v2826_v28 = vsel %vm2741_vm13, %v2825_v38, %v2801_v29 }
  0xf6   : > { %7718 = vmatprep.mubr.bf16.mxu0 %v18454_v16  ;;  %v13555_v34 = vand.u32 3, %v1168_v46  ;;  %v13558_v11 = vsel %vm18594_vm15, %v534_v48, %v622_v33  ;;  %vm13562_vm2 = vcmp.le.f32.partialorder %v2739_v9, 0.7853982  ;;  %v3054_v63 = vand.u32 2139095040, %v13553_v27 }
  0xf7   : > { %v2805_v49 = vsub.s32 0, %v13541_v3  ;;  %v1391_v17 = vshrl.u32 %v1390_v12, 23  ;;  %18595 = vst [vmem:[#allocation11_spill] sm:$0xff] %v13558_v11  ;;  %v2828_v61 = vsel %vm13562_vm2, 0, %v2826_v28  ;;  %v1394_v20 = vand.u32 8388607, %v18456_v35 }
  0xf8   : > { %v13578_v41 = vmul.f32 2.0, %v13558_v11  ;;  %vm1174_vm0 = vcmp.eq.s32.totalorder %v13555_v34, 2  ;;  %v13581_v26 = vand.u32 3, %v1164_v23  ;;  %v13584_v40 = vmul.f32 8.0, %v13558_v11 }
  0xf9   : > { %v11744_v39 = vmin.u32 %v2805_v49, %v13541_v3  ;;  %v11691_v6 = vadd.s32 4294967169, %v1391_v17  ;;  %v2795_v52 = vadd.s32 %v13466_v45, %v13454_v44  ;;  %v2832_v59 = vadd.s32 3, %v2828_v61 }
  0xfa   : > { %v13591_v30 = vmul.f32 4.0, %v13558_v11  ;;  %v1395_v29 = vor.u32 8388608, %v1394_v20  ;;  %v18453_v23 = vand.u32 2147483647, %v13553_v27  ;;  %v3055_v58 = vshrl.u32 %v3054_v63, 23 }
  0xfb   : > { %v2807_v9 = vclz %v11744_v39  ;;  %v1397_v55 = vadd.s32 1, %v11691_v6  ;;  %v13601_v38 = vand.u32 3, %v2828_v61  ;;  %v13605_v49 = vand.u32 3, %v2832_v59 }
  0xfc   : > { %vm1171_vm5 = vcmp.eq.s32.totalorder %v13555_v34, 0  ;;  %v13608_v17 = vshll.u32 %v1395_v29, 8  ;;  %v11755_v39 = vadd.s32 4294967169, %v3055_v58  ;;  %v13612_v6 = vand.u32 8388607, %v18453_v23 }
  0xfd   : > { %v13586_v18 = vpop.eup %12321  ;;  %v11745_v22 = vadd.s32 4294967294, %v2807_v9  ;;  %11933 = vmatmul.mubr.msk.bf16.gmra.mrb[4].mxu0 %vm18496_vm11, %v13572_v56  ;;  %vm1398_vm3 = vcmp.gt.s32.totalorder %v1397_v55, 0  ;;  %vm1170_vm4 = vcmp.lt.s32.totalorder %v13555_v34, 2  ;;  %vm4499_vm8 = vcmp.eq.s32.totalorder %v13581_v26, 2 }
  0xfe   : > { %v18461_v51 = vxor.u32 2147483648, %v13586_v18  ;;  %v1399_v8 = vsel %vm1398_vm3, %v1397_v55, 0  ;;  %7728 = vmatprep.mubr.bf16.mxu0 %v18454_v16  ;;  %v13599_v44 = vpop.eup %12323  ;;  %vm4496_vm9 = vcmp.eq.s32.totalorder %v13581_v26, 0  ;;  %vm1167_vm14 = vweird.f32 %v13183_v13 }
  0xff   : > { %vm11746_vm1 = vcmp.lt.s32.totalorder %v11745_v22, 0  ;;  %v1400_v31 = vshrl.u32 %v1399_v8, 5  ;;  %v1401_v28 = vand.u32 31, %v1399_v8  ;;  %v1172_v61 = vxor.u32 2147483648, %v13599_v44 }
 0x100   : > { %v2810_v45 = vsel %vm11746_vm1, 0, %v11745_v22  ;;  %vm4495_vm15 = vcmp.lt.s32.totalorder %v13581_v26, 2  ;;  %vm18599_vm3 = vcmask 1043456  }
 0x101   : > { %v2811_v48 = vsub.s32 32, %v2810_v45  ;;  %v2812_v33 = vshll.u32 %v13541_v3, %v2810_v45  ;;  %v2815_v12 = vsub.s32 4294967266, %v2810_v45  ;;  %v13620_v3 = vsel %vm1174_vm0, %v18461_v51, %v13599_v44 }
 0x102   : > { %v1402_v9 = vsub.s32 32, %v1401_v28  ;;  %v1404_v55 = vshll.u32 %v18457_v62, %v1401_v28  ;;  %v1407_v22 = vshll.u32 %v18459_v0, %v1401_v28  ;;  %vm1419_vm7 = vcmp.lt.s32.totalorder %v1400_v31, 1 }
 0x103   : > { %v2813_v20 = vshrl.u32 %v2795_v52, %v2811_v48  ;;  %v2816_v63 = vadd.s32 127, %v2815_v12  ;;  %v1410_v58 = vshll.u32 %v18464_v2, %v1401_v28  ;;  %v1413_v8 = vshll.u32 %v18462_v4, %v1401_v28 }
 0x104   : > { %v1403_v45 = vshrl.u32 %v18457_v62, %v1402_v9  ;;  %v1405_v23 = vshrl.u32 %v18459_v0, %v1402_v9  ;;  %v1408_v16 = vshrl.u32 %v18464_v2, %v1402_v9  ;;  %v1411_v52 = vshrl.u32 %v18462_v4, %v1402_v9 }
 0x105   : > { %v2814_v59 = vor.u32 %v2813_v20, %v2812_v33  ;;  %v2817_v29 = vshll.u32 %v2816_v63, 23  ;;  %v1414_v33 = vshrl.u32 %v18482_v7, %v1402_v9  ;;  %v1416_v20 = vshll.u32 %v18482_v7, %v1401_v28 }
 0x106   : > { %v1406_v63 = vor.u32 %v1405_v23, %v1404_v55  ;;  %v1409_v35 = vor.u32 %v1408_v16, %v1407_v22  ;;  %v1412_v46 = vor.u32 %v1411_v52, %v1410_v58  ;;  %v1417_v62 = vshrl.u32 %v18466_v15, %v1402_v9 }
 0x107   : > { %v2818_v48 = vor.u32 4788187, %v2817_v29  ;;  %v2821_v12 = vcvt.s32.f32 %v2814_v59  ;;  %v1415_v51 = vor.u32 %v1414_v33, %v1413_v8  ;;  %vm1420_vm10 = vcmp.lt.s32.totalorder %v1400_v31, 2 }
 0x108   : > { %vm1421_vm6 = vcmp.lt.s32.totalorder %v1400_v31, 3  ;;  %v1418_v4 = vor.u32 %v1417_v62, %v1416_v20  ;;  %vm1422_vm12 = vcmp.lt.s32.totalorder %v1400_v31, 4  ;;  %v1423_v59 = vsel %vm1419_vm7, %v1403_v45, %v1406_v63 }
 0x109   : > { %v2819_v0 = vand.u32 2147483647, %v2818_v48  ;;  %v1427_v29 = vsel %vm1419_vm7, %v1406_v63, %v1409_v35  ;;  %v1424_v37 = vsel %vm1422_vm12, %v1412_v46, 2102212464  ;;  %v1428_v28 = vsel %vm1422_vm12, %v1415_v51, 920167782 }
 0x10a   : > { %v1431_v16 = vsel %vm1419_vm7, %v1409_v35, %v1412_v46  ;;  %v1425_v23 = vsel %vm1421_vm6, %v1409_v35, %v1424_v37  ;;  %v1429_v9 = vsel %vm1421_vm6, %v1412_v46, %v1428_v28  ;;  %v1432_v55 = vsel %vm1422_vm12, %v1418_v4, 1326507024 }
 0x10b   : > { %v2822_v2 = vmul.f32 %v2821_v12, %v2819_v0  ;;  %v3061_v22 = vadd.s32 1, %v11755_v39  ;;  %v1173_v62 = vsel %vm1171_vm5, %v13586_v18, %v1172_v61  ;;  %v1430_v0 = vsel %vm1420_vm10, %v1427_v29, %v1429_v9 }
 0x10c   : > { %v1433_v8 = vsel %vm1421_vm6, %v1415_v51, %v1432_v55  ;;  %v1426_v45 = vsel %vm1420_vm10, %v1423_v59, %v1425_v23  ;;  %v13652_v35 = vmul.u32.u64.low %v13608_v17, %v1430_v0  ;;  %v13653_v37 = vmul.u32.u64.high %v13608_v17, %v1430_v0, %v13652_v35 }
 0x10d   : > { %v2823_v58 = vxor.u32 2147483648, %v2822_v2  ;;  %v1434_v52 = vsel %vm1420_vm10, %v1431_v16, %v1433_v8  ;;  %vm3062_vm0 = vcmp.gt.s32.totalorder %v3061_v22, 0  ;;  %v3059_v31 = vor.u32 8388608, %v13612_v6 }
 0x10e   : > { %v13660_v46 = vmul.u32.u64.low %v13608_v17, %v1434_v52  ;;  %v13661_v39 = vmul.u32.u64.high %v13608_v17, %v1434_v52, %v13660_v46  ;;  %v3063_v48 = vsel %vm3062_vm0, %v3061_v22, 0  ;;  %v18598_v12 = vrot.slane %v13578_v41, 4 }
 0x10f   : > { %v2824_v4 = vsel %vm2741_vm13, %v2823_v58, %v2822_v2  ;;  %v1442_v2 = vmul.u32 %v13608_v17, %v1426_v45  ;;  %v3065_v20 = vand.u32 31, %v3063_v48  ;;  %v1177_v47 = vsel %vm1170_vm4, %v1173_v62, %v13620_v3 }
 0x110   : > { %v2827_v51 = vsel %vm13562_vm2, %v13333_v50, %v2824_v4  ;;  %v13671_v33 = vsel %vm18599_vm3, %v13558_v11, %v18598_v12  ;;  %v18600_v6 = vxor.u32 2147483648, %v13586_v18  ;;  %v1445_v59 = vadd.s32 1, %v13653_v37 }
 0x111   : > { %12325 = vcosq.f32 %v2827_v51  ;;  %v18469_v63 = vand.u32 2147483647, %v13671_v33  ;;  %vm2838_vm13 = vcmp.eq.s32.totalorder %v13605_v49, 2  ;;  %vm6147_vm2 = vcmp.eq.s32.totalorder %v13601_v38, 2 }
 0x112   : > { %12327 = vsinq.f32 %v2827_v51  ;;  %v4501_v41 = vsel %vm4499_vm8, %v18600_v6, %v13599_v44  ;;  %vm1444_vm1 = vc.u32 %v13661_v39, %v13652_v35  ;;  %v13688_v17 = vshrl.u32 %v3063_v48, 5 }
 0x113   : > { %v3066_v34 = vsub.s32 32, %v3065_v20  ;;  %v18601_v3 = vmov 683565275   ;;  %vm2835_vm5 = vcmp.eq.s32.totalorder %v13605_v49, 0  ;;  %vm6144_vm7 = vcmp.eq.s32.totalorder %v13601_v38, 0 }
 0x114   : > { %v3068_v29 = vshll.u32 %v18601_v3, %v3065_v20  ;;  %v1446_v28 = vsel %vm1444_vm1, %v1445_v59, %v13653_v37  ;;  %v18602_v16 = vmov 2475754826   ;;  %v18603_v9 = vmov 2131351028  }
 0x115   : > { %v3071_v23 = vshll.u32 %v18602_v16, %v3065_v20  ;;  %v3074_v55 = vshll.u32 %v18603_v9, %v3065_v20  ;;  %v18604_v22 = vmov 2102212464   ;;  %vm2834_vm4 = vcmp.lt.s32.totalorder %v13605_v49, 2 }
 0x116   : > { %v3077_v62 = vshll.u32 %v18604_v22, %v3065_v20  ;;  %v4498_v58 = vsel %vm4496_vm9, %v13586_v18, %v1172_v61  ;;  %vm6143_vm8 = vcmp.lt.s32.totalorder %v13601_v38, 2  ;;  %v1447_v0 = vadd.s32 %v1446_v28, %v1442_v2 }
 0x117   : > { %v3069_v8 = vshrl.u32 %v18602_v16, %v3066_v34  ;;  %v3072_v45 = vshrl.u32 %v18603_v9, %v3066_v34  ;;  %vm2831_vm10 = vweird.f32 %v13333_v50  ;;  %v3075_v52 = vshrl.u32 %v18604_v22, %v3066_v34 }
 0x118   : > { %v3078_v37 = vshrl.u32 %v18482_v7, %v3066_v34  ;;  %v3080_v4 = vshll.u32 %v18482_v7, %v3065_v20  ;;  %v3081_v44 = vshrl.u32 %v18466_v15, %v3066_v34  ;;  %v1178_v18 = vsel %vm1167_vm14, nan, %v1177_v47 }
 0x119   : > { %v1448_v61 = vadd.s32 536870912, %v1447_v0  ;;  %v3070_v46 = vor.u32 %v3069_v8, %v3068_v29  ;;  %v3073_v51 = vor.u32 %v3072_v45, %v3071_v23  ;;  %v3076_v48 = vor.u32 %v3075_v52, %v3074_v55 }
 0x11a   : > { %v3079_v12 = vor.u32 %v3078_v37, %v3077_v62  ;;  %v3082_v2 = vor.u32 %v3081_v44, %v3080_v4  ;;  %vm3083_vm6 = vcmp.lt.s32.totalorder %v13688_v17, 1  ;;  %v3067_v59 = vshrl.u32 %v18601_v3, %v3066_v34 }
 0x11b   : > { %v13714_v6 = vshrl.u32 %v1448_v61, 30  ;;  %vm3085_vm9 = vcmp.lt.s32.totalorder %v13688_v17, 3  ;;  %vm3086_vm12 = vcmp.lt.s32.totalorder %v13688_v17, 4  ;;  %v4502_v20 = vsel %vm4495_vm15, %v4498_v58, %v4501_v41  ;;  %v12326_v23 = vpop.eup %12325 }
 0x11c   : > { %v3092_v47 = vsel %vm3086_vm12, %v3079_v12, 920167782  ;;  %v13721_v28 = vshll.u32 %v3059_v31, 8  ;;  %v1598_v29 = vand.u32 2139095040, %v13671_v33  ;;  %vm3084_vm0 = vcmp.lt.s32.totalorder %v13688_v17, 2  ;;  %v12328_v8 = vpop.eup %12327 }
 0x11d   : > { %v1450_v55 = vshll.u32 %v13714_v6, 30  ;;  %v3088_v62 = vsel %vm3086_vm12, %v3076_v48, 2102212464  ;;  %v3095_v34 = vsel %vm3083_vm6, %v3073_v51, %v3076_v48  ;;  %v2839_v45 = vxor.u32 2147483648, %v12326_v23 }
 0x11e   : > { %v3091_v26 = vsel %vm3083_vm6, %v3070_v46, %v3073_v51  ;;  %v3093_v31 = vsel %vm3085_vm9, %v3076_v48, %v3092_v47  ;;  %v3096_v41 = vsel %vm3086_vm12, %v3082_v2, 1326507024  ;;  %v2836_v58 = vxor.u32 2147483648, %v12328_v8 }
 0x11f   : > { %v13732_v52 = vsub.s32 %v1447_v0, %v1450_v55  ;;  %v3087_v37 = vsel %vm3083_vm6, %v3067_v59, %v3070_v46  ;;  %v3097_v4 = vsel %vm3085_vm9, %v3079_v12, %v3096_v41  ;;  %v2840_v44 = vsel %vm2838_vm13, %v2839_v45, %v12328_v8 }
 0x120   : > { %v6149_v61 = vsel %vm6147_vm2, %v2839_v45, %v12328_v8  ;;  %v3089_v15 = vsel %vm3085_vm9, %v3073_v51, %v3088_v62  ;;  %v3098_v48 = vsel %vm3084_vm0, %v3095_v34, %v3097_v4  ;;  %v2837_v0 = vsel %vm2835_vm5, %v12326_v23, %v2836_v58 }
 0x121   : > { %v6146_v46 = vsel %vm6144_vm7, %v12326_v23, %v2836_v58  ;;  %v1453_v12 = vsub.s32 0, %v13732_v52  ;;  %v3094_v2 = vsel %vm3084_vm0, %v3091_v26, %v3093_v31  ;;  %v2841_v59 = vsel %vm2834_vm4, %v2837_v0, %v2840_v44 }
 0x122   : > { %v6150_v51 = vsel %vm6143_vm8, %v6146_v46, %v6149_v61  ;;  %v13758_v47 = vmul.u32.u64.low %v13721_v28, %v3098_v48  ;;  %v13759_v55 = vmul.u32.u64.high %v13721_v28, %v3098_v48, %v13758_v47  ;;  %v2842_v62 = vsel %vm2831_vm10, nan, %v2841_v59 }
 0x123   : > { %v4503_v23 = vsel %vm1167_vm14, nan, %v4502_v20  ;;  %v6151_v34 = vsel %vm2831_vm10, nan, %v6150_v51  ;;  %v11692_v8 = vmin.u32 %v1453_v12, %v13732_v52  ;;  %v13768_v49 = vpack.c.bf16 %v2842_v62, %v1178_v18  ;;  %vm18607_vm14 = vmmov %vm18599_vm3 }
 0x124   : > { %v3090_v38 = vsel %vm3084_vm0, %v3087_v37, %v3089_v15  ;;  %v13773_v45 = vmul.u32.u64.low %v13721_v28, %v3094_v2  ;;  %v13774_v26 = vmul.u32.u64.high %v13721_v28, %v3094_v2, %v13773_v45  ;;  %v7525_v31 = vpack.c.bf16 %v12688_v19, %v12688_v19 }
 0x125   : > { %18605 = vst [vmem:[#allocation12_spill] sm:$0xff] %v13768_v49  ;;  %v1455_v41 = vclz %v11692_v8  ;;  %v1473_v13 = vsub.s32 4, %v13714_v6  ;;  %v18606_v50 = vrot.slane %v13584_v40, 4  ;;  %7750 = vmatpush1.bf16.msra.mxu1 %v13768_v49  ;;  %v13786_v17 = vpack.c.bf16 %v6151_v34, %v4503_v23 }
 0x126   : > { %v13790_v15 = vpack.c.bf16 %v12694_v21, %v12694_v21  ;;  %v1599_v18 = vshrl.u32 %v1598_v29, 23  ;;  %7751 = vmatprep.subr.bf16.mxu1 %v13366_v24  ;;  %vm1389_vm15 = vcmp.lt.s32.totalorder %v13539_v32, 0  ;;  %v3106_v40 = vmul.u32 %v13721_v28, %v3090_v38 }
 0x127   : > { %v13783_v20 = vsel %vm18607_vm14, %v13591_v30, %v18606_v50  ;;  %18608 = vst [vmem:[#allocation13_spill] sm:$0xff] %v13786_v17  ;;  %v11693_v19 = vadd.s32 4294967294, %v1455_v41  ;;  %vm3108_vm3 = vc.u32 %v13759_v55, %v13773_v45  ;;  %v3109_v30 = vadd.s32 1, %v13774_v26 }
 0x128   : > { %18609 = vst [vmem:[#allocation14_spill] sm:$0xff] %v13790_v15  ;;  %v11699_v58 = vadd.s32 4294967169, %v1599_v18  ;;  %v1602_v37 = vand.u32 8388607, %v18469_v63  ;;  %v3262_v4 = vand.u32 2139095040, %v13783_v20  ;;  %vm18610_vm13 = vcmask 1041408  }
 0x129   : > { %v13801_v21 = vsel %vm18610_vm13, %v7525_v31, 0  ;;  %v1443_v29 = vadd.s32 %v13652_v35, %v13661_v39  ;;  %vm11694_vm2 = vcmp.lt.s32.totalorder %v11693_v19, 0  ;;  %v1474_v28 = vsel %vm1389_vm15, %v1473_v13, %v13714_v6  ;;  %7752 = vmatpush1.bf16.msra.mxu1 %v13786_v17  ;;  %vm18615_vm5 = vmmov %vm18610_vm13 }
 0x12a   : > { %18611 = vst [vmem:[#allocation15_spill] sm:$0xff] %v13801_v21  ;;  %v18612_v44 = vand.u32 2147483647, %v13539_v32  ;;  %v1458_v48 = vsel %vm11694_vm2, 0, %v11693_v19  ;;  %v3110_v0 = vsel %vm3108_vm3, %v3109_v30, %v13774_v26  ;;  %v1605_v46 = vadd.s32 1, %v11699_v58  ;;  %11936 = vmatprep.subr.msk.bf16.mxu1 %vm18615_vm5, %v13790_v15 }
 0x12b   : > { %v1459_v35 = vsub.s32 32, %v1458_v48  ;;  %v1460_v39 = vshll.u32 %v13732_v52, %v1458_v48  ;;  %v1463_v12 = vsub.s32 4294967266, %v1458_v48  ;;  %v3111_v6 = vadd.s32 %v3110_v0, %v3106_v40 }
 0x12c   : > { %vm13811_vm1 = vcmp.le.f32.partialorder %v18612_v44, 0.7853982  ;;  %v1603_v59 = vor.u32 8388608, %v1602_v37  ;;  %vm1606_vm7 = vcmp.gt.s32.totalorder %v1605_v46, 0  ;;  %v3263_v51 = vshrl.u32 %v3262_v4, 23 }
 0x12d   : > { %v13821_v2 = vsel %vm13811_vm1, 0, %v1474_v28  ;;  %v1461_v47 = vshrl.u32 %v1443_v29, %v1459_v35  ;;  %v1464_v62 = vadd.s32 127, %v1463_v12  ;;  %v3112_v23 = vadd.s32 536870912, %v3111_v6  ;;  %7754 = vmatpush1.bf16.msra.mxu1 %v13801_v21 }
 0x12e   : > { %v1607_v34 = vsel %vm1606_vm7, %v1605_v46, 0  ;;  %v13825_v52 = vadd.s32 3, %v13821_v2  ;;  %v13828_v41 = vadd.s32 %v13773_v45, %v13759_v55  ;;  %v18468_v50 = vand.u32 2147483647, %v13783_v20 }
 0x12f   : > { %v1609_v8 = vand.u32 31, %v1607_v34  ;;  %v1462_v38 = vor.u32 %v1461_v47, %v1460_v39  ;;  %v1465_v26 = vshll.u32 %v1464_v62, 23  ;;  %v3113_v31 = vshrl.u32 %v3112_v23, 30 }
 0x130   : > { %v11763_v18 = vadd.s32 4294967169, %v3263_v51  ;;  %11937 = vmatmul.mubr.msk.bf16.vlgmr.msra.gmra.mrb[0].mxu1 %vm18496_vm11, %v13533_v10  ;;  %v13833_v58 = vshll.u32 %v1603_v59, 8  ;;  %v18616_v37 = vmov 0   ;;  %vm3053_vm4 = vcmp.lt.s32.totalorder %v13553_v27, 0 }
 0x131   : > { %v1610_v13 = vsub.s32 32, %v1609_v8  ;;  %v1466_v19 = vor.u32 4788187, %v1465_v26  ;;  %v1469_v40 = vcvt.s32.f32 %v1462_v38  ;;  %v3114_v30 = vshll.u32 %v3113_v31, 30  ;;  %7791 = vmatprep.mubr.bf16.mxu1 %v18616_v37 }
 0x132   : > { %v1612_v4 = vshll.u32 %v18601_v3, %v1609_v8  ;;  %v1615_v55 = vshll.u32 %v18602_v16, %v1609_v8  ;;  %v1608_v10 = vshrl.u32 %v1607_v34, 5  ;;  %v1621_v48 = vshll.u32 %v18604_v22, %v1609_v8 }
 0x133   : > { %v1613_v29 = vshrl.u32 %v18602_v16, %v1610_v13  ;;  %v1616_v45 = vshrl.u32 %v18603_v9, %v1610_v13  ;;  %v1467_v28 = vand.u32 2147483647, %v1466_v19  ;;  %v13841_v44 = vsub.s32 %v3111_v6, %v3114_v30 }
 0x134   : > { %v1618_v0 = vshll.u32 %v18603_v9, %v1609_v8  ;;  %v1619_v46 = vshrl.u32 %v18604_v22, %v1610_v13  ;;  %v13848_v35 = vand.u32 8388607, %v18468_v50  ;;  %v3269_v39 = vadd.s32 1, %v11763_v18 }
 0x135   : > { %v1470_v12 = vmul.f32 %v1469_v40, %v1467_v28  ;;  %v3117_v59 = vsub.s32 0, %v13841_v44  ;;  %v1611_v51 = vshrl.u32 %v18601_v3, %v1610_v13  ;;  %v1622_v6 = vshrl.u32 %v18482_v7, %v1610_v13 }
 0x136   : > { %v1614_v47 = vor.u32 %v1613_v29, %v1612_v4  ;;  %v1617_v62 = vor.u32 %v1616_v45, %v1615_v55  ;;  %v1624_v23 = vshll.u32 %v18482_v7, %v1609_v8  ;;  %v18617_v34 = vmov 1326507024  }
 0x137   : > { %v1625_v38 = vshrl.u32 %v18617_v34, %v1610_v13  ;;  %v1471_v26 = vxor.u32 2147483648, %v1470_v12  ;;  %v18618_v19 = vand.u32 2147483647, %v13553_v27  ;;  %v11756_v18 = vmin.u32 %v3117_v59, %v13841_v44 }
 0x138   : > { %v1623_v40 = vor.u32 %v1622_v6, %v1621_v48  ;;  %vm1627_vm10 = vcmp.lt.s32.totalorder %v1608_v10, 1  ;;  %v3137_v28 = vsub.s32 4, %v3113_v31  ;;  %v1620_v50 = vor.u32 %v1619_v46, %v1618_v0  ;;  %11938 = vmatmul.mubr.msk.bf16.gmra.mrb[4].mxu1 %vm18496_vm11, %v13572_v56 }
 0x139   : > { %vm13857_vm8 = vcmp.le.f32.partialorder %v18618_v19, 0.7853982  ;;  %vm1628_vm6 = vcmp.lt.s32.totalorder %v1608_v10, 2  ;;  %vm1630_vm9 = vcmp.lt.s32.totalorder %v1608_v10, 4  ;;  %v1472_v8 = vsel %vm1389_vm15, %v1471_v26, %v1470_v12  ;;  %7801 = vmatprep.mubr.bf16.mxu1 %v18616_v37 }
 0x13a   : > { %v3119_v13 = vclz %v11756_v18  ;;  %v1626_v4 = vor.u32 %v1625_v38, %v1624_v23  ;;  %vm1629_vm12 = vcmp.lt.s32.totalorder %v1608_v10, 3  ;;  %v1475_v29 = vsel %vm13811_vm1, %v13539_v32, %v1472_v8 }
 0x13b   : > { %v1631_v55 = vsel %vm1627_vm10, %v1611_v51, %v1614_v47  ;;  %v1632_v45 = vsel %vm1630_vm9, %v1620_v50, 2102212464  ;;  %v1635_v48 = vsel %vm1627_vm10, %v1614_v47, %v1617_v62  ;;  %12329 = vcosq.f32 %v1475_v29 }
 0x13c   : > { %v11757_v56 = vadd.s32 4294967294, %v3119_v13  ;;  %v1633_v0 = vsel %vm1629_vm12, %v1617_v62, %v1632_v45  ;;  %v1636_v46 = vsel %vm1630_vm9, %v1623_v40, 920167782  ;;  %12331 = vsinq.f32 %v1475_v29 }
 0x13d   : > { %v3138_v12 = vsel %vm3053_vm4, %v3137_v28, %v3113_v31  ;;  %v1637_v61 = vsel %vm1629_vm12, %v1620_v50, %v1636_v46  ;;  %v1639_v59 = vsel %vm1627_vm10, %v1617_v62, %v1620_v50  ;;  %v1634_v51 = vsel %vm1628_vm6, %v1631_v55, %v1633_v0 }
 0x13e   : > { %vm11758_vm0 = vcmp.lt.s32.totalorder %v11757_v56, 0  ;;  %v1638_v6 = vsel %vm1628_vm6, %v1635_v48, %v1637_v61  ;;  %v1640_v47 = vsel %vm1630_vm9, %v1626_v4, 1326507024  ;;  %v13892_v62 = vsel %vm13857_vm8, 0, %v3138_v12 }
 0x13f   : > { %v3122_v23 = vsel %vm11758_vm0, 0, %v11757_v56  ;;  %v1641_v38 = vsel %vm1629_vm12, %v1623_v40, %v1640_v47  ;;  %v13884_v26 = vmul.u32.u64.low %v13833_v58, %v1638_v6  ;;  %v13885_v19 = vmul.u32.u64.high %v13833_v58, %v1638_v6, %v13884_v26 }
 0x140   : > { %v3123_v31 = vsub.s32 32, %v3122_v23  ;;  %v3124_v18 = vshll.u32 %v13841_v44, %v3122_v23  ;;  %v3127_v28 = vsub.s32 4294967266, %v3122_v23  ;;  %v1642_v50 = vsel %vm1628_vm6, %v1639_v59, %v1641_v38 }
 0x141   : > { %v13895_v8 = vmul.u32.u64.low %v13833_v58, %v1642_v50  ;;  %v13896_v13 = vmul.u32.u64.high %v13833_v58, %v1642_v50, %v13895_v8  ;;  %vm3270_vm14 = vcmp.gt.s32.totalorder %v3269_v39, 0  ;;  %v13899_v40 = vand.u32 3, %v13825_v52 }
 0x142   : > { %v3125_v4 = vshrl.u32 %v13828_v41, %v3123_v31  ;;  %v3128_v29 = vadd.s32 127, %v3127_v28  ;;  %v3271_v55 = vsel %vm3270_vm14, %v3269_v39, 0  ;;  %v1650_v44 = vmul.u32 %v13833_v58, %v1634_v51 }
 0x143   : > { %v1653_v10 = vadd.s32 1, %v13885_v19  ;;  %v3267_v45 = vor.u32 8388608, %v13848_v35  ;;  %v3273_v48 = vand.u32 31, %v3271_v55  ;;  %v3144_v46 = vadd.s32 3, %v13892_v62 }
 0x144   : > { %v3126_v56 = vor.u32 %v3125_v4, %v3124_v18  ;;  %v3129_v0 = vshll.u32 %v3128_v29, 23  ;;  %vm1652_vm15 = vc.u32 %v13896_v13, %v13884_v26  ;;  %v13909_v12 = vmul.f32 2.0, %v13509_v53 }
 0x145   : > { %v3274_v52 = vsub.s32 32, %v3273_v48  ;;  %v13911_v41 = vpop.eup %12329  ;;  %vm1483_vm3 = vcmp.eq.s32.totalorder %v13899_v40, 0  ;;  %v1654_v35 = vsel %vm1652_vm15, %v1653_v10, %v13885_v19  ;;  %vm1486_vm13 = vcmp.eq.s32.totalorder %v13899_v40, 2 }
 0x146   : > { %v3130_v58 = vor.u32 4788187, %v3129_v0  ;;  %v3133_v39 = vcvt.s32.f32 %v3126_v56  ;;  %v13915_v61 = vpop.eup %12331  ;;  %v1655_v59 = vadd.s32 %v1654_v35, %v1650_v44  ;;  %v13918_v51 = vshll.u32 %v3267_v45, 8 }
 0x147   : > { %v13921_v6 = vmul.f32 4.0, %v13509_v53  ;;  %v13923_v23 = vand.u32 3, %v3144_v46  ;;  %v3272_v38 = vshrl.u32 %v3271_v55, 5  ;;  %v3276_v31 = vshll.u32 %v18601_v3, %v3273_v48 }
 0x148   : > { %v3131_v47 = vand.u32 2147483647, %v3130_v58  ;;  %v1656_v18 = vadd.s32 536870912, %v1655_v59  ;;  %v3277_v28 = vshrl.u32 %v18602_v16, %v3274_v52  ;;  %v3279_v19 = vshll.u32 %v18602_v16, %v3273_v48 }
 0x149   : > { %v3280_v50 = vshrl.u32 %v18603_v9, %v3274_v52  ;;  %vm1482_vm2 = vcmp.lt.s32.totalorder %v13899_v40, 2  ;;  %v3282_v4 = vshll.u32 %v18603_v9, %v3273_v48  ;;  %v3283_v29 = vshrl.u32 %v18604_v22, %v3274_v52 }
 0x14a   : > { %v3134_v8 = vmul.f32 %v3133_v39, %v3131_v47  ;;  %v3285_v44 = vshll.u32 %v18604_v22, %v3273_v48  ;;  %v1657_v10 = vshrl.u32 %v1656_v18, 30  ;;  %v3286_v45 = vshrl.u32 %v18482_v7, %v3274_v52 }
 0x14b   : > { %v758_v56 = vrot.slane %v13909_v12, 4  ;;  %v3275_v46 = vshrl.u32 %v18601_v3, %v3274_v52  ;;  %v3288_v58 = vshll.u32 %v18482_v7, %v3273_v48  ;;  %v3289_v39 = vshrl.u32 %v18617_v34, %v3274_v52 }
 0x14c   : > { %v3135_v0 = vxor.u32 2147483648, %v3134_v8  ;;  %v18474_v35 = vxor.u32 2147483648, %v13915_v61  ;;  %v1658_v47 = vshll.u32 %v1657_v10, 30  ;;  %v3278_v63 = vor.u32 %v3277_v28, %v3276_v31 }
 0x14d   : > { %v3281_v21 = vor.u32 %v3280_v50, %v3279_v19  ;;  %vm1479_vm1 = vweird.f32 %v13539_v32  ;;  %v3284_v55 = vor.u32 %v3283_v29, %v3282_v4  ;;  %v3287_v15 = vor.u32 %v3286_v45, %v3285_v44 }
 0x14e   : > { %v3136_v18 = vsel %vm3053_vm4, %v3135_v0, %v3134_v8  ;;  %vm3291_vm5 = vcmp.lt.s32.totalorder %v3272_v38, 1  ;;  %v13946_v48 = vsub.s32 %v1655_v59, %v1658_v47  ;;  %v3290_v52 = vor.u32 %v3289_v39, %v3288_v58 }
 0x14f   : > { %v3139_v12 = vsel %vm13857_vm8, %v13553_v27, %v3136_v18  ;;  %vm3294_vm7 = vcmp.lt.s32.totalorder %v3272_v38, 4  ;;  %v18621_v31 = vxor.u32 2147483648, %v13911_v41  ;;  %vm1597_vm4 = vcmp.lt.s32.totalorder %v13671_v33, 0 }
 0x150   : > { %12333 = vcosq.f32 %v3139_v12  ;;  %vm3293_vm10 = vcmp.lt.s32.totalorder %v3272_v38, 3  ;;  %v3296_v19 = vsel %vm3294_vm7, %v3284_v55, 2102212464  ;;  %v1485_v30 = vsel %vm1483_vm3, %v13911_v41, %v18474_v35 }
 0x151   : > { %v1488_v28 = vsel %vm1486_vm13, %v18621_v31, %v13915_v61  ;;  %12335 = vsinq.f32 %v3139_v12  ;;  %v1661_v59 = vsub.s32 0, %v13946_v48  ;;  %vm3292_vm8 = vcmp.lt.s32.totalorder %v3272_v38, 2 }
 0x152   : > { %v3295_v50 = vsel %vm3291_vm5, %v3275_v46, %v3278_v63  ;;  %v3297_v8 = vsel %vm3293_vm10, %v3281_v21, %v3296_v19  ;;  %v3299_v4 = vsel %vm3291_vm5, %v3278_v63, %v3281_v21  ;;  %v3300_v29 = vsel %vm3294_vm7, %v3287_v15, 920167782 }
 0x153   : > { %v11700_v44 = vmin.u32 %v1661_v59, %v13946_v48  ;;  %v3301_v45 = vsel %vm3293_vm10, %v3284_v55, %v3300_v29  ;;  %v3303_v0 = vsel %vm3291_vm5, %v3281_v21, %v3284_v55  ;;  %v3304_v58 = vsel %vm3294_vm7, %v3290_v52, 1326507024 }
 0x154   : > { %vm3146_vm6 = vcmp.lt.s32.totalorder %v13923_v23, 2  ;;  %v3302_v39 = vsel %vm3292_vm8, %v3299_v4, %v3301_v45  ;;  %v3305_v46 = vsel %vm3293_vm10, %v3287_v15, %v3304_v58  ;;  %v726_v47 = vmul.f32 8.0, %v13509_v53 }
 0x155   : > { %v1489_v63 = vsel %vm1482_vm2, %v1485_v30, %v1488_v28  ;;  %vm3143_vm9 = vweird.f32 %v13553_v27  ;;  %v18622_v18 = vand.u32 2147483647, %v13671_v33  ;;  %v1663_v21 = vclz %v11700_v44 }
 0x156   : > { %v1681_v55 = vsub.s32 4, %v1657_v10  ;;  %vm18625_vm0 = vcmask 1043456   ;;  %v3298_v15 = vsel %vm3292_vm8, %v3295_v50, %v3297_v8  ;;  %v3306_v31 = vsel %vm3292_vm8, %v3303_v0, %v3305_v46 }
 0x157   : > { %vm13978_vm12 = vcmp.le.f32.partialorder %v18622_v18, 0.7853982  ;;  %v13984_v52 = vsel %vm18625_vm0, %v13509_v53, %v758_v56  ;;  %v13989_v40 = vmul.u32.u64.low %v13918_v51, %v3302_v39  ;;  %v13990_v28 = vmul.u32.u64.high %v13918_v51, %v3302_v39, %v13989_v40  ;;  %vm18626_vm2 = vmmov %vm18625_vm0 }
 0x158   : > { %vm3147_vm14 = vcmp.eq.s32.totalorder %v13923_v23, 0  ;;  %v11701_v19 = vadd.s32 4294967294, %v1663_v21  ;;  %v13994_v30 = vmul.u32.u64.low %v13918_v51, %v3306_v31  ;;  %v13995_v59 = vmul.u32.u64.high %v13918_v51, %v3306_v31, %v13994_v30 }
 0x159   : > { %vm3150_vm15 = vcmp.eq.s32.totalorder %v13923_v23, 2  ;;  %v1651_v56 = vadd.s32 %v13884_v26, %v13896_v13  ;;  %v806_v4 = vrot.slane %v726_v47, 4  ;;  %v1286_v38 = vand.u32 2139095040, %v13984_v52 }
 0x15a   : > { %v1490_v50 = vsel %vm1479_vm1, nan, %v1489_v63  ;;  %vm11702_vm3 = vcmp.lt.s32.totalorder %v11701_v19, 0  ;;  %v1682_v8 = vsel %vm1597_vm4, %v1681_v55, %v1657_v10  ;;  %v3314_v29 = vmul.u32 %v13918_v51, %v3298_v15  ;;  %v14006_v44 = vpop.eup %12333 }
 0x15b   : > { %v1666_v45 = vsel %vm11702_vm3, 0, %v11701_v19  ;;  %v3317_v0 = vadd.s32 1, %v13990_v28  ;;  %v18475_v58 = vand.u32 2147483647, %v13984_v52  ;;  %v1287_v26 = vshrl.u32 %v1286_v38, 23  ;;  %v14010_v13 = vpop.eup %12335 }
 0x15c   : > { %v18472_v39 = vxor.u32 2147483648, %v14006_v44  ;;  %v1667_v46 = vsub.s32 32, %v1666_v45  ;;  %v1668_v47 = vshll.u32 %v13946_v48, %v1666_v45  ;;  %v1671_v63 = vsub.s32 4294967266, %v1666_v45 }
 0x15d   : > { %v18473_v10 = vxor.u32 2147483648, %v14010_v13  ;;  %vm3316_vm13 = vc.u32 %v13995_v59, %v13989_v40  ;;  %v14018_v51 = vsel %vm18626_vm2, %v13921_v6, %v806_v4  ;;  %v11687_v18 = vadd.s32 4294967169, %v1287_v26 }
 0x15e   : > { %v3152_v21 = vsel %vm3150_vm15, %v18472_v39, %v14010_v13  ;;  %v1669_v55 = vshrl.u32 %v1651_v56, %v1667_v46  ;;  %v1672_v15 = vadd.s32 127, %v1671_v63  ;;  %v3318_v48 = vsel %vm3316_vm13, %v3317_v0, %v13990_v28 }
 0x15f   : > { %v3149_v31 = vsel %vm3147_vm14, %v14006_v44, %v18473_v10  ;;  %v14033_v6 = vsel %vm13978_vm12, 0, %v1682_v8  ;;  %v3319_v19 = vadd.s32 %v3318_v48, %v3314_v29  ;;  %v1293_v30 = vadd.s32 1, %v11687_v18 }
 0x160   : > { %v3153_v4 = vsel %vm3146_vm6, %v3149_v31, %v3152_v21  ;;  %v1670_v38 = vor.u32 %v1669_v55, %v1668_v47  ;;  %v1673_v56 = vshll.u32 %v1672_v15, 23  ;;  %v1290_v28 = vand.u32 8388607, %v18475_v58 }
 0x161   : > { %v3154_v45 = vsel %vm3143_vm9, nan, %v3153_v4  ;;  %v3320_v0 = vadd.s32 536870912, %v3319_v19  ;;  %vm1294_vm5 = vcmp.gt.s32.totalorder %v1293_v30, 0  ;;  %v2950_v26 = vand.u32 2139095040, %v14018_v51 }
 0x162   : > { %v14042_v46 = vpack.c.bf16 %v3154_v45, %v1490_v50  ;;  %v1674_v8 = vor.u32 4788187, %v1673_v56  ;;  %v1677_v29 = vcvt.s32.f32 %v1670_v38  ;;  %v1295_v63 = vsel %vm1294_vm5, %v1293_v30, 0 }
 0x163   : > { %v3321_v18 = vshrl.u32 %v3320_v0, 30  ;;  %v1297_v23 = vand.u32 31, %v1295_v63  ;;  %v14046_v21 = vadd.s32 3, %v14033_v6  ;;  %vm3261_vm7 = vcmp.lt.s32.totalorder %v13783_v20, 0 }
 0x164   : > { %18627 = vst [vmem:[#allocation16_spill] sm:$0xff] %v14042_v46  ;;  %7822 = vmatprep.subr.bf16.mxu0 %v14042_v46  ;;  %v1675_v47 = vand.u32 2147483647, %v1674_v8  ;;  %v14051_v15 = vadd.s32 %v13989_v40, %v13995_v59  ;;  %v1291_v48 = vor.u32 8388608, %v1290_v28  ;;  %v1296_v30 = vshrl.u32 %v1295_v63, 5 }
 0x165   : > { %v3322_v50 = vshll.u32 %v3321_v18, 30  ;;  %v1298_v31 = vsub.s32 32, %v1297_v23  ;;  %v1300_v38 = vshll.u32 %v18601_v3, %v1297_v23  ;;  %v2951_v56 = vshrl.u32 %v2950_v26, 23 }
 0x166   : > { %v1678_v4 = vmul.f32 %v1677_v29, %v1675_v47  ;;  %v1303_v8 = vshll.u32 %v18602_v16, %v1297_v23  ;;  %v1306_v39 = vshll.u32 %v18603_v9, %v1297_v23  ;;  %v18628_v40 = vand.u32 2147483647, %v13783_v20 }
 0x167   : > { %v14054_v45 = vsub.s32 %v3319_v19, %v3322_v50  ;;  %v1301_v0 = vshrl.u32 %v18602_v16, %v1298_v31  ;;  %v1304_v28 = vshrl.u32 %v18603_v9, %v1298_v31  ;;  %v1307_v29 = vshrl.u32 %v18604_v22, %v1298_v31 }
 0x168   : > { %v1679_v10 = vxor.u32 2147483648, %v1678_v4  ;;  %vm14061_vm10 = vcmp.le.f32.partialorder %v18628_v40, 0.7853982  ;;  %v1309_v19 = vshll.u32 %v18604_v22, %v1297_v23  ;;  %v3345_v63 = vsub.s32 4, %v3321_v18 }
 0x169   : > { %v3325_v26 = vsub.s32 0, %v14054_v45  ;;  %v1310_v47 = vshrl.u32 %v18482_v7, %v1298_v31  ;;  %v14070_v50 = vshll.u32 %v1291_v48, 8  ;;  %v1299_v40 = vshrl.u32 %v18601_v3, %v1298_v31 }
 0x16a   : > { %v1680_v35 = vsel %vm1597_vm4, %v1679_v10, %v1678_v4  ;;  %v1312_v58 = vshll.u32 %v18482_v7, %v1297_v23  ;;  %v11751_v55 = vadd.s32 4294967169, %v2951_v56  ;;  %v1302_v49 = vor.u32 %v1301_v0, %v1300_v38 }
 0x16b   : > { %v1683_v17 = vsel %vm13978_vm12, %v13671_v33, %v1680_v35  ;;  %v11764_v24 = vmin.u32 %v3325_v26, %v14054_v45  ;;  %v1305_v54 = vor.u32 %v1304_v28, %v1303_v8  ;;  %v1308_v46 = vor.u32 %v1307_v29, %v1306_v39 }
 0x16c   : > { %v1311_v43 = vor.u32 %v1310_v47, %v1309_v19  ;;  %v1313_v48 = vshrl.u32 %v18617_v34, %v1298_v31  ;;  %vm1315_vm8 = vcmp.lt.s32.totalorder %v1296_v30, 1  ;;  %12337 = vcosq.f32 %v1683_v17 }
 0x16d   : > { %v3327_v10 = vclz %v11764_v24  ;;  %v3346_v4 = vsel %vm3261_vm7, %v3345_v63, %v3321_v18  ;;  %v18631_v23 = vand.u32 2147483647, %v14018_v51  ;;  %vm1316_vm4 = vcmp.lt.s32.totalorder %v1296_v30, 2 }
 0x16e   : > { %v1314_v7 = vor.u32 %v1313_v48, %v1312_v58  ;;  %vm1317_vm6 = vcmp.lt.s32.totalorder %v1296_v30, 3  ;;  %vm1318_vm12 = vcmp.lt.s32.totalorder %v1296_v30, 4  ;;  %v1319_v12 = vsel %vm1315_vm8, %v1299_v40, %v1302_v49 }
 0x16f   : > { %v2954_v56 = vand.u32 8388607, %v18631_v23  ;;  %v11765_v35 = vadd.s32 4294967294, %v3327_v10  ;;  %v1320_v38 = vsel %vm1318_vm12, %v1308_v46, 2102212464  ;;  %v1323_v39 = vsel %vm1315_vm8, %v1302_v49, %v1305_v54 }
 0x170   : > { %v1321_v0 = vsel %vm1317_vm6, %v1305_v54, %v1320_v38  ;;  %v1324_v8 = vsel %vm1318_vm12, %v1311_v43, 920167782  ;;  %v1327_v31 = vsel %vm1315_vm8, %v1305_v54, %v1308_v46  ;;  %v1328_v28 = vsel %vm1318_vm12, %v1314_v7, 1326507024 }
 0x171   : > { %vm11766_vm0 = vcmp.lt.s32.totalorder %v11765_v35, 0  ;;  %v14087_v24 = vsel %vm14061_vm10, 0, %v3346_v4  ;;  %v1325_v18 = vsel %vm1317_vm6, %v1308_v46, %v1324_v8  ;;  %v1329_v29 = vsel %vm1317_vm6, %v1311_v43, %v1328_v28 }
 0x172   : > { %12339 = vsinq.f32 %v1683_v17  ;;  %v3330_v58 = vsel %vm11766_vm0, 0, %v11765_v35  ;;  %v1326_v19 = vsel %vm1316_vm4, %v1323_v39, %v1325_v18  ;;  %v1330_v26 = vsel %vm1316_vm4, %v1327_v31, %v1329_v29 }
 0x173   : > { %v3331_v63 = vsub.s32 32, %v3330_v58  ;;  %v3332_v49 = vshll.u32 %v14054_v45, %v3330_v58  ;;  %v3335_v47 = vsub.s32 4294967266, %v3330_v58  ;;  %v1322_v54 = vsel %vm1316_vm4, %v1319_v12, %v1321_v0  ;;  %v12272_v45 = vld [vmem:[%s18440_s3 + $0x10] sm:$0xff]  }
 0x174   : > { %v14094_v7 = vmul.u32.u64.low %v14070_v50, %v1330_v26  ;;  %v14095_v40 = vmul.u32.u64.high %v14070_v50, %v1330_v26, %v14094_v7  ;;  %v14098_v48 = vmul.u32.u64.low %v14070_v50, %v1326_v19  ;;  %v14099_v46 = vmul.u32.u64.high %v14070_v50, %v1326_v19, %v14098_v48  ;;  %11934 = vmatmul.mubr.msk.bf16.gmra.mrb[8].mxu0 %vm18496_vm11, %v12272_v45  ;;  %11939 = vmatmul.mubr.msk.bf16.gmra.mrb[8].mxu1 %vm18496_vm11, %v12272_v45 }
 0x175   : > { %v3333_v43 = vshrl.u32 %v14051_v15, %v3331_v63  ;;  %v3336_v17 = vadd.s32 127, %v3335_v47  ;;  %v2957_v10 = vadd.s32 1, %v11751_v55  ;;  %v14107_v30 = vand.u32 3, %v14046_v21  ;;  %7738 = vmatprep.mubr.bf16.mxu0 %v18616_v37  ;;  %7811 = vmatprep.mubr.bf16.mxu1 %v18616_v37 }
 0x176   : > { %v3352_v4 = vadd.s32 3, %v14087_v24  ;;  %v1338_v23 = vmul.u32 %v14070_v50, %v1322_v54  ;;  %v14111_v35 = vpop.eup %12337  ;;  %v2955_v39 = vor.u32 8388608, %v2954_v56  ;;  %vm1340_vm15 = vc.u32 %v14095_v40, %v14098_v48 }
 0x177   : > { %v3334_v12 = vor.u32 %v3333_v43, %v3332_v49  ;;  %v3337_v38 = vshll.u32 %v3336_v17, 23  ;;  %vm2958_vm14 = vcmp.gt.s32.totalorder %v2957_v10, 0  ;;  %v1341_v21 = vadd.s32 1, %v14099_v46  ;;  %v12273_v43 = vld [vmem:[%s18440_s3 + $0x18] sm:$0xff]  }
 0x178   : > { %v2959_v50 = vsel %vm2958_vm14, %v2957_v10, 0  ;;  %vm1694_vm3 = vcmp.eq.s32.totalorder %v14107_v30, 2  ;;  %v14123_v8 = vmul.f32 2.0, %v13512_v14  ;;  %vm1691_vm13 = vcmp.eq.s32.totalorder %v14107_v30, 0 }
 0x179   : > { %v3338_v55 = vor.u32 4788187, %v3337_v38  ;;  %v3341_v15 = vcvt.s32.f32 %v3334_v12  ;;  %v1342_v56 = vsel %vm1340_vm15, %v1341_v21, %v14099_v46  ;;  %v2961_v0 = vand.u32 31, %v2959_v50 }
 0x17a   : > { %v14126_v28 = vand.u32 3, %v3352_v4  ;;  %v1343_v18 = vadd.s32 %v1342_v56, %v1338_v23  ;;  %v14128_v29 = vshll.u32 %v2955_v39, 8  ;;  %v14133_v26 = vshrl.u32 %v2959_v50, 5 }
 0x17b   : > { %v3339_v31 = vand.u32 2147483647, %v3338_v55  ;;  %v2962_v63 = vsub.s32 32, %v2961_v0  ;;  %v2964_v49 = vshll.u32 %v18601_v3, %v2961_v0  ;;  %v2967_v7 = vshll.u32 %v18602_v16, %v2961_v0 }
 0x17c   : > { %v14130_v58 = vpop.eup %12339  ;;  %v1344_v54 = vadd.s32 536870912, %v1343_v18  ;;  %v2970_v46 = vshll.u32 %v18603_v9, %v2961_v0  ;;  %vm1690_vm2 = vcmp.lt.s32.totalorder %v14107_v30, 2  ;;  %v2973_v4 = vshll.u32 %v18604_v22, %v2961_v0  ;;  %11935 = vmatmul.mubr.msk.bf16.gmra.mrb[12].mxu0 %vm18496_vm11, %v12273_v43  ;;  %11940 = vmatmul.mubr.msk.bf16.gmra.mrb[12].mxu1 %vm18496_vm11, %v12273_v43 }
 0x17d   : > { %v3342_v47 = vmul.f32 %v3341_v15, %v3339_v31  ;;  %v2965_v17 = vshrl.u32 %v18602_v16, %v2962_v63  ;;  %v2968_v10 = vshrl.u32 %v18603_v9, %v2962_v63  ;;  %v2971_v45 = vshrl.u32 %v18604_v22, %v2962_v63  ;;  %7854 = vmatprep.mubr.bf16.mxu0 %v18616_v37 }
 0x17e   : > { %v1345_v12 = vshrl.u32 %v1344_v54, 30  ;;  %v18632_v38 = vmov 920167782   ;;  %vm1285_vm5 = vcmp.lt.s32.totalorder %v13984_v52, 0  ;;  %v2963_v15 = vshrl.u32 %v18601_v3, %v2962_v63  ;;  %7927 = vmatprep.mubr.bf16.mxu1 %v18616_v37 }
 0x17f   : > { %v3343_v23 = vxor.u32 2147483648, %v3342_v47  ;;  %v2974_v39 = vshrl.u32 %v18632_v38, %v2962_v63  ;;  %v2976_v21 = vshll.u32 %v18632_v38, %v2961_v0  ;;  %v2977_v50 = vshrl.u32 %v18617_v34, %v2962_v63 }
 0x180   : > { %v760_v56 = vrot.slane %v14123_v8, 4  ;;  %v1346_v0 = vshll.u32 %v1345_v12, 30  ;;  %v2966_v54 = vor.u32 %v2965_v17, %v2964_v49  ;;  %v2969_v19 = vor.u32 %v2968_v10, %v2967_v7 }
 0x181   : > { %v3344_v31 = vsel %vm3261_vm7, %v3343_v23, %v3342_v47  ;;  %vm18497_vm8 = vweird.f32 %v13671_v33  ;;  %v2975_v55 = vor.u32 %v2974_v39, %v2973_v4  ;;  %v2978_v63 = vor.u32 %v2977_v50, %v2976_v21  ;;  %v7547_v4 = vld [vmem:[%s18441_s4] sm:$0xff] }
 0x182   : > { %v3347_v43 = vsel %vm14061_vm10, %v13783_v20, %v3344_v31  ;;  %vm2979_vm4 = vcmp.lt.s32.totalorder %v14133_v26, 1  ;;  %v18633_v8 = vxor.u32 2147483648, %v14111_v35  ;;  %v14169_v49 = vsub.s32 %v1343_v18, %v1346_v0  ;;  %7557 = vperm.xlu0 %12264, %v7547_v4   ;;  %v7548_v4 = vld [vmem:[%s18441_s4 + $0x8] sm:$0xff] }
 0x183   : > { %12341 = vcosq.f32 %v3347_v43  ;;  %v2972_v7 = vor.u32 %v2971_v45, %v2970_v46  ;;  %v18634_v17 = vand.u32 2147483647, %v13984_v52  ;;  %v1369_v10 = vsub.s32 4, %v1345_v12 }
 0x184   : > { %v1696_v47 = vsel %vm1694_vm3, %v18633_v8, %v14130_v58  ;;  %12343 = vsinq.f32 %v3347_v43  ;;  %vm2981_vm10 = vcmp.lt.s32.totalorder %v14133_v26, 3  ;;  %vm2982_vm6 = vcmp.lt.s32.totalorder %v14133_v26, 4 }
 0x185   : > { %vm14173_vm7 = vcmp.le.f32.partialorder %v18634_v17, 0.7853982  ;;  %v1349_v18 = vsub.s32 0, %v14169_v49  ;;  %vm2980_vm12 = vcmp.lt.s32.totalorder %v14133_v26, 2  ;;  %v2984_v46 = vsel %vm2982_vm6, %v2972_v7, 2102212464 }
 0x186   : > { %v2987_v45 = vsel %vm2979_vm4, %v2966_v54, %v2969_v19  ;;  %v18637_v23 = vxor.u32 2147483648, %v14130_v58  ;;  %v2983_v21 = vsel %vm2979_vm4, %v2963_v15, %v2966_v54  ;;  %v2988_v50 = vsel %vm2982_vm6, %v2975_v55, 920167782  ;;  %7562 = vperm.xlu0 %12264, %v7548_v4  }
 0x187   : > { %v2992_v31 = vsel %vm2982_vm6, %v2978_v63, 1326507024  ;;  %v11688_v0 = vmin.u32 %v1349_v18, %v14169_v49  ;;  %v2985_v43 = vsel %vm2981_vm10, %v2969_v19, %v2984_v46  ;;  %v2989_v8 = vsel %vm2981_vm10, %v2972_v7, %v2988_v50 }
 0x188   : > { %v1693_v39 = vsel %vm1691_vm13, %v14111_v35, %v18637_v23  ;;  %v2991_v17 = vsel %vm2979_vm4, %v2969_v19, %v2972_v7  ;;  %vm3351_vm0 = vweird.f32 %v13783_v20  ;;  %vm3354_vm14 = vcmp.lt.s32.totalorder %v14126_v28, 2  ;;  %v7549_v19 = vld [vmem:[%s18441_s4 + $0x10] sm:$0xff] }
 0x189   : > { %v2990_v15 = vsel %vm2980_vm12, %v2987_v45, %v2989_v8  ;;  %v2993_v54 = vsel %vm2981_vm10, %v2975_v55, %v2992_v31  ;;  %v712_v63 = vmul.f32 4.0, %v13512_v14  ;;  %v1697_v7 = vsel %vm1690_vm2, %v1693_v39, %v1696_v47  ;;  %7567 = vperm.xlu1 %12265, %v7549_v19  }
 0x18a   : > { %v1351_v18 = vclz %v11688_v0  ;;  %v1370_v46 = vsel %vm1285_vm5, %v1369_v10, %v1345_v12  ;;  %vm18638_vm15 = vcmask 1043456   ;;  %v2986_v55 = vsel %vm2980_vm12, %v2983_v21, %v2985_v43  ;;  %v7551_v12 = vld [vmem:[%s18441_s4 + $0x20] sm:$0xff] }
 0x18b   : > { %v14219_v23 = vsel %vm18638_vm15, %v13512_v14, %v760_v56  ;;  %v2994_v45 = vsel %vm2980_vm12, %v2991_v17, %v2993_v54  ;;  %v14226_v50 = vmul.u32.u64.low %v14128_v29, %v2990_v15  ;;  %v14227_v30 = vmul.u32.u64.high %v14128_v29, %v2990_v15, %v14226_v50  ;;  %7577 = vperm.xlu0 %12264, %v7551_v12   ;;  %vm18641_vm6 = vmmov %vm18638_vm15 }
 0x18c   : > { %vm3355_vm3 = vcmp.eq.s32.totalorder %v14126_v28, 0  ;;  %v11689_v56 = vadd.s32 4294967294, %v1351_v18  ;;  %v14234_v47 = vmul.u32.u64.low %v14128_v29, %v2994_v45  ;;  %v14235_v10 = vmul.u32.u64.high %v14128_v29, %v2994_v45, %v14234_v47 }
 0x18d   : > { %vm3358_vm13 = vcmp.eq.s32.totalorder %v14126_v28, 2  ;;  %v1339_v26 = vadd.s32 %v14098_v48, %v14095_v40  ;;  %v728_v39 = vmul.f32 8.0, %v13512_v14  ;;  %v1494_v21 = vand.u32 2139095040, %v14219_v23  ;;  %v14242_v31 = vpop.eup %12341 }
 0x18e   : > { %v1698_v0 = vsel %vm18497_vm8, nan, %v1697_v7  ;;  %vm11690_vm2 = vcmp.lt.s32.totalorder %v11689_v56, 0  ;;  %v14248_v43 = vsel %vm14173_vm7, 0, %v1370_v46  ;;  %v3002_v8 = vmul.u32 %v14128_v29, %v2986_v55  ;;  %v14251_v17 = vpop.eup %12343 }
 0x18f   : > { %v18484_v40 = vxor.u32 2147483648, %v14242_v31  ;;  %v1354_v48 = vsel %vm11690_vm2, 0, %v11689_v56  ;;  %v3005_v4 = vadd.s32 1, %v14227_v30  ;;  %v1495_v15 = vshrl.u32 %v1494_v21, 23 }
 0x190   : > { %v18488_v54 = vxor.u32 2147483648, %v14251_v17  ;;  %v1355_v19 = vsub.s32 32, %v1354_v48  ;;  %v1356_v7 = vshll.u32 %v14169_v49, %v1354_v48  ;;  %v1359_v18 = vsub.s32 4294967266, %v1354_v48 }
 0x191   : > { %v3360_v29 = vsel %vm3358_vm13, %v18484_v40, %v14251_v17  ;;  %vm3004_vm4 = vc.u32 %v14235_v10, %v14226_v50  ;;  %v11695_v55 = vadd.s32 4294967169, %v1495_v15  ;;  %v808_v48 = vrot.slane %v728_v39, 4 }
 0x192   : > { %v3357_v45 = vsel %vm3355_vm3, %v14242_v31, %v18488_v54  ;;  %v1357_v12 = vshrl.u32 %v1339_v26, %v1355_v19  ;;  %v1360_v49 = vadd.s32 127, %v1359_v18  ;;  %v3006_v56 = vsel %vm3004_vm4, %v3005_v4, %v14227_v30 }
 0x193   : > { %v3361_v47 = vsel %vm3354_vm14, %v3357_v45, %v3360_v29  ;;  %v3007_v21 = vadd.s32 %v3006_v56, %v3002_v8  ;;  %v1501_v40 = vadd.s32 1, %v11695_v55  ;;  %v1376_v1 = vadd.s32 3, %v14248_v43 }
 0x194   : > { %v3362_v46 = vsel %vm3351_vm0, nan, %v3361_v47  ;;  %v1358_v15 = vor.u32 %v1357_v12, %v1356_v7  ;;  %v1361_v57 = vshll.u32 %v1360_v49, 23  ;;  %v18640_v26 = vand.u32 2147483647, %v14219_v23 }
 0x195   : > { %v14275_v25 = vpack.c.bf16 %v3362_v46, %v1698_v0  ;;  %v3008_v54 = vadd.s32 536870912, %v3007_v21  ;;  %vm1502_vm10 = vcmp.gt.s32.totalorder %v1501_v40, 0  ;;  %v14281_v8 = vsel %vm18641_vm6, %v712_v63, %v808_v48 }
 0x196   : > { %v1498_v19 = vand.u32 8388607, %v18640_v26  ;;  %v1362_v30 = vor.u32 4788187, %v1361_v57  ;;  %v1365_v28 = vcvt.s32.f32 %v1358_v15  ;;  %v1503_v4 = vsel %vm1502_vm10, %v1501_v40, 0 }
 0x197   : > { %18639 = vst [vmem:[#allocation17_spill] sm:$0xff] %v14275_v25  ;;  %7895 = vmatprep.subr.bf16.mxu1 %v14275_v25  ;;  %v3009_v39 = vshrl.u32 %v3008_v54, 30  ;;  %v1505_v7 = vand.u32 31, %v1503_v4  ;;  %v14283_v29 = vand.u32 3, %v1376_v1  ;;  %vm2949_vm12 = vcmp.lt.s32.totalorder %v14018_v51, 0 }
 0x198   : > { %v1363_v18 = vand.u32 2147483647, %v1362_v30  ;;  %v14288_v46 = vadd.s32 %v14226_v50, %v14235_v10  ;;  %v1499_v55 = vor.u32 8388608, %v1498_v19  ;;  %v1504_v12 = vshrl.u32 %v1503_v4, 5 }
 0x199   : > { %v3010_v57 = vshll.u32 %v3009_v39, 30  ;;  %v1506_v40 = vsub.s32 32, %v1505_v7  ;;  %v1508_v54 = vshll.u32 %v18601_v3, %v1505_v7  ;;  %v3158_v63 = vand.u32 2139095040, %v14281_v8 }
 0x19a   : > { %v1366_v45 = vmul.f32 %v1365_v28, %v1363_v18  ;;  %v1511_v56 = vshll.u32 %v18602_v16, %v1505_v7  ;;  %v1514_v47 = vshll.u32 %v18603_v9, %v1505_v7  ;;  %v18642_v50 = vand.u32 2147483647, %v14018_v51 }
 0x19b   : > { %v14292_v49 = vsub.s32 %v3007_v21, %v3010_v57  ;;  %v1509_v1 = vshrl.u32 %v18602_v16, %v1506_v40  ;;  %v1512_v15 = vshrl.u32 %v18603_v9, %v1506_v40  ;;  %v1515_v26 = vshrl.u32 %v18604_v22, %v1506_v40 }
 0x19c   : > { %v1367_v48 = vxor.u32 2147483648, %v1366_v45  ;;  %vm14299_vm14 = vcmp.le.f32.partialorder %v18642_v50, 0.7853982  ;;  %v1517_v21 = vshll.u32 %v18604_v22, %v1505_v7  ;;  %v3033_v30 = vsub.s32 4, %v3009_v39 }
 0x19d   : > { %v3013_v19 = vsub.s32 0, %v14292_v49  ;;  %v1518_v28 = vshrl.u32 %v18632_v38, %v1506_v40  ;;  %v14308_v4 = vshll.u32 %v1499_v55, 8  ;;  %v1507_v57 = vshrl.u32 %v18601_v3, %v1506_v40 }
 0x19e   : > { %v1368_v18 = vsel %vm1285_vm5, %v1367_v48, %v1366_v45  ;;  %v1520_v50 = vshll.u32 %v18632_v38, %v1505_v7  ;;  %v3159_v0 = vshrl.u32 %v3158_v63, 23  ;;  %v1510_v36 = vor.u32 %v1509_v1, %v1508_v54 }
 0x19f   : > { %v1371_v25 = vsel %vm14173_vm7, %v13984_v52, %v1368_v18  ;;  %v11752_v42 = vmin.u32 %v3013_v19, %v14292_v49  ;;  %v1513_v14 = vor.u32 %v1512_v15, %v1511_v56  ;;  %v1516_v11 = vor.u32 %v1515_v26, %v1514_v47 }
 0x1a0   : > { %v1519_v37 = vor.u32 %v1518_v28, %v1517_v21  ;;  %v1521_v55 = vshrl.u32 %v18617_v34, %v1506_v40  ;;  %vm1523_vm15 = vcmp.lt.s32.totalorder %v1504_v12, 1  ;;  %12345 = vcosq.f32 %v1371_v25 }
 0x1a1   : > { %v3015_v45 = vclz %v11752_v42  ;;  %v3034_v48 = vsel %vm2949_vm12, %v3033_v30, %v3009_v39  ;;  %vm1524_vm5 = vcmp.lt.s32.totalorder %v1504_v12, 2  ;;  %12347 = vsinq.f32 %v1371_v25 }
 0x1a2   : > { %v1522_v7 = vor.u32 %v1521_v55, %v1520_v50  ;;  %vm1525_vm3 = vcmp.lt.s32.totalorder %v1504_v12, 3  ;;  %vm1526_vm13 = vcmp.lt.s32.totalorder %v1504_v12, 4  ;;  %v1527_v63 = vsel %vm1523_vm15, %v1507_v57, %v1510_v36 }
 0x1a3   : > { %v11753_v59 = vadd.s32 4294967294, %v3015_v45  ;;  %v1528_v19 = vsel %vm1526_vm13, %v1516_v11, 2102212464  ;;  %v1531_v54 = vsel %vm1523_vm15, %v1510_v36, %v1513_v14  ;;  %v1532_v56 = vsel %vm1526_vm13, %v1519_v37, 920167782 }
 0x1a4   : > { %v1529_v1 = vsel %vm1525_vm3, %v1513_v14, %v1528_v19  ;;  %v1535_v47 = vsel %vm1523_vm15, %v1513_v14, %v1516_v11  ;;  %v1536_v15 = vsel %vm1526_vm13, %v1522_v7, 1326507024  ;;  %v14323_v42 = vsel %vm14299_vm14, 0, %v3034_v48 }
 0x1a5   : > { %vm11754_vm7 = vcmp.lt.s32.totalorder %v11753_v59, 0  ;;  %v1533_v40 = vsel %vm1525_vm3, %v1516_v11, %v1532_v56  ;;  %v1537_v39 = vsel %vm1525_vm3, %v1519_v37, %v1536_v15  ;;  %v1530_v25 = vsel %vm1524_vm5, %v1527_v63, %v1529_v1 }
 0x1a6   : > { %v3018_v26 = vsel %vm11754_vm7, 0, %v11753_v59  ;;  %v1534_v21 = vsel %vm1524_vm5, %v1531_v54, %v1533_v40  ;;  %v1538_v30 = vsel %vm1524_vm5, %v1535_v47, %v1537_v39  ;;  %v11759_v14 = vadd.s32 4294967169, %v3159_v0 }
 0x1a7   : > { %v3019_v28 = vsub.s32 32, %v3018_v26  ;;  %v3020_v36 = vshll.u32 %v14292_v49, %v3018_v26  ;;  %v3023_v18 = vsub.s32 4294967266, %v3018_v26  ;;  %v3040_v12 = vadd.s32 3, %v14323_v42 }
 0x1a8   : > { %v14330_v57 = vmul.u32.u64.low %v14308_v4, %v1538_v30  ;;  %v14331_v50 = vmul.u32.u64.high %v14308_v4, %v1538_v30, %v14330_v57  ;;  %v14334_v55 = vmul.u32.u64.low %v14308_v4, %v1534_v21  ;;  %v14335_v11 = vmul.u32.u64.high %v14308_v4, %v1534_v21, %v14334_v55 }
 0x1a9   : > { %v3021_v37 = vshrl.u32 %v14288_v46, %v3019_v28  ;;  %v3024_v45 = vadd.s32 127, %v3023_v18  ;;  %v3165_v48 = vadd.s32 1, %v11759_v14  ;;  %v18645_v7 = vand.u32 2147483647, %v14281_v8 }
 0x1aa   : > { %v14342_v59 = vpop.eup %12345  ;;  %v1546_v19 = vmul.u32 %v14308_v4, %v1530_v25  ;;  %vm1379_vm4 = vcmp.eq.s32.totalorder %v14283_v29, 0  ;;  %vm1548_vm10 = vc.u32 %v14331_v50, %v14334_v55  ;;  %v1549_v46 = vadd.s32 1, %v14335_v11 }
 0x1ab   : > { %v3162_v49 = vand.u32 8388607, %v18645_v7  ;;  %v3022_v0 = vor.u32 %v3021_v37, %v3020_v36  ;;  %v3025_v63 = vshll.u32 %v3024_v45, 23  ;;  %vm3166_vm2 = vcmp.gt.s32.totalorder %v3165_v48, 0  ;;  %v14345_v54 = vpop.eup %12347 }
 0x1ac   : > { %vm1382_vm6 = vcmp.eq.s32.totalorder %v14283_v29, 2  ;;  %v3167_v47 = vsel %vm3166_vm2, %v3165_v48, 0  ;;  %v14352_v15 = vand.u32 3, %v3040_v12  ;;  %v1550_v40 = vsel %vm1548_vm10, %v1549_v46, %v14335_v11 }
 0x1ad   : > { %v3026_v1 = vor.u32 4788187, %v3025_v63  ;;  %v3029_v56 = vcvt.s32.f32 %v3022_v0  ;;  %v3169_v4 = vand.u32 31, %v3167_v47  ;;  %v14356_v39 = vand.u32 3, %v13821_v2 }
 0x1ae   : > { %v1383_v26 = vxor.u32 2147483648, %v14342_v59  ;;  %v1551_v21 = vadd.s32 %v1550_v40, %v1546_v19  ;;  %v3163_v30 = vor.u32 8388608, %v3162_v49  ;;  %v14360_v36 = vshrl.u32 %v3167_v47, 5 }
 0x1af   : > { %v3027_v25 = vand.u32 2147483647, %v3026_v1  ;;  %v3170_v18 = vsub.s32 32, %v3169_v4  ;;  %v3172_v14 = vshll.u32 %v18601_v3, %v3169_v4  ;;  %vm1378_vm15 = vcmp.lt.s32.totalorder %v14283_v29, 2 }
 0x1b0   : > { %v1552_v11 = vadd.s32 536870912, %v1551_v21  ;;  %v3175_v37 = vshll.u32 %v18602_v16, %v3169_v4  ;;  %v3178_v2 = vshll.u32 %v18603_v9, %v3169_v4  ;;  %v3181_v7 = vshll.u32 %v18604_v22, %v3169_v4 }
 0x1b1   : > { %v3030_v57 = vmul.f32 %v3029_v56, %v3027_v25  ;;  %v3173_v45 = vshrl.u32 %v18602_v16, %v3170_v18  ;;  %v3176_v48 = vshrl.u32 %v18603_v9, %v3170_v18  ;;  %v3179_v12 = vshrl.u32 %v18604_v22, %v3170_v18 }
 0x1b2   : > { %v14370_v0 = vshrl.u32 %v1552_v11, 30  ;;  %v3182_v63 = vshrl.u32 %v18632_v38, %v3170_v18  ;;  %v3184_v19 = vshll.u32 %v18632_v38, %v3169_v4  ;;  %vm1375_vm5 = vweird.f32 %v13984_v52 }
 0x1b3   : > { %v3031_v49 = vxor.u32 2147483648, %v3030_v57  ;;  %v1384_v46 = vsel %vm1382_vm6, %v1383_v26, %v14345_v54  ;;  %v3171_v1 = vshrl.u32 %v18601_v3, %v3170_v18  ;;  %v3185_v56 = vshrl.u32 %v18617_v34, %v3170_v18 }
 0x1b4   : > { %vm4805_vm3 = vcmp.eq.s32.totalorder %v14356_v39, 0  ;;  %v1554_v40 = vshll.u32 %v14370_v0, 30  ;;  %v3174_v4 = vor.u32 %v3173_v45, %v3172_v14  ;;  %v3177_v25 = vor.u32 %v3176_v48, %v3175_v37 }
 0x1b5   : > { %v3032_v47 = vsel %vm2949_vm12, %v3031_v49, %v3030_v57  ;;  %v3183_v28 = vor.u32 %v3182_v63, %v3181_v7  ;;  %v3186_v38 = vor.u32 %v3185_v56, %v3184_v19  ;;  %vm3187_vm13 = vcmp.lt.s32.totalorder %v14360_v36, 1 }
 0x1b6   : > { %v3035_v11 = vsel %vm14299_vm14, %v14018_v51, %v3032_v47  ;;  %vm4804_vm7 = vcmp.lt.s32.totalorder %v14356_v39, 2  ;;  %v18646_v18 = vxor.u32 2147483648, %v14345_v54  ;;  %v14396_v49 = vsub.s32 %v1551_v21, %v1554_v40 }
 0x1b7   : > { %12349 = vcosq.f32 %v3035_v11  ;;  %v3180_v14 = vor.u32 %v3179_v12, %v3178_v2  ;;  %vm3189_vm12 = vcmp.lt.s32.totalorder %v14360_v36, 3  ;;  %vm3190_vm14 = vcmp.lt.s32.totalorder %v14360_v36, 4 }
 0x1b8   : > { %v1381_v57 = vsel %vm1379_vm4, %v14342_v59, %v18646_v18  ;;  %12351 = vsinq.f32 %v3035_v11  ;;  %v3203_v10 = vshll.u32 %v3163_v30, 8  ;;  %vm3046_vm2 = vcmp.eq.s32.totalorder %v14352_v15, 2 }
 0x1b9   : > { %v1557_v37 = vsub.s32 0, %v14396_v49  ;;  %vm3188_vm10 = vcmp.lt.s32.totalorder %v14360_v36, 2  ;;  %v3192_v45 = vsel %vm3190_vm14, %v3180_v14, 2102212464  ;;  %v3195_v48 = vsel %vm3187_vm13, %v3174_v4, %v3177_v25 }
 0x1ba   : > { %vm3043_vm4 = vcmp.eq.s32.totalorder %v14352_v15, 0  ;;  %v3191_v21 = vsel %vm3187_vm13, %v3171_v1, %v3174_v4  ;;  %v3193_v2 = vsel %vm3189_vm12, %v3177_v25, %v3192_v45  ;;  %v3196_v12 = vsel %vm3190_vm14, %v3183_v28, 920167782 }
 0x1bb   : > { %v3200_v30 = vsel %vm3190_vm14, %v3186_v38, 1326507024  ;;  %vm3042_vm6 = vcmp.lt.s32.totalorder %v14352_v15, 2  ;;  %v11696_v7 = vmin.u32 %v1557_v37, %v14396_v49  ;;  %v3197_v63 = vsel %vm3189_vm12, %v3180_v14, %v3196_v12 }
 0x1bc   : > { %v3199_v19 = vsel %vm3187_vm13, %v3177_v25, %v3180_v14  ;;  %vm4808_vm11 = vcmp.eq.s32.totalorder %v14356_v39, 2  ;;  %v1385_v1 = vsel %vm1378_vm15, %v1381_v57, %v1384_v46  ;;  %vm3039_vm8 = vweird.f32 %v14018_v51  ;;  %v18682_v51 = vld [vmem:[#allocation9_spill] sm:$0xff] }
 0x1bd   : > { %v3198_v38 = vsel %vm3188_vm10, %v3195_v48, %v3197_v63  ;;  %v3201_v56 = vsel %vm3189_vm12, %v3183_v28, %v3200_v30  ;;  %v6451_v47 = vand.u32 3, %v13892_v62  ;;  %v1547_v40 = vadd.s32 %v14334_v55, %v14331_v50 }
 0x1be   : > { %v1559_v4 = vclz %v11696_v7  ;;  %v3194_v25 = vsel %vm3188_vm10, %v3191_v21, %v3193_v2  ;;  %v18647_v29 = vxor.u32 2147483648, %v13915_v61  ;;  %v3202_v11 = vsel %vm3188_vm10, %v3199_v19, %v3201_v56 }
 0x1bf   : > { %v14436_v18 = vmul.u32.u64.low %v3203_v10, %v3198_v38  ;;  %v14437_v28 = vmul.u32.u64.high %v3203_v10, %v3198_v38, %v14436_v18  ;;  %v18648_v62 = vxor.u32 2147483648, %v13911_v41  ;;  %v1386_v55 = vsel %vm1375_vm5, nan, %v1385_v1 }
 0x1c0   : > { %v4807_v46 = vsel %vm4805_vm3, %v13911_v41, %v18647_v29  ;;  %v11697_v57 = vadd.s32 4294967294, %v1559_v4  ;;  %v14445_v14 = vmul.u32.u64.low %v3203_v10, %v3202_v11  ;;  %v14446_v37 = vmul.u32.u64.high %v3203_v10, %v3202_v11, %v14445_v14 }
 0x1c1   : > { %v4810_v50 = vsel %vm4808_vm11, %v18648_v62, %v13915_v61  ;;  %v3210_v45 = vmul.u32 %v3203_v10, %v3194_v25  ;;  %vm6452_vm15 = vcmp.lt.s32.totalorder %v6451_v47, 2  ;;  %vm6453_vm3 = vcmp.eq.s32.totalorder %v6451_v47, 0  ;;  %v14448_v36 = vpop.eup %12349 }
 0x1c2   : > { %vm6456_vm13 = vcmp.eq.s32.totalorder %v6451_v47, 2  ;;  %vm11698_vm12 = vcmp.lt.s32.totalorder %v11697_v57, 0  ;;  %v4811_v48 = vsel %vm4804_vm7, %v4807_v46, %v4810_v50  ;;  %v18649_v41 = vxor.u32 2147483648, %v14010_v13  ;;  %v14458_v12 = vpop.eup %12351 }
 0x1c3   : > { %v18650_v21 = vxor.u32 2147483648, %v14006_v44  ;;  %v3047_v10 = vxor.u32 2147483648, %v14448_v36  ;;  %v1562_v30 = vsel %vm11698_vm12, 0, %v11697_v57  ;;  %v3213_v7 = vadd.s32 1, %v14437_v28 }
 0x1c4   : > { %v6455_v61 = vsel %vm6453_vm3, %v14006_v44, %v18649_v41  ;;  %v3044_v19 = vxor.u32 2147483648, %v14458_v12  ;;  %v1563_v39 = vsub.s32 32, %v1562_v30  ;;  %v1564_v1 = vshll.u32 %v14396_v49, %v1562_v30 }
 0x1c5   : > { %v6458_v2 = vsel %vm6456_vm13, %v18650_v21, %v14010_v13  ;;  %v1567_v38 = vsub.s32 4294967266, %v1562_v30  ;;  %v3048_v44 = vsel %vm3046_vm2, %v3047_v10, %v14458_v12  ;;  %vm3212_vm11 = vc.u32 %v14446_v37, %v14436_v18 }
 0x1c6   : > { %v6459_v63 = vsel %vm6452_vm15, %v6455_v61, %v6458_v2  ;;  %v4812_v13 = vsel %vm1479_vm1, nan, %v4811_v48  ;;  %v3045_v49 = vsel %vm3043_vm4, %v14448_v36, %v3044_v19  ;;  %v1565_v47 = vshrl.u32 %v1547_v40, %v1563_v39 }
 0x1c7   : > { %v6460_v56 = vsel %vm3143_vm9, nan, %v6459_v63  ;;  %v1568_v4 = vadd.s32 127, %v1567_v38  ;;  %v3214_v25 = vsel %vm3212_vm11, %v3213_v7, %v14437_v28  ;;  %v3049_v29 = vsel %vm3042_vm6, %v3045_v49, %v3048_v44  ;;  %v491_v49 = vld [vmem:[%s12671_s14 + $0x10] sm:$0xff] }
 0x1c8   : > { %v3215_v46 = vadd.s32 %v3214_v25, %v3210_v45  ;;  %v3050_v32 = vsel %vm3039_vm8, nan, %v3049_v29  ;;  %v1566_v11 = vor.u32 %v1565_v47, %v1564_v1  ;;  %v14485_v62 = vpack.c.bf16 %v6460_v56, %v4812_v13  ;;  %v495_v47 = vld [vmem:[%s12676_s17 + $0x10] sm:$0xff] }
 0x1c9   : > { %v1569_v27 = vshll.u32 %v1568_v4, 23  ;;  %v14487_v50 = vpack.c.bf16 %v3050_v32, %v1386_v55  ;;  %v6657_v40 = vand.u32 3, %v14087_v24  ;;  %vm1493_vm1 = vcmp.lt.s32.totalorder %v14219_v23, 0 }
 0x1ca   : > { %18651 = vst [vmem:[#allocation18_spill] sm:$0xff] %v14485_v62  ;;  %v3216_v57 = vadd.s32 536870912, %v3215_v46  ;;  %v1573_v48 = vcvt.s32.f32 %v1566_v11  ;;  %v4700_v28 = vand.u32 3, %v14248_v43  ;;  %v18653_v45 = vand.u32 2147483647, %v14219_v23 }
 0x1cb   : > { %18652 = vst [vmem:[#allocation19_spill] sm:$0xff] %v14487_v50  ;;  %v1570_v14 = vor.u32 4788187, %v1569_v27  ;;  %7823 = vmatpush1.bf16.msra.mxu0 %v14487_v50  ;;  %vm6658_vm7 = vcmp.lt.s32.totalorder %v6657_v40, 2  ;;  %vm6659_vm14 = vcmp.eq.s32.totalorder %v6657_v40, 0  ;;  %v1577_v24 = vsub.s32 4, %v14370_v0 }
 0x1cc   : > { %v14492_v15 = vshrl.u32 %v3216_v57, 30  ;;  %vm14497_vm9 = vcmp.le.f32.partialorder %v18653_v45, 0.7853982  ;;  %7824 = vmatprep.subr.bf16.mxu0 %v14485_v62  ;;  %v18656_v21 = vxor.u32 2147483648, %v14251_v17  ;;  %vm6662_vm2 = vcmp.eq.s32.totalorder %v6657_v40, 2 }
 0x1cd   : > { %v1571_v55 = vand.u32 2147483647, %v1570_v14  ;;  %v18657_v30 = vxor.u32 2147483648, %v14242_v31  ;;  %vm4702_vm10 = vcmp.eq.s32.totalorder %v4700_v28, 0  ;;  %v6348_v63 = vand.u32 3, %v14323_v42 }
 0x1ce   : > { %v3218_v61 = vshll.u32 %v14492_v15, 30  ;;  %v6661_v2 = vsel %vm6659_vm14, %v14242_v31, %v18656_v21  ;;  %v5009_v1 = vand.u32 3, %v14033_v6  ;;  %vm4701_vm4 = vcmp.lt.s32.totalorder %v4700_v28, 2 }
 0x1cf   : > { %v1574_v43 = vmul.f32 %v1573_v48, %v1571_v55  ;;  %v6664_v7 = vsel %vm6662_vm2, %v18657_v30, %v14251_v17  ;;  %v18658_v56 = vxor.u32 2147483648, %v14345_v54  ;;  %vm4705_vm6 = vcmp.eq.s32.totalorder %v4700_v28, 2 }
 0x1d0   : > { %v14511_v39 = vsub.s32 %v3215_v46, %v3218_v61  ;;  %v6665_v38 = vsel %vm6658_vm7, %v6661_v2, %v6664_v7  ;;  %v4707_v42 = vsel %vm4705_vm6, %v1383_v26, %v14345_v54  ;;  %v1578_v20 = vsel %vm1493_vm1, %v1577_v24, %v14370_v0 }
 0x1d1   : > { %v1575_v44 = vxor.u32 2147483648, %v1574_v43  ;;  %v14516_v13 = vsel %vm3351_vm0, nan, %v6665_v38  ;;  %v4704_v31 = vsel %vm4702_vm10, %v14342_v59, %v18658_v56  ;;  %vm6350_vm0 = vcmp.eq.s32.totalorder %v6348_v63, 0 }
 0x1d2   : > { %v3221_v17 = vsub.s32 0, %v14511_v39  ;;  %v542_v4 = vrot.slane %v491_v49, %v12666_v5  ;;  %vm5011_vm15 = vcmp.eq.s32.totalorder %v5009_v1, 0  ;;  %v4708_v59 = vsel %vm4701_vm4, %v4704_v31, %v4707_v42 }
 0x1d3   : > { %v1576_v6 = vsel %vm1493_vm1, %v1575_v44, %v1574_v43  ;;  %vm5014_vm3 = vcmp.eq.s32.totalorder %v5009_v1, 2  ;;  %vm6349_vm13 = vcmp.lt.s32.totalorder %v6348_v63, 2  ;;  %v6352_v54 = vsel %vm6350_vm0, %v14448_v36, %v3044_v19 }
 0x1d4   : > { %v1579_v25 = vsel %vm14497_vm9, %v14219_v23, %v1576_v6  ;;  %v11760_v29 = vmin.u32 %v3221_v17, %v14511_v39  ;;  %vm6353_vm12 = vcmp.eq.s32.totalorder %v6348_v63, 2  ;;  %v1580_v26 = vsel %vm14497_vm9, 0, %v1578_v20 }
 0x1d5   : > { %vm5010_vm11 = vcmp.lt.s32.totalorder %v5009_v1, 2  ;;  %v623_v46 = vcombine.low %v495_v47, %v495_v47  ;;  %12353 = vcosq.f32 %v1579_v25  ;;  %v3241_v32 = vsub.s32 4, %v14492_v15 }
 0x1d6   : > { %v3223_v0 = vclz %v11760_v29  ;;  %v4709_v11 = vsel %vm1375_vm5, nan, %v4708_v59  ;;  %v6355_v27 = vsel %vm6353_vm12, %v3047_v10, %v14458_v12  ;;  %v18659_v19 = vxor.u32 2147483648, %v14130_v58 }
 0x1d7   : > { %v18660_v48 = vxor.u32 2147483648, %v14111_v35  ;;  %v6356_v28 = vsel %vm6349_vm13, %v6352_v54, %v6355_v27  ;;  %12355 = vsinq.f32 %v1579_v25  ;;  %v14559_v52 = vpack.c.bf16 %v13518_v60, %v13518_v60 }
 0x1d8   : > { %v11761_v57 = vadd.s32 4294967294, %v3223_v0  ;;  %v5013_v14 = vsel %vm5011_vm15, %v14111_v35, %v18659_v19  ;;  %v6357_v45 = vsel %vm3039_vm8, nan, %v6356_v28  ;;  %v7527_v36 = vpack.c.bf16 %v13509_v53, %v13509_v53 }
 0x1d9   : > { %v5016_v40 = vsel %vm5014_vm3, %v18660_v48, %v14130_v58  ;;  %18661 = vst [vmem:[#allocation20_spill] sm:$0xff] %v14559_v52  ;;  %vm3157_vm5 = vcmp.lt.s32.totalorder %v14281_v8, 0  ;;  %v3211_v12 = vadd.s32 %v14436_v18, %v14446_v37  ;;  %v14566_v35 = vpack.c.bf16 %v6357_v45, %v4709_v11 }
 0x1da   : > { %vm11762_vm1 = vcmp.lt.s32.totalorder %v11761_v57, 0  ;;  %v1584_v58 = vadd.s32 3, %v1580_v26  ;;  %v18663_v10 = vand.u32 2147483647, %v14281_v8  ;;  %v3242_v53 = vsel %vm3157_vm5, %v3241_v32, %v14492_v15 }
 0x1db   : > { %18662 = vst [vmem:[#allocation21_spill] sm:$0xff] %v14566_v35  ;;  %v3226_v60 = vsel %vm11762_vm1, 0, %v11761_v57  ;;  %v5017_v18 = vsel %vm5010_vm11, %v5013_v14, %v5016_v40  ;;  %7825 = vmatpush1.bf16.msra.mxu0 %v14566_v35  ;;  %vm18666_vm8 = vcmask 1041408   ;;  %v550_v61 = vcombine.high %v542_v4, %v542_v4 }
 0x1dc   : > { %vm14570_vm9 = vcmp.le.f32.partialorder %v18663_v10, 0.7853982  ;;  %v3227_v41 = vsub.s32 32, %v3226_v60  ;;  %v3228_v55 = vshll.u32 %v14511_v39, %v3226_v60  ;;  %v3231_v24 = vsub.s32 4294967266, %v3226_v60  ;;  %11941 = vmatprep.subr.msk.bf16.mxu0 %vm18666_vm8, %v14559_v52  ;;  %vm18667_vm7 = vmmov %vm18666_vm8 }
 0x1dd   : > { %v14583_v37 = vsel %vm18667_vm7, %v7527_v36, 0  ;;  %v630_v21 = vrot.slane %v623_v46, %v12666_v5  ;;  %v535_v2 = vcombine.high %v491_v49, %v491_v49  ;;  %v3244_v30 = vsel %vm14570_vm9, 0, %v3242_v53  ;;  %vm18669_vm14 = vmmov %vm18667_vm7 }
 0x1de   : > { %18668 = vst [vmem:[#allocation22_spill] sm:$0xff] %v14583_v37  ;;  %v3229_v43 = vshrl.u32 %v3211_v12, %v3227_v41  ;;  %v3232_v15 = vadd.s32 127, %v3231_v24  ;;  %v14589_v7 = vrot.slane %v495_v47, %v12666_v5  ;;  %v14591_v63 = vand.u32 3, %v1584_v58  ;;  %vm18671_vm10 = vmmov %vm18667_vm7 }
 0x1df   : > { %v638_v39 = vcombine.high %v630_v21, %v630_v21  ;;  %v14594_v1 = vrot.slane %v535_v2, %v12666_v5  ;;  %v14597_v38 = vsel %vm18669_vm14, %v542_v4, %v630_v21  ;;  %7827 = vmatpush1.bf16.msra.mxu0 %v14583_v37  ;;  %v12354_v31 = vpop.eup %12353  ;;  %v3248_v17 = vadd.s32 3, %v3244_v30  ;;  %vm18675_vm12 = vmmov %vm18667_vm7 }
 0x1e0   : > { %v3230_v44 = vor.u32 %v3229_v43, %v3228_v55  ;;  %v3233_v56 = vshll.u32 %v3232_v15, 23  ;;  %vm18670_vm2 = vweird.f32 %v13671_v33  ;;  %v4906_v49 = vand.u32 3, %v1580_v26  ;;  %v14615_v33 = vld [vmem:[%s18440_s3] sm:$0xff]   ;;  %v14661_v43 = vld [vmem:[%s18440_s3 + $0x8] sm:$0xff]  }
 0x1e1   : > { %v5018_v42 = vsel %vm18670_vm2, nan, %v5017_v18  ;;  %v14603_v6 = vsel %vm18671_vm10, %v550_v61, %v638_v39  ;;  %v551_v25 = vcombine.high %v14594_v1, %v14594_v1  ;;  %v639_v4 = vcombine.high %v14589_v7, %v14589_v7  ;;  %v12356_v29 = vpop.eup %12355  ;;  %v18680_v39 = vld [vmem:[#allocation11_spill] sm:$0xff] }
 0x1e2   : > { %v3234_v20 = vor.u32 4788187, %v3233_v56  ;;  %v3237_v47 = vcvt.s32.f32 %v3230_v44  ;;  %vm1586_vm4 = vcmp.lt.s32.totalorder %v14591_v63, 2  ;;  %vm1587_vm6 = vcmp.eq.s32.totalorder %v14591_v63, 0 }
 0x1e3   : > { %vm1590_vm0 = vcmp.eq.s32.totalorder %v14591_v63, 2  ;;  %vm18672_vm15 = vcmask 293888   ;;  %v699_v59 = vmul.f32 2.0, %v14603_v6  ;;  %v1591_v54 = vxor.u32 2147483648, %v12354_v31 }
 0x1e4   : > { %11942 = vmatmul.mubr.msk.bf16.vlgmr.msra.gmra.mrb[16].mxu0 %vm18672_vm15, %v14615_v33  ;;  %v3235_v26 = vand.u32 2147483647, %v3234_v20  ;;  %v18673_v0 = vmov 0   ;;  %v715_v46 = vmul.f32 4.0, %v14603_v6  ;;  %v731_v32 = vmul.f32 8.0, %v14603_v6  ;;  %vm18679_vm14 = vmmov %vm18672_vm15 }
 0x1e5   : > { %7864 = vmatprep.mubr.bf16.mxu0 %v18673_v0  ;;  %vm1583_vm3 = vweird.f32 %v14219_v23  ;;  %v14624_v11 = vand.u32 3, %v3248_v17  ;;  %v14627_v27 = vpack.c.bf16 %v14516_v13, %v5018_v42  ;;  %vm4911_vm13 = vcmp.eq.s32.totalorder %v4906_v49, 2 }
 0x1e6   : > { %v763_v57 = vrot.slane %v699_v59, 4  ;;  %v1588_v19 = vxor.u32 2147483648, %v12356_v29  ;;  %v3238_v14 = vmul.f32 %v3237_v47, %v3235_v26  ;;  %v811_v48 = vrot.slane %v731_v32, 4 }
 0x1e7   : > { %18674 = vst [vmem:[#allocation23_spill] sm:$0xff] %v14627_v27  ;;  %v14630_v40 = vsel %vm18675_vm12, %v551_v25, %v639_v4  ;;  %vm4907_vm11 = vcmp.lt.s32.totalorder %v4906_v49, 2  ;;  %vm4908_vm1 = vcmp.eq.s32.totalorder %v4906_v49, 0  ;;  %v14632_v28 = vand.u32 3, %v3244_v30 }
 0x1e8   : > { %18676 = vst [vmem:[#allocation24_spill] sm:$0xff] %v14630_v40  ;;  %vm18677_vm8 = vcmask 1043456   ;;  %v1592_v13 = vsel %vm1590_vm0, %v1591_v54, %v12356_v29  ;;  %v3239_v36 = vxor.u32 2147483648, %v3238_v14  ;;  %v4913_v10 = vsel %vm4911_vm13, %v1591_v54, %v12356_v29  ;;  %vm18683_vm0 = vmmov %vm18675_vm12 }
 0x1e9   : > { %v14636_v45 = vsel %vm18677_vm8, %v14603_v6, %v763_v57  ;;  %vm18678_vm7 = vmmov %vm18677_vm8  ;;  %v701_v41 = vmul.f32 2.0, %v14630_v40  ;;  %v1589_v55 = vsel %vm1587_vm6, %v12354_v31, %v1588_v19  ;;  %v4910_v2 = vsel %vm4908_vm1, %v12354_v31, %v1588_v19 }
 0x1ea   : > { %v14641_v12 = vsel %vm18678_vm7, %v715_v46, %v811_v48  ;;  %v18499_v58 = vand.u32 2147483647, %v14636_v45  ;;  %v1806_v60 = vand.u32 2139095040, %v14636_v45  ;;  %v3240_v24 = vsel %vm3157_vm5, %v3239_v36, %v3238_v14  ;;  %vm18685_vm12 = vmmov %vm18678_vm7 }
 0x1eb   : > { %v18498_v53 = vand.u32 2147483647, %v14641_v12  ;;  %v3470_v61 = vand.u32 2139095040, %v14641_v12  ;;  %v3243_v21 = vsel %vm14570_vm9, %v14281_v8, %v3240_v24  ;;  %v14669_v44 = vpack.c.bf16 %v18680_v39, %v18680_v39 }
 0x1ec   : > { %v1810_v18 = vand.u32 8388607, %v18499_v58  ;;  %11943 = vmatmul.mubr.msk.bf16.gmra.mrb[20].mxu0 %vm18679_vm14, %v14661_v43  ;;  %v1807_v15 = vshrl.u32 %v1806_v60, 23  ;;  %12357 = vcosq.f32 %v3243_v21  ;;  %v7529_v56 = vpack.c.bf16 %v18682_v51, %v18682_v51 }
 0x1ed   : > { %v3474_v30 = vand.u32 8388607, %v18498_v53  ;;  %18681 = vst [vmem:[#allocation11_spill] sm:$0xff] %v14669_v44  ;;  %v3471_v31 = vshrl.u32 %v3470_v61, 23  ;;  %7874 = vmatprep.mubr.bf16.mxu0 %v18673_v0  ;;  %v1593_v17 = vsel %vm1586_vm4, %v1589_v55, %v1592_v13  ;;  %12359 = vsinq.f32 %v3243_v21 }
 0x1ee   : > { %v11707_v42 = vadd.s32 4294967169, %v1807_v15  ;;  %v765_v20 = vrot.slane %v701_v41, 4  ;;  %vm3254_vm5 = vcmp.eq.s32.totalorder %v14624_v11, 2  ;;  %v4914_v47 = vsel %vm4907_vm11, %v4910_v2, %v4913_v10  ;;  %v14716_v41 = vld [vmem:[%s18440_s3 + $0x10] sm:$0xff]  }
 0x1ef   : > { %v1811_v25 = vor.u32 8388608, %v1810_v18  ;;  %v11771_v4 = vadd.s32 4294967169, %v3471_v31  ;;  %v14679_v29 = vmul.f32 8.0, %v14630_v40  ;;  %vm3251_vm9 = vcmp.eq.s32.totalorder %v14624_v11, 0 }
 0x1f0   : > { %vm6556_vm2 = vcmp.eq.s32.totalorder %v14632_v28, 0  ;;  %vm6559_vm10 = vcmp.eq.s32.totalorder %v14632_v28, 2  ;;  %v1813_v63 = vadd.s32 1, %v11707_v42  ;;  %v3475_v59 = vor.u32 8388608, %v3474_v30 }
 0x1f1   : > { %v14686_v54 = vsel %vm1583_vm3, nan, %v1593_v17  ;;  %vm3250_vm4 = vcmp.lt.s32.totalorder %v14624_v11, 2  ;;  %vm6555_vm6 = vcmp.lt.s32.totalorder %v14632_v28, 2  ;;  %v14691_v49 = vsel %vm18683_vm0, %v7529_v56, 0 }
 0x1f2   : > { %18684 = vst [vmem:[#allocation9_spill] sm:$0xff] %v14691_v49  ;;  %v3477_v26 = vadd.s32 1, %v11771_v4  ;;  %v14694_v46 = vmul.f32 2.0, %v14597_v38  ;;  %vm3247_vm15 = vweird.f32 %v14281_v8  ;;  %v4915_v32 = vsel %vm1583_vm3, nan, %v4914_v47  ;;  %vm18686_vm3 = vmmov %vm18679_vm14 }
 0x1f3   : > { %vm1814_vm13 = vcmp.gt.s32.totalorder %v1813_v63, 0  ;;  %v14700_v57 = vmul.f32 4.0, %v14630_v40  ;;  %v14704_v19 = vsel %vm18685_vm12, %v14630_v40, %v765_v20  ;;  %v14706_v48 = vshll.u32 %v1811_v25, 8  ;;  %vm18688_vm14 = vmmov %vm18686_vm3 }
 0x1f4   : > { %v1815_v14 = vsel %vm1814_vm13, %v1813_v63, 0  ;;  %vm3478_vm11 = vcmp.gt.s32.totalorder %v3477_v26, 0  ;;  %v14711_v23 = vshll.u32 %v3475_v59, 8  ;;  %11944 = vmatmul.mubr.msk.bf16.gmra.mrb[24].mxu0 %vm18686_vm3, %v14716_v41  ;;  %v18687_v56 = vmov 920167782   ;;  %vm18695_vm13 = vmmov %vm18685_vm12 }
 0x1f5   : > { %v14709_v36 = vshrl.u32 %v1815_v14, 5  ;;  %v1817_v10 = vand.u32 31, %v1815_v14  ;;  %v3479_v60 = vsel %vm3478_vm11, %v3477_v26, 0  ;;  %7884 = vmatprep.mubr.bf16.mxu0 %v18673_v0  ;;  %vm1805_vm12 = vcmp.lt.s32.totalorder %v14636_v45, 0 }
 0x1f6   : > { %v14720_v55 = vshrl.u32 %v3479_v60, 5  ;;  %v14722_v24 = vand.u32 31, %v3479_v60  ;;  %v12358_v39 = vpop.eup %12357 }
 0x1f7   : > { %v1818_v21 = vsub.s32 32, %v1817_v10  ;;  %v1820_v2 = vshll.u32 %v18601_v3, %v1817_v10  ;;  %v1823_v15 = vshll.u32 %v18602_v16, %v1817_v10  ;;  %v1826_v30 = vshll.u32 %v18603_v9, %v1817_v10  ;;  %v12360_v17 = vpop.eup %12359 }
 0x1f8   : > { %v1829_v51 = vshll.u32 %v18604_v22, %v1817_v10  ;;  %v1832_v31 = vshll.u32 %v18687_v56, %v1817_v10  ;;  %vm1835_vm1 = vcmp.lt.s32.totalorder %v14709_v36, 1  ;;  %vm1836_vm8 = vcmp.lt.s32.totalorder %v14709_v36, 2 }
 0x1f9   : > { %v3255_v42 = vxor.u32 2147483648, %v12358_v39  ;;  %v1819_v20 = vshrl.u32 %v18601_v3, %v1818_v21  ;;  %v1821_v47 = vshrl.u32 %v18602_v16, %v1818_v21  ;;  %v1824_v25 = vshrl.u32 %v18603_v9, %v1818_v21 }
 0x1fa   : > { %v3252_v4 = vxor.u32 2147483648, %v12360_v17  ;;  %v1827_v63 = vshrl.u32 %v18604_v22, %v1818_v21  ;;  %v1830_v59 = vshrl.u32 %v18687_v56, %v1818_v21  ;;  %v1833_v26 = vshrl.u32 %v18617_v34, %v1818_v21 }
 0x1fb   : > { %v3256_v14 = vsel %vm3254_vm5, %v3255_v42, %v12360_v17  ;;  %v6561_v10 = vsel %vm6559_vm10, %v3255_v42, %v12360_v17  ;;  %v1822_v60 = vor.u32 %v1821_v47, %v1820_v2  ;;  %v1825_v53 = vor.u32 %v1824_v25, %v1823_v15  ;;  %v14756_v2 = vld [vmem:[%s18440_s3 + $0x18] sm:$0xff]  }
 0x1fc   : > { %v3253_v58 = vsel %vm3251_vm9, %v12358_v39, %v3252_v4  ;;  %v6558_v18 = vsel %vm6556_vm2, %v12358_v39, %v3252_v4  ;;  %v1828_v13 = vor.u32 %v1827_v63, %v1826_v30  ;;  %v1831_v61 = vor.u32 %v1830_v59, %v1829_v51  ;;  %11945 = vmatmul.mubr.msk.bf16.gmra.mrb[28].mxu0 %vm18688_vm14, %v14756_v2  ;;  %vm18691_vm9 = vmmov %vm18683_vm0 }
 0x1fd   : > { %v3257_v37 = vsel %vm3250_vm4, %v3253_v58, %v3256_v14  ;;  %v6562_v21 = vsel %vm6555_vm6, %v6558_v18, %v6561_v10  ;;  %v1834_v52 = vor.u32 %v1833_v26, %v1832_v31  ;;  %vm1837_vm7 = vcmp.lt.s32.totalorder %v14709_v36, 3  ;;  %8000 = vmatprep.mubr.bf16.mxu0 %v18673_v0 }
 0x1fe   : > { %v3258_v15 = vsel %vm3247_vm15, nan, %v3257_v37  ;;  %v6563_v11 = vsel %vm3247_vm15, nan, %v6562_v21  ;;  %vm1838_vm5 = vcmp.lt.s32.totalorder %v14709_v36, 4  ;;  %v1839_v28 = vsel %vm1835_vm1, %v1819_v20, %v1822_v60  ;;  %vm18693_vm15 = vmmov %vm18686_vm3 }
 0x1ff   : > { %v14769_v58 = vpack.c.bf16 %v3258_v15, %v14686_v54  ;;  %v14771_v18 = vpack.c.bf16 %v6563_v11, %v4915_v32  ;;  %v1840_v30 = vsel %vm1838_vm5, %v1828_v13, 2102212464  ;;  %v1843_v39 = vsel %vm1835_vm1, %v1822_v60, %v1825_v53 }
 0x200   : > { %v1841_v8 = vsel %vm1837_vm7, %v1825_v53, %v1840_v30  ;;  %v1844_v37 = vsel %vm1838_vm5, %v1831_v61, 920167782  ;;  %v1847_v51 = vsel %vm1835_vm1, %v1825_v53, %v1828_v13  ;;  %v1848_v31 = vsel %vm1838_vm5, %v1834_v52, 1326507024  ;;  %vm18697_vm1 = vmmov %vm18688_vm14 }
 0x201   : > { %18689 = vst [vmem:[#allocation25_spill] sm:$0xff] %v14769_v58  ;;  %18690 = vst [vmem:[#allocation26_spill] sm:$0xff] %v14771_v18  ;;  %7896 = vmatpush1.bf16.msra.mxu1 %v14769_v58  ;;  %v1842_v54 = vsel %vm1836_vm8, %v1839_v28, %v1841_v8  ;;  %v1845_v32 = vsel %vm1837_vm7, %v1828_v13, %v1844_v37  ;;  %v1849_v17 = vsel %vm1837_vm7, %v1831_v61, %v1848_v31 }
 0x202   : > { %v3482_v42 = vsub.s32 32, %v14722_v24  ;;  %7897 = vmatprep.subr.bf16.mxu1 %v14627_v27  ;;  %v1846_v20 = vsel %vm1836_vm8, %v1843_v39, %v1845_v32  ;;  %v1850_v52 = vsel %vm1836_vm8, %v1847_v51, %v1849_v17  ;;  %v1858_v53 = vmul.u32 %v14706_v48, %v1842_v54  ;;  %vm18701_vm7 = vmmov %vm18695_vm13 }
 0x203   : > { %v3484_v47 = vshll.u32 %v18601_v3, %v14722_v24  ;;  %v14796_v13 = vmul.u32.u64.low %v14706_v48, %v1850_v52  ;;  %v14797_v25 = vmul.u32.u64.high %v14706_v48, %v1850_v52, %v14796_v13  ;;  %v3487_v36 = vshll.u32 %v18602_v16, %v14722_v24 }
 0x204   : > { %v14800_v61 = vmul.u32.u64.low %v14706_v48, %v1846_v20  ;;  %v14801_v4 = vmul.u32.u64.high %v14706_v48, %v1846_v20, %v14800_v61  ;;  %v3483_v63 = vshrl.u32 %v18601_v3, %v3482_v42  ;;  %v3485_v59 = vshrl.u32 %v18602_v16, %v3482_v42 }
 0x205   : > { %v3488_v26 = vshrl.u32 %v18603_v9, %v3482_v42  ;;  %7898 = vmatpush1.bf16.msra.mxu1 %v14771_v18  ;;  %v3490_v14 = vshll.u32 %v18603_v9, %v14722_v24  ;;  %v3491_v10 = vshrl.u32 %v18604_v22, %v3482_v42  ;;  %v3493_v48 = vshll.u32 %v18604_v22, %v14722_v24 }
 0x206   : > { %v3494_v60 = vshrl.u32 %v18687_v56, %v3482_v42  ;;  %11946 = vmatprep.subr.msk.bf16.mxu1 %vm18691_vm9, %v14669_v44  ;;  %v3486_v21 = vor.u32 %v3485_v59, %v3484_v47  ;;  %v3496_v11 = vshll.u32 %v18687_v56, %v14722_v24  ;;  %v3497_v28 = vshrl.u32 %v18617_v34, %v3482_v42  ;;  %vm18702_vm9 = vmmov %vm18697_vm1 }
 0x207   : > { %v3489_v15 = vor.u32 %v3488_v26, %v3487_v36  ;;  %vm1860_vm2 = vc.u32 %v14797_v25, %v14800_v61  ;;  %v1861_v30 = vadd.s32 1, %v14801_v4  ;;  %v3492_v39 = vor.u32 %v3491_v10, %v3490_v14 }
 0x208   : > { %v18692_v8 = vand.u32 2139095040, %v14704_v19  ;;  %v3495_v51 = vor.u32 %v3494_v60, %v3493_v48  ;;  %v3498_v31 = vor.u32 %v3497_v28, %v3496_v11  ;;  %vm3499_vm10 = vcmp.lt.s32.totalorder %v14720_v55, 1 }
 0x209   : > { %vm3500_vm4 = vcmp.lt.s32.totalorder %v14720_v55, 2  ;;  %7900 = vmatpush1.bf16.msra.mxu1 %v14691_v49  ;;  %v1862_v24 = vsel %vm1860_vm2, %v1861_v30, %v14801_v4  ;;  %vm3501_vm6 = vcmp.lt.s32.totalorder %v14720_v55, 3  ;;  %vm3502_vm0 = vcmp.lt.s32.totalorder %v14720_v55, 4 }
 0x20a   : > { %v2015_v37 = vshrl.u32 %v18692_v8, 23  ;;  %v3503_v54 = vsel %vm3499_vm10, %v3483_v63, %v3486_v21  ;;  %v1863_v32 = vadd.s32 %v1862_v24, %v1858_v53  ;;  %v3504_v17 = vsel %vm3502_vm0, %v3492_v39, 2102212464 }
 0x20b   : > { %v3507_v42 = vsel %vm3499_vm10, %v3486_v21, %v3489_v15  ;;  %v3508_v20 = vsel %vm3502_vm0, %v3495_v51, 920167782  ;;  %v3505_v52 = vsel %vm3501_vm6, %v3489_v15, %v3504_v17  ;;  %v3511_v13 = vsel %vm3499_vm10, %v3489_v15, %v3492_v39 }
 0x20c   : > { %v3509_v47 = vsel %vm3501_vm6, %v3492_v39, %v3508_v20  ;;  %v3512_v59 = vsel %vm3502_vm0, %v3498_v31, 1326507024  ;;  %11947 = vmatmul.mubr.msk.bf16.vlgmr.msra.gmra.mrb[16].mxu1 %vm18693_vm15, %v14615_v33  ;;  %v1864_v36 = vadd.s32 536870912, %v1863_v32  ;;  %v18694_v14 = vrot.slane %v14679_v29, 4  ;;  %vm18706_vm15 = vmmov %vm18697_vm1 }
 0x20d   : > { %v3510_v4 = vsel %vm3500_vm4, %v3507_v42, %v3509_v47  ;;  %v3513_v26 = vsel %vm3501_vm6, %v3495_v51, %v3512_v59  ;;  %7937 = vmatprep.mubr.bf16.mxu1 %v18673_v0  ;;  %v3506_v63 = vsel %vm3500_vm4, %v3503_v54, %v3505_v52  ;;  %v11715_v15 = vadd.s32 4294967169, %v2015_v37 }
 0x20e   : > { %v14840_v53 = vsel %vm18695_vm13, %v14700_v57, %v18694_v14  ;;  %v3514_v10 = vsel %vm3500_vm4, %v3511_v13, %v3513_v26  ;;  %v14848_v33 = vmul.u32.u64.low %v14711_v23, %v3510_v4  ;;  %v14849_v48 = vmul.u32.u64.high %v14711_v23, %v3510_v4, %v14848_v33 }
 0x20f   : > { %v1865_v60 = vshrl.u32 %v1864_v36, 30  ;;  %v14852_v21 = vmul.u32.u64.low %v14711_v23, %v3514_v10  ;;  %v14853_v29 = vmul.u32.u64.high %v14711_v23, %v3514_v10, %v14852_v21  ;;  %v18696_v57 = vand.u32 2147483647, %v14704_v19 }
 0x210   : > { %v18502_v28 = vand.u32 2147483647, %v14840_v53  ;;  %v3678_v30 = vand.u32 2139095040, %v14840_v53  ;;  %v3522_v8 = vmul.u32 %v14711_v23, %v3506_v63  ;;  %v2021_v51 = vadd.s32 1, %v11715_v15 }
 0x211   : > { %v2018_v11 = vand.u32 8388607, %v18696_v57  ;;  %v1866_v39 = vshll.u32 %v1865_v60, 30  ;;  %v1889_v55 = vsub.s32 4, %v1865_v60  ;;  %v3525_v31 = vadd.s32 1, %v14849_v48 }
 0x212   : > { %v3679_v24 = vshrl.u32 %v3678_v30, 23  ;;  %v14862_v54 = vmul.f32 8.0, %v14597_v38  ;;  %vm3524_vm11 = vc.u32 %v14853_v29, %v14848_v33  ;;  %v762_v17 = vrot.slane %v14694_v46, 4 }
 0x213   : > { %v14865_v37 = vsub.s32 %v1863_v32, %v1866_v39  ;;  %v1890_v42 = vsel %vm1805_vm12, %v1889_v55, %v1865_v60  ;;  %v3526_v23 = vsel %vm3524_vm11, %v3525_v31, %v14849_v48  ;;  %v2019_v20 = vor.u32 8388608, %v2018_v11 }
 0x214   : > { %vm2022_vm3 = vcmp.gt.s32.totalorder %v2021_v51, 0  ;;  %11948 = vmatmul.mubr.msk.bf16.gmra.mrb[20].mxu1 %vm18697_vm1, %v14661_v43  ;;  %v3527_v47 = vadd.s32 %v3526_v23, %v3522_v8  ;;  %v3682_v32 = vand.u32 8388607, %v18502_v28  ;;  %v18698_v59 = vand.u32 2147483647, %v14636_v45 }
 0x215   : > { %v1869_v52 = vsub.s32 0, %v14865_v37  ;;  %v2023_v13 = vsel %vm2022_vm3, %v2021_v51, 0  ;;  %v11779_v4 = vadd.s32 4294967169, %v3679_v24  ;;  %7947 = vmatprep.mubr.bf16.mxu1 %v18673_v0  ;;  %v14890_v63 = vmul.f32 4.0, %v14597_v38 }
 0x216   : > { %vm14879_vm8 = vcmp.le.f32.partialorder %v18698_v59, 0.7853982  ;;  %v2025_v36 = vand.u32 31, %v2023_v13  ;;  %v3528_v14 = vadd.s32 536870912, %v3527_v47  ;;  %v1859_v10 = vadd.s32 %v14800_v61, %v14797_v25 }
 0x217   : > { %v11708_v26 = vmin.u32 %v1869_v52, %v14865_v37  ;;  %v14887_v43 = vsel %vm14879_vm8, 0, %v1890_v42  ;;  %v14897_v21 = vsel %vm18701_vm7, %v14597_v38, %v762_v17  ;;  %v14900_v57 = vadd.s32 %v14848_v33, %v14853_v29 }
 0x218   : > { %v2026_v48 = vsub.s32 32, %v2025_v36  ;;  %v14902_v11 = vshll.u32 %v2019_v20, 8  ;;  %v3683_v30 = vor.u32 8388608, %v3682_v32  ;;  %v14905_v39 = vadd.s32 3, %v14887_v43 }
 0x219   : > { %v1871_v15 = vclz %v11708_v26  ;;  %v3529_v55 = vshrl.u32 %v3528_v14, 30  ;;  %v14907_v8 = vshrl.u32 %v2023_v13, 5  ;;  %v14909_v25 = vadd.s32 1, %v11779_v4 }
 0x21a   : > { %v2028_v51 = vshll.u32 %v18601_v3, %v2025_v36  ;;  %v2031_v31 = vshll.u32 %v18602_v16, %v2025_v36  ;;  %v2034_v24 = vshll.u32 %v18603_v9, %v2025_v36  ;;  %v2029_v29 = vshrl.u32 %v18602_v16, %v2026_v48 }
 0x21b   : > { %v11709_v61 = vadd.s32 4294967294, %v1871_v15  ;;  %v3530_v33 = vshll.u32 %v3529_v55, 30  ;;  %v2032_v17 = vshrl.u32 %v18603_v9, %v2026_v48  ;;  %v2035_v42 = vshrl.u32 %v18604_v22, %v2026_v48 }
 0x21c   : > { %vm3469_vm5 = vcmp.lt.s32.totalorder %v14641_v12, 0  ;;  %v2037_v23 = vshll.u32 %v18604_v22, %v2025_v36  ;;  %v2038_v20 = vshrl.u32 %v18687_v56, %v2026_v48  ;;  %v14920_v52 = vshll.u32 %v3683_v30, 8  ;;  %11949 = vmatmul.mubr.msk.bf16.gmra.mrb[24].mxu1 %vm18702_vm9, %v14716_v41 }
 0x21d   : > { %vm11710_vm14 = vcmp.lt.s32.totalorder %v11709_v61, 0  ;;  %v14924_v32 = vsub.s32 %v3527_v47, %v3530_v33  ;;  %v2040_v59 = vshll.u32 %v18687_v56, %v2025_v36  ;;  %v2041_v4 = vshrl.u32 %v18617_v34, %v2026_v48  ;;  %7957 = vmatprep.mubr.bf16.mxu1 %v18673_v0 }
 0x21e   : > { %v1874_v13 = vsel %vm11710_vm14, 0, %v11709_v61  ;;  %v2027_v28 = vshrl.u32 %v18601_v3, %v2026_v48  ;;  %v2030_v60 = vor.u32 %v2029_v29, %v2028_v51  ;;  %v2033_v49 = vor.u32 %v2032_v17, %v2031_v31 }
 0x21f   : > { %v1875_v26 = vsub.s32 32, %v1874_v13  ;;  %v1876_v14 = vshll.u32 %v14865_v37, %v1874_v13  ;;  %v1879_v15 = vsub.s32 4294967266, %v1874_v13  ;;  %v3533_v30 = vsub.s32 0, %v14924_v32 }
 0x220   : > { %v2036_v41 = vor.u32 %v2035_v42, %v2034_v24  ;;  %v2039_v33 = vor.u32 %v2038_v20, %v2037_v23  ;;  %vm2043_vm2 = vcmp.lt.s32.totalorder %v14907_v8, 1  ;;  %v18703_v36 = vand.u32 2147483647, %v14641_v12 }
 0x221   : > { %v1877_v61 = vshrl.u32 %v1859_v10, %v1875_v26  ;;  %v1880_v47 = vadd.s32 127, %v1879_v15  ;;  %v11772_v37 = vmin.u32 %v3533_v30, %v14924_v32  ;;  %v3553_v13 = vsub.s32 4, %v3529_v55 }
 0x222   : > { %vm14935_vm10 = vcmp.le.f32.partialorder %v18703_v36, 0.7853982  ;;  %v2042_v48 = vor.u32 %v2041_v4, %v2040_v59  ;;  %vm2046_vm4 = vcmp.lt.s32.totalorder %v14907_v8, 4  ;;  %vm2045_vm6 = vcmp.lt.s32.totalorder %v14907_v8, 3 }
 0x223   : > { %v1878_v51 = vor.u32 %v1877_v61, %v1876_v14  ;;  %v1881_v31 = vshll.u32 %v1880_v47, 23  ;;  %v2048_v10 = vsel %vm2046_vm4, %v2036_v41, 2102212464  ;;  %v3535_v24 = vclz %v11772_v37 }
 0x224   : > { %vm2044_vm0 = vcmp.lt.s32.totalorder %v14907_v8, 2  ;;  %v2047_v29 = vsel %vm2043_vm2, %v2027_v28, %v2030_v60  ;;  %v2051_v17 = vsel %vm2043_vm2, %v2030_v60, %v2033_v49  ;;  %v2049_v20 = vsel %vm2045_vm6, %v2033_v49, %v2048_v10  ;;  %11950 = vmatmul.mubr.msk.bf16.gmra.mrb[28].mxu1 %vm18706_vm15, %v14756_v2 }
 0x225   : > { %v1882_v42 = vor.u32 4788187, %v1881_v31  ;;  %v1885_v23 = vcvt.s32.f32 %v1878_v51  ;;  %v2052_v59 = vsel %vm2046_vm4, %v2039_v33, 920167782  ;;  %v11773_v4 = vadd.s32 4294967294, %v3535_v24  ;;  %8073 = vmatprep.mubr.bf16.mxu1 %v18673_v0 }
 0x226   : > { %v3554_v26 = vsel %vm3469_vm5, %v3553_v13, %v3529_v55  ;;  %v2053_v28 = vsel %vm2045_vm6, %v2036_v41, %v2052_v59  ;;  %v2055_v60 = vsel %vm2043_vm2, %v2033_v49, %v2036_v41  ;;  %v2050_v15 = vsel %vm2044_vm0, %v2047_v29, %v2049_v20 }
 0x227   : > { %v1883_v14 = vand.u32 2147483647, %v1882_v42  ;;  %v2054_v30 = vsel %vm2044_vm0, %v2051_v17, %v2053_v28  ;;  %v2056_v2 = vsel %vm2046_vm4, %v2042_v48, 1326507024  ;;  %vm11774_vm13 = vcmp.lt.s32.totalorder %v11773_v4, 0 }
 0x228   : > { %v2057_v55 = vsel %vm2045_vm6, %v2039_v33, %v2056_v2  ;;  %v14971_v61 = vmul.u32.u64.low %v14902_v11, %v2054_v30  ;;  %v14972_v47 = vmul.u32.u64.high %v14902_v11, %v2054_v30, %v14971_v61  ;;  %v3538_v41 = vsel %vm11774_vm13, 0, %v11773_v4 }
 0x229   : > { %v1886_v49 = vmul.f32 %v1885_v23, %v1883_v14  ;;  %v2058_v36 = vsel %vm2044_vm0, %v2055_v60, %v2057_v55  ;;  %vm3686_vm11 = vcmp.gt.s32.totalorder %v14909_v25, 0  ;;  %v3539_v37 = vsub.s32 32, %v3538_v41 }
 0x22a   : > { %v3540_v13 = vshll.u32 %v14924_v32, %v3538_v41  ;;  %v3543_v48 = vsub.s32 4294967266, %v3538_v41  ;;  %v3687_v51 = vsel %vm3686_vm11, %v14909_v25, 0  ;;  %v14982_v33 = vsel %vm14935_vm10, 0, %v3554_v26 }
 0x22b   : > { %v1887_v31 = vxor.u32 2147483648, %v1886_v49  ;;  %v14985_v10 = vmul.u32.u64.low %v14902_v11, %v2058_v36  ;;  %v14986_v24 = vmul.u32.u64.high %v14902_v11, %v2058_v36, %v14985_v10  ;;  %v3541_v8 = vshrl.u32 %v14900_v57, %v3539_v37 }
 0x22c   : > { %v3544_v29 = vadd.s32 127, %v3543_v48  ;;  %v2069_v17 = vadd.s32 1, %v14972_v47  ;;  %v3689_v42 = vand.u32 31, %v3687_v51  ;;  %v14993_v25 = vand.u32 3, %v14905_v39 }
 0x22d   : > { %v1888_v32 = vsel %vm1805_vm12, %v1887_v31, %v1886_v49  ;;  %v2066_v23 = vmul.u32 %v14902_v11, %v2050_v15  ;;  %v14996_v20 = vshrl.u32 %v3687_v51, 5  ;;  %v3542_v4 = vor.u32 %v3541_v8, %v3540_v13 }
 0x22e   : > { %v1891_v59 = vsel %vm14879_vm8, %v14636_v45, %v1888_v32  ;;  %v3545_v57 = vshll.u32 %v3544_v29, 23  ;;  %v3690_v26 = vsub.s32 32, %v3689_v42  ;;  %v3560_v28 = vadd.s32 3, %v14982_v33 }
 0x22f   : > { %12361 = vcosq.f32 %v1891_v59  ;;  %vm2068_vm12 = vc.u32 %v14986_v24, %v14971_v61  ;;  %v3692_v39 = vshll.u32 %v18601_v3, %v3689_v42  ;;  %v3549_v11 = vcvt.s32.f32 %v3542_v4 }
 0x230   : > { %12363 = vsinq.f32 %v1891_v59  ;;  %v3546_v60 = vor.u32 4788187, %v3545_v57  ;;  %v2070_v14 = vsel %vm2068_vm12, %v2069_v17, %v14972_v47  ;;  %v3693_v46 = vshrl.u32 %v18602_v16, %v3690_v26 }
 0x231   : > { %v2071_v15 = vadd.s32 %v2070_v14, %v2066_v23  ;;  %v3695_v30 = vshll.u32 %v18602_v16, %v3689_v42  ;;  %vm3707_vm3 = vcmp.lt.s32.totalorder %v14996_v20, 1  ;;  %v3696_v55 = vshrl.u32 %v18603_v9, %v3690_v26 }
 0x232   : > { %v3547_v2 = vand.u32 2147483647, %v3546_v60  ;;  %v3698_v49 = vshll.u32 %v18603_v9, %v3689_v42  ;;  %v3699_v41 = vshrl.u32 %v18604_v22, %v3690_v26  ;;  %v3694_v37 = vor.u32 %v3693_v46, %v3692_v39 }
 0x233   : > { %v2072_v36 = vadd.s32 536870912, %v2071_v15  ;;  %v3701_v13 = vshll.u32 %v18604_v22, %v3689_v42  ;;  %v3702_v47 = vshrl.u32 %v18687_v56, %v3690_v26  ;;  %vm2013_vm1 = vcmp.lt.s32.totalorder %v14704_v19, 0 }
 0x234   : > { %v3550_v48 = vmul.f32 %v3549_v11, %v3547_v2  ;;  %v3697_v51 = vor.u32 %v3696_v55, %v3695_v30  ;;  %v3700_v31 = vor.u32 %v3699_v41, %v3698_v49  ;;  %v3704_v10 = vshll.u32 %v18687_v56, %v3689_v42 }
 0x235   : > { %v2073_v8 = vshrl.u32 %v2072_v36, 30  ;;  %v3703_v29 = vor.u32 %v3702_v47, %v3701_v13  ;;  %v3705_v17 = vshrl.u32 %v18617_v34, %v3690_v26  ;;  %vm3710_vm8 = vcmp.lt.s32.totalorder %v14996_v20, 4 }
 0x236   : > { %vm1899_vm7 = vcmp.eq.s32.totalorder %v14993_v25, 0  ;;  %vm1902_vm14 = vcmp.eq.s32.totalorder %v14993_v25, 2  ;;  %v3551_v32 = vxor.u32 2147483648, %v3550_v48  ;;  %vm3709_vm9 = vcmp.lt.s32.totalorder %v14996_v20, 3 }
 0x237   : > { %v15021_v23 = vand.u32 3, %v3560_v28  ;;  %v2074_v59 = vshll.u32 %v2073_v8, 30  ;;  %vm3708_vm2 = vcmp.lt.s32.totalorder %v14996_v20, 2  ;;  %v3715_v42 = vsel %vm3707_vm3, %v3694_v37, %v3697_v51 }
 0x238   : > { %v3552_v4 = vsel %vm3469_vm5, %v3551_v32, %v3550_v48  ;;  %v3691_v57 = vshrl.u32 %v18601_v3, %v3690_v26  ;;  %v3706_v39 = vor.u32 %v3705_v17, %v3704_v10  ;;  %v3716_v60 = vsel %vm3710_vm8, %v3703_v29, 920167782 }
 0x239   : > { %v15031_v11 = vpop.eup %12361  ;;  %vm1895_vm4 = vweird.f32 %v14636_v45  ;;  %v3555_v28 = vsel %vm14935_vm10, %v14641_v12, %v3552_v4  ;;  %v15037_v14 = vsub.s32 %v2071_v15, %v2074_v59  ;;  %v2097_v46 = vsub.s32 4, %v2073_v8 }
 0x23a   : > { %v3717_v30 = vsel %vm3709_vm9, %v3700_v31, %v3716_v60  ;;  %v15041_v2 = vpop.eup %12363  ;;  %v18507_v26 = vxor.u32 2147483648, %v15031_v11  ;;  %12365 = vcosq.f32 %v3555_v28  ;;  %v3712_v55 = vsel %vm3710_vm8, %v3700_v31, 2102212464 }
 0x23b   : > { %v3718_v49 = vsel %vm3708_vm2, %v3715_v42, %v3717_v30  ;;  %v18508_v44 = vxor.u32 2147483648, %v15041_v2  ;;  %12367 = vsinq.f32 %v3555_v28  ;;  %v2077_v15 = vsub.s32 0, %v15037_v14 }
 0x23c   : > { %v3719_v41 = vsel %vm3707_vm3, %v3697_v51, %v3700_v31  ;;  %v3711_v36 = vsel %vm3707_vm3, %v3691_v57, %v3694_v37  ;;  %v3720_v13 = vsel %vm3710_vm8, %v3706_v39, 1326507024  ;;  %v2098_v17 = vsel %vm2013_vm1, %v2097_v46, %v2073_v8 }
 0x23d   : > { %v15057_v47 = vmul.u32.u64.low %v14920_v52, %v3718_v49  ;;  %v15058_v48 = vmul.u32.u64.high %v14920_v52, %v3718_v49, %v15057_v47  ;;  %v11716_v10 = vmin.u32 %v2077_v15, %v15037_v14  ;;  %v3713_v32 = vsel %vm3709_vm9, %v3697_v51, %v3712_v55 }
 0x23e   : > { %v3721_v31 = vsel %vm3709_vm9, %v3703_v29, %v3720_v13  ;;  %vm1898_vm5 = vcmp.lt.s32.totalorder %v14993_v25, 2  ;;  %v1901_v37 = vsel %vm1899_vm7, %v15031_v11, %v18508_v44  ;;  %v1904_v8 = vsel %vm1902_vm14, %v18507_v26, %v15041_v2 }
 0x23f   : > { %v3722_v51 = vsel %vm3708_vm2, %v3719_v41, %v3721_v31  ;;  %vm3559_vm10 = vweird.f32 %v14641_v12  ;;  %v18707_v29 = vand.u32 2147483647, %v14704_v19  ;;  %v2079_v42 = vclz %v11716_v10 }
 0x240   : > { %v18710_v4 = vrot.slane %v14862_v54, 4  ;;  %vm18711_vm0 = vcmask 1043456   ;;  %v18510_v25 = vand.u32 2147483647, %v14897_v21  ;;  %v3714_v60 = vsel %vm3708_vm2, %v3711_v36, %v3713_v32 }
 0x241   : > { %vm15084_vm6 = vcmp.le.f32.partialorder %v18707_v29, 0.7853982  ;;  %v15102_v28 = vmul.u32.u64.low %v14920_v52, %v3722_v51  ;;  %v15103_v46 = vmul.u32.u64.high %v14920_v52, %v3722_v51, %v15102_v28  ;;  %v1905_v30 = vsel %vm1898_vm5, %v1901_v37, %v1904_v8 }
 0x242   : > { %v15092_v57 = vsel %vm18711_vm0, %v14890_v63, %v18710_v4  ;;  %v15097_v39 = vsel %vm15084_vm6, 0, %v2098_v17  ;;  %vm3562_vm15 = vcmp.lt.s32.totalorder %v15021_v23, 2  ;;  %v11717_v54 = vadd.s32 4294967294, %v2079_v42 }
 0x243   : > { %v1702_v63 = vand.u32 2139095040, %v14897_v21  ;;  %vm3563_vm13 = vcmp.eq.s32.totalorder %v15021_v23, 0  ;;  %vm3566_vm11 = vcmp.eq.s32.totalorder %v15021_v23, 2  ;;  %v2067_v55 = vadd.s32 %v14971_v61, %v14986_v24 }
 0x244   : > { %v3733_v20 = vadd.s32 1, %v15058_v48  ;;  %vm11718_vm12 = vcmp.lt.s32.totalorder %v11717_v54, 0  ;;  %v2104_v49 = vadd.s32 3, %v15097_v39  ;;  %v3730_v15 = vmul.u32 %v14920_v52, %v3714_v60  ;;  %v15114_v36 = vpop.eup %12365 }
 0x245   : > { %v1703_v41 = vshrl.u32 %v1702_v63, 23  ;;  %v1906_v13 = vsel %vm1895_vm4, nan, %v1905_v30  ;;  %v2082_v10 = vsel %vm11718_vm12, 0, %v11717_v54  ;;  %vm3732_vm3 = vc.u32 %v15103_v46, %v15057_v47  ;;  %v15121_v61 = vpop.eup %12367 }
 0x246   : > { %v3366_v17 = vand.u32 2139095040, %v15092_v57  ;;  %v18505_v24 = vxor.u32 2147483648, %v15114_v36  ;;  %v2083_v32 = vsub.s32 32, %v2082_v10  ;;  %v2084_v31 = vshll.u32 %v15037_v14, %v2082_v10 }
 0x247   : > { %v2087_v52 = vsub.s32 4294967266, %v2082_v10  ;;  %v18506_v37 = vxor.u32 2147483648, %v15121_v61  ;;  %v3734_v8 = vsel %vm3732_vm3, %v3733_v20, %v15058_v48  ;;  %v11703_v51 = vadd.s32 4294967169, %v1703_v41 }
 0x248   : > { %v1706_v29 = vand.u32 8388607, %v18510_v25  ;;  %v3568_v42 = vsel %vm3566_vm11, %v18505_v24, %v15121_v61  ;;  %v2085_v4 = vshrl.u32 %v2067_v55, %v2083_v32  ;;  %v3735_v28 = vadd.s32 %v3734_v8, %v3730_v15 }
 0x249   : > { %v2088_v60 = vadd.s32 127, %v2087_v52  ;;  %v3565_v14 = vsel %vm3563_vm13, %v15114_v36, %v18506_v37  ;;  %v1709_v48 = vadd.s32 1, %v11703_v51  ;;  %v18509_v30 = vand.u32 2147483647, %v15092_v57 }
 0x24a   : > { %v3367_v54 = vshrl.u32 %v3366_v17, 23  ;;  %v3569_v63 = vsel %vm3562_vm15, %v3565_v14, %v3568_v42  ;;  %v2086_v20 = vor.u32 %v2085_v4, %v2084_v31  ;;  %v3736_v10 = vadd.s32 536870912, %v3735_v28 }
 0x24b   : > { %v2089_v41 = vshll.u32 %v2088_v60, 23  ;;  %v3570_v55 = vsel %vm3559_vm10, nan, %v3569_v63  ;;  %v1707_v15 = vor.u32 8388608, %v1706_v29  ;;  %vm1710_vm8 = vcmp.gt.s32.totalorder %v1709_v48, 0 }
 0x24c   : > { %v11767_v32 = vadd.s32 4294967169, %v3367_v54  ;;  %v15144_v52 = vpack.c.bf16 %v3570_v55, %v1906_v13  ;;  %v2093_v24 = vcvt.s32.f32 %v2086_v20  ;;  %v3737_v51 = vshrl.u32 %v3736_v10, 30 }
 0x24d   : > { %v2090_v8 = vor.u32 4788187, %v2089_v41  ;;  %v1711_v37 = vsel %vm1710_vm8, %v1709_v48, 0  ;;  %v15148_v17 = vand.u32 8388607, %v18509_v30  ;;  %v15151_v42 = vand.u32 3, %v2104_v49 }
 0x24e   : > { %18712 = vst [vmem:[#allocation27_spill] sm:$0xff] %v15144_v52  ;;  %7968 = vmatprep.subr.bf16.mxu0 %v15144_v52  ;;  %v3738_v31 = vshll.u32 %v3737_v51, 30  ;;  %vm3677_vm7 = vcmp.lt.s32.totalorder %v14840_v53, 0  ;;  %v3731_v13 = vadd.s32 %v15057_v47, %v15103_v46  ;;  %v1713_v29 = vand.u32 31, %v1711_v37 }
 0x24f   : > { %v2091_v23 = vand.u32 2147483647, %v2090_v8  ;;  %v15158_v14 = vshll.u32 %v1707_v15, 8  ;;  %v3373_v48 = vadd.s32 1, %v11767_v32  ;;  %v3761_v54 = vsub.s32 4, %v3737_v51 }
 0x250   : > { %v15156_v60 = vsub.s32 %v3735_v28, %v3738_v31  ;;  %v1712_v63 = vshrl.u32 %v1711_v37, 5  ;;  %v1714_v20 = vsub.s32 32, %v1713_v29  ;;  %v3371_v41 = vor.u32 8388608, %v15148_v17  ;;  %v7553_v17 = vld [vmem:[%s18441_s4 + $0x30] sm:$0xff] }
 0x251   : > { %v2094_v4 = vmul.f32 %v2093_v24, %v2091_v23  ;;  %v1716_v55 = vshll.u32 %v18601_v3, %v1713_v29  ;;  %v1719_v8 = vshll.u32 %v18602_v16, %v1713_v29  ;;  %v1722_v24 = vshll.u32 %v18603_v9, %v1713_v29  ;;  %7587 = vperm.xlu0 %12264, %v7553_v17   ;;  %v7554_v17 = vld [vmem:[%s18441_s4 + $0x38] sm:$0xff] }
 0x252   : > { %v3741_v49 = vsub.s32 0, %v15156_v60  ;;  %v1717_v47 = vshrl.u32 %v18602_v16, %v1714_v20  ;;  %v1720_v46 = vshrl.u32 %v18603_v9, %v1714_v20  ;;  %v1723_v28 = vshrl.u32 %v18604_v22, %v1714_v20 }
 0x253   : > { %v2095_v10 = vxor.u32 2147483648, %v2094_v4  ;;  %v18713_v15 = vand.u32 2147483647, %v14840_v53  ;;  %vm3374_vm9 = vcmp.gt.s32.totalorder %v3373_v48, 0  ;;  %vm18716_vm2 = vcmask 1041408  }
 0x254   : > { %v11780_v23 = vmin.u32 %v3741_v49, %v15156_v60  ;;  %v15180_v31 = vsel %vm18716_vm2, %v14594_v1, %v14589_v7  ;;  %v1718_v30 = vor.u32 %v1717_v47, %v1716_v55  ;;  %v1721_v49 = vor.u32 %v1720_v46, %v1719_v8 }
 0x255   : > { %v2096_v37 = vsel %vm2013_vm1, %v2095_v10, %v2094_v4  ;;  %vm15172_vm14 = vcmp.le.f32.partialorder %v18713_v15, 0.7853982  ;;  %18717 = vst [vmem:[#allocation28_spill] sm:$0xff] %v15180_v31  ;;  %v3762_v4 = vsel %vm3677_vm7, %v3761_v54, %v3737_v51  ;;  %v1715_v10 = vshrl.u32 %v18601_v3, %v1714_v20 }
 0x256   : > { %v2099_v26 = vsel %vm15084_vm6, %v14704_v19, %v2096_v37  ;;  %v1725_v15 = vshll.u32 %v18604_v22, %v1713_v29  ;;  %v3743_v44 = vclz %v11780_v23  ;;  %vm1731_vm1 = vcmp.lt.s32.totalorder %v1712_v63, 1 }
 0x257   : > { %12369 = vcosq.f32 %v2099_v26  ;;  %v1724_v25 = vor.u32 %v1723_v28, %v1722_v24  ;;  %v1726_v7 = vshrl.u32 %v18687_v56, %v1714_v20  ;;  %v1728_v1 = vshll.u32 %v18687_v56, %v1713_v29 }
 0x258   : > { %12371 = vsinq.f32 %v2099_v26  ;;  %v11781_v59 = vadd.s32 4294967294, %v3743_v44  ;;  %v1729_v37 = vshrl.u32 %v18617_v34, %v1714_v20  ;;  %vm1732_vm5 = vcmp.lt.s32.totalorder %v1712_v63, 2 }
 0x259   : > { %v1727_v51 = vor.u32 %v1726_v7, %v1725_v15  ;;  %vm1733_vm6 = vcmp.lt.s32.totalorder %v1712_v63, 3  ;;  %vm1734_vm0 = vcmp.lt.s32.totalorder %v1712_v63, 4  ;;  %v1735_v54 = vsel %vm1731_vm1, %v1715_v10, %v1718_v30 }
 0x25a   : > { %vm11782_vm15 = vcmp.lt.s32.totalorder %v11781_v59, 0  ;;  %v1730_v55 = vor.u32 %v1729_v37, %v1728_v1  ;;  %v1736_v8 = vsel %vm1734_vm0, %v1724_v25, 2102212464  ;;  %v1739_v47 = vsel %vm1731_vm1, %v1718_v30, %v1721_v49 }
 0x25b   : > { %v3746_v46 = vsel %vm11782_vm15, 0, %v11781_v59  ;;  %v1737_v24 = vsel %vm1733_vm6, %v1721_v49, %v1736_v8  ;;  %v1740_v26 = vsel %vm1734_vm0, %v1727_v51, 920167782  ;;  %v1743_v44 = vsel %vm1731_vm1, %v1721_v49, %v1724_v25 }
 0x25c   : > { %v3747_v29 = vsub.s32 32, %v3746_v46  ;;  %v3748_v20 = vshll.u32 %v15156_v60, %v3746_v46  ;;  %v3751_v28 = vsub.s32 4294967266, %v3746_v46  ;;  %v3375_v23 = vsel %vm3374_vm9, %v3373_v48, 0 }
 0x25d   : > { %v15202_v10 = vsel %vm15172_vm14, 0, %v3762_v4  ;;  %v1738_v15 = vsel %vm1732_vm5, %v1735_v54, %v1737_v24  ;;  %v1741_v30 = vsel %vm1733_vm6, %v1724_v25, %v1740_v26  ;;  %v1744_v7 = vsel %vm1734_vm0, %v1730_v55, 1326507024  ;;  %v7550_v25 = vld [vmem:[%s18441_s4 + $0x18] sm:$0xff] }
 0x25e   : > { %v3749_v1 = vshrl.u32 %v3731_v13, %v3747_v29  ;;  %v3752_v59 = vadd.s32 127, %v3751_v28  ;;  %v1742_v49 = vsel %vm1732_vm5, %v1739_v47, %v1741_v30  ;;  %v1745_v37 = vsel %vm1733_vm6, %v1727_v51, %v1744_v7  ;;  %7572 = vperm.xlu1 %12265, %v7550_v25  }
 0x25f   : > { %v1746_v60 = vsel %vm1732_vm5, %v1743_v44, %v1745_v37  ;;  %v15211_v48 = vmul.u32.u64.low %v15158_v14, %v1742_v49  ;;  %v15212_v8 = vmul.u32.u64.high %v15158_v14, %v1742_v49, %v15211_v48  ;;  %v3377_v4 = vand.u32 31, %v3375_v23 }
 0x260   : > { %v3750_v54 = vor.u32 %v3749_v1, %v3748_v20  ;;  %v3753_v55 = vshll.u32 %v3752_v59, 23  ;;  %v15219_v13 = vmul.u32.u64.low %v15158_v14, %v1746_v60  ;;  %v15220_v46 = vmul.u32.u64.high %v15158_v14, %v1746_v60, %v15219_v13 }
 0x261   : > { %v15222_v51 = vpop.eup %12369  ;;  %v3378_v63 = vsub.s32 32, %v3377_v4  ;;  %v15226_v47 = vshll.u32 %v3371_v41, 8  ;;  %v1754_v29 = vmul.u32 %v15158_v14, %v1738_v15  ;;  %v15232_v20 = vmul.f32 2.0, %v15180_v31  ;;  %v7552_v41 = vld [vmem:[%s18441_s4 + $0x28] sm:$0xff] }
 0x262   : > { %v15228_v24 = vpop.eup %12371  ;;  %v3754_v26 = vor.u32 4788187, %v3753_v55  ;;  %v3757_v44 = vcvt.s32.f32 %v3750_v54  ;;  %v3768_v28 = vadd.s32 3, %v15202_v10  ;;  %v1757_v30 = vadd.s32 1, %v15212_v8  ;;  %7582 = vperm.xlu1 %12265, %v7552_v41  }
 0x263   : > { %v3380_v7 = vshll.u32 %v18601_v3, %v3377_v4  ;;  %v3381_v1 = vshrl.u32 %v18602_v16, %v3378_v63  ;;  %vm2107_vm13 = vcmp.eq.s32.totalorder %v15151_v42, 0  ;;  %vm2110_vm11 = vcmp.eq.s32.totalorder %v15151_v42, 2 }
 0x264   : > { %v3755_v14 = vand.u32 2147483647, %v3754_v26  ;;  %vm1756_vm12 = vc.u32 %v15220_v46, %v15211_v48  ;;  %v15248_v15 = vshrl.u32 %v3375_v23, 5  ;;  %v3383_v59 = vshll.u32 %v18602_v16, %v3377_v4  ;;  %v8460_v23 = vld [vmem:[%s18443_s6] sm:$0xff] }
 0x265   : > { %v1758_v37 = vsel %vm1756_vm12, %v1757_v30, %v15212_v8  ;;  %v3384_v60 = vshrl.u32 %v18603_v9, %v3378_v63  ;;  %v3386_v25 = vshll.u32 %v18603_v9, %v3377_v4  ;;  %v3379_v13 = vshrl.u32 %v18601_v3, %v3378_v63  ;;  %8470 = vperm.xlu0 %12264, %v8460_v23  }
 0x266   : > { %v3758_v54 = vmul.f32 %v3757_v44, %v3755_v14  ;;  %v1759_v55 = vadd.s32 %v1758_v37, %v1754_v29  ;;  %v3387_v26 = vshrl.u32 %v18604_v22, %v3378_v63  ;;  %v3382_v41 = vor.u32 %v3381_v1, %v3380_v7  ;;  %7592 = vperm.xlu1 %12265, %v7554_v17   ;;  %v8462_v7 = vld [vmem:[%s18443_s6 + $0x10] sm:$0xff]  ;;  %v8464_v17 = vld [vmem:[%s18443_s6 + $0x20] sm:$0xff] }
 0x267   : > { %v3389_v8 = vshll.u32 %v18604_v22, %v3377_v4  ;;  %v3390_v30 = vshrl.u32 %v18687_v56, %v3378_v63  ;;  %v3392_v44 = vshll.u32 %v18687_v56, %v3377_v4  ;;  %vm2106_vm3 = vcmp.lt.s32.totalorder %v15151_v42, 2 }
 0x268   : > { %v3759_v29 = vxor.u32 2147483648, %v3758_v54  ;;  %v1760_v14 = vadd.s32 536870912, %v1759_v55  ;;  %v3385_v37 = vor.u32 %v3384_v60, %v3383_v59  ;;  %v3393_v49 = vshrl.u32 %v18617_v34, %v3378_v63  ;;  %v8461_v63 = vld [vmem:[%s18443_s6 + $0x8] sm:$0xff] }
 0x269   : > { %v18518_v18 = vxor.u32 2147483648, %v15228_v24  ;;  %v3388_v27 = vor.u32 %v3387_v26, %v3386_v25  ;;  %v3391_v58 = vor.u32 %v3390_v30, %v3389_v8  ;;  %vm3395_vm8 = vcmp.lt.s32.totalorder %v15248_v15, 1  ;;  %8480 = vperm.xlu0 %12264, %v8462_v7  }
 0x26a   : > { %v3760_v4 = vsel %vm3677_vm7, %v3759_v29, %v3758_v54  ;;  %v1761_v1 = vshrl.u32 %v1760_v14, 30  ;;  %v3394_v52 = vor.u32 %v3393_v49, %v3392_v44  ;;  %vm3398_vm9 = vcmp.lt.s32.totalorder %v15248_v15, 4  ;;  %8475 = vperm.xlu1 %12265, %v8461_v63  }
 0x26b   : > { %v3763_v59 = vsel %vm15172_vm14, %v14840_v53, %v3760_v4  ;;  %vm3396_vm2 = vcmp.lt.s32.totalorder %v15248_v15, 2  ;;  %vm3397_vm1 = vcmp.lt.s32.totalorder %v15248_v15, 3  ;;  %v3400_v60 = vsel %vm3398_vm9, %v3388_v27, 2102212464  ;;  %v8465_v15 = vld [vmem:[%s18443_s6 + $0x28] sm:$0xff] }
 0x26c   : > { %12373 = vcosq.f32 %v3763_v59  ;;  %v1762_v25 = vshll.u32 %v1761_v1, 30  ;;  %v3399_v49 = vsel %vm3395_vm8, %v3379_v13, %v3382_v41  ;;  %v3403_v54 = vsel %vm3395_vm8, %v3382_v41, %v3385_v37  ;;  %v8463_v13 = vld [vmem:[%s18443_s6 + $0x18] sm:$0xff] }
 0x26d   : > { %12375 = vsinq.f32 %v3763_v59  ;;  %v3401_v32 = vsel %vm3397_vm1, %v3385_v37, %v3400_v60  ;;  %v3404_v26 = vsel %vm3398_vm9, %v3391_v58, 920167782  ;;  %v3407_v23 = vsel %vm3395_vm8, %v3385_v37, %v3388_v27  ;;  %8490 = vperm.xlu0 %12264, %v8464_v17  }
 0x26e   : > { %v15302_v41 = vand.u32 3, %v3768_v28  ;;  %v15304_v8 = vsub.s32 %v1759_v55, %v1762_v25  ;;  %v3405_v30 = vsel %vm3397_vm1, %v3388_v27, %v3404_v26  ;;  %v3408_v44 = vsel %vm3398_vm9, %v3394_v52, 1326507024  ;;  %8485 = vperm.xlu1 %12265, %v8463_v13  }
 0x26f   : > { %v2109_v29 = vsel %vm2107_vm13, %v15222_v51, %v18518_v18  ;;  %v18718_v14 = vxor.u32 2147483648, %v15222_v51  ;;  %v3406_v55 = vsel %vm3396_vm2, %v3403_v54, %v3405_v30  ;;  %v3409_v27 = vsel %vm3397_vm1, %v3391_v58, %v3408_v44  ;;  %v8466_v58 = vld [vmem:[%s18443_s6 + $0x30] sm:$0xff]  ;;  %v9322_v44 = vld [vmem:[%s18445_s8] sm:$0xff] }
 0x270   : > { %v1765_v52 = vsub.s32 0, %v15304_v8  ;;  %v1785_v37 = vsub.s32 4, %v1761_v1  ;;  %v3402_v7 = vsel %vm3396_vm2, %v3399_v49, %v3401_v32  ;;  %v3410_v4 = vsel %vm3396_vm2, %v3407_v23, %v3409_v27 }
 0x271   : > { %v2112_v28 = vsel %vm2110_vm11, %v18718_v14, %v15228_v24  ;;  %v15330_v63 = vmul.u32.u64.low %v15226_v47, %v3410_v4  ;;  %v15331_v59 = vmul.u32.u64.high %v15226_v47, %v3410_v4, %v15330_v63  ;;  %vm2103_vm7 = vweird.f32 %v14704_v19  ;;  %8500 = vperm.xlu0 %12264, %v8466_v58  }
 0x272   : > { %v15334_v60 = vmul.u32.u64.low %v15226_v47, %v3406_v55  ;;  %v15335_v25 = vmul.u32.u64.high %v15226_v47, %v3406_v55, %v15334_v60  ;;  %vm18526_vm14 = vweird.f32 %v14840_v53  ;;  %v11704_v49 = vmin.u32 %v1765_v52, %v15304_v8  ;;  %8495 = vperm.xlu1 %12265, %v8465_v15  }
 0x273   : > { %v764_v54 = vrot.slane %v15232_v20, 4  ;;  %v2113_v32 = vsel %vm2106_vm3, %v2109_v29, %v2112_v28  ;;  %vm3770_vm5 = vcmp.lt.s32.totalorder %v15302_v41, 2  ;;  %v18719_v26 = vand.u32 2147483647, %v14897_v21 }
 0x274   : > { %vm1701_vm0 = vcmp.lt.s32.totalorder %v14897_v21, 0  ;;  %vm3771_vm15 = vcmp.eq.s32.totalorder %v15302_v41, 0  ;;  %v1767_v17 = vclz %v11704_v49  ;;  %v3418_v20 = vmul.u32 %v15226_v47, %v3402_v7  ;;  %v8467_v47 = vld [vmem:[%s18443_s6 + $0x38] sm:$0xff] }
 0x275   : > { %vm15353_vm6 = vcmp.le.f32.partialorder %v18719_v26, 0.7853982  ;;  %v1786_v13 = vsel %vm1701_vm0, %v1785_v37, %v1761_v1  ;;  %vm3774_vm13 = vcmp.eq.s32.totalorder %v15302_v41, 2  ;;  %vm3420_vm11 = vc.u32 %v15331_v59, %v15334_v60  ;;  %9329 = vperm.xlu0 %12264, %v9322_v44   ;;  %v9902_v41 = vld [vmem:[%s18447_s10] sm:$0xff] }
 0x276   : > { %v3421_v42 = vadd.s32 1, %v15335_v25  ;;  %vm18722_vm12 = vcmask 1043456   ;;  %v15376_v1 = vpop.eup %12373  ;;  %v2114_v29 = vsel %vm2103_vm7, nan, %v2113_v32  ;;  %v1755_v14 = vadd.s32 %v15211_v48, %v15220_v46  ;;  %8505 = vperm.xlu1 %12265, %v8467_v47   ;;  %v9323_v32 = vld [vmem:[%s18445_s8 + $0x8] sm:$0xff] }
 0x277   : > { %v15368_v30 = vsel %vm18722_vm12, %v15180_v31, %v764_v54  ;;  %v11705_v28 = vadd.s32 4294967294, %v1767_v17  ;;  %v15383_v27 = vpop.eup %12375  ;;  %v18516_v52 = vxor.u32 2147483648, %v15376_v1  ;;  %v15388_v37 = vsel %vm15353_vm6, 0, %v1786_v13  ;;  %v9324_v54 = vld [vmem:[%s18445_s8 + $0x10] sm:$0xff]  ;;  %vm18724_vm2 = vmmov %vm18722_vm12 }
 0x278   : > { %v18515_v55 = vand.u32 2147483647, %v15368_v30  ;;  %v3422_v7 = vsel %vm3420_vm11, %v3421_v42, %v15335_v25  ;;  %v1910_v4 = vand.u32 2139095040, %v15368_v30  ;;  %v18517_v63 = vxor.u32 2147483648, %v15383_v27 }
 0x279   : > { %vm11706_vm3 = vcmp.lt.s32.totalorder %v11705_v28, 0  ;;  %v3423_v58 = vadd.s32 %v3422_v7, %v3418_v20  ;;  %v732_v48 = vmul.f32 8.0, %v15180_v31  ;;  %v3776_v46 = vsel %vm3774_vm13, %v18516_v52, %v15383_v27  ;;  %9339 = vperm.xlu0 %12264, %v9324_v54  }
 0x27a   : > { %v1770_v15 = vsel %vm11706_vm3, 0, %v11705_v28  ;;  %v1911_v49 = vshrl.u32 %v1910_v4, 23  ;;  %v1914_v25 = vand.u32 8388607, %v18515_v55  ;;  %v3773_v26 = vsel %vm3771_vm15, %v15376_v1, %v18517_v63  ;;  %9334 = vperm.xlu1 %12265, %v9323_v32  }
 0x27b   : > { %v1771_v17 = vsub.s32 32, %v1770_v15  ;;  %v1772_v13 = vshll.u32 %v15304_v8, %v1770_v15  ;;  %v1775_v20 = vsub.s32 4294967266, %v1770_v15  ;;  %v3777_v42 = vsel %vm3770_vm5, %v3773_v26, %v3776_v46 }
 0x27c   : > { %v3424_v44 = vadd.s32 536870912, %v3423_v58  ;;  %v716_v47 = vmul.f32 4.0, %v15180_v31  ;;  %v11711_v28 = vadd.s32 4294967169, %v1911_v49  ;;  %v3778_v7 = vsel %vm18526_vm14, nan, %v3777_v42 }
 0x27d   : > { %v1773_v4 = vshrl.u32 %v1755_v14, %v1771_v17  ;;  %v1776_v55 = vadd.s32 127, %v1775_v20  ;;  %v812_v52 = vrot.slane %v732_v48, 4  ;;  %v15418_v63 = vpack.c.bf16 %v3778_v7, %v2114_v29  ;;  %9912 = vperm.xlu0 %12264, %v9902_v41  }
 0x27e   : > { %v1792_v8 = vadd.s32 3, %v15388_v37  ;;  %v3425_v15 = vshrl.u32 %v3424_v44, 30  ;;  %v1917_v18 = vadd.s32 1, %v11711_v28  ;;  %v1915_v26 = vor.u32 8388608, %v1914_v25 }
 0x27f   : > { %18723 = vst [vmem:[#allocation29_spill] sm:$0xff] %v15418_v63  ;;  %v1774_v46 = vor.u32 %v1773_v4, %v1772_v13  ;;  %v1777_v49 = vshll.u32 %v1776_v55, 23  ;;  %8041 = vmatprep.subr.bf16.mxu1 %v15418_v63  ;;  %vm3365_vm8 = vcmp.lt.s32.totalorder %v15092_v57, 0  ;;  %v15427_v32 = vsel %vm18724_vm2, %v716_v47, %v812_v52 }
 0x280   : > { %v3426_v14 = vshll.u32 %v3425_v15, 30  ;;  %v3449_v48 = vsub.s32 4, %v3425_v15  ;;  %vm1918_vm9 = vcmp.gt.s32.totalorder %v1917_v18, 0  ;;  %v15429_v20 = vand.u32 3, %v1792_v8 }
 0x281   : > { %v1778_v29 = vor.u32 4788187, %v1777_v49  ;;  %v1781_v54 = vcvt.s32.f32 %v1774_v46  ;;  %v1919_v17 = vsel %vm1918_vm9, %v1917_v18, 0  ;;  %v18725_v13 = vand.u32 2147483647, %v15092_v57 }
 0x282   : > { %v15437_v25 = vsub.s32 %v3423_v58, %v3426_v14  ;;  %v1921_v42 = vand.u32 31, %v1919_v17  ;;  %v3419_v28 = vadd.s32 %v15334_v60, %v15331_v59  ;;  %v15441_v7 = vshll.u32 %v1915_v26, 8 }
 0x283   : > { %vm15433_vm1 = vcmp.le.f32.partialorder %v18725_v13, 0.7853982  ;;  %v1779_v44 = vand.u32 2147483647, %v1778_v29  ;;  %v18525_v18 = vand.u32 2147483647, %v15427_v32  ;;  %v3450_v47 = vsel %vm3365_vm8, %v3449_v48, %v3425_v15 }
 0x284   : > { %v3429_v52 = vsub.s32 0, %v15437_v25  ;;  %v1922_v4 = vsub.s32 32, %v1921_v42  ;;  %v3574_v8 = vand.u32 2139095040, %v15427_v32  ;;  %v1920_v58 = vshrl.u32 %v1919_v17, 5 }
 0x285   : > { %v1782_v41 = vmul.f32 %v1781_v54, %v1779_v44  ;;  %v1924_v46 = vshll.u32 %v18601_v3, %v1921_v42  ;;  %v1927_v49 = vshll.u32 %v18602_v16, %v1921_v42  ;;  %v1930_v26 = vshll.u32 %v18603_v9, %v1921_v42 }
 0x286   : > { %v11768_v59 = vmin.u32 %v3429_v52, %v15437_v25  ;;  %v1925_v60 = vshrl.u32 %v18602_v16, %v1922_v4  ;;  %v1933_v14 = vshll.u32 %v18604_v22, %v1921_v42  ;;  %v1928_v15 = vshrl.u32 %v18603_v9, %v1922_v4 }
 0x287   : > { %v1783_v29 = vxor.u32 2147483648, %v1782_v41  ;;  %v1931_v48 = vshrl.u32 %v18604_v22, %v1922_v4  ;;  %v1934_v54 = vshrl.u32 %v18687_v56, %v1922_v4  ;;  %v15459_v13 = vsel %vm15433_vm1, 0, %v3450_v47 }
 0x288   : > { %v3431_v17 = vclz %v11768_v59  ;;  %v3575_v44 = vshrl.u32 %v3574_v8, 23  ;;  %v15463_v52 = vand.u32 8388607, %v18525_v18  ;;  %v1923_v35 = vshrl.u32 %v18601_v3, %v1922_v4 }
 0x289   : > { %v1784_v63 = vsel %vm1701_vm0, %v1783_v29, %v1782_v41  ;;  %v1926_v62 = vor.u32 %v1925_v60, %v1924_v46  ;;  %v1929_v50 = vor.u32 %v1928_v15, %v1927_v49  ;;  %v1932_v31 = vor.u32 %v1931_v48, %v1930_v26 }
 0x28a   : > { %v1787_v59 = vsel %vm15353_vm6, %v14897_v21, %v1784_v63  ;;  %v11769_v40 = vadd.s32 4294967294, %v3431_v17  ;;  %v1936_v47 = vshll.u32 %v18687_v56, %v1921_v42  ;;  %v1935_v8 = vor.u32 %v1934_v54, %v1933_v14 }
 0x28b   : > { %12377 = vcosq.f32 %v1787_v59  ;;  %v1937_v18 = vshrl.u32 %v18617_v34, %v1922_v4  ;;  %vm1939_vm5 = vcmp.lt.s32.totalorder %v1920_v58, 1  ;;  %vm1940_vm0 = vcmp.lt.s32.totalorder %v1920_v58, 2 }
 0x28c   : > { %12379 = vsinq.f32 %v1787_v59  ;;  %vm11770_vm15 = vcmp.lt.s32.totalorder %v11769_v40, 0  ;;  %vm1942_vm13 = vcmp.lt.s32.totalorder %v1920_v58, 4  ;;  %vm1941_vm11 = vcmp.lt.s32.totalorder %v1920_v58, 3 }
 0x28d   : > { %v3434_v41 = vsel %vm11770_vm15, 0, %v11769_v40  ;;  %v1938_v46 = vor.u32 %v1937_v18, %v1936_v47  ;;  %v1944_v49 = vsel %vm1942_vm13, %v1932_v31, 2102212464  ;;  %v1943_v42 = vsel %vm1939_vm5, %v1923_v35, %v1926_v62 }
 0x28e   : > { %v3435_v23 = vsub.s32 32, %v3434_v41  ;;  %v3436_v63 = vshll.u32 %v15437_v25, %v3434_v41  ;;  %v3439_v60 = vsub.s32 4294967266, %v3434_v41  ;;  %v1945_v26 = vsel %vm1941_vm11, %v1929_v50, %v1944_v49 }
 0x28f   : > { %v1947_v14 = vsel %vm1939_vm5, %v1926_v62, %v1929_v50  ;;  %v1948_v4 = vsel %vm1942_vm13, %v1935_v8, 920167782  ;;  %v1951_v29 = vsel %vm1939_vm5, %v1929_v50, %v1932_v31  ;;  %v1952_v18 = vsel %vm1942_vm13, %v1938_v46, 1326507024 }
 0x290   : > { %v3437_v15 = vshrl.u32 %v3419_v28, %v3435_v23  ;;  %v3440_v48 = vadd.s32 127, %v3439_v60  ;;  %v1949_v40 = vsel %vm1941_vm11, %v1932_v31, %v1948_v4  ;;  %v1953_v17 = vsel %vm1941_vm11, %v1935_v8, %v1952_v18 }
 0x291   : > { %v1950_v54 = vsel %vm1940_vm0, %v1947_v14, %v1949_v40  ;;  %v11775_v59 = vadd.s32 4294967169, %v3575_v44  ;;  %v3579_v25 = vor.u32 8388608, %v15463_v52  ;;  %v1946_v41 = vsel %vm1940_vm0, %v1943_v42, %v1945_v26 }
 0x292   : > { %v3438_v47 = vor.u32 %v3437_v15, %v3436_v63  ;;  %v3441_v35 = vshll.u32 %v3440_v48, 23  ;;  %v1954_v62 = vsel %vm1940_vm0, %v1951_v29, %v1953_v17  ;;  %v3456_v44 = vadd.s32 3, %v15459_v13 }
 0x293   : > { %v15485_v49 = vmul.u32.u64.low %v15441_v7, %v1954_v62  ;;  %v15486_v50 = vmul.u32.u64.high %v15441_v7, %v1954_v62, %v15485_v49  ;;  %v15489_v31 = vmul.u32.u64.low %v15441_v7, %v1950_v54  ;;  %v15490_v28 = vmul.u32.u64.high %v15441_v7, %v1950_v54, %v15489_v31 }
 0x294   : > { %v3442_v46 = vor.u32 4788187, %v3441_v35  ;;  %v3445_v8 = vcvt.s32.f32 %v3438_v47  ;;  %v3581_v52 = vadd.s32 1, %v11775_v59  ;;  %v15497_v63 = vand.u32 3, %v14887_v43 }
 0x295   : > { %v15494_v23 = vpop.eup %12377  ;;  %v15500_v58 = vand.u32 3, %v14982_v33  ;;  %v15503_v60 = vand.u32 3, %v15097_v39  ;;  %v1962_v14 = vmul.u32 %v15441_v7, %v1946_v41  ;;  %v15509_v4 = vand.u32 3, %v15202_v10 }
 0x296   : > { %v15505_v42 = vpop.eup %12379  ;;  %v3443_v26 = vand.u32 2147483647, %v3442_v46  ;;  %vm3582_vm6 = vcmp.gt.s32.totalorder %v3581_v52, 0  ;;  %vm1795_vm12 = vcmp.eq.s32.totalorder %v15429_v20, 0  ;;  %vm1798_vm3 = vcmp.eq.s32.totalorder %v15429_v20, 2 }
 0x297   : > { %vm1964_vm9 = vc.u32 %v15486_v50, %v15489_v31  ;;  %v1965_v43 = vadd.s32 1, %v15490_v28  ;;  %v15516_v39 = vand.u32 3, %v3456_v44  ;;  %v3583_v29 = vsel %vm3582_vm6, %v3581_v52, 0 }
 0x298   : > { %v3446_v33 = vmul.f32 %v3445_v8, %v3443_v26  ;;  %v15518_v15 = vshll.u32 %v3579_v25, 8  ;;  %v3585_v48 = vand.u32 31, %v3583_v29  ;;  %vm5217_vm2 = vcmp.eq.s32.totalorder %v15497_v63, 0 }
 0x299   : > { %v1966_v7 = vsel %vm1964_vm9, %v1965_v43, %v15490_v28  ;;  %vm5220_vm5 = vcmp.eq.s32.totalorder %v15497_v63, 2  ;;  %vm1794_vm15 = vcmp.lt.s32.totalorder %v15429_v20, 2  ;;  %v18528_v10 = vxor.u32 2147483648, %v15505_v42 }
 0x29a   : > { %v18527_v40 = vxor.u32 2147483648, %v15494_v23  ;;  %v3447_v18 = vxor.u32 2147483648, %v3446_v33  ;;  %v1967_v54 = vadd.s32 %v1966_v7, %v1962_v14  ;;  %v3584_v17 = vshrl.u32 %v3583_v29, 5 }
 0x29b   : > { %v3586_v59 = vsub.s32 32, %v3585_v48  ;;  %v3588_v25 = vshll.u32 %v18601_v3, %v3585_v48  ;;  %v3591_v47 = vshll.u32 %v18602_v16, %v3585_v48  ;;  %v3594_v62 = vshll.u32 %v18603_v9, %v3585_v48 }
 0x29c   : > { %v3448_v35 = vsel %vm3365_vm8, %v3447_v18, %v3446_v33  ;;  %v1968_v41 = vadd.s32 536870912, %v1967_v54  ;;  %v3597_v49 = vshll.u32 %v18604_v22, %v3585_v48  ;;  %vm1791_vm0 = vweird.f32 %v14897_v21 }
 0x29d   : > { %v3451_v28 = vsel %vm15433_vm1, %v15092_v57, %v3448_v35  ;;  %v3587_v46 = vshrl.u32 %v18601_v3, %v3586_v59  ;;  %v3589_v8 = vshrl.u32 %v18602_v16, %v3586_v59  ;;  %v3592_v44 = vshrl.u32 %v18603_v9, %v3586_v59 }
 0x29e   : > { %vm5216_vm13 = vcmp.lt.s32.totalorder %v15497_v63, 2  ;;  %12381 = vcosq.f32 %v3451_v28  ;;  %v15540_v52 = vshrl.u32 %v1968_v41, 30  ;;  %v3595_v26 = vshrl.u32 %v18604_v22, %v3586_v59 }
 0x29f   : > { %v3598_v14 = vshrl.u32 %v18687_v56, %v3586_v59  ;;  %12383 = vsinq.f32 %v3451_v28  ;;  %v3590_v43 = vor.u32 %v3589_v8, %v3588_v25  ;;  %v3593_v33 = vor.u32 %v3592_v44, %v3591_v47 }
 0x2a0   : > { %v3600_v55 = vshll.u32 %v18687_v56, %v3585_v48  ;;  %v1800_v29 = vsel %vm1798_vm3, %v18527_v40, %v15505_v42  ;;  %vm3462_vm8 = vcmp.eq.s32.totalorder %v15516_v39, 2  ;;  %v1970_v7 = vshll.u32 %v15540_v52, 30 }
 0x2a1   : > { %v3599_v18 = vor.u32 %v3598_v14, %v3597_v49  ;;  %v18728_v35 = vxor.u32 2147483648, %v15041_v2  ;;  %v1797_v48 = vsel %vm1795_vm12, %v15494_v23, %v18528_v10  ;;  %vm3459_vm1 = vcmp.eq.s32.totalorder %v15516_v39, 0 }
 0x2a2   : > { %v3596_v47 = vor.u32 %v3595_v26, %v3594_v62  ;;  %v3601_v41 = vshrl.u32 %v18617_v34, %v3586_v59  ;;  %vm3603_vm11 = vcmp.lt.s32.totalorder %v3584_v17, 1  ;;  %vm3458_vm6 = vcmp.lt.s32.totalorder %v15516_v39, 2 }
 0x2a3   : > { %v5219_v25 = vsel %vm5217_vm2, %v15031_v11, %v18728_v35  ;;  %v15565_v49 = vsub.s32 %v1967_v54, %v1970_v7  ;;  %vm3604_vm3 = vcmp.lt.s32.totalorder %v3584_v17, 2  ;;  %vm3605_vm9 = vcmp.lt.s32.totalorder %v3584_v17, 3 }
 0x2a4   : > { %vm3606_vm14 = vcmp.lt.s32.totalorder %v3584_v17, 4  ;;  %vm3455_vm2 = vweird.f32 %v15092_v57  ;;  %v3602_v28 = vor.u32 %v3601_v41, %v3600_v55  ;;  %v3607_v8 = vsel %vm3603_vm11, %v3587_v46, %v3590_v43 }
 0x2a5   : > { %v3608_v44 = vsel %vm3606_vm14, %v3596_v47, 2102212464  ;;  %v3611_v14 = vsel %vm3603_vm11, %v3590_v43, %v3593_v33  ;;  %v1973_v62 = vsub.s32 0, %v15565_v49  ;;  %v3612_v26 = vsel %vm3606_vm14, %v3599_v18, 920167782 }
 0x2a6   : > { %v3609_v59 = vsel %vm3605_vm9, %v3593_v33, %v3608_v44  ;;  %v18729_v54 = vxor.u32 2147483648, %v15031_v11  ;;  %v1801_v35 = vsel %vm1794_vm15, %v1797_v48, %v1800_v29  ;;  %v3613_v55 = vsel %vm3605_vm9, %v3596_v47, %v3612_v26 }
 0x2a7   : > { %v3615_v46 = vsel %vm3603_vm11, %v3593_v33, %v3596_v47  ;;  %v3616_v41 = vsel %vm3606_vm14, %v3602_v28, 1326507024  ;;  %v11712_v43 = vmin.u32 %v1973_v62, %v15565_v49  ;;  %v3610_v40 = vsel %vm3604_vm3, %v3607_v8, %v3609_v59 }
 0x2a8   : > { %v5222_v7 = vsel %vm5220_vm5, %v18729_v54, %v15041_v2  ;;  %v3614_v44 = vsel %vm3604_vm3, %v3611_v14, %v3613_v55  ;;  %v3617_v10 = vsel %vm3605_vm9, %v3599_v18, %v3616_v41  ;;  %vm6864_vm12 = vcmp.lt.s32.totalorder %v15500_v58, 2  ;;  %v15592_v20 = vpop.eup %12381 }
 0x2a9   : > { %v3618_v11 = vsel %vm3604_vm3, %v3615_v46, %v3617_v10  ;;  %v15587_v2 = vmul.u32.u64.low %v15518_v15, %v3614_v44  ;;  %v15588_v54 = vmul.u32.u64.high %v15518_v15, %v3614_v44, %v15587_v2  ;;  %v1802_v33 = vsel %vm1791_vm0, nan, %v1801_v35  ;;  %v15600_v10 = vpop.eup %12383 }
 0x2aa   : > { %v1963_v29 = vadd.s32 %v15489_v31, %v15486_v50  ;;  %v1975_v48 = vclz %v11712_v43  ;;  %v5223_v17 = vsel %vm5216_vm13, %v5219_v25, %v5222_v7  ;;  %v3463_v18 = vxor.u32 2147483648, %v15592_v20 }
 0x2ab   : > { %v15604_v47 = vmul.u32.u64.low %v15518_v15, %v3618_v11  ;;  %v15605_v28 = vmul.u32.u64.high %v15518_v15, %v3618_v11, %v15604_v47  ;;  %v3626_v8 = vmul.u32 %v15518_v15, %v3610_v40  ;;  %v3460_v14 = vxor.u32 2147483648, %v15600_v10 }
 0x2ac   : > { %v11713_v62 = vadd.s32 4294967294, %v1975_v48  ;;  %vm6865_vm14 = vcmp.eq.s32.totalorder %v15500_v58, 0  ;;  %vm6868_vm5 = vcmp.eq.s32.totalorder %v15500_v58, 2  ;;  %v3464_v50 = vsel %vm3462_vm8, %v3463_v18, %v15600_v10 }
 0x2ad   : > { %v3629_v31 = vadd.s32 1, %v15588_v54  ;;  %v18730_v63 = vxor.u32 2147483648, %v15121_v61  ;;  %v18731_v15 = vxor.u32 2147483648, %v15114_v36  ;;  %v3461_v59 = vsel %vm3459_vm1, %v15592_v20, %v3460_v14 }
 0x2ae   : > { %vm11714_vm15 = vcmp.lt.s32.totalorder %v11713_v62, 0  ;;  %v5224_v26 = vsel %vm1895_vm4, nan, %v5223_v17  ;;  %v3465_v35 = vsel %vm3458_vm6, %v3461_v59, %v3464_v50  ;;  %vm3628_vm13 = vc.u32 %v15605_v28, %v15587_v2 }
 0x2af   : > { %v6867_v25 = vsel %vm6865_vm14, %v15114_v36, %v18730_v63  ;;  %v6870_v40 = vsel %vm6868_vm5, %v18731_v15, %v15121_v61  ;;  %v1978_v55 = vsel %vm11714_vm15, 0, %v11713_v62  ;;  %vm5422_vm8 = vcmp.lt.s32.totalorder %v15503_v60, 2 }
 0x2b0   : > { %v6871_v7 = vsel %vm6864_vm12, %v6867_v25, %v6870_v40  ;;  %v3466_v36 = vsel %vm3455_vm2, nan, %v3465_v35  ;;  %v1979_v61 = vsub.s32 32, %v1978_v55  ;;  %v1980_v46 = vshll.u32 %v15565_v49, %v1978_v55 }
 0x2b1   : > { %v1983_v45 = vsub.s32 4294967266, %v1978_v55  ;;  %v15640_v41 = vpack.c.bf16 %v3466_v36, %v1802_v33  ;;  %v3630_v58 = vsel %vm3628_vm13, %v3629_v31, %v15588_v54  ;;  %v6872_v39 = vsel %vm3559_vm10, nan, %v6871_v7 }
 0x2b2   : > { %vm5423_vm4 = vcmp.eq.s32.totalorder %v15503_v60, 0  ;;  %v1981_v43 = vshrl.u32 %v1963_v29, %v1979_v61  ;;  %v3631_v11 = vadd.s32 %v3630_v58, %v3626_v8  ;;  %v15646_v48 = vpack.c.bf16 %v6872_v39, %v5224_v26 }
 0x2b3   : > { %18732 = vst [vmem:[#allocation30_spill] sm:$0xff] %v15640_v41  ;;  %v1984_v44 = vadd.s32 127, %v1983_v45  ;;  %7969 = vmatpush1.bf16.msra.mxu0 %v15640_v41  ;;  %v18734_v17 = vxor.u32 2147483648, %v15228_v24  ;;  %vm5426_vm1 = vcmp.eq.s32.totalorder %v15503_v60, 2  ;;  %vm7070_vm11 = vcmp.lt.s32.totalorder %v15509_v4, 2 }
 0x2b4   : > { %18733 = vst [vmem:[#allocation31_spill] sm:$0xff] %v15646_v48  ;;  %vm7071_vm6 = vcmp.eq.s32.totalorder %v15509_v4, 0  ;;  %v1982_v12 = vor.u32 %v1981_v43, %v1980_v46  ;;  %v3632_v33 = vadd.s32 536870912, %v3631_v11  ;;  %7970 = vmatprep.subr.bf16.mxu0 %v15646_v48  ;;  %v18735_v29 = vxor.u32 2147483648, %v15222_v51 }
 0x2b5   : > { %v5425_v49 = vsel %vm5423_vm4, %v15222_v51, %v18734_v17  ;;  %v1985_v54 = vshll.u32 %v1984_v44, 23  ;;  %v18736_v62 = vxor.u32 2147483648, %v15383_v27  ;;  %vm7074_vm10 = vcmp.eq.s32.totalorder %v15509_v4, 2 }
 0x2b6   : > { %v5428_v47 = vsel %vm5426_vm1, %v18735_v29, %v15228_v24  ;;  %v5112_v31 = vand.u32 3, %v15388_v37  ;;  %v1989_v25 = vcvt.s32.f32 %v1982_v12  ;;  %v1993_v15 = vsub.s32 4, %v15540_v52 }
 0x2b7   : > { %v5429_v8 = vsel %vm5422_vm8, %v5425_v49, %v5428_v47  ;;  %v7073_v50 = vsel %vm7071_vm6, %v15376_v1, %v18736_v62  ;;  %v1986_v63 = vor.u32 4788187, %v1985_v54  ;;  %v3633_v40 = vshrl.u32 %v3632_v33, 30  ;;  %v496_v33 = vld [vmem:[%s12676_s17 + $0x18] sm:$0xff] }
 0x2b8   : > { %v5430_v51 = vsel %vm2103_vm7, nan, %v5429_v8  ;;  %v18737_v24 = vxor.u32 2147483648, %v15376_v1  ;;  %vm5114_vm3 = vcmp.eq.s32.totalorder %v5112_v31, 0  ;;  %vm5117_vm9 = vcmp.eq.s32.totalorder %v5112_v31, 2 }
 0x2b9   : > { %v1987_v59 = vand.u32 2147483647, %v1986_v63  ;;  %v3634_v26 = vshll.u32 %v3633_v40, 30  ;;  %vm5113_vm12 = vcmp.lt.s32.totalorder %v5112_v31, 2  ;;  %vm18738_vm14 = vweird.f32 %v14840_v53 }
 0x2ba   : > { %v7076_v60 = vsel %vm7074_vm10, %v18737_v24, %v15383_v27  ;;  %v18739_v35 = vxor.u32 2147483648, %v15505_v42  ;;  %v18740_v55 = vxor.u32 2147483648, %v15494_v23  ;;  %v6760_v27 = vand.u32 3, %v15459_v13 }
 0x2bb   : > { %v7077_v7 = vsel %vm7070_vm11, %v7073_v50, %v7076_v60  ;;  %v1990_v36 = vmul.f32 %v1989_v25, %v1987_v59  ;;  %v3635_v61 = vsub.s32 %v3631_v11, %v3634_v26  ;;  %v18742_v4 = vand.u32 2147483647, %v15368_v30 }
 0x2bc   : > { %v7078_v37 = vsel %vm18738_vm14, nan, %v7077_v7  ;;  %v5116_v19 = vsel %vm5114_vm3, %v15494_v23, %v18739_v35  ;;  %v5119_v1 = vsel %vm5117_vm9, %v18740_v55, %v15505_v42  ;;  %vm1909_vm5 = vcmp.lt.s32.totalorder %v15368_v30, 0 }
 0x2bd   : > { %v15683_v46 = vpack.c.bf16 %v7078_v37, %v5430_v51  ;;  %vm15687_vm7 = vcmp.le.f32.partialorder %v18742_v4, 0.7853982  ;;  %vm6762_vm15 = vcmp.eq.s32.totalorder %v6760_v27, 0  ;;  %v1991_v53 = vxor.u32 2147483648, %v1990_v36 }
 0x2be   : > { %v3637_v58 = vsub.s32 0, %v3635_v61  ;;  %v5120_v39 = vsel %vm5113_vm12, %v5116_v19, %v5119_v1  ;;  %vm6761_vm13 = vcmp.lt.s32.totalorder %v6760_v27, 2  ;;  %v1994_v13 = vsel %vm1909_vm5, %v1993_v15, %v15540_v52 }
 0x2bf   : > { %18741 = vst [vmem:[#allocation32_spill] sm:$0xff] %v15683_v46  ;;  %v6764_v23 = vsel %vm6762_vm15, %v15592_v20, %v3460_v14  ;;  %vm6765_vm8 = vcmp.eq.s32.totalorder %v6760_v27, 2  ;;  %v1992_v42 = vsel %vm1909_vm5, %v1991_v53, %v1990_v36  ;;  %v5121_v17 = vsel %vm1791_vm0, nan, %v5120_v39 }
 0x2c0   : > { %v11776_v43 = vmin.u32 %v3637_v58, %v3635_v61  ;;  %v6767_v44 = vsel %vm6765_vm8, %v3463_v18, %v15600_v10  ;;  %v1995_v11 = vsel %vm15687_vm7, %v15368_v30, %v1992_v42  ;;  %v1996_v49 = vsel %vm15687_vm7, 0, %v1994_v13  ;;  %v492_v18 = vld [vmem:[%s12671_s14 + $0x18] sm:$0xff]  ;;  %s18321_s14 = scalar_lea.vmem %s18450_s13, %s11670_s16 }
 0x2c1   : > { %v6768_v52 = vsel %vm6761_vm13, %v6764_v23, %v6767_v44  ;;  %12385 = vcosq.f32 %v1995_v11  ;;  %v3657_v12 = vsub.s32 4, %v3633_v40  ;;  %v2000_v29 = vadd.s32 3, %v1996_v49 }
 0x2c2   : > { %v3639_v14 = vclz %v11776_v43  ;;  %v6769_v54 = vsel %vm3455_vm2, nan, %v6768_v52  ;;  %12387 = vsinq.f32 %v1995_v11  ;;  %vm3573_vm4 = vcmp.lt.s32.totalorder %v15427_v32, 0 }
 0x2c3   : > { %v15709_v10 = vpack.c.bf16 %v6769_v54, %v5121_v17  ;;  %v15715_v21 = vpack.c.bf16 %v14603_v6, %v14603_v6  ;;  %v7531_v47 = vpack.c.bf16 %v14597_v38, %v14597_v38  ;;  %v3627_v57 = vadd.s32 %v15587_v2, %v15605_v28 }
 0x2c4   : > { %v11777_v20 = vadd.s32 4294967294, %v3639_v14  ;;  %v559_v8 = vrot.slane %v492_v18, %v12666_v5  ;;  %v640_v62 = vcombine.low %v496_v33, %v496_v33  ;;  %v3658_v31 = vsel %vm3573_vm4, %v3657_v12, %v3633_v40 }
 0x2c5   : > { %18745 = vst [vmem:[#allocation33_spill] sm:$0xff] %v15709_v10  ;;  %18746 = vst [vmem:[#allocation34_spill] sm:$0xff] %v15715_v21  ;;  %7971 = vmatpush1.bf16.msra.mxu0 %v15709_v10  ;;  %vm18747_vm2 = vcmask 1041408   ;;  %v552_v38 = vcombine.high %v492_v18, %v492_v18  ;;  %v18750_v63 = vand.u32 2147483647, %v15427_v32  ;;  %v654_v60 = vrot.slane %v496_v33, %v12666_v5 }
 0x2c6   : > { %vm11778_vm0 = vcmp.lt.s32.totalorder %v11777_v20, 0  ;;  %11951 = vmatprep.subr.msk.bf16.mxu0 %vm18747_vm2, %v15715_v21  ;;  %vm18748_vm1 = vmmov %vm18747_vm2  ;;  %v567_v51 = vcombine.high %v559_v8, %v559_v8  ;;  %v647_v24 = vrot.slane %v640_v62, %v12666_v5  ;;  %v15739_v59 = vand.u32 3, %v2000_v29 }
 0x2c7   : > { %v3642_v50 = vsel %vm11778_vm0, 0, %v11777_v20  ;;  %v15728_v6 = vsel %vm18748_vm1, %v7531_v47, 0  ;;  %vm15732_vm11 = vcmp.le.f32.partialorder %v18750_v63, 0.7853982  ;;  %v566_v40 = vrot.slane %v552_v38, %v12666_v5  ;;  %vm18753_vm6 = vmmov %vm18748_vm1  ;;  %v15788_v38 = vld [vmem:[%s18440_s3 + $0x8] sm:$0xff]  }
 0x2c8   : > { %18749 = vst [vmem:[#allocation35_spill] sm:$0xff] %v15728_v6  ;;  %v3643_v28 = vsub.s32 32, %v3642_v50  ;;  %v3644_v25 = vshll.u32 %v3635_v61, %v3642_v50  ;;  %v3647_v15 = vsub.s32 4294967266, %v3642_v50  ;;  %v3660_v37 = vsel %vm15732_vm11, 0, %v3658_v31  ;;  %vm18754_vm10 = vmmov %vm18748_vm1  ;;  %v15753_v61 = vld [vmem:[%s18440_s3] sm:$0xff]  }
 0x2c9   : > { %7973 = vmatpush1.bf16.msra.mxu0 %v15728_v6  ;;  %v655_v35 = vcombine.high %v647_v24, %v647_v24  ;;  %v15745_v19 = vsel %vm18753_vm6, %v559_v8, %v647_v24  ;;  %v15748_v55 = vsel %vm18754_vm10, %v566_v40, %v654_v60  ;;  %v3664_v5 = vadd.s32 3, %v3660_v37  ;;  %vm18757_vm9 = vmmov %vm18748_vm1 }
 0x2ca   : > { %v3645_v26 = vshrl.u32 %v3627_v57, %v3643_v28  ;;  %v3648_v7 = vadd.s32 127, %v3647_v15  ;;  %18755 = vst [vmem:[#allocation36_spill] sm:$0xff] %v15748_v55  ;;  %vm18756_vm3 = vcmask 293888   ;;  %vm2002_vm12 = vcmp.lt.s32.totalorder %v15739_v59, 2  ;;  %vm18760_vm8 = vmmov %vm18748_vm1 }
 0x2cb   : > { %v12386_v36 = vpop.eup %12385  ;;  %v15758_v4 = vsel %vm18757_vm9, %v567_v51, %v655_v35  ;;  %v5318_v39 = vand.u32 3, %v1996_v49  ;;  %v568_v43 = vcombine.high %v566_v40, %v566_v40  ;;  %v656_v44 = vcombine.high %v654_v60, %v654_v60  ;;  %vm18762_vm1 = vmmov %vm18756_vm3 }
 0x2cc   : > { %v3646_v1 = vor.u32 %v3645_v26, %v3644_v25  ;;  %v3649_v27 = vshll.u32 %v3648_v7, 23  ;;  %11952 = vmatmul.mubr.msk.bf16.vlgmr.msra.gmra.mrb[32].mxu0 %vm18756_vm3, %v15753_v61  ;;  %v12388_v45 = vpop.eup %12387  ;;  %v703_v13 = vmul.f32 2.0, %v15758_v4  ;;  %v719_v23 = vmul.f32 4.0, %v15758_v4 }
 0x2cd   : > { %8010 = vmatprep.mubr.bf16.mxu0 %v18673_v0  ;;  %v735_v42 = vmul.f32 8.0, %v15758_v4  ;;  %vm2003_vm14 = vcmp.eq.s32.totalorder %v15739_v59, 0  ;;  %v2007_v11 = vxor.u32 2147483648, %v12386_v36  ;;  %v2004_v14 = vxor.u32 2147483648, %v12388_v45 }
 0x2ce   : > { %v3650_v53 = vor.u32 4788187, %v3649_v27  ;;  %v3653_v58 = vcvt.s32.f32 %v3646_v1  ;;  %v767_v52 = vrot.slane %v703_v13, 4  ;;  %vm2006_vm7 = vcmp.eq.s32.totalorder %v15739_v59, 2 }
 0x2cf   : > { %v15767_v12 = vand.u32 3, %v3660_v37  ;;  %v815_v49 = vrot.slane %v735_v42, 4  ;;  %v15769_v33 = vand.u32 3, %v3664_v5  ;;  %vm5323_vm5 = vcmp.eq.s32.totalorder %v5318_v39, 2  ;;  %v18763_v37 = vld [vmem:[#allocation28_spill] sm:$0xff] }
 0x2d0   : > { %v3651_v17 = vand.u32 2147483647, %v3650_v53  ;;  %vm18758_vm15 = vcmask 1043456   ;;  %v15781_v57 = vsel %vm18760_vm8, %v568_v43, %v656_v44  ;;  %v2008_v8 = vsel %vm2006_vm7, %v2007_v11, %v12388_v45  ;;  %vm18766_vm7 = vmmov %vm18760_vm8 }
 0x2d1   : > { %v15773_v20 = vsel %vm18758_vm15, %v15758_v4, %v767_v52  ;;  %vm18759_vm13 = vmmov %vm18758_vm15  ;;  %18761 = vst [vmem:[#allocation37_spill] sm:$0xff] %v15781_v57  ;;  %vm5319_vm0 = vcmp.lt.s32.totalorder %v5318_v39, 2  ;;  %vm5320_vm2 = vcmp.eq.s32.totalorder %v5318_v39, 0  ;;  %v2005_v50 = vsel %vm2003_vm14, %v12386_v36, %v2004_v14  ;;  %v18764_v39 = vld [vmem:[#allocation24_spill] sm:$0xff] }
 0x2d2   : > { %v3654_v54 = vmul.f32 %v3653_v58, %v3651_v17  ;;  %v15776_v18 = vsel %vm18759_vm13, %v719_v23, %v815_v49  ;;  %v2219_v29 = vand.u32 2147483647, %v15773_v20  ;;  %v2222_v47 = vand.u32 2139095040, %v15773_v20  ;;  %v15840_v17 = vld [vmem:[%s18440_s3 + $0x10] sm:$0xff]   ;;  %vm18768_vm13 = vmmov %vm18762_vm1 }
 0x2d3   : > { %v5325_v31 = vsel %vm5323_vm5, %v2007_v11, %v12388_v45  ;;  %v3886_v28 = vand.u32 2139095040, %v15776_v18  ;;  %v18530_v51 = vand.u32 2147483647, %v15776_v18  ;;  %v705_v24 = vmul.f32 2.0, %v15781_v57 }
 0x2d4   : > { %v3655_v62 = vxor.u32 2147483648, %v3654_v54  ;;  %11953 = vmatmul.mubr.msk.bf16.gmra.mrb[36].mxu0 %vm18762_vm1, %v15788_v38  ;;  %v2223_v63 = vshrl.u32 %v2222_v47, 23  ;;  %v2226_v15 = vand.u32 8388607, %v2219_v29  ;;  %v5322_v60 = vsel %vm5320_vm2, %v12386_v36, %v2004_v14 }
 0x2d5   : > { %8020 = vmatprep.mubr.bf16.mxu0 %v18673_v0  ;;  %v3887_v7 = vshrl.u32 %v3886_v28, 23  ;;  %vm1999_vm6 = vweird.f32 %v15368_v30  ;;  %v7533_v35 = vpack.c.bf16 %v18763_v37, %v18763_v37  ;;  %v2009_v1 = vsel %vm2002_vm12, %v2005_v50, %v2008_v8 }
 0x2d6   : > { %v3656_v25 = vsel %vm3573_vm4, %v3655_v62, %v3654_v54  ;;  %v11723_v26 = vadd.s32 4294967169, %v2223_v63  ;;  %vm3670_vm4 = vcmp.eq.s32.totalorder %v15769_v33, 2  ;;  %v5326_v2 = vsel %vm5319_vm0, %v5322_v60, %v5325_v31 }
 0x2d7   : > { %v3659_v40 = vsel %vm15732_vm11, %v15427_v32, %v3656_v25  ;;  %v11787_v5 = vadd.s32 4294967169, %v3887_v7  ;;  %v2227_v45 = vor.u32 8388608, %v2226_v15  ;;  %v15812_v36 = vand.u32 8388607, %v18530_v51 }
 0x2d8   : > { %12389 = vcosq.f32 %v3659_v40  ;;  %v2229_v27 = vadd.s32 1, %v11723_v26  ;;  %v769_v53 = vrot.slane %v705_v24, 4  ;;  %vm3667_vm11 = vcmp.eq.s32.totalorder %v15769_v33, 0 }
 0x2d9   : > { %12391 = vsinq.f32 %v3659_v40  ;;  %vm6968_vm10 = vcmp.eq.s32.totalorder %v15767_v12, 0  ;;  %vm6971_vm3 = vcmp.eq.s32.totalorder %v15767_v12, 2  ;;  %v3893_v59 = vadd.s32 1, %v11787_v5 }
 0x2da   : > { %vm2230_vm9 = vcmp.gt.s32.totalorder %v2229_v27, 0  ;;  %v15819_v58 = vsel %vm1999_vm6, nan, %v2009_v1  ;;  %vm3666_vm12 = vcmp.lt.s32.totalorder %v15769_v33, 2  ;;  %vm6967_vm14 = vcmp.lt.s32.totalorder %v15767_v12, 2 }
 0x2db   : > { %v15825_v13 = vpack.c.bf16 %v18764_v39, %v18764_v39  ;;  %v15828_v23 = vsel %vm18766_vm7, %v7533_v35, 0  ;;  %v2231_v42 = vsel %vm2230_vm9, %v2229_v27, 0  ;;  %vm3663_vm5 = vweird.f32 %v15427_v32  ;;  %vm18770_vm9 = vmmov %vm18768_vm13 }
 0x2dc   : > { %18767 = vst [vmem:[#allocation24_spill] sm:$0xff] %v15828_v23  ;;  %v15833_v43 = vsel %vm1999_vm6, nan, %v5326_v2  ;;  %v15835_v44 = vshrl.u32 %v2231_v42, 5  ;;  %v2233_v11 = vand.u32 31, %v2231_v42  ;;  %vm3894_vm15 = vcmp.gt.s32.totalorder %v3893_v59, 0  ;;  %11954 = vmatmul.mubr.msk.bf16.gmra.mrb[40].mxu0 %vm18768_vm13, %v15840_v17  ;;  %v15880_v42 = vld [vmem:[%s18440_s3 + $0x18] sm:$0xff]  }
 0x2dd   : > { %18765 = vst [vmem:[#allocation28_spill] sm:$0xff] %v15825_v13  ;;  %v15844_v52 = vshll.u32 %v2227_v45, 8  ;;  %v3891_v14 = vor.u32 8388608, %v15812_v36  ;;  %v3895_v49 = vsel %vm3894_vm15, %v3893_v59, 0  ;;  %vm18769_vm8 = vcmask 1043456   ;;  %8030 = vmatprep.mubr.bf16.mxu0 %v18673_v0 }
 0x2de   : > { %v15849_v30 = vsel %vm18769_vm8, %v15781_v57, %v769_v53  ;;  %v2234_v54 = vsub.s32 32, %v2233_v11  ;;  %v2236_v47 = vshll.u32 %v18601_v3, %v2233_v11  ;;  %v2239_v8 = vshll.u32 %v18602_v16, %v2233_v11 }
 0x2df   : > { %v2242_v62 = vshll.u32 %v18603_v9, %v2233_v11  ;;  %v2245_v50 = vshll.u32 %v18604_v22, %v2233_v11  ;;  %v2248_v31 = vshll.u32 %v18687_v56, %v2233_v11  ;;  %vm2251_vm0 = vcmp.lt.s32.totalorder %v15835_v44, 1 }
 0x2e0   : > { %vm2252_vm2 = vcmp.lt.s32.totalorder %v15835_v44, 2  ;;  %v2235_v63 = vshrl.u32 %v18601_v3, %v2234_v54  ;;  %v2237_v28 = vshrl.u32 %v18602_v16, %v2234_v54  ;;  %v2240_v25 = vshrl.u32 %v18603_v9, %v2234_v54 }
 0x2e1   : > { %v2243_v15 = vshrl.u32 %v18604_v22, %v2234_v54  ;;  %v2246_v40 = vshrl.u32 %v18687_v56, %v2234_v54  ;;  %v2249_v60 = vshrl.u32 %v18617_v34, %v2234_v54  ;;  %vm2253_vm1 = vcmp.lt.s32.totalorder %v15835_v44, 3 }
 0x2e2   : > { %v12390_v24 = vpop.eup %12389  ;;  %vm2254_vm6 = vcmp.lt.s32.totalorder %v15835_v44, 4  ;;  %v2238_v37 = vor.u32 %v2237_v28, %v2236_v47  ;;  %v2241_v35 = vor.u32 %v2240_v25, %v2239_v8  ;;  %v15867_v45 = vshrl.u32 %v3895_v49, 5 }
 0x2e3   : > { %v12392_v26 = vpop.eup %12391  ;;  %v3671_v7 = vxor.u32 2147483648, %v12390_v24  ;;  %v2244_v1 = vor.u32 %v2243_v15, %v2242_v62  ;;  %v2247_v5 = vor.u32 %v2246_v40, %v2245_v50  ;;  %v2250_v2 = vor.u32 %v2249_v60, %v2248_v31 }
 0x2e4   : > { %v3668_v27 = vxor.u32 2147483648, %v12392_v26  ;;  %v2255_v59 = vsel %vm2251_vm0, %v2235_v63, %v2238_v37  ;;  %11955 = vmatmul.mubr.msk.bf16.gmra.mrb[44].mxu0 %vm18770_vm9, %v15880_v42  ;;  %v2259_v8 = vsel %vm2251_vm0, %v2238_v37, %v2241_v35  ;;  %v15916_v60 = vshll.u32 %v3891_v14, 8 }
 0x2e5   : > { %v3672_v36 = vsel %vm3670_vm4, %v3671_v7, %v12392_v26  ;;  %v6973_v53 = vsel %vm6971_vm3, %v3671_v7, %v12392_v26  ;;  %v2256_v39 = vsel %vm2254_vm6, %v2244_v1, 2102212464  ;;  %8146 = vmatprep.mubr.bf16.mxu0 %v18673_v0  ;;  %v2260_v63 = vsel %vm2254_vm6, %v2247_v5, 920167782  ;;  %vm18773_vm3 = vmmov %vm18766_vm7 }
 0x2e6   : > { %v3669_v11 = vsel %vm3667_vm11, %v12390_v24, %v3668_v27  ;;  %v6970_v54 = vsel %vm6968_vm10, %v12390_v24, %v3668_v27  ;;  %v2257_v47 = vsel %vm2253_vm1, %v2241_v35, %v2256_v39  ;;  %v2261_v15 = vsel %vm2253_vm1, %v2244_v1, %v2260_v63  ;;  %vm18774_vm7 = vmmov %vm18770_vm9 }
 0x2e7   : > { %v3673_v62 = vsel %vm3666_vm12, %v3669_v11, %v3672_v36  ;;  %v6974_v50 = vsel %vm6967_vm14, %v6970_v54, %v6973_v53  ;;  %v2258_v31 = vsel %vm2252_vm2, %v2255_v59, %v2257_v47  ;;  %v2263_v33 = vsel %vm2251_vm0, %v2241_v35, %v2244_v1  ;;  %vm18775_vm13 = vmmov %vm18774_vm7 }
 0x2e8   : > { %v3674_v28 = vsel %vm3663_vm5, nan, %v3673_v62  ;;  %v6975_v25 = vsel %vm3663_vm5, nan, %v6974_v50  ;;  %v2262_v24 = vsel %vm2252_vm2, %v2259_v8, %v2261_v15  ;;  %v2264_v40 = vsel %vm2254_vm6, %v2250_v2, 1326507024 }
 0x2e9   : > { %v15910_v12 = vpack.c.bf16 %v3674_v28, %v15819_v58  ;;  %v2265_v32 = vsel %vm2253_vm1, %v2247_v5, %v2264_v40  ;;  %v15921_v26 = vmul.u32.u64.low %v15844_v52, %v2262_v24  ;;  %v15922_v7 = vmul.u32.u64.high %v15844_v52, %v2262_v24, %v15921_v26  ;;  %vm18776_vm1 = vmmov %vm18774_vm7 }
 0x2ea   : > { %v2430_v37 = vand.u32 2139095040, %v15849_v30  ;;  %v15928_v58 = vpack.c.bf16 %v6975_v25, %v15833_v43  ;;  %v2266_v35 = vsel %vm2252_vm2, %v2263_v33, %v2265_v32  ;;  %v2274_v14 = vmul.u32 %v15844_v52, %v2258_v31 }
 0x2eb   : > { %18771 = vst [vmem:[#allocation38_spill] sm:$0xff] %v15910_v12  ;;  %8042 = vmatpush1.bf16.msra.mxu1 %v15910_v12  ;;  %v3897_v1 = vand.u32 31, %v3895_v49  ;;  %v15935_v27 = vmul.u32.u64.low %v15844_v52, %v2266_v35  ;;  %v15936_v5 = vmul.u32.u64.high %v15844_v52, %v2266_v35, %v15935_v27  ;;  %vm3915_vm4 = vcmp.lt.s32.totalorder %v15867_v45, 1 }
 0x2ec   : > { %18772 = vst [vmem:[#allocation39_spill] sm:$0xff] %v15928_v58  ;;  %8043 = vmatprep.subr.bf16.mxu1 %v15683_v46  ;;  %vm3916_vm11 = vcmp.lt.s32.totalorder %v15867_v45, 2  ;;  %v2277_v53 = vadd.s32 1, %v15922_v7  ;;  %vm3917_vm10 = vcmp.lt.s32.totalorder %v15867_v45, 3  ;;  %vm3918_vm14 = vcmp.lt.s32.totalorder %v15867_v45, 4 }
 0x2ed   : > { %v3898_v2 = vsub.s32 32, %v3897_v1  ;;  %v3900_v43 = vshll.u32 %v18601_v3, %v3897_v1  ;;  %v3903_v36 = vshll.u32 %v18602_v16, %v3897_v1  ;;  %v3906_v44 = vshll.u32 %v18603_v9, %v3897_v1 }
 0x2ee   : > { %v3909_v49 = vshll.u32 %v18604_v22, %v3897_v1  ;;  %v3912_v59 = vshll.u32 %v18687_v56, %v3897_v1  ;;  %vm2276_vm12 = vc.u32 %v15936_v5, %v15921_v26  ;;  %v2431_v33 = vshrl.u32 %v2430_v37, 23 }
 0x2ef   : > { %8044 = vmatpush1.bf16.msra.mxu1 %v15928_v58  ;;  %v3899_v52 = vshrl.u32 %v18601_v3, %v3898_v2  ;;  %v3901_v39 = vshrl.u32 %v18602_v16, %v3898_v2  ;;  %v3904_v11 = vshrl.u32 %v18603_v9, %v3898_v2  ;;  %v3907_v54 = vshrl.u32 %v18604_v22, %v3898_v2 }
 0x2f0   : > { %11956 = vmatprep.subr.msk.bf16.mxu1 %vm18773_vm3, %v15825_v13  ;;  %v3910_v47 = vshrl.u32 %v18687_v56, %v3898_v2  ;;  %v3913_v8 = vshrl.u32 %v18617_v34, %v3898_v2  ;;  %v2278_v62 = vsel %vm2276_vm12, %v2277_v53, %v15922_v7  ;;  %vm2221_vm0 = vcmp.lt.s32.totalorder %v15773_v20, 0  ;;  %vm18779_vm12 = vmmov %vm18776_vm1 }
 0x2f1   : > { %v3902_v50 = vor.u32 %v3901_v39, %v3900_v43  ;;  %v3905_v31 = vor.u32 %v3904_v11, %v3903_v36  ;;  %v3908_v63 = vor.u32 %v3907_v54, %v3906_v44  ;;  %v2279_v28 = vadd.s32 %v2278_v62, %v2274_v14 }
 0x2f2   : > { %v3911_v25 = vor.u32 %v3910_v47, %v3909_v49  ;;  %v3914_v15 = vor.u32 %v3913_v8, %v3912_v59  ;;  %v737_v43 = vmul.f32 8.0, %v15781_v57  ;;  %v11731_v36 = vadd.s32 4294967169, %v2431_v33 }
 0x2f3   : > { %8046 = vmatpush1.bf16.msra.mxu1 %v15828_v23  ;;  %v3919_v24 = vsel %vm3915_vm4, %v3899_v52, %v3902_v50  ;;  %v3920_v40 = vsel %vm3918_vm14, %v3908_v63, 2102212464  ;;  %v3923_v32 = vsel %vm3915_vm4, %v3902_v50, %v3905_v31  ;;  %v3927_v7 = vsel %vm3915_vm4, %v3905_v31, %v3908_v63 }
 0x2f4   : > { %v2280_v35 = vadd.s32 536870912, %v2279_v28  ;;  %v3921_v14 = vsel %vm3917_vm10, %v3905_v31, %v3920_v40  ;;  %v3924_v37 = vsel %vm3918_vm14, %v3911_v25, 920167782  ;;  %v3928_v1 = vsel %vm3918_vm14, %v3914_v15, 1326507024 }
 0x2f5   : > { %v3925_v27 = vsel %vm3917_vm10, %v3908_v63, %v3924_v37  ;;  %v3929_v2 = vsel %vm3917_vm10, %v3911_v25, %v3928_v1  ;;  %v3922_v53 = vsel %vm3916_vm11, %v3919_v24, %v3921_v14  ;;  %v2437_v47 = vadd.s32 1, %v11731_v36 }
 0x2f6   : > { %11957 = vmatmul.mubr.msk.bf16.vlgmr.msra.gmra.mrb[32].mxu1 %vm18774_vm7, %v15753_v61  ;;  %v2281_v44 = vshrl.u32 %v2280_v35, 30  ;;  %v3926_v49 = vsel %vm3916_vm11, %v3923_v32, %v3925_v27  ;;  %v3930_v59 = vsel %vm3916_vm11, %v3927_v7, %v3929_v2  ;;  %v721_v8 = vmul.f32 4.0, %v15781_v57 }
 0x2f7   : > { %8083 = vmatprep.mubr.bf16.mxu1 %v18673_v0  ;;  %v15990_v52 = vmul.u32.u64.low %v15916_v60, %v3930_v59  ;;  %v15991_v39 = vmul.u32.u64.high %v15916_v60, %v3930_v59, %v15990_v52  ;;  %v15994_v11 = vmul.u32.u64.low %v15916_v60, %v3926_v49  ;;  %v15995_v54 = vmul.u32.u64.high %v15916_v60, %v3926_v49, %v15994_v11 }
 0x2f8   : > { %v2282_v61 = vshll.u32 %v2281_v44, 30  ;;  %v3938_v45 = vmul.u32 %v15916_v60, %v3922_v53  ;;  %v817_v50 = vrot.slane %v737_v43, 4  ;;  %vm2438_vm5 = vcmp.gt.s32.totalorder %v2437_v47, 0 }
 0x2f9   : > { %vm3940_vm15 = vc.u32 %v15991_v39, %v15994_v11  ;;  %v3941_v31 = vadd.s32 1, %v15995_v54  ;;  %v18529_v25 = vand.u32 2147483647, %v15849_v30  ;;  %v2439_v15 = vsel %vm2438_vm5, %v2437_v47, 0 }
 0x2fa   : > { %v15999_v62 = vsub.s32 %v2279_v28, %v2282_v61  ;;  %v2441_v24 = vand.u32 31, %v2439_v15  ;;  %v16012_v40 = vsel %vm18769_vm8, %v721_v8, %v817_v50  ;;  %v16015_v32 = vmul.f32 2.0, %v15745_v19 }
 0x2fb   : > { %v3942_v33 = vsel %vm3940_vm15, %v3941_v31, %v15995_v54  ;;  %v2275_v7 = vadd.s32 %v15921_v26, %v15936_v5  ;;  %v16021_v14 = vmul.f32 8.0, %v15745_v19  ;;  %v2305_v37 = vsub.s32 4, %v2281_v44 }
 0x2fc   : > { %v2285_v63 = vsub.s32 0, %v15999_v62  ;;  %v3943_v28 = vadd.s32 %v3942_v33, %v3938_v45  ;;  %v2442_v35 = vsub.s32 32, %v2441_v24  ;;  %v2434_v1 = vand.u32 8388607, %v18529_v25 }
 0x2fd   : > { %v2444_v43 = vshll.u32 %v18601_v3, %v2441_v24  ;;  %v4094_v26 = vand.u32 2139095040, %v16012_v40  ;;  %v2447_v53 = vshll.u32 %v18602_v16, %v2441_v24  ;;  %v2450_v59 = vshll.u32 %v18603_v9, %v2441_v24 }
 0x2fe   : > { %11958 = vmatmul.mubr.msk.bf16.gmra.mrb[36].mxu1 %vm18775_vm13, %v15788_v38  ;;  %v11724_v60 = vmin.u32 %v2285_v63, %v15999_v62  ;;  %v3944_v2 = vadd.s32 536870912, %v3943_v28  ;;  %v2445_v36 = vshrl.u32 %v18602_v16, %v2442_v35  ;;  %v2448_v49 = vshrl.u32 %v18603_v9, %v2442_v35  ;;  %vm18784_vm13 = vmmov %vm18769_vm8 }
 0x2ff   : > { %8093 = vmatprep.mubr.bf16.mxu1 %v18673_v0  ;;  %v2451_v54 = vshrl.u32 %v18604_v22, %v2442_v35  ;;  %v2453_v61 = vshll.u32 %v18604_v22, %v2441_v24  ;;  %v2454_v47 = vshrl.u32 %v18687_v56, %v2442_v35  ;;  %v2306_v8 = vsel %vm2221_vm0, %v2305_v37, %v2281_v44 }
 0x300   : > { %v2287_v38 = vclz %v11724_v60  ;;  %v16033_v52 = vshrl.u32 %v3944_v2, 30  ;;  %v2435_v45 = vor.u32 8388608, %v2434_v1  ;;  %v2440_v50 = vshrl.u32 %v2439_v15, 5 }
 0x301   : > { %v2446_v33 = vor.u32 %v2445_v36, %v2444_v43  ;;  %v2456_v60 = vshll.u32 %v18687_v56, %v2441_v24  ;;  %v2457_v27 = vshrl.u32 %v18617_v34, %v2442_v35  ;;  %v2449_v44 = vor.u32 %v2448_v49, %v2447_v53 }
 0x302   : > { %v11725_v5 = vadd.s32 4294967294, %v2287_v38  ;;  %v3946_v63 = vshll.u32 %v16033_v52, 30  ;;  %v2452_v37 = vor.u32 %v2451_v54, %v2450_v59  ;;  %v2455_v15 = vor.u32 %v2454_v47, %v2453_v61 }
 0x303   : > { %vm2459_vm6 = vcmp.lt.s32.totalorder %v2440_v50, 1  ;;  %vm2462_vm9 = vcmp.lt.s32.totalorder %v2440_v50, 4  ;;  %vm16051_vm4 = vcmp.le.f32.partialorder %v2219_v29, 0.7853982  ;;  %vm2461_vm11 = vcmp.lt.s32.totalorder %v2440_v50, 3 }
 0x304   : > { %vm11726_vm2 = vcmp.lt.s32.totalorder %v11725_v5, 0  ;;  %v16046_v51 = vsub.s32 %v3943_v28, %v3946_v63  ;;  %v16057_v28 = vshll.u32 %v2435_v45, 8  ;;  %v2458_v53 = vor.u32 %v2457_v27, %v2456_v60 }
 0x305   : > { %v2290_v31 = vsel %vm11726_vm2, 0, %v11725_v5  ;;  %vm2460_vm10 = vcmp.lt.s32.totalorder %v2440_v50, 2  ;;  %v2467_v29 = vsel %vm2459_vm6, %v2446_v33, %v2449_v44  ;;  %v2468_v49 = vsel %vm2462_vm9, %v2455_v15, 920167782 }
 0x306   : > { %v2291_v38 = vsub.s32 32, %v2290_v31  ;;  %v2292_v2 = vshll.u32 %v15999_v62, %v2290_v31  ;;  %v2295_v25 = vsub.s32 4294967266, %v2290_v31  ;;  %11959 = vmatmul.mubr.msk.bf16.gmra.mrb[40].mxu1 %vm18776_vm1, %v15840_v17  ;;  %v3949_v24 = vsub.s32 0, %v16046_v51 }
 0x307   : > { %8103 = vmatprep.mubr.bf16.mxu1 %v18673_v0  ;;  %v2443_v17 = vshrl.u32 %v18601_v3, %v2442_v35  ;;  %vm3885_vm3 = vcmp.lt.s32.totalorder %v15776_v18, 0  ;;  %v2469_v35 = vsel %vm2461_vm11, %v2452_v37, %v2468_v49  ;;  %v4095_v61 = vshrl.u32 %v4094_v26, 23 }
 0x308   : > { %v2293_v1 = vshrl.u32 %v2275_v7, %v2291_v38  ;;  %v2296_v43 = vadd.s32 127, %v2295_v25  ;;  %v11788_v25 = vmin.u32 %v3949_v24, %v16046_v51  ;;  %v2464_v7 = vsel %vm2462_vm9, %v2452_v37, 2102212464 }
 0x309   : > { %v3939_v47 = vadd.s32 %v15994_v11, %v15991_v39  ;;  %v2463_v45 = vsel %vm2459_vm6, %v2443_v17, %v2446_v33  ;;  %v2471_v31 = vsel %vm2459_vm6, %v2449_v44, %v2452_v37  ;;  %v2465_v60 = vsel %vm2461_vm11, %v2449_v44, %v2464_v7 }
 0x30a   : > { %v2294_v36 = vor.u32 %v2293_v1, %v2292_v2  ;;  %v2297_v5 = vshll.u32 %v2296_v43, 23  ;;  %v3951_v27 = vclz %v11788_v25  ;;  %v2470_v38 = vsel %vm2460_vm10, %v2467_v29, %v2469_v35 }
 0x30b   : > { %v2472_v2 = vsel %vm2462_vm9, %v2458_v53, 1326507024  ;;  %v18780_v26 = vand.u32 2147483647, %v15776_v18  ;;  %v16082_v33 = vmul.u32.u64.low %v16057_v28, %v2470_v38  ;;  %v16083_v37 = vmul.u32.u64.high %v16057_v28, %v2470_v38, %v16082_v33 }
 0x30c   : > { %v2298_v59 = vor.u32 4788187, %v2297_v5  ;;  %v2301_v54 = vcvt.s32.f32 %v2294_v36  ;;  %v11789_v39 = vadd.s32 4294967294, %v3951_v27  ;;  %v2473_v11 = vsel %vm2461_vm11, %v2455_v15, %v2472_v2 }
 0x30d   : > { %vm16076_vm14 = vcmp.le.f32.partialorder %v18780_v26, 0.7853982  ;;  %v3969_v43 = vsub.s32 4, %v16033_v52  ;;  %v11795_v24 = vadd.s32 4294967169, %v4095_v61  ;;  %v2466_v17 = vsel %vm2460_vm10, %v2463_v45, %v2465_v60 }
 0x30e   : > { %v2299_v63 = vand.u32 2147483647, %v2298_v59  ;;  %11960 = vmatmul.mubr.msk.bf16.gmra.mrb[44].mxu1 %vm18779_vm12, %v15880_v42  ;;  %v2474_v42 = vsel %vm2460_vm10, %v2471_v31, %v2473_v11  ;;  %vm11790_vm7 = vcmp.lt.s32.totalorder %v11789_v39, 0  ;;  %v16096_v53 = vsel %vm16051_vm4, 0, %v2306_v8 }
 0x30f   : > { %8219 = vmatprep.mubr.bf16.mxu1 %v18673_v0  ;;  %v16091_v36 = vmul.u32.u64.low %v16057_v28, %v2474_v42  ;;  %v16092_v5 = vmul.u32.u64.high %v16057_v28, %v2474_v42, %v16091_v36  ;;  %v3954_v25 = vsel %vm11790_vm7, 0, %v11789_v39  ;;  %v4101_v7 = vadd.s32 1, %v11795_v24 }
 0x310   : > { %v2302_v44 = vmul.f32 %v2301_v54, %v2299_v63  ;;  %v3955_v29 = vsub.s32 32, %v3954_v25  ;;  %v3956_v49 = vshll.u32 %v16046_v51, %v3954_v25  ;;  %v3959_v59 = vsub.s32 4294967266, %v3954_v25 }
 0x311   : > { %v2485_v54 = vadd.s32 1, %v16083_v37  ;;  %v2482_v35 = vmul.u32 %v16057_v28, %v2466_v17  ;;  %vm4102_vm5 = vcmp.gt.s32.totalorder %v4101_v7, 0  ;;  %v766_v61 = vrot.slane %v16015_v32, 4 }
 0x312   : > { %v2303_v15 = vxor.u32 2147483648, %v2302_v44  ;;  %v3957_v27 = vshrl.u32 %v3939_v47, %v3955_v29  ;;  %v3960_v45 = vadd.s32 127, %v3959_v59  ;;  %v3970_v51 = vsel %vm3885_vm3, %v3969_v43, %v16033_v52 }
 0x313   : > { %v2312_v31 = vadd.s32 3, %v16096_v53  ;;  %vm2484_vm15 = vc.u32 %v16092_v5, %v16082_v33  ;;  %v18783_v28 = vand.u32 2147483647, %v16012_v40  ;;  %v4103_v60 = vsel %vm4102_vm5, %v4101_v7, 0 }
 0x314   : > { %v2304_v50 = vsel %vm2221_vm0, %v2303_v15, %v2302_v44  ;;  %v3958_v32 = vor.u32 %v3957_v27, %v3956_v49  ;;  %v3961_v38 = vshll.u32 %v3960_v45, 23  ;;  %v2486_v62 = vsel %vm2484_vm15, %v2485_v54, %v16083_v37 }
 0x315   : > { %v2307_v8 = vsel %vm16051_vm4, %v15773_v20, %v2304_v50  ;;  %v4098_v63 = vand.u32 8388607, %v18783_v28  ;;  %v16118_v47 = vsel %vm16076_vm14, 0, %v3970_v51  ;;  %v2487_v52 = vadd.s32 %v2486_v62, %v2482_v35 }
 0x316   : > { %12393 = vcosq.f32 %v2307_v8  ;;  %v4105_v2 = vand.u32 31, %v4103_v60  ;;  %v3962_v26 = vor.u32 4788187, %v3961_v38  ;;  %v3965_v39 = vcvt.s32.f32 %v3958_v32 }
 0x317   : > { %12395 = vsinq.f32 %v2307_v8  ;;  %v16121_v11 = vmul.f32 4.0, %v15745_v19  ;;  %v16123_v44 = vand.u32 3, %v2312_v31  ;;  %v2488_v43 = vadd.s32 536870912, %v2487_v52 }
 0x318   : > { %v4106_v42 = vsub.s32 32, %v4105_v2  ;;  %v3963_v17 = vand.u32 2147483647, %v3962_v26  ;;  %v3976_v37 = vadd.s32 3, %v16118_v47  ;;  %v4099_v36 = vor.u32 8388608, %v4098_v63 }
 0x319   : > { %v16129_v15 = vsel %vm18784_vm13, %v15745_v19, %v766_v61  ;;  %v16131_v25 = vshrl.u32 %v2488_v43, 30  ;;  %v4108_v7 = vshll.u32 %v18601_v3, %v4105_v2  ;;  %v4111_v29 = vshll.u32 %v18602_v16, %v4105_v2 }
 0x31a   : > { %v4117_v49 = vshll.u32 %v18604_v22, %v4105_v2  ;;  %v3966_v59 = vmul.f32 %v3965_v39, %v3963_v17  ;;  %v4109_v54 = vshrl.u32 %v18602_v16, %v4106_v42  ;;  %v4112_v50 = vshrl.u32 %v18603_v9, %v4106_v42 }
 0x31b   : > { %v4118_v35 = vshrl.u32 %v18687_v56, %v4106_v42  ;;  %vm2315_vm8 = vcmp.eq.s32.totalorder %v16123_v44, 0  ;;  %v2490_v61 = vshll.u32 %v16131_v25, 30  ;;  %v4104_v8 = vshrl.u32 %v4103_v60, 5 }
 0x31c   : > { %v4114_v27 = vshll.u32 %v18603_v9, %v4105_v2  ;;  %v4115_v45 = vshrl.u32 %v18604_v22, %v4106_v42  ;;  %vm2318_vm0 = vcmp.eq.s32.totalorder %v16123_v44, 2  ;;  %v3967_v51 = vxor.u32 2147483648, %v3966_v59 }
 0x31d   : > { %v4120_v31 = vshll.u32 %v18687_v56, %v4105_v2  ;;  %v4121_v28 = vshrl.u32 %v18617_v34, %v4106_v42  ;;  %v16146_v63 = vand.u32 3, %v3976_v37  ;;  %v16148_v32 = vsub.s32 %v2487_v52, %v2490_v61 }
 0x31e   : > { %v4107_v38 = vshrl.u32 %v18601_v3, %v4106_v42  ;;  %v16151_v62 = vshll.u32 %v4099_v36, 8  ;;  %v3968_v26 = vsel %vm3885_vm3, %v3967_v51, %v3966_v59  ;;  %v4110_v39 = vor.u32 %v4109_v54, %v4108_v7 }
 0x31f   : > { %v4113_v43 = vor.u32 %v4112_v50, %v4111_v29  ;;  %v4119_v17 = vor.u32 %v4118_v35, %v4117_v49  ;;  %vm2314_vm2 = vcmp.lt.s32.totalorder %v16123_v44, 2  ;;  %v3971_v52 = vsel %vm16076_vm14, %v15776_v18, %v3968_v26 }
 0x320   : > { %v16153_v60 = vpop.eup %12393  ;;  %v2493_v2 = vsub.s32 0, %v16148_v32  ;;  %v4116_v42 = vor.u32 %v4115_v45, %v4114_v27  ;;  %vm4123_vm1 = vcmp.lt.s32.totalorder %v4104_v8, 1  ;;  %12397 = vcosq.f32 %v3971_v52 }
 0x321   : > { %v16157_v24 = vpop.eup %12395  ;;  %v4122_v37 = vor.u32 %v4121_v28, %v4120_v31  ;;  %vm4124_vm6 = vcmp.lt.s32.totalorder %v4104_v8, 2  ;;  %vm4126_vm9 = vcmp.lt.s32.totalorder %v4104_v8, 4  ;;  %v18533_v36 = vxor.u32 2147483648, %v16153_v60 }
 0x322   : > { %12399 = vsinq.f32 %v3971_v52  ;;  %v11732_v7 = vmin.u32 %v2493_v2, %v16148_v32  ;;  %vm4125_vm4 = vcmp.lt.s32.totalorder %v4104_v8, 3  ;;  %v18534_v29 = vxor.u32 2147483648, %v16157_v24 }
 0x323   : > { %v4128_v49 = vsel %vm4126_vm9, %v4116_v42, 2102212464  ;;  %v4131_v1 = vsel %vm4123_vm1, %v4110_v39, %v4113_v43  ;;  %v4132_v59 = vsel %vm4126_vm9, %v4119_v17, 920167782  ;;  %vm2311_vm11 = vweird.f32 %v15773_v20 }
 0x324   : > { %vm3979_vm10 = vcmp.eq.s32.totalorder %v16146_v63, 0  ;;  %vm2429_vm3 = vcmp.lt.s32.totalorder %v15849_v30, 0  ;;  %v2483_v54 = vadd.s32 %v16082_v33, %v16092_v5  ;;  %v2495_v50 = vclz %v11732_v7 }
 0x325   : > { %v18535_v35 = vand.u32 2147483647, %v16129_v15  ;;  %v2118_v61 = vand.u32 2139095040, %v16129_v15  ;;  %vm3978_vm12 = vcmp.lt.s32.totalorder %v16146_v63, 2  ;;  %v4127_v27 = vsel %vm4123_vm1, %v4107_v38, %v4110_v39 }
 0x326   : > { %v4129_v45 = vsel %vm4125_vm4, %v4113_v43, %v4128_v49  ;;  %v4133_v51 = vsel %vm4125_vm4, %v4116_v42, %v4132_v59  ;;  %v4135_v31 = vsel %vm4123_vm1, %v4113_v43, %v4116_v42  ;;  %v2320_v33 = vsel %vm2318_vm0, %v18533_v36, %v16157_v24 }
 0x327   : > { %vm3975_vm14 = vweird.f32 %v15776_v18  ;;  %v11733_v5 = vadd.s32 4294967294, %v2495_v50  ;;  %v4134_v28 = vsel %vm4124_vm6, %v4131_v1, %v4133_v51  ;;  %v4136_v26 = vsel %vm4126_vm9, %v4122_v37, 1326507024 }
 0x328   : > { %v2317_v38 = vsel %vm2315_vm8, %v16153_v60, %v18534_v29  ;;  %v4137_v39 = vsel %vm4125_vm4, %v4119_v17, %v4136_v26  ;;  %v16197_v43 = vmul.u32.u64.low %v16151_v62, %v4134_v28  ;;  %v16198_v52 = vmul.u32.u64.high %v16151_v62, %v4134_v28, %v16197_v43 }
 0x329   : > { %vm11734_vm7 = vcmp.lt.s32.totalorder %v11733_v5, 0  ;;  %v4130_v2 = vsel %vm4124_vm6, %v4127_v27, %v4129_v45  ;;  %v4138_v42 = vsel %vm4124_vm6, %v4135_v31, %v4137_v39  ;;  %v2119_v7 = vshrl.u32 %v2118_v61, 23 }
 0x32a   : > { %v18785_v37 = vand.u32 2147483647, %v15849_v30  ;;  %v2498_v1 = vsel %vm11734_vm7, 0, %v11733_v5  ;;  %v2513_v17 = vsub.s32 4, %v16131_v25  ;;  %v16215_v45 = vpop.eup %12397  ;;  %v2321_v61 = vsel %vm2314_vm2, %v2317_v38, %v2320_v33 }
 0x32b   : > { %v16211_v59 = vmul.u32.u64.low %v16151_v62, %v4138_v42  ;;  %v16212_v50 = vmul.u32.u64.high %v16151_v62, %v4138_v42, %v16211_v59  ;;  %v2499_v51 = vsub.s32 32, %v2498_v1  ;;  %v2500_v28 = vshll.u32 %v16148_v32, %v2498_v1 }
 0x32c   : > { %vm16205_vm5 = vcmp.le.f32.partialorder %v18785_v37, 0.7853982  ;;  %v2503_v27 = vsub.s32 4294967266, %v2498_v1  ;;  %v11719_v8 = vadd.s32 4294967169, %v2119_v7  ;;  %vm3982_vm15 = vcmp.eq.s32.totalorder %v16146_v63, 2  ;;  %v16222_v26 = vpop.eup %12399 }
 0x32d   : > { %v4146_v31 = vmul.u32 %v16151_v62, %v4130_v2  ;;  %v4149_v5 = vadd.s32 1, %v16198_v52  ;;  %v18531_v39 = vxor.u32 2147483648, %v16215_v45  ;;  %v2501_v42 = vshrl.u32 %v2483_v54, %v2499_v51 }
 0x32e   : > { %v2504_v37 = vadd.s32 127, %v2503_v27  ;;  %v2125_v32 = vadd.s32 1, %v11719_v8  ;;  %v18532_v7 = vxor.u32 2147483648, %v16222_v26  ;;  %v2514_v44 = vsel %vm2429_vm3, %v2513_v17, %v16131_v25 }
 0x32f   : > { %vm4148_vm13 = vc.u32 %v16212_v50, %v16197_v43  ;;  %v2122_v62 = vand.u32 8388607, %v18535_v35  ;;  %v3984_v33 = vsel %vm3982_vm15, %v18531_v39, %v16222_v26  ;;  %v2502_v38 = vor.u32 %v2501_v42, %v2500_v28 }
 0x330   : > { %v2505_v54 = vshll.u32 %v2504_v37, 23  ;;  %v4150_v2 = vsel %vm4148_vm13, %v4149_v5, %v16198_v52  ;;  %v2322_v1 = vsel %vm2311_vm11, nan, %v2321_v61  ;;  %v3981_v25 = vsel %vm3979_vm10, %v16215_v45, %v18532_v7 }
 0x331   : > { %vm4093_vm8 = vcmp.lt.s32.totalorder %v16012_v40, 0  ;;  %v4151_v17 = vadd.s32 %v4150_v2, %v4146_v31  ;;  %vm2126_vm0 = vcmp.gt.s32.totalorder %v2125_v32, 0  ;;  %v3985_v59 = vsel %vm3978_vm12, %v3981_v25, %v3984_v33 }
 0x332   : > { %v2506_v51 = vor.u32 4788187, %v2505_v54  ;;  %v2509_v28 = vcvt.s32.f32 %v2502_v38  ;;  %v2127_v27 = vsel %vm2126_vm0, %v2125_v32, 0  ;;  %v3986_v52 = vsel %vm3975_vm14, nan, %v3985_v59 }
 0x333   : > { %v4152_v8 = vadd.s32 536870912, %v4151_v17  ;;  %v18788_v61 = vrot.slane %v16021_v14, 4  ;;  %vm18789_vm2 = vcmask 1043456   ;;  %v2129_v42 = vand.u32 31, %v2127_v27 }
 0x334   : > { %v16255_v37 = vpack.c.bf16 %v3986_v52, %v2322_v1  ;;  %v2507_v31 = vand.u32 2147483647, %v2506_v51  ;;  %v16259_v63 = vsel %vm16205_vm5, 0, %v2514_v44  ;;  %v2123_v33 = vor.u32 8388608, %v2122_v62 }
 0x335   : > { %v16253_v5 = vsel %vm18789_vm2, %v16121_v11, %v18788_v61  ;;  %v18791_v32 = vand.u32 2147483647, %v16012_v40  ;;  %v4153_v14 = vshrl.u32 %v4152_v8, 30  ;;  %v2128_v54 = vshrl.u32 %v2127_v27, 5 }
 0x336   : > { %18790 = vst [vmem:[#allocation40_spill] sm:$0xff] %v16255_v37  ;;  %v2130_v2 = vsub.s32 32, %v2129_v42  ;;  %v2132_v11 = vshll.u32 %v18601_v3, %v2129_v42  ;;  %8114 = vmatprep.subr.bf16.mxu0 %v16255_v37  ;;  %v2510_v1 = vmul.f32 %v2509_v28, %v2507_v31  ;;  %v2135_v25 = vshll.u32 %v18602_v16, %v2129_v42 }
 0x337   : > { %vm16263_vm1 = vcmp.le.f32.partialorder %v18791_v32, 0.7853982  ;;  %v2138_v44 = vshll.u32 %v18603_v9, %v2129_v42  ;;  %v2141_v62 = vshll.u32 %v18604_v22, %v2129_v42  ;;  %v4154_v59 = vshll.u32 %v4153_v14, 30 }
 0x338   : > { %v4177_v51 = vsub.s32 4, %v4153_v14  ;;  %v2133_v52 = vshrl.u32 %v18602_v16, %v2130_v2  ;;  %v2144_v61 = vshll.u32 %v18687_v56, %v2129_v42  ;;  %v2511_v8 = vxor.u32 2147483648, %v2510_v1 }
 0x339   : > { %v2136_v27 = vshrl.u32 %v18603_v9, %v2130_v2  ;;  %v2139_v32 = vshrl.u32 %v18604_v22, %v2130_v2  ;;  %v2142_v39 = vshrl.u32 %v18687_v56, %v2130_v2  ;;  %v16277_v28 = vsub.s32 %v4151_v17, %v4154_v59 }
 0x33a   : > { %v2145_v31 = vshrl.u32 %v18617_v34, %v2130_v2  ;;  %v3782_v36 = vand.u32 2139095040, %v16253_v5  ;;  %v2520_v29 = vadd.s32 3, %v16259_v63  ;;  %v4178_v42 = vsel %vm4093_vm8, %v4177_v51, %v4153_v14 }
 0x33b   : > { %v2134_v35 = vor.u32 %v2133_v52, %v2132_v11  ;;  %v16285_v37 = vshll.u32 %v2123_v33, 8  ;;  %v2512_v23 = vsel %vm2429_vm3, %v2511_v8, %v2510_v1  ;;  %v4157_v17 = vsub.s32 0, %v16277_v28 }
 0x33c   : > { %v2137_v59 = vor.u32 %v2136_v27, %v2135_v25  ;;  %v2140_v13 = vor.u32 %v2139_v32, %v2138_v44  ;;  %v2131_v58 = vshrl.u32 %v18601_v3, %v2130_v2  ;;  %v2143_v7 = vor.u32 %v2142_v39, %v2141_v62 }
 0x33d   : > { %v2146_v46 = vor.u32 %v2145_v31, %v2144_v61  ;;  %vm2147_vm6 = vcmp.lt.s32.totalorder %v2128_v54, 1  ;;  %v4147_v12 = vadd.s32 %v16197_v43, %v16212_v50  ;;  %v11796_v14 = vmin.u32 %v4157_v17, %v16277_v28 }
 0x33e   : > { %v3783_v11 = vshrl.u32 %v3782_v36, 23  ;;  %v18794_v33 = vand.u32 2147483647, %v16253_v5  ;;  %v2515_v1 = vsel %vm16205_vm5, %v15849_v30, %v2512_v23  ;;  %v16303_v2 = vsel %vm16263_vm1, 0, %v4178_v42 }
 0x33f   : > { %vm2149_vm9 = vcmp.lt.s32.totalorder %v2128_v54, 3  ;;  %vm2150_vm4 = vcmp.lt.s32.totalorder %v2128_v54, 4  ;;  %v4159_v39 = vclz %v11796_v14  ;;  %vm2148_vm10 = vcmp.lt.s32.totalorder %v2128_v54, 2 }
 0x340   : > { %v16296_v51 = vand.u32 8388607, %v18794_v33  ;;  %v2155_v43 = vsel %vm2147_vm6, %v2134_v35, %v2137_v59  ;;  %v2159_v50 = vsel %vm2147_vm6, %v2137_v59, %v2140_v13  ;;  %v2151_v25 = vsel %vm2147_vm6, %v2131_v58, %v2134_v35 }
 0x341   : > { %v2152_v36 = vsel %vm2150_vm4, %v2140_v13, 2102212464  ;;  %v2156_v44 = vsel %vm2150_vm4, %v2143_v7, 920167782  ;;  %v2160_v62 = vsel %vm2150_vm4, %v2146_v46, 1326507024  ;;  %12401 = vcosq.f32 %v2515_v1 }
 0x342   : > { %v11797_v52 = vadd.s32 4294967294, %v4159_v39  ;;  %v2153_v61 = vsel %vm2149_vm9, %v2137_v59, %v2152_v36  ;;  %v2157_v8 = vsel %vm2149_vm9, %v2140_v13, %v2156_v44  ;;  %v2161_v27 = vsel %vm2149_vm9, %v2143_v7, %v2160_v62 }
 0x343   : > { %v2158_v23 = vsel %vm2148_vm10, %v2155_v43, %v2157_v8  ;;  %v2162_v49 = vsel %vm2148_vm10, %v2159_v50, %v2161_v27  ;;  %v11783_v32 = vadd.s32 4294967169, %v3783_v11  ;;  %12403 = vsinq.f32 %v2515_v1  ;;  %v9325_v11 = vld [vmem:[%s18445_s8 + $0x18] sm:$0xff] }
 0x344   : > { %vm11798_vm3 = vcmp.lt.s32.totalorder %v11797_v52, 0  ;;  %v16308_v31 = vmul.u32.u64.low %v16285_v37, %v2162_v49  ;;  %v16309_v42 = vmul.u32.u64.high %v16285_v37, %v2162_v49, %v16308_v31  ;;  %v2154_v35 = vsel %vm2148_vm10, %v2151_v25, %v2153_v61  ;;  %9344 = vperm.xlu1 %12265, %v9325_v11  }
 0x345   : > { %v4162_v58 = vsel %vm11798_vm3, 0, %v11797_v52  ;;  %v16313_v46 = vmul.u32.u64.low %v16285_v37, %v2158_v23  ;;  %v16314_v17 = vmul.u32.u64.high %v16285_v37, %v2158_v23, %v16313_v46  ;;  %v3789_v14 = vadd.s32 1, %v11783_v32 }
 0x346   : > { %v4163_v13 = vsub.s32 32, %v4162_v58  ;;  %v4164_v7 = vshll.u32 %v16277_v28, %v4162_v58  ;;  %v4167_v59 = vsub.s32 4294967266, %v4162_v58  ;;  %v16321_v33 = vand.u32 3, %v2520_v29  ;;  %v9903_v29 = vld [vmem:[%s18447_s10 + $0x8] sm:$0xff]  ;;  %v9906_v58 = vld [vmem:[%s18447_s10 + $0x20] sm:$0xff] }
 0x347   : > { %v4184_v39 = vadd.s32 3, %v16303_v2  ;;  %v2170_v43 = vmul.u32 %v16285_v37, %v2154_v35  ;;  %vm2172_vm12 = vc.u32 %v16309_v42, %v16313_v46  ;;  %v2173_v28 = vadd.s32 1, %v16314_v17  ;;  %v9905_v35 = vld [vmem:[%s18447_s10 + $0x18] sm:$0xff] }
 0x348   : > { %v4165_v1 = vshrl.u32 %v4147_v12, %v4163_v13  ;;  %v4168_v54 = vadd.s32 127, %v4167_v59  ;;  %v3787_v50 = vor.u32 8388608, %v16296_v51  ;;  %vm3790_vm7 = vcmp.gt.s32.totalorder %v3789_v14, 0  ;;  %v9904_v12 = vld [vmem:[%s18447_s10 + $0x10] sm:$0xff]  ;;  %9917 = vperm.xlu1 %12265, %v9903_v29  }
 0x349   : > { %v3791_v44 = vsel %vm3790_vm7, %v3789_v14, 0  ;;  %v2174_v37 = vsel %vm2172_vm12, %v2173_v28, %v16314_v17  ;;  %v16337_v52 = vmul.f32 2.0, %v15748_v55  ;;  %9922 = vperm.xlu0 %12264, %v9904_v12   ;;  %vm2523_vm5 = vcmp.eq.s32.totalorder %v16321_v33, 0 }
 0x34a   : > { %v4166_v25 = vor.u32 %v4165_v1, %v4164_v7  ;;  %v4169_v36 = vshll.u32 %v4168_v54, 23  ;;  %v3793_v62 = vand.u32 31, %v3791_v44  ;;  %vm2526_vm15 = vcmp.eq.s32.totalorder %v16321_v33, 2 }
 0x34b   : > { %v2175_v8 = vadd.s32 %v2174_v37, %v2170_v43  ;;  %v16341_v27 = vpop.eup %12401  ;;  %v16343_v23 = vand.u32 3, %v4184_v39  ;;  %v16346_v31 = vshll.u32 %v3787_v50, 8  ;;  %vm2522_vm13 = vcmp.lt.s32.totalorder %v16321_v33, 2 }
 0x34c   : > { %v4170_v51 = vor.u32 4788187, %v4169_v36  ;;  %v4173_v61 = vcvt.s32.f32 %v4166_v25  ;;  %v3794_v49 = vsub.s32 32, %v3793_v62  ;;  %v3796_v32 = vshll.u32 %v18601_v3, %v3793_v62  ;;  %9927 = vperm.xlu1 %12265, %v9905_v35   ;;  %v9908_v36 = vld [vmem:[%s18447_s10 + $0x30] sm:$0xff] }
 0x34d   : > { %v16354_v17 = vpop.eup %12403  ;;  %v2176_v7 = vadd.s32 536870912, %v2175_v8  ;;  %v3799_v59 = vshll.u32 %v18602_v16, %v3793_v62  ;;  %v3802_v14 = vshll.u32 %v18603_v9, %v3793_v62  ;;  %v3805_v39 = vshll.u32 %v18604_v22, %v3793_v62  ;;  %9932 = vperm.xlu0 %12264, %v9906_v58  }
 0x34e   : > { %v4171_v13 = vand.u32 2147483647, %v4170_v51  ;;  %v3797_v11 = vshrl.u32 %v18602_v16, %v3794_v49  ;;  %v3800_v1 = vshrl.u32 %v18603_v9, %v3794_v49  ;;  %v3803_v54 = vshrl.u32 %v18604_v22, %v3794_v49 }
 0x34f   : > { %v16363_v28 = vshrl.u32 %v2176_v7, 30  ;;  %v16365_v50 = vshrl.u32 %v3791_v44, 5  ;;  %v3806_v25 = vshrl.u32 %v18687_v56, %v3794_v49  ;;  %v3808_v29 = vshll.u32 %v18687_v56, %v3793_v62  ;;  %v9907_v44 = vld [vmem:[%s18447_s10 + $0x28] sm:$0xff] }
 0x350   : > { %v4174_v43 = vmul.f32 %v4173_v61, %v4171_v13  ;;  %v3809_v37 = vshrl.u32 %v18617_v34, %v3794_v49  ;;  %v768_v51 = vrot.slane %v16337_v52, 4  ;;  %v18545_v61 = vxor.u32 2147483648, %v16354_v17  ;;  %9937 = vperm.xlu1 %12265, %v9907_v44  }
 0x351   : > { %v2178_v35 = vshll.u32 %v16363_v28, 30  ;;  %v3795_v13 = vshrl.u32 %v18601_v3, %v3794_v49  ;;  %vm2519_vm0 = vweird.f32 %v15849_v30  ;;  %v3798_v7 = vor.u32 %v3797_v11, %v3796_v32  ;;  %9942 = vperm.xlu0 %12264, %v9908_v36   ;;  %v10760_v49 = vld [vmem:[%s18449_s12] sm:$0xff]  ;;  %v9909_v11 = vld [vmem:[%s18447_s10 + $0x38] sm:$0xff] }
 0x352   : > { %v4175_v58 = vxor.u32 2147483648, %v4174_v43  ;;  %v3801_v12 = vor.u32 %v3800_v1, %v3799_v59  ;;  %v3804_v62 = vor.u32 %v3803_v54, %v3802_v14  ;;  %v3807_v6 = vor.u32 %v3806_v25, %v3805_v39 }
 0x353   : > { %vm2117_vm2 = vcmp.lt.s32.totalorder %v16129_v15, 0  ;;  %v16385_v21 = vsub.s32 %v2175_v8, %v2178_v35  ;;  %vm3811_vm6 = vcmp.lt.s32.totalorder %v16365_v50, 1  ;;  %vm3814_vm9 = vcmp.lt.s32.totalorder %v16365_v50, 4 }
 0x354   : > { %v4176_v52 = vsel %vm4093_vm8, %v4175_v58, %v4174_v43  ;;  %v18795_v32 = vxor.u32 2147483648, %v16341_v27  ;;  %v3810_v14 = vor.u32 %v3809_v37, %v3808_v29  ;;  %vm3813_vm8 = vcmp.lt.s32.totalorder %v16365_v50, 3  ;;  %9947 = vperm.xlu1 %12265, %v9909_v11   ;;  %v16556_v43 = vpop.f32.mrb[0].mxu1 }
 0x355   : > { %v4179_v8 = vsel %vm16263_vm1, %v16012_v40, %v4176_v52  ;;  %v2181_v1 = vsub.s32 0, %v16385_v21  ;;  %vm3812_vm4 = vcmp.lt.s32.totalorder %v16365_v50, 2  ;;  %v3816_v54 = vsel %vm3814_vm9, %v3804_v62, 2102212464  ;;  %10763 = vperm.xlu0 %12264, %v10760_v49  }
 0x356   : > { %v2528_v59 = vsel %vm2526_vm15, %v18795_v32, %v16354_v17  ;;  %12405 = vcosq.f32 %v4179_v8  ;;  %v2525_v38 = vsel %vm2523_vm5, %v16341_v27, %v18545_v61  ;;  %v18796_v39 = vand.u32 2147483647, %v16129_v15 }
 0x357   : > { %12407 = vsinq.f32 %v4179_v8  ;;  %v3819_v25 = vsel %vm3811_vm6, %v3798_v7, %v3801_v12  ;;  %v3820_v36 = vsel %vm3814_vm9, %v3807_v6, 920167782  ;;  %v11720_v29 = vmin.u32 %v2181_v1, %v16385_v21 }
 0x358   : > { %vm16415_vm1 = vcmp.le.f32.partialorder %v18796_v39, 0.7853982  ;;  %v2201_v37 = vsub.s32 4, %v16363_v28  ;;  %v3815_v44 = vsel %vm3811_vm6, %v3795_v13, %v3798_v7  ;;  %v3821_v58 = vsel %vm3813_vm8, %v3804_v62, %v3820_v36  ;;  %v9326_v13 = vld [vmem:[%s18445_s8 + $0x20] sm:$0xff] }
 0x359   : > { %v3817_v35 = vsel %vm3813_vm8, %v3801_v12, %v3816_v54  ;;  %v3822_v52 = vsel %vm3812_vm4, %v3819_v25, %v3821_v58  ;;  %v3823_v49 = vsel %vm3811_vm6, %v3801_v12, %v3804_v62  ;;  %v3824_v32 = vsel %vm3814_vm9, %v3810_v14, 1326507024  ;;  %9349 = vperm.xlu1 %12265, %v9326_v13  }
 0x35a   : > { %v2529_v7 = vsel %vm2522_vm13, %v2525_v38, %v2528_v59  ;;  %vm4186_vm10 = vcmp.lt.s32.totalorder %v16343_v23, 2  ;;  %vm4187_vm3 = vcmp.eq.s32.totalorder %v16343_v23, 0  ;;  %vm4190_vm12 = vcmp.eq.s32.totalorder %v16343_v23, 2 }
 0x35b   : > { %v2183_v8 = vclz %v11720_v29  ;;  %vm4183_vm7 = vweird.f32 %v16012_v40  ;;  %v3825_v12 = vsel %vm3813_vm8, %v3807_v6, %v3824_v32  ;;  %vm18799_vm5 = vcmask 1043456  }
 0x35c   : > { %v16449_v62 = vmul.u32.u64.low %v16346_v31, %v3822_v52  ;;  %v16450_v14 = vmul.u32.u64.high %v16346_v31, %v3822_v52, %v16449_v62  ;;  %v16455_v33 = vsel %vm18799_vm5, %v15748_v55, %v768_v51  ;;  %v3818_v11 = vsel %vm3812_vm4, %v3815_v44, %v3817_v35  ;;  %vm18801_vm8 = vmmov %vm18799_vm5 }
 0x35d   : > { %v11721_v59 = vadd.s32 4294967294, %v2183_v8  ;;  %v3826_v1 = vsel %vm3812_vm4, %v3823_v49, %v3825_v12  ;;  %v720_v54 = vmul.f32 4.0, %v15748_v55  ;;  %v2202_v6 = vsel %vm2117_vm2, %v2201_v37, %v16363_v28 }
 0x35e   : > { %v16466_v38 = vmul.u32.u64.low %v16346_v31, %v3826_v1  ;;  %v16467_v39 = vmul.u32.u64.high %v16346_v31, %v3826_v1, %v16466_v38  ;;  %v2326_v51 = vand.u32 2139095040, %v16455_v33  ;;  %v2530_v25 = vsel %vm2519_vm0, nan, %v2529_v7 }
 0x35f   : > { %v2171_v50 = vadd.s32 %v16313_v46, %v16309_v42  ;;  %vm11722_vm15 = vcmp.lt.s32.totalorder %v11721_v59, 0  ;;  %v736_v36 = vmul.f32 8.0, %v15748_v55  ;;  %v3834_v44 = vmul.u32 %v16346_v31, %v3818_v11 }
 0x360   : > { %v2186_v29 = vsel %vm11722_vm15, 0, %v11721_v59  ;;  %v3837_v28 = vadd.s32 1, %v16450_v14  ;;  %v2327_v37 = vshrl.u32 %v2326_v51, 23  ;;  %v16477_v58 = vpop.eup %12405  ;;  %v16482_v32 = vsel %vm16415_vm1, 0, %v2202_v6 }
 0x361   : > { %v2187_v35 = vsub.s32 32, %v2186_v29  ;;  %v2188_v52 = vshll.u32 %v16385_v21, %v2186_v29  ;;  %v2191_v49 = vsub.s32 4294967266, %v2186_v29  ;;  %v16484_v42 = vpop.eup %12407  ;;  %v18544_v46 = vxor.u32 2147483648, %v16477_v58 }
 0x362   : > { %vm3836_vm13 = vc.u32 %v16467_v39, %v16449_v62  ;;  %v18547_v31 = vand.u32 2147483647, %v16455_v33  ;;  %v11727_v13 = vadd.s32 4294967169, %v2327_v37  ;;  %v18546_v7 = vxor.u32 2147483648, %v16484_v42 }
 0x363   : > { %v2189_v8 = vshrl.u32 %v2171_v50, %v2187_v35  ;;  %v2192_v12 = vadd.s32 127, %v2191_v49  ;;  %v3838_v21 = vsel %vm3836_vm13, %v3837_v28, %v16450_v14  ;;  %v4192_v59 = vsel %vm4190_vm12, %v18544_v46, %v16484_v42 }
 0x364   : > { %v2208_v11 = vadd.s32 3, %v16482_v32  ;;  %v3839_v1 = vadd.s32 %v3838_v21, %v3834_v44  ;;  %v2333_v6 = vadd.s32 1, %v11727_v13  ;;  %v4189_v38 = vsel %vm4187_vm3, %v16477_v58, %v18546_v7 }
 0x365   : > { %v2190_v51 = vor.u32 %v2189_v8, %v2188_v52  ;;  %v2193_v50 = vshll.u32 %v2192_v12, 23  ;;  %v816_v29 = vrot.slane %v736_v36, 4  ;;  %v4193_v14 = vsel %vm4186_vm10, %v4189_v38, %v4192_v59 }
 0x366   : > { %v3840_v28 = vadd.s32 536870912, %v3839_v1  ;;  %v2330_v37 = vand.u32 8388607, %v18547_v31  ;;  %vm2334_vm6 = vcmp.gt.s32.totalorder %v2333_v6, 0  ;;  %v4194_v44 = vsel %vm4183_vm7, nan, %v4193_v14 }
 0x367   : > { %v2194_v35 = vor.u32 4788187, %v2193_v50  ;;  %v2197_v49 = vcvt.s32.f32 %v2190_v51  ;;  %v2335_v13 = vsel %vm2334_vm6, %v2333_v6, 0  ;;  %v16509_v21 = vpack.c.bf16 %v4194_v44, %v2530_v25 }
 0x368   : > { %v3841_v46 = vshrl.u32 %v3840_v28, 30  ;;  %v2337_v52 = vand.u32 31, %v2335_v13  ;;  %v16511_v36 = vand.u32 3, %v2208_v11  ;;  %vm3781_vm9 = vcmp.lt.s32.totalorder %v16253_v5, 0 }
 0x369   : > { %18800 = vst [vmem:[#allocation41_spill] sm:$0xff] %v16509_v21  ;;  %v2195_v8 = vand.u32 2147483647, %v2194_v35  ;;  %v16515_v23 = vsel %vm18801_vm8, %v720_v54, %v816_v29  ;;  %8187 = vmatprep.subr.bf16.mxu1 %v16509_v21  ;;  %v2331_v59 = vor.u32 8388608, %v2330_v37  ;;  %v16521_v25 = vadd.s32 %v16449_v62, %v16467_v39 }
 0x36a   : > { %v3842_v12 = vshll.u32 %v3841_v46, 30  ;;  %v2338_v38 = vsub.s32 32, %v2337_v52  ;;  %v2336_v50 = vshrl.u32 %v2335_v13, 5  ;;  %v2340_v11 = vshll.u32 %v18601_v3, %v2337_v52 }
 0x36b   : > { %v2198_v6 = vmul.f32 %v2197_v49, %v2195_v8  ;;  %v2343_v29 = vshll.u32 %v18602_v16, %v2337_v52  ;;  %v2346_v28 = vshll.u32 %v18603_v9, %v2337_v52  ;;  %v18802_v44 = vand.u32 2147483647, %v16253_v5 }
 0x36c   : > { %v16524_v14 = vsub.s32 %v3839_v1, %v3842_v12  ;;  %v2341_v54 = vshrl.u32 %v18602_v16, %v2338_v38  ;;  %v2344_v62 = vshrl.u32 %v18603_v9, %v2338_v38  ;;  %v2347_v39 = vshrl.u32 %v18604_v22, %v2338_v38 }
 0x36d   : > { %v2199_v37 = vxor.u32 2147483648, %v2198_v6  ;;  %vm16531_vm4 = vcmp.le.f32.partialorder %v18802_v44, 0.7853982  ;;  %v2349_v1 = vshll.u32 %v18604_v22, %v2337_v52  ;;  %v3865_v13 = vsub.s32 4, %v3841_v46 }
 0x36e   : > { %v3845_v49 = vsub.s32 0, %v16524_v14  ;;  %v2350_v8 = vshrl.u32 %v18687_v56, %v2338_v38  ;;  %v16540_v12 = vshll.u32 %v2331_v59, 8  ;;  %v2339_v44 = vshrl.u32 %v18601_v3, %v2338_v38 }
 0x36f   : > { %v2200_v61 = vsel %vm2117_vm2, %v2199_v37, %v2198_v6  ;;  %v2342_v7 = vor.u32 %v2341_v54, %v2340_v11  ;;  %v2352_v31 = vshll.u32 %v18687_v56, %v2337_v52  ;;  %v2345_v10 = vor.u32 %v2344_v62, %v2343_v29  ;;  %v16554_v54 = vpop.f32.mrb[0].mxu0 }
 0x370   : > { %v2203_v51 = vsel %vm16415_vm1, %v16129_v15, %v2200_v61  ;;  %v11784_v21 = vmin.u32 %v3845_v49, %v16524_v14  ;;  %v2348_v48 = vor.u32 %v2347_v39, %v2346_v28  ;;  %v2351_v41 = vor.u32 %v2350_v8, %v2349_v1  ;;  %v16558_v29 = vpop.f32.mrb[1].mxu0  ;;  %v16560_v28 = vpop.f32.mrb[1].mxu1 }
 0x371   : > { %12409 = vcosq.f32 %v2203_v51  ;;  %v2353_v59 = vshrl.u32 %v18617_v34, %v2338_v38  ;;  %vm2355_vm10 = vcmp.lt.s32.totalorder %v2336_v50, 1  ;;  %v3866_v11 = vsel %vm3781_vm9, %v3865_v13, %v3841_v46  ;;  %18805 = vst [vmem:[#allocation42_spill] sm:$0xff] %v16558_v29  ;;  %18806 = vst [vmem:[#allocation43_spill] sm:$0xff] %v16560_v28  ;;  %v16564_v37 = vpop.f32.mrb[2].mxu0  ;;  %v16566_v62 = vpop.f32.mrb[2].mxu1 }
 0x372   : > { %12411 = vsinq.f32 %v2203_v51  ;;  %v3847_v6 = vclz %v11784_v21  ;;  %v3990_v52 = vand.u32 2139095040, %v16515_v23  ;;  %vm2356_vm2 = vcmp.lt.s32.totalorder %v2336_v50, 2  ;;  %18807 = vst [vmem:[#allocation44_spill] sm:$0xff] %v16564_v37  ;;  %18808 = vst [vmem:[#allocation45_spill] sm:$0xff] %v16566_v62 }
 0x373   : > { %v2354_v61 = vor.u32 %v2353_v59, %v2352_v31  ;;  %vm2357_vm1 = vcmp.lt.s32.totalorder %v2336_v50, 3  ;;  %vm2358_vm3 = vcmp.lt.s32.totalorder %v2336_v50, 4  ;;  %v2359_v21 = vsel %vm2355_vm10, %v2339_v44, %v2342_v7  ;;  %v16578_v59 = vpop.f32.mrb[3].mxu1 }
 0x374   : > { %v11785_v38 = vadd.s32 4294967294, %v3847_v6  ;;  %v2360_v51 = vsel %vm2358_vm3, %v2348_v48, 2102212464  ;;  %v2363_v46 = vsel %vm2355_vm10, %v2342_v7, %v2345_v10  ;;  %v2364_v31 = vsel %vm2358_vm3, %v2351_v41, 920167782  ;;  %v16576_v7 = vpop.f32.mrb[3].mxu0 }
 0x375   : > { %v2361_v39 = vsel %vm2357_vm1, %v2345_v10, %v2360_v51  ;;  %v2367_v1 = vsel %vm2355_vm10, %v2345_v10, %v2348_v48  ;;  %v2368_v49 = vsel %vm2358_vm3, %v2354_v61, 1326507024  ;;  %v16572_v13 = vsel %vm16531_vm4, 0, %v3866_v11  ;;  %18809 = vst [vmem:[#allocation46_spill] sm:$0xff] %v16576_v7  ;;  %18810 = vst [vmem:[#allocation47_spill] sm:$0xff] %v16578_v59  ;;  %v16583_v61 = vpop.f32.mrb[4].mxu0 }
 0x376   : > { %vm11786_vm12 = vcmp.lt.s32.totalorder %v11785_v38, 0  ;;  %v2365_v8 = vsel %vm2357_vm1, %v2348_v48, %v2364_v31  ;;  %v2369_v44 = vsel %vm2357_vm1, %v2351_v41, %v2368_v49  ;;  %v2362_v51 = vsel %vm2356_vm2, %v2359_v21, %v2361_v39  ;;  %18811 = vst [vmem:[#allocation48_spill] sm:$0xff] %v16583_v61  ;;  %v16585_v62 = vpop.f32.mrb[4].mxu1  ;;  %v16588_v49 = vpop.f32.mrb[5].mxu0 }
 0x377   : > { %v3850_v6 = vsel %vm11786_vm12, 0, %v11785_v38  ;;  %v2366_v0 = vsel %vm2356_vm2, %v2363_v46, %v2365_v8  ;;  %v2370_v10 = vsel %vm2356_vm2, %v2367_v1, %v2369_v44  ;;  %18812 = vst [vmem:[#allocation49_spill] sm:$0xff] %v16585_v62  ;;  %v3991_v41 = vshrl.u32 %v3990_v52, 23  ;;  %18813 = vst [vmem:[#allocation50_spill] sm:$0xff] %v16588_v49  ;;  %v16590_v7 = vpop.f32.mrb[5].mxu1 }
 0x378   : > { %v3851_v11 = vsub.s32 32, %v3850_v6  ;;  %v3852_v48 = vshll.u32 %v16524_v14, %v3850_v6  ;;  %v3855_v31 = vsub.s32 4294967266, %v3850_v6  ;;  %18814 = vst [vmem:[#allocation51_spill] sm:$0xff] %v16590_v7  ;;  %v16602_v14 = vpop.f32.mrb[6].mxu0  ;;  %v16604_v52 = vpop.f32.mrb[6].mxu1  ;;  %vm2211_vm5 = vcmp.eq.s32.totalorder %v16511_v36, 0 }
 0x379   : > { %v16593_v38 = vmul.u32.u64.low %v16540_v12, %v2370_v10  ;;  %v16594_v21 = vmul.u32.u64.high %v16540_v12, %v2370_v10, %v16593_v38  ;;  %v16597_v50 = vmul.u32.u64.low %v16540_v12, %v2366_v0  ;;  %v16598_v46 = vmul.u32.u64.high %v16540_v12, %v2366_v0, %v16597_v50  ;;  %18815 = vst [vmem:[#allocation52_spill] sm:$0xff] %v16602_v14  ;;  %18816 = vst [vmem:[#allocation53_spill] sm:$0xff] %v16604_v52  ;;  %v16612_v0 = vpop.f32.mrb[7].mxu0  ;;  %v16614_v7 = vpop.f32.mrb[7].mxu1 }
 0x37a   : > { %v3853_v39 = vshrl.u32 %v16521_v25, %v3851_v11  ;;  %v3856_v1 = vadd.s32 127, %v3855_v31  ;;  %v11791_v8 = vadd.s32 4294967169, %v3991_v41  ;;  %v3872_v6 = vadd.s32 3, %v16572_v13  ;;  %18818 = vst [vmem:[#allocation54_spill] sm:$0xff] %v16612_v0  ;;  %18819 = vst [vmem:[#allocation55_spill] sm:$0xff] %v16614_v7  ;;  %v16619_v14 = vpop.f32.mrb[8].mxu0 }
 0x37b   : > { %v16606_v44 = vpop.eup %12409  ;;  %v18817_v10 = vand.u32 2147483647, %v16515_v23  ;;  %v2378_v41 = vmul.u32 %v16540_v12, %v2362_v51  ;;  %18820 = vst [vmem:[#allocation56_spill] sm:$0xff] %v16619_v14  ;;  %v16621_v49 = vpop.f32.mrb[8].mxu1  ;;  %vm2214_vm15 = vcmp.eq.s32.totalorder %v16511_v36, 2  ;;  %vm2380_vm13 = vc.u32 %v16594_v21, %v16597_v50 }
 0x37c   : > { %v16616_v25 = vpop.eup %12411  ;;  %v3854_v11 = vor.u32 %v3853_v39, %v3852_v48  ;;  %v3857_v31 = vshll.u32 %v3856_v1, 23  ;;  %v3997_v52 = vadd.s32 1, %v11791_v8  ;;  %18821 = vst [vmem:[#allocation57_spill] sm:$0xff] %v16621_v49  ;;  %vm2210_vm6 = vcmp.lt.s32.totalorder %v16511_v36, 2  ;;  %v16630_v51 = vpop.f32.mrb[9].mxu0 }
 0x37d   : > { %v3994_v38 = vand.u32 8388607, %v18817_v10  ;;  %v2381_v10 = vadd.s32 1, %v16598_v46  ;;  %18822 = vst [vmem:[#allocation58_spill] sm:$0xff] %v16630_v51  ;;  %v16632_v1 = vpop.f32.mrb[9].mxu1  ;;  %v16634_v8 = vand.u32 3, %v3872_v6  ;;  %vm2207_vm10 = vweird.f32 %v16129_v15  ;;  %v16981_v15 = vpop.permute.xlu0 %7557 }
 0x37e   : > { %v3858_v39 = vor.u32 4788187, %v3857_v31  ;;  %v3861_v12 = vcvt.s32.f32 %v3854_v11  ;;  %vm3998_vm8 = vcmp.gt.s32.totalorder %v3997_v52, 0  ;;  %18823 = vst [vmem:[#allocation59_spill] sm:$0xff] %v16632_v1  ;;  %v16637_v7 = vpop.f32.mrb[10].mxu0  ;;  %v16639_v0 = vpop.f32.mrb[10].mxu1 }
 0x37f   : > { %v2382_v62 = vsel %vm2380_vm13, %v2381_v10, %v16598_v46  ;;  %v3995_v49 = vor.u32 8388608, %v3994_v38  ;;  %v3999_v14 = vsel %vm3998_vm8, %v3997_v52, 0  ;;  %18824 = vst [vmem:[#allocation60_spill] sm:$0xff] %v16637_v7  ;;  %18825 = vst [vmem:[#allocation61_spill] sm:$0xff] %v16639_v0  ;;  %v16642_v31 = vand.u32 3, %v16096_v53  ;;  %v16647_v48 = vpop.f32.mrb[11].mxu0 }
 0x380   : > { %v3859_v61 = vand.u32 2147483647, %v3858_v39  ;;  %v2383_v59 = vadd.s32 %v2382_v62, %v2378_v41  ;;  %v16645_v11 = vand.u32 3, %v16118_v47  ;;  %18826 = vst [vmem:[#allocation62_spill] sm:$0xff] %v16647_v48  ;;  %v16649_v6 = vpop.f32.mrb[11].mxu1  ;;  %v16651_v1 = vshrl.u32 %v3999_v14, 5 }
 0x381   : > { %18827 = vst [vmem:[#allocation63_spill] sm:$0xff] %v16649_v6  ;;  %v4001_v46 = vand.u32 31, %v3999_v14  ;;  %v16654_v52 = vand.u32 3, %v16259_v63  ;;  %v16657_v38 = vand.u32 3, %v16303_v2  ;;  %v18828_v62 = vxor.u32 2147483648, %v16616_v25  ;;  %v16669_v39 = vpop.f32.mrb[12].mxu0 }
 0x382   : > { %v18829_v47 = vxor.u32 2147483648, %v16606_v44  ;;  %v3862_v10 = vmul.f32 %v3861_v12, %v3859_v61  ;;  %v2384_v14 = vadd.s32 536870912, %v2383_v59  ;;  %18830 = vst [vmem:[#allocation64_spill] sm:$0xff] %v16669_v39  ;;  %v16671_v63 = vpop.f32.mrb[12].mxu1  ;;  %v16678_v0 = vpop.f32.mrb[13].mxu0  ;;  %vm4019_vm2 = vcmp.lt.s32.totalorder %v16651_v1, 1 }
 0x383   : > { %v2213_v53 = vsel %vm2211_vm5, %v16606_v44, %v18828_v62  ;;  %18831 = vst [vmem:[#allocation65_spill] sm:$0xff] %v16671_v63  ;;  %v4002_v2 = vsub.s32 32, %v4001_v46  ;;  %v4004_v6 = vshll.u32 %v18601_v3, %v4001_v46  ;;  %v4007_v48 = vshll.u32 %v18602_v16, %v4001_v46  ;;  %18832 = vst [vmem:[#allocation66_spill] sm:$0xff] %v16678_v0  ;;  %v16680_v7 = vpop.f32.mrb[13].mxu1  ;;  %v16686_v39 = vpop.f32.mrb[14].mxu0 }
 0x384   : > { %v2216_v41 = vsel %vm2214_vm15, %v18829_v47, %v16616_v25  ;;  %v16676_v62 = vshll.u32 %v3995_v49, 8  ;;  %18833 = vst [vmem:[#allocation67_spill] sm:$0xff] %v16680_v7  ;;  %v3863_v47 = vxor.u32 2147483648, %v3862_v10  ;;  %v16682_v61 = vshrl.u32 %v2384_v14, 30  ;;  %18834 = vst [vmem:[#allocation68_spill] sm:$0xff] %v16686_v39  ;;  %v16688_v51 = vpop.f32.mrb[14].mxu1 }
 0x385   : > { %v4010_v12 = vshll.u32 %v18603_v9, %v4001_v46  ;;  %v4013_v63 = vshll.u32 %v18604_v22, %v4001_v46  ;;  %18835 = vst [vmem:[#allocation69_spill] sm:$0xff] %v16688_v51  ;;  %v4005_v37 = vshrl.u32 %v18602_v16, %v4002_v2  ;;  %v4008_v49 = vshrl.u32 %v18603_v9, %v4002_v2  ;;  %v16699_v39 = vpop.f32.mrb[15].mxu0  ;;  %v16701_v51 = vpop.f32.mrb[15].mxu1 }
 0x386   : > { %v4011_v28 = vshrl.u32 %v18604_v22, %v4002_v2  ;;  %v3864_v14 = vsel %vm3781_vm9, %v3863_v47, %v3862_v10  ;;  %v2386_v7 = vshll.u32 %v16682_v61, 30  ;;  %v4014_v0 = vshrl.u32 %v18687_v56, %v4002_v2  ;;  %18836 = vst [vmem:[#allocation70_spill] sm:$0xff] %v16699_v39  ;;  %18837 = vst [vmem:[#allocation71_spill] sm:$0xff] %v16701_v51  ;;  %v16707_v29 = vpop.f32.mrb[16].mxu0  ;;  %v16709_v10 = vpop.f32.mrb[16].mxu1 }
 0x387   : > { %v4016_v55 = vshll.u32 %v18687_v56, %v4001_v46  ;;  %v3867_v16 = vsel %vm16531_vm4, %v16253_v5, %v3864_v14  ;;  %v4003_v9 = vshrl.u32 %v18601_v3, %v4002_v2  ;;  %v4006_v22 = vor.u32 %v4005_v37, %v4004_v6  ;;  %v16714_v51 = vpop.f32.mrb[17].mxu0  ;;  %v16716_v39 = vpop.f32.mrb[17].mxu1 }
 0x388   : > { %v4009_v57 = vor.u32 %v4008_v49, %v4007_v48  ;;  %12413 = vcosq.f32 %v3867_v16  ;;  %vm2325_vm9 = vcmp.lt.s32.totalorder %v16455_v33, 0  ;;  %v16712_v56 = vsub.s32 %v2383_v59, %v2386_v7  ;;  %v16729_v7 = vpop.f32.mrb[18].mxu1 }
 0x389   : > { %v4012_v46 = vor.u32 %v4011_v28, %v4010_v12  ;;  %v4015_v47 = vor.u32 %v4014_v0, %v4013_v63  ;;  %v2217_v3 = vsel %vm2210_vm6, %v2213_v53, %v2216_v41  ;;  %12415 = vsinq.f32 %v3867_v16  ;;  %v16727_v28 = vpop.f32.mrb[18].mxu0  ;;  %v16740_v6 = vpop.f32.mrb[19].mxu1 }
 0x38a   : > { %v4017_v35 = vshrl.u32 %v18617_v34, %v4002_v2  ;;  %vm4021_vm4 = vcmp.lt.s32.totalorder %v16651_v1, 3  ;;  %vm3878_vm1 = vcmp.eq.s32.totalorder %v16634_v8, 2  ;;  %v2389_v37 = vsub.s32 0, %v16712_v56  ;;  %v16738_v48 = vpop.f32.mrb[19].mxu0  ;;  %v16752_v12 = vpop.f32.mrb[20].mxu1 }
 0x38b   : > { %vm4020_vm3 = vcmp.lt.s32.totalorder %v16651_v1, 2  ;;  %vm4022_vm12 = vcmp.lt.s32.totalorder %v16651_v1, 4  ;;  %vm5629_vm5 = vcmp.eq.s32.totalorder %v16642_v31, 0  ;;  %vm3875_vm15 = vcmp.eq.s32.totalorder %v16634_v8, 0  ;;  %v16750_v2 = vpop.f32.mrb[20].mxu0 }
 0x38c   : > { %v4018_v36 = vor.u32 %v4017_v35, %v4016_v55  ;;  %v4024_v34 = vsel %vm4022_vm12, %v4012_v46, 2102212464  ;;  %v4027_v59 = vsel %vm4019_vm2, %v4006_v22, %v4009_v57  ;;  %v4028_v0 = vsel %vm4022_vm12, %v4015_v47, 920167782 }
 0x38d   : > { %vm3874_vm13 = vcmp.lt.s32.totalorder %v16634_v8, 2  ;;  %v11728_v53 = vmin.u32 %v2389_v37, %v16712_v56  ;;  %v4023_v55 = vsel %vm4019_vm2, %v4003_v9, %v4006_v22  ;;  %v4025_v41 = vsel %vm4021_vm4, %v4009_v57, %v4024_v34  ;;  %v16769_v34 = vpop.f32.mrb[21].mxu0 }
 0x38e   : > { %v4029_v63 = vsel %vm4021_vm4, %v4012_v46, %v4028_v0  ;;  %vm3871_vm6 = vweird.f32 %v16253_v5  ;;  %v2409_v49 = vsub.s32 4, %v16682_v61  ;;  %v4031_v16 = vsel %vm4019_vm2, %v4009_v57, %v4012_v46  ;;  %v16771_v0 = vpop.f32.mrb[21].mxu1 }
 0x38f   : > { %v4030_v14 = vsel %vm4020_vm3, %v4027_v59, %v4029_v63  ;;  %v4032_v9 = vsel %vm4022_vm12, %v4018_v36, 1326507024  ;;  %v16764_v22 = vsel %vm2207_vm10, nan, %v2217_v3  ;;  %v2379_v35 = vadd.s32 %v16597_v50, %v16594_v21  ;;  %18838 = vst [vmem:[#allocation72_spill] sm:$0xff] %v16771_v0  ;;  %v16782_v59 = vpop.f32.mrb[22].mxu0  ;;  %v16784_v21 = vpop.f32.mrb[22].mxu1 }
 0x390   : > { %v2391_v37 = vclz %v11728_v53  ;;  %vm5628_vm8 = vcmp.lt.s32.totalorder %v16642_v31, 2  ;;  %v4026_v57 = vsel %vm4020_vm3, %v4023_v55, %v4025_v41  ;;  %v4033_v46 = vsel %vm4021_vm4, %v4015_v47, %v4032_v9  ;;  %18839 = vst [vmem:[#allocation73_spill] sm:$0xff] %v16782_v59  ;;  %18840 = vst [vmem:[#allocation74_spill] sm:$0xff] %v16784_v21  ;;  %v16802_v9 = vpop.f32.mrb[23].mxu1 }
 0x391   : > { %v16778_v36 = vmul.u32.u64.low %v16676_v62, %v4030_v14  ;;  %v16779_v3 = vmul.u32.u64.high %v16676_v62, %v4030_v14, %v16778_v36  ;;  %v18841_v50 = vand.u32 2147483647, %v16455_v33  ;;  %v4034_v55 = vsel %vm4020_vm3, %v4031_v16, %v4033_v46  ;;  %v16800_v14 = vpop.f32.mrb[23].mxu0  ;;  %18846 = vst [vmem:[#allocation76_spill] sm:$0xff] %v16802_v9 }
 0x392   : > { %v11729_v63 = vadd.s32 4294967294, %v2391_v37  ;;  %v18844_v47 = vxor.u32 2147483648, %v16157_v24  ;;  %vm5632_vm4 = vcmp.eq.s32.totalorder %v16642_v31, 2  ;;  %18845 = vst [vmem:[#allocation75_spill] sm:$0xff] %v16800_v14  ;;  %v18847_v16 = vxor.u32 2147483648, %v16153_v60  ;;  %v16814_v21 = vpop.eup %12413  ;;  %v16820_v14 = vpop.f32.mrb[24].mxu0 }
 0x393   : > { %vm16788_vm2 = vcmp.le.f32.partialorder %v18841_v50, 0.7853982  ;;  %v2410_v50 = vsel %vm2325_vm9, %v2409_v49, %v16682_v61  ;;  %v16808_v37 = vmul.u32.u64.low %v16676_v62, %v4034_v55  ;;  %v16809_v1 = vmul.u32.u64.high %v16676_v62, %v4034_v55, %v16808_v37  ;;  %18848 = vst [vmem:[#allocation77_spill] sm:$0xff] %v16820_v14  ;;  %v16822_v61 = vpop.f32.mrb[24].mxu1  ;;  %v16824_v49 = vpop.eup %12415 }
 0x394   : > { %v5631_v41 = vsel %vm5629_vm5, %v16153_v60, %v18844_v47  ;;  %v5634_v46 = vsel %vm5632_vm4, %v18847_v16, %v16157_v24  ;;  %vm11730_vm3 = vcmp.lt.s32.totalorder %v11729_v63, 0  ;;  %v4042_v47 = vmul.u32 %v16676_v62, %v4026_v57  ;;  %18849 = vst [vmem:[#allocation78_spill] sm:$0xff] %v16822_v61  ;;  %v16829_v37 = vpop.f32.mrb[25].mxu0  ;;  %v16831_v62 = vpop.f32.mrb[25].mxu1 }
 0x395   : > { %v5635_v9 = vsel %vm5628_vm8, %v5631_v41, %v5634_v46  ;;  %vm7277_vm12 = vcmp.eq.s32.totalorder %v16645_v11, 0  ;;  %v18556_v55 = vxor.u32 2147483648, %v16814_v21  ;;  %v2394_v60 = vsel %vm11730_vm3, 0, %v11729_v63  ;;  %18850 = vst [vmem:[#allocation79_spill] sm:$0xff] %v16829_v37  ;;  %18851 = vst [vmem:[#allocation80_spill] sm:$0xff] %v16831_v62  ;;  %v16835_v46 = vpop.f32.mrb[26].mxu0 }
 0x396   : > { %v4045_v24 = vadd.s32 1, %v16779_v3  ;;  %vm7280_vm5 = vcmp.eq.s32.totalorder %v16645_v11, 2  ;;  %v2395_v57 = vsub.s32 32, %v2394_v60  ;;  %v2396_v41 = vshll.u32 %v16712_v56, %v2394_v60  ;;  %18852 = vst [vmem:[#allocation81_spill] sm:$0xff] %v16835_v46  ;;  %v16837_v61 = vpop.f32.mrb[26].mxu1 }
 0x397   : > { %v2399_v16 = vsub.s32 4294967266, %v2394_v60  ;;  %18853 = vst [vmem:[#allocation82_spill] sm:$0xff] %v16837_v61  ;;  %v3880_v63 = vsel %vm3878_vm1, %v18556_v55, %v16824_v49  ;;  %vm4044_vm8 = vc.u32 %v16809_v1, %v16778_v36  ;;  %vm7276_vm4 = vcmp.lt.s32.totalorder %v16645_v11, 2  ;;  %v16852_v60 = vpop.f32.mrb[27].mxu0  ;;  %v16861_v14 = vpop.f32.mrb[27].mxu1 }
 0x398   : > { %v18854_v31 = vxor.u32 2147483648, %v16222_v26  ;;  %18855 = vst [vmem:[#allocation83_spill] sm:$0xff] %v16852_v60  ;;  %v18856_v61 = vxor.u32 2147483648, %v16824_v49  ;;  %v2397_v55 = vshrl.u32 %v2379_v35, %v2395_v57  ;;  %vm3989_vm1 = vcmp.lt.s32.totalorder %v16515_v23, 0  ;;  %v16863_v59 = vpop.f32.mrb[28].mxu0  ;;  %v16874_v57 = vpop.f32.mrb[28].mxu1 }
 0x399   : > { %v2400_v62 = vadd.s32 127, %v2399_v16  ;;  %v4046_v37 = vsel %vm4044_vm8, %v4045_v24, %v16779_v3  ;;  %v5636_v0 = vsel %vm2311_vm11, nan, %v5635_v9  ;;  %v16876_v3 = vpop.f32.mrb[29].mxu0  ;;  %v16882_v20 = vpop.f32.mrb[29].mxu1  ;;  %vm5835_vm11 = vcmp.eq.s32.totalorder %v16654_v52, 0 }
 0x39a   : > { %v7279_v56 = vsel %vm7277_vm12, %v16215_v45, %v18854_v31  ;;  %v3877_v46 = vsel %vm3875_vm15, %v16814_v21, %v18856_v61  ;;  %v4047_v60 = vadd.s32 %v4046_v37, %v4042_v47  ;;  %v18857_v61 = vxor.u32 2147483648, %v16215_v45  ;;  %v16884_v9 = vpop.f32.mrb[30].mxu0 }
 0x39b   : > { %v3881_v31 = vsel %vm3874_vm13, %v3877_v46, %v3880_v63  ;;  %v2398_v16 = vor.u32 %v2397_v55, %v2396_v41  ;;  %v2401_v8 = vshll.u32 %v2400_v62, 23  ;;  %v16895_v55 = vpop.f32.mrb[30].mxu1  ;;  %v16900_v63 = vpop.f32.mrb[31].mxu0  ;;  %vm5838_vm15 = vcmp.eq.s32.totalorder %v16654_v52, 2 }
 0x39c   : > { %v7282_v35 = vsel %vm7280_vm5, %v18857_v61, %v16222_v26  ;;  %v3882_v24 = vsel %vm3871_vm6, nan, %v3881_v31  ;;  %v16891_v26 = vsel %vm16788_vm2, 0, %v2410_v50  ;;  %v4048_v37 = vadd.s32 536870912, %v4047_v60 }
 0x39d   : > { %v7283_v47 = vsel %vm7276_vm4, %v7279_v56, %v7282_v35  ;;  %v16887_v45 = vpack.c.bf16 %v3882_v24, %v16764_v22  ;;  %v2402_v62 = vor.u32 4788187, %v2401_v8  ;;  %v2405_v11 = vcvt.s32.f32 %v2398_v16  ;;  %v16902_v22 = vpop.f32.mrb[31].mxu1 }
 0x39e   : > { %v7284_v46 = vsel %vm3975_vm14, nan, %v7283_v47  ;;  %v4049_v50 = vshrl.u32 %v4048_v37, 30  ;;  %vm7482_vm13 = vcmp.lt.s32.totalorder %v16657_v38, 2  ;;  %vm7483_vm14 = vcmp.eq.s32.totalorder %v16657_v38, 0 }
 0x39f   : > { %18858 = vst [vmem:[#allocation84_spill] sm:$0xff] %v16887_v45  ;;  %v16897_v41 = vpack.c.bf16 %v7284_v46, %v5636_v0  ;;  %8115 = vmatpush1.bf16.msra.mxu0 %v16887_v45  ;;  %v2403_v18 = vand.u32 2147483647, %v2402_v62  ;;  %vm5834_vm3 = vcmp.lt.s32.totalorder %v16654_v52, 2  ;;  %v18860_v0 = vxor.u32 2147483648, %v16484_v42 }
 0x3a0   : > { %vm7486_vm12 = vcmp.eq.s32.totalorder %v16657_v38, 2  ;;  %v4050_v31 = vshll.u32 %v4049_v50, 30  ;;  %v4073_v61 = vsub.s32 4, %v4049_v50  ;;  %v18861_v35 = vxor.u32 2147483648, %v16354_v17 }
 0x3a1   : > { %18859 = vst [vmem:[#allocation85_spill] sm:$0xff] %v16897_v41  ;;  %8116 = vmatprep.subr.bf16.mxu0 %v16897_v41  ;;  %v7485_v56 = vsel %vm7483_vm14, %v16477_v58, %v18860_v0  ;;  %v18862_v16 = vxor.u32 2147483648, %v16477_v58  ;;  %v2406_v47 = vmul.f32 %v2405_v11, %v2403_v18  ;;  %v18863_v37 = vxor.u32 2147483648, %v16341_v27 }
 0x3a2   : > { %v5837_v24 = vsel %vm5835_vm11, %v16341_v27, %v18861_v35  ;;  %v5524_v0 = vand.u32 3, %v16482_v32  ;;  %v2416_v38 = vadd.s32 3, %v16891_v26  ;;  %v16925_v41 = vsub.s32 %v4047_v60, %v4050_v31  ;;  %v16951_v31 = vpop.f32.mrb[32].mxu0 }
 0x3a3   : > { %v7488_v8 = vsel %vm7486_vm12, %v18862_v16, %v16484_v42  ;;  %v5840_v46 = vsel %vm5838_vm15, %v18863_v37, %v16354_v17  ;;  %v4074_v45 = vsel %vm3989_vm1, %v4073_v61, %v4049_v50  ;;  %v2407_v58 = vxor.u32 2147483648, %v2406_v47  ;;  %18869 = vst [vmem:[#allocation86_spill] sm:$0xff] %v16951_v31 }
 0x3a4   : > { %v7489_v62 = vsel %vm7482_vm13, %v7485_v56, %v7488_v8  ;;  %v18864_v42 = vand.u32 2147483647, %v16515_v23  ;;  %vm5525_vm8 = vcmp.lt.s32.totalorder %v5524_v0, 2  ;;  %v7172_v27 = vand.u32 3, %v16572_v13 }
 0x3a5   : > { %v7490_v35 = vsel %vm4183_vm7, nan, %v7489_v62  ;;  %v4053_v17 = vsub.s32 0, %v16925_v41  ;;  %v5841_v32 = vsel %vm5834_vm3, %v5837_v24, %v5840_v46  ;;  %vm5526_vm4 = vcmp.eq.s32.totalorder %v5524_v0, 0 }
 0x3a6   : > { %vm16933_vm5 = vcmp.le.f32.partialorder %v18864_v42, 0.7853982  ;;  %vm5529_vm11 = vcmp.eq.s32.totalorder %v5524_v0, 2  ;;  %v2408_v40 = vsel %vm2325_vm9, %v2407_v58, %v2406_v47  ;;  %v18867_v50 = vxor.u32 2147483648, %v16616_v25 }
 0x3a7   : > { %v4076_v60 = vsel %vm16933_vm5, 0, %v4074_v45  ;;  %v18868_v13 = vxor.u32 2147483648, %v16606_v44  ;;  %v2411_v52 = vsel %vm16788_vm2, %v16455_v33, %v2408_v40  ;;  %v16956_v61 = vand.u32 3, %v2416_v38  ;;  %v16959_v45 = vpop.f32.mrb[33].mxu0 }
 0x3a8   : > { %v5528_v18 = vsel %vm5526_vm4, %v16606_v44, %v18867_v50  ;;  %v11792_v24 = vmin.u32 %v4053_v17, %v16925_v41  ;;  %18870 = vst [vmem:[#allocation87_spill] sm:$0xff] %v16959_v45  ;;  %12417 = vcosq.f32 %v2411_v52  ;;  %vm7173_vm7 = vcmp.lt.s32.totalorder %v7172_v27, 2  ;;  %v16961_v8 = vpop.f32.mrb[34].mxu0 }
 0x3a9   : > { %v5531_v56 = vsel %vm5529_vm11, %v18868_v13, %v16616_v25  ;;  %vm7174_vm9 = vcmp.eq.s32.totalorder %v7172_v27, 0  ;;  %vm7177_vm15 = vcmp.eq.s32.totalorder %v7172_v27, 2  ;;  %18871 = vst [vmem:[#allocation88_spill] sm:$0xff] %v16961_v8  ;;  %12419 = vsinq.f32 %v2411_v52  ;;  %v16965_v47 = vpop.f32.mrb[35].mxu0 }
 0x3aa   : > { %v5532_v16 = vsel %vm5525_vm8, %v5528_v18, %v5531_v56  ;;  %v4055_v44 = vclz %v11792_v24  ;;  %v4080_v25 = vadd.s32 3, %v4076_v60  ;;  %v5842_v53 = vsel %vm2519_vm0, nan, %v5841_v32  ;;  %18872 = vst [vmem:[#allocation89_spill] sm:$0xff] %v16965_v47 }
 0x3ab   : > { %v5533_v37 = vsel %vm2207_vm10, nan, %v5532_v16  ;;  %v18873_v46 = vxor.u32 2147483648, %v16824_v49  ;;  %v18874_v0 = vxor.u32 2147483648, %v16814_v21  ;;  %v16976_v58 = vand.u32 3, %v16891_v26 }
 0x3ac   : > { %vm2419_vm2 = vcmp.eq.s32.totalorder %v16956_v61, 0  ;;  %vm2422_vm0 = vcmp.eq.s32.totalorder %v16956_v61, 2  ;;  %v11793_v30 = vadd.s32 4294967294, %v4055_v44  ;;  %vm2418_vm10 = vcmp.lt.s32.totalorder %v16956_v61, 2  ;;  %v18884_v44 = vld [vmem:[#allocation37_spill] sm:$0xff]  ;;  %v18895_v61 = vld [vmem:[#allocation47_spill] sm:$0xff] }
 0x3ad   : > { %v7176_v62 = vsel %vm7174_vm9, %v16814_v21, %v18873_v46  ;;  %v7179_v38 = vsel %vm7177_vm15, %v18874_v0, %v16824_v49  ;;  %v4043_v17 = vadd.s32 %v16778_v36, %v16809_v1  ;;  %v16986_v32 = vpack.c.bf16 %v7490_v35, %v5842_v53  ;;  %v17005_v36 = vpop.f32.mrb[36].mxu0  ;;  %v18885_v53 = vld [vmem:[#allocation36_spill] sm:$0xff]  ;;  %v17031_v46 = vpop.permute.xlu0 %7562 }
 0x3ae   : > { %v7180_v42 = vsel %vm7173_vm7, %v7176_v62, %v7179_v38  ;;  %v16992_v49 = vpack.c.bf16 %v15758_v4, %v15758_v4  ;;  %vm2415_vm13 = vweird.f32 %v16455_v33  ;;  %vm11794_vm14 = vcmp.lt.s32.totalorder %v11793_v30, 0  ;;  %18877 = vst [vmem:[#allocation92_spill] sm:$0xff] %v17005_v36  ;;  %v18887_v38 = vld [vmem:[#allocation43_spill] sm:$0xff] }
 0x3af   : > { %v7181_v21 = vsel %vm3871_vm6, nan, %v7180_v42  ;;  %v16995_v26 = vand.u32 3, %v4080_v25  ;;  %v16999_v40 = vand.u32 3, %v4076_v60  ;;  %v4058_v50 = vsel %vm11794_vm14, 0, %v11793_v30  ;;  %v17010_v60 = vpop.f32.mrb[37].mxu0  ;;  %v18888_v42 = vld [vmem:[#allocation44_spill] sm:$0xff] }
 0x3b0   : > { %18875 = vst [vmem:[#allocation90_spill] sm:$0xff] %v16992_v49  ;;  %v16997_v27 = vpack.c.bf16 %v7181_v21, %v5533_v37  ;;  %vm5731_vm3 = vcmp.lt.s32.totalorder %v16976_v58, 2  ;;  %vm5732_vm12 = vcmp.eq.s32.totalorder %v16976_v58, 0  ;;  %v7535_v5 = vpack.c.bf16 %v15745_v19, %v15745_v19  ;;  %18878 = vst [vmem:[#allocation93_spill] sm:$0xff] %v17010_v60  ;;  %v17023_v52 = vpop.f32.mrb[38].mxu0 }
 0x3b1   : > { %v4059_v4 = vsub.s32 32, %v4058_v50  ;;  %v4060_v1 = vshll.u32 %v16925_v41, %v4058_v50  ;;  %v4063_v35 = vsub.s32 4294967266, %v4058_v50  ;;  %vm5735_vm6 = vcmp.eq.s32.totalorder %v16976_v58, 2  ;;  %v18882_v41 = vld [vmem:[#allocation42_spill] sm:$0xff] }
 0x3b2   : > { %18876 = vst [vmem:[#allocation91_spill] sm:$0xff] %v16997_v27  ;;  %8117 = vmatpush1.bf16.msra.mxu0 %v16997_v27  ;;  %vm18879_vm8 = vcmask 1041408   ;;  %v7711_v19 = vadd.f32 %v16554_v54, %v16981_v15  ;;  %v7784_v13 = vadd.f32 %v16556_v43, %v16981_v15  ;;  %v7713_v56 = vadd.f32 %v18882_v41, %v16981_v15  ;;  %18883 = vst [vmem:[#allocation42_spill] sm:$0xff] %v17023_v52  ;;  %v17033_v54 = vpop.f32.mrb[39].mxu0  ;;  %v12418_v62 = vpop.eup %12417 }
 0x3b3   : > { %11961 = vmatprep.subr.msk.bf16.mxu0 %vm18879_vm8, %v16992_v49  ;;  %vm18880_vm4 = vmmov %vm18879_vm8  ;;  %v4061_v24 = vshrl.u32 %v4043_v17, %v4059_v4  ;;  %v4064_v16 = vadd.s32 127, %v4063_v35  ;;  %v17027_v25 = vpack.c.bf16 %v18884_v44, %v18884_v44  ;;  %18886 = vst [vmem:[#allocation37_spill] sm:$0xff] %v17033_v54  ;;  %v7786_v30 = vadd.f32 %v18887_v38, %v16981_v15  ;;  %v12420_v21 = vpop.eup %12419  ;;  %v17040_v35 = vpop.permute.xlu1 %7567  ;;  %v18890_v49 = vld [vmem:[#allocation46_spill] sm:$0xff] }
 0x3b4   : > { %v17015_v18 = vsel %vm18880_vm4, %v7535_v5, 0  ;;  %v8260_v43 = vmax.f32 %v7711_v19, 0.0  ;;  %v8262_v0 = vmax.f32 %v7784_v13, 0.0  ;;  %v7715_v17 = vadd.f32 %v18888_v42, %v17031_v46  ;;  %v18889_v19 = vld [vmem:[#allocation45_spill] sm:$0xff] }
 0x3b5   : > { %18881 = vst [vmem:[#allocation94_spill] sm:$0xff] %v17015_v18  ;;  %v2423_v50 = vxor.u32 2147483648, %v12418_v62  ;;  %v4062_v5 = vor.u32 %v4061_v24, %v4060_v1  ;;  %v4065_v4 = vshll.u32 %v4064_v16, 23  ;;  %v8261_v41 = vmax.f32 %v7713_v56, 0.0  ;;  %v17057_v16 = vld [vmem:[%s18440_s3] sm:$0xff]  }
 0x3b6   : > { %8119 = vmatpush1.bf16.msra.mxu0 %v17015_v18  ;;  %v2420_v44 = vxor.u32 2147483648, %v12420_v21  ;;  %v8276_v37 = vmax.f32 %v7715_v17, 0.0  ;;  %v7788_v13 = vadd.f32 %v18889_v19, %v17031_v46  ;;  %v7717_v38 = vadd.f32 %v18890_v49, %v17031_v46 }
 0x3b7   : > { %v2424_v42 = vsel %vm2422_vm0, %v2423_v50, %v12420_v21  ;;  %v4066_v27 = vor.u32 4788187, %v4065_v4  ;;  %v4069_v54 = vcvt.s32.f32 %v4062_v5  ;;  %v5737_v1 = vsel %vm5735_vm6, %v2423_v50, %v12420_v21  ;;  %v17061_v5 = vpop.f32.mrb[40].mxu0  ;;  %vm18944_vm6 = vmmov %vm18880_vm4 }
 0x3b8   : > { %v2421_v24 = vsel %vm2419_vm2, %v12418_v62, %v2420_v44  ;;  %v5734_v56 = vsel %vm5732_vm12, %v12418_v62, %v2420_v44  ;;  %vm18891_vm11 = vcmask 293888   ;;  %v8396_v49 = vpack.c.bf16 %v8276_v37, %v8260_v43  ;;  %18892 = vst [vmem:[#allocation36_spill] sm:$0xff] %v17061_v5  ;;  %v17066_v44 = vpop.f32.mrb[41].mxu0  ;;  %vm18942_vm12 = vmmov %vm18880_vm4 }
 0x3b9   : > { %11962 = vmatmul.mubr.msk.bf16.vlgmr.msra.gmra.mrb[48].mxu0 %vm18891_vm11, %v17057_v16  ;;  %v8278_v17 = vmax.f32 %v7788_v13, 0.0  ;;  %v2425_v21 = vsel %vm2418_vm10, %v2421_v24, %v2424_v42  ;;  %v4067_v50 = vand.u32 2147483647, %v4066_v27  ;;  %v18893_v4 = vmov 0   ;;  %18894 = vst [vmem:[#allocation43_spill] sm:$0xff] %v17066_v44  ;;  %v17080_v27 = vpop.f32.mrb[42].mxu0  ;;  %vm18907_vm7 = vmmov %vm18891_vm11 }
 0x3ba   : > { %8156 = vmatprep.mubr.bf16.mxu0 %v18893_v4  ;;  %v8263_v19 = vmax.f32 %v7786_v30, 0.0  ;;  %v8277_v62 = vmax.f32 %v7717_v38, 0.0  ;;  %v17070_v18 = vsel %vm2415_vm13, nan, %v2425_v21  ;;  %v17074_v37 = vsel %vm5731_vm3, %v5734_v56, %v5737_v1  ;;  %18896 = vst [vmem:[#allocation44_spill] sm:$0xff] %v17080_v27  ;;  %v17082_v30 = vpop.permute.xlu1 %7572  ;;  %v18897_v24 = vld [vmem:[#allocation48_spill] sm:$0xff]  ;;  %v18898_v21 = vld [vmem:[#allocation49_spill] sm:$0xff]  ;;  %vm18926_vm14 = vmmov %vm18907_vm7 }
 0x3bb   : > { %v17076_v43 = vpack.c.bf16 %v8278_v17, %v8262_v0  ;;  %v7790_v13 = vadd.f32 %v18895_v61, %v17031_v46  ;;  %v4070_v42 = vmul.f32 %v4069_v54, %v4067_v50  ;;  %v7721_v44 = vadd.f32 %v18897_v24, %v17040_v35  ;;  %v17088_v58 = vpop.f32.mrb[43].mxu0  ;;  %v18900_v0 = vld [vmem:[#allocation50_spill] sm:$0xff]  ;;  %v18901_v17 = vld [vmem:[#allocation51_spill] sm:$0xff]  ;;  %v18902_v54 = vld [vmem:[#allocation52_spill] sm:$0xff] }
 0x3bc   : > { %v8397_v38 = vpack.c.bf16 %v8277_v62, %v8261_v41  ;;  %v7794_v5 = vadd.f32 %v18898_v21, %v17040_v35  ;;  %18899 = vst [vmem:[#allocation45_spill] sm:$0xff] %v17088_v58  ;;  %v7723_v56 = vadd.f32 %v18900_v0, %v17040_v35  ;;  %v7796_v61 = vadd.f32 %v18901_v17, %v17040_v35  ;;  %v18903_v24 = vld [vmem:[#allocation53_spill] sm:$0xff]  ;;  %v17098_v21 = vpop.permute.xlu0 %7577  ;;  %vm18949_vm8 = vmmov %vm18907_vm7 }
 0x3bd   : > { %v8279_v1 = vmax.f32 %v7790_v13, 0.0  ;;  %v7725_v50 = vadd.f32 %v18902_v54, %v17082_v30  ;;  %v4071_v27 = vxor.u32 2147483648, %v4070_v42  ;;  %v8292_v41 = vmax.f32 %v7721_v44, 0.0  ;;  %v18904_v54 = vld [vmem:[#allocation54_spill] sm:$0xff]  ;;  %vm18957_vm4 = vmmov %vm18907_vm7 }
 0x3be   : > { %v8294_v62 = vmax.f32 %v7794_v5, 0.0  ;;  %v7798_v52 = vadd.f32 %v18903_v24, %v17082_v30  ;;  %8541 = vmatprep.subr.bf16.mxu0 %v8397_v38  ;;  %v8293_v13 = vmax.f32 %v7723_v56, 0.0  ;;  %v8295_v60 = vmax.f32 %v7796_v61, 0.0  ;;  %v18905_v5 = vld [vmem:[#allocation55_spill] sm:$0xff]  ;;  %v17122_v56 = vpop.f32.mrb[44].mxu0  ;;  %vm18966_vm11 = vmmov %vm18957_vm4 }
 0x3bf   : > { %v17100_v58 = vpack.c.bf16 %v8279_v1, %v8263_v19  ;;  %v8308_v0 = vmax.f32 %v7725_v50, 0.0  ;;  %8542 = vmatpush1.bf16.msra.mxu0 %v8396_v49  ;;  %v4072_v17 = vsel %vm3989_vm1, %v4071_v27, %v4070_v42  ;;  %v7727_v44 = vadd.f32 %v18904_v54, %v17082_v30  ;;  %v17114_v19 = vld [vmem:[%s18440_s3 + $0x8] sm:$0xff]   ;;  %v18909_v42 = vld [vmem:[#allocation57_spill] sm:$0xff]  ;;  %18910 = vst [vmem:[#allocation47_spill] sm:$0xff] %v17122_v56  ;;  %v17127_v24 = vpop.f32.mrb[45].mxu0  ;;  %v18913_v54 = vld [vmem:[#allocation58_spill] sm:$0xff] }
 0x3c0   : > { %v8310_v36 = vmax.f32 %v7798_v52, 0.0  ;;  %v7800_v47 = vadd.f32 %v18905_v5, %v17082_v30  ;;  %v4075_v38 = vsel %vm16933_vm5, %v16515_v23, %v4072_v17  ;;  %18906 = vst [vmem:[#allocation46_spill] sm:$0xff] %v17114_v19  ;;  %v18908_v52 = vld [vmem:[#allocation56_spill] sm:$0xff]  ;;  %v7804_v1 = vadd.f32 %v18909_v42, %v17098_v21  ;;  %18912 = vst [vmem:[#allocation49_spill] sm:$0xff] %v17127_v24  ;;  %v17129_v17 = vpop.permute.xlu1 %7582 }
 0x3c1   : > { %11963 = vmatmul.mubr.msk.bf16.gmra.mrb[52].mxu0 %vm18907_vm7, %v17114_v19  ;;  %v8412_v49 = vpack.c.bf16 %v8308_v0, %v8292_v41  ;;  %v7731_v27 = vadd.f32 %v18908_v52, %v17098_v21  ;;  %12421 = vcosq.f32 %v4075_v38  ;;  %v8309_v61 = vmax.f32 %v7727_v44, 0.0  ;;  %v17133_v52 = vpop.f32.mrb[46].mxu0  ;;  %v18921_v24 = vld [vmem:[#allocation64_spill] sm:$0xff] }
 0x3c2   : > { %8166 = vmatprep.mubr.bf16.mxu0 %v18893_v4  ;;  %v17125_v11 = vpack.c.bf16 %v8310_v36, %v8294_v62  ;;  %v8311_v50 = vmax.f32 %v7800_v47, 0.0  ;;  %12423 = vsinq.f32 %v4075_v38  ;;  %v8326_v0 = vmax.f32 %v7804_v1, 0.0  ;;  %18914 = vst [vmem:[#allocation50_spill] sm:$0xff] %v17133_v52  ;;  %v18915_v47 = vld [vmem:[#allocation59_spill] sm:$0xff]  ;;  %v18916_v38 = vld [vmem:[#allocation60_spill] sm:$0xff]  ;;  %v17147_v1 = vpop.permute.xlu0 %7587  ;;  %v18918_v52 = vld [vmem:[#allocation61_spill] sm:$0xff] }
 0x3c3   : > { %v8324_v41 = vmax.f32 %v7731_v27, 0.0  ;;  %v7733_v5 = vadd.f32 %v18913_v54, %v17098_v21  ;;  %vm4086_vm1 = vcmp.eq.s32.totalorder %v16995_v26, 2  ;;  %vm7383_vm5 = vcmp.eq.s32.totalorder %v16999_v40, 2  ;;  %v17143_v27 = vpop.f32.mrb[47].mxu0 }
 0x3c4   : > { %18911 = vst [vmem:[#allocation48_spill] sm:$0xff] %v17125_v11  ;;  %v8413_v36 = vpack.c.bf16 %v8309_v61, %v8293_v13  ;;  %v17137_v62 = vpack.c.bf16 %v8311_v50, %v8295_v60  ;;  %v7806_v44 = vadd.f32 %v18915_v47, %v17098_v21  ;;  %v7735_v42 = vadd.f32 %v18916_v38, %v17129_v17  ;;  %v18919_v60 = vld [vmem:[#allocation62_spill] sm:$0xff]  ;;  %v18920_v50 = vld [vmem:[#allocation63_spill] sm:$0xff] }
 0x3c5   : > { %18917 = vst [vmem:[#allocation51_spill] sm:$0xff] %v17143_v27  ;;  %vm4083_vm9 = vcmp.eq.s32.totalorder %v16995_v26, 0  ;;  %vm7380_vm15 = vcmp.eq.s32.totalorder %v16999_v40, 0  ;;  %v8325_v54 = vmax.f32 %v7733_v5, 0.0  ;;  %v7808_v13 = vadd.f32 %v18918_v52, %v17129_v17  ;;  %v18922_v5 = vld [vmem:[#allocation65_spill] sm:$0xff] }
 0x3c6   : > { %v7737_v61 = vadd.f32 %v18919_v60, %v17129_v17  ;;  %v7810_v47 = vadd.f32 %v18920_v50, %v17129_v17  ;;  %vm4082_vm2 = vcmp.lt.s32.totalorder %v16995_v26, 2  ;;  %vm7379_vm0 = vcmp.lt.s32.totalorder %v16999_v40, 2  ;;  %8543 = vmatprep.subr.bf16.mxu0 %v8413_v36  ;;  %v18923_v50 = vld [vmem:[#allocation66_spill] sm:$0xff] }
 0x3c7   : > { %v8327_v38 = vmax.f32 %v7806_v44, 0.0  ;;  %v8340_v27 = vmax.f32 %v7735_v42, 0.0  ;;  %v7741_v56 = vadd.f32 %v18921_v24, %v17147_v1  ;;  %v7814_v19 = vadd.f32 %v18922_v5, %v17147_v1  ;;  %8544 = vmatpush1.bf16.msra.mxu0 %v8412_v49  ;;  %v18924_v24 = vld [vmem:[#allocation67_spill] sm:$0xff]  ;;  %v17172_v5 = vld [vmem:[%s18440_s3 + $0x10] sm:$0xff]   ;;  %v17176_v49 = vpop.permute.xlu1 %7592 }
 0x3c8   : > { %vm4079_vm10 = vweird.f32 %v16515_v23  ;;  %v8342_v52 = vmax.f32 %v7808_v13, 0.0  ;;  %v8341_v60 = vmax.f32 %v7737_v61, 0.0  ;;  %v8343_v8 = vmax.f32 %v7810_v47, 0.0  ;;  %18925 = vst [vmem:[#allocation52_spill] sm:$0xff] %v17172_v5  ;;  %v18930_v47 = vld [vmem:[#allocation69_spill] sm:$0xff] }
 0x3c9   : > { %v7743_v11 = vadd.f32 %v18923_v50, %v17147_v1  ;;  %v5739_v44 = vsel %vm2415_vm13, nan, %v17074_v37  ;;  %v8428_v36 = vpack.c.bf16 %v8340_v27, %v8324_v41  ;;  %v8356_v42 = vmax.f32 %v7741_v56, 0.0  ;;  %11964 = vmatmul.mubr.msk.bf16.gmra.mrb[56].mxu0 %vm18926_vm14, %v17172_v5  ;;  %v18929_v41 = vld [vmem:[#allocation68_spill] sm:$0xff]  ;;  %vm18933_vm13 = vmmov %vm18907_vm7 }
 0x3ca   : > { %v7816_v45 = vadd.f32 %v18924_v24, %v17147_v1  ;;  %v17178_v13 = vpack.c.bf16 %v8342_v52, %v8326_v0  ;;  %v8429_v61 = vpack.c.bf16 %v8341_v60, %v8325_v54  ;;  %v17180_v33 = vpack.c.bf16 %v8343_v8, %v8327_v38  ;;  %8176 = vmatprep.mubr.bf16.mxu0 %v18893_v4  ;;  %v18931_v24 = vld [vmem:[#allocation70_spill] sm:$0xff]  ;;  %v18932_v0 = vld [vmem:[#allocation71_spill] sm:$0xff]  ;;  %vm18973_vm7 = vmmov %vm18957_vm4 }
 0x3cb   : > { %v8358_v37 = vmax.f32 %v7814_v19, 0.0  ;;  %v8357_v56 = vmax.f32 %v7743_v11, 0.0  ;;  %v7745_v27 = vadd.f32 %v18929_v41, %v17176_v49  ;;  %v7818_v50 = vadd.f32 %v18930_v47, %v17176_v49  ;;  %v12422_v11 = vpop.eup %12421 }
 0x3cc   : > { %18927 = vst [vmem:[#allocation53_spill] sm:$0xff] %v17178_v13  ;;  %18928 = vst [vmem:[#allocation54_spill] sm:$0xff] %v17180_v33  ;;  %v7747_v5 = vadd.f32 %v18931_v24, %v17176_v49  ;;  %v8359_v31 = vmax.f32 %v7816_v45, 0.0  ;;  %8545 = vmatprep.subr.bf16.mxu0 %v8429_v61  ;;  %v7820_v54 = vadd.f32 %v18932_v0, %v17176_v49  ;;  %v12424_v47 = vpop.eup %12423  ;;  %v4087_v45 = vxor.u32 2147483648, %v12422_v11 }
 0x3cd   : > { %v7857_v8 = vadd.f32 %v16707_v29, %v16981_v15  ;;  %v7930_v19 = vadd.f32 %v16709_v10, %v16981_v15  ;;  %v8372_v38 = vmax.f32 %v7745_v27, 0.0  ;;  %v8374_v52 = vmax.f32 %v7818_v50, 0.0  ;;  %8546 = vmatpush1.bf16.msra.mxu0 %v8428_v36 }
 0x3ce   : > { %v8373_v60 = vmax.f32 %v7747_v5, 0.0  ;;  %v7859_v41 = vadd.f32 %v16714_v51, %v16981_v15  ;;  %v8375_v61 = vmax.f32 %v7820_v54, 0.0  ;;  %v7932_v0 = vadd.f32 %v16716_v39, %v16981_v15 }
 0x3cf   : > { %v8264_v24 = vmax.f32 %v7857_v8, 0.0  ;;  %v4084_v13 = vxor.u32 2147483648, %v12424_v47  ;;  %v8444_v29 = vpack.c.bf16 %v8372_v38, %v8356_v42  ;;  %v17199_v33 = vpack.c.bf16 %v8374_v52, %v8358_v37 }
 0x3d0   : > { %v8445_v10 = vpack.c.bf16 %v8373_v60, %v8357_v56  ;;  %v4088_v27 = vsel %vm4086_vm1, %v4087_v45, %v12424_v47  ;;  %v7385_v36 = vsel %vm7383_vm5, %v4087_v45, %v12424_v47  ;;  %v17205_v5 = vpack.c.bf16 %v8375_v61, %v8359_v31  ;;  %v17220_v31 = vld [vmem:[%s18440_s3 + $0x18] sm:$0xff]   ;;  %v17252_v61 = vld [vmem:[%s18442_s5] sm:$0xff]   ;;  %vm18979_vm1 = vmmov %vm18944_vm6 }
 0x3d1   : > { %v8266_v51 = vmax.f32 %v7930_v19, 0.0  ;;  %v4085_v50 = vsel %vm4083_vm9, %v12422_v11, %v4084_v13  ;;  %v7382_v39 = vsel %vm7380_vm15, %v12422_v11, %v4084_v13  ;;  %v8265_v54 = vmax.f32 %v7859_v41, 0.0  ;;  %11965 = vmatmul.mubr.msk.bf16.gmra.mrb[60].mxu0 %vm18933_vm13, %v17220_v31  ;;  %vm18988_vm9 = vmmov %vm18979_vm1 }
 0x3d2   : > { %v7861_v42 = vadd.f32 %v16727_v28, %v17031_v46  ;;  %8547 = vmatprep.subr.bf16.mxu0 %v8445_v10  ;;  %v4089_v37 = vsel %vm4082_vm2, %v4085_v50, %v4088_v27  ;;  %v7386_v56 = vsel %vm7379_vm0, %v7382_v39, %v7385_v36  ;;  %v7934_v13 = vadd.f32 %v16729_v7, %v17031_v46  ;;  %v18935_v27 = vld [vmem:[#allocation73_spill] sm:$0xff]  ;;  %v18936_v39 = vld [vmem:[#allocation74_spill] sm:$0xff]  ;;  %vm18993_vm15 = vmmov %vm18979_vm1 }
 0x3d3   : > { %v7863_v28 = vadd.f32 %v16738_v48, %v17031_v46  ;;  %v4090_v26 = vsel %vm4079_vm10, nan, %v4089_v37  ;;  %v7387_v40 = vsel %vm4079_vm10, nan, %v7386_v56  ;;  %v7936_v19 = vadd.f32 %v16740_v6, %v17031_v46  ;;  %8548 = vmatpush1.bf16.msra.mxu0 %v8444_v29  ;;  %8573 = vmatprep.mubr.bf16.mxu0 %v18893_v4  ;;  %v17238_v48 = vpop.f32.mrb[32].mxu1  ;;  %v18934_v29 = vld [vmem:[#allocation72_spill] sm:$0xff]  ;;  %vm19003_vm2 = vmmov %vm18979_vm1 }
 0x3d4   : > { %v8280_v8 = vmax.f32 %v7861_v42, 0.0  ;;  %v17236_v11 = vpack.c.bf16 %v4090_v26, %v17070_v18  ;;  %v8267_v7 = vmax.f32 %v7932_v0, 0.0  ;;  %v8282_v38 = vmax.f32 %v7934_v13, 0.0  ;;  %v17244_v45 = vpop.f32.mrb[33].mxu1  ;;  %v18938_v13 = vld [vmem:[#allocation76_spill] sm:$0xff]  ;;  %v18939_v26 = vld [vmem:[#allocation77_spill] sm:$0xff]  ;;  %vm19006_vm0 = vmmov %vm18979_vm1 }
 0x3d5   : > { %v8281_v52 = vmax.f32 %v7863_v28, 0.0  ;;  %v17240_v60 = vpack.c.bf16 %v7387_v40, %v5739_v44  ;;  %v8283_v23 = vmax.f32 %v7936_v19, 0.0  ;;  %v7867_v47 = vadd.f32 %v16750_v2, %v17040_v35  ;;  %v17258_v0 = vpop.f32.mrb[34].mxu1  ;;  %vm19014_vm10 = vmmov %vm19006_vm0 }
 0x3d6   : > { %v8400_v41 = vpack.c.bf16 %v8280_v8, %v8264_v24  ;;  %8188 = vmatpush1.bf16.msra.mxu1 %v17236_v11  ;;  %v17247_v6 = vpack.c.bf16 %v8282_v38, %v8266_v51  ;;  %v7940_v44 = vadd.f32 %v16752_v12, %v17040_v35  ;;  %v7869_v24 = vadd.f32 %v16769_v34, %v17040_v35  ;;  %v17267_v51 = vpop.f32.mrb[35].mxu1  ;;  %vm19021_vm14 = vmmov %vm19006_vm0 }
 0x3d7   : > { %v8401_v18 = vpack.c.bf16 %v8281_v52, %v8265_v54  ;;  %8189 = vmatprep.subr.bf16.mxu1 %v16986_v32  ;;  %v17261_v2 = vpack.c.bf16 %v8283_v23, %v8267_v7  ;;  %vm8528_vm3 = vcmask 523264   ;;  %v7942_v10 = vadd.f32 %v18934_v29, %v17040_v35  ;;  %v18937_v54 = vld [vmem:[#allocation75_spill] sm:$0xff]  ;;  %v18940_v7 = vld [vmem:[#allocation78_spill] sm:$0xff]  ;;  %vm19024_vm13 = vmmov %vm19006_vm0 }
 0x3d8   : > { %v7871_v36 = vadd.f32 %v18935_v27, %v17082_v30  ;;  %v8296_v50 = vmax.f32 %v7867_v47, 0.0  ;;  %v8298_v12 = vmax.f32 %v7940_v44, 0.0  ;;  %v7944_v34 = vadd.f32 %v18936_v39, %v17082_v30  ;;  %v18941_v52 = vld [vmem:[#allocation79_spill] sm:$0xff]  ;;  %v17292_v27 = vpop.f32.mrb[36].mxu1 }
 0x3d9   : > { %8687 = vmatprep.subr.bf16.mxu0 %v8401_v18  ;;  %v7873_v42 = vadd.f32 %v18937_v54, %v17082_v30  ;;  %v8297_v37 = vmax.f32 %v7869_v24, 0.0  ;;  %v7946_v28 = vadd.f32 %v18938_v13, %v17082_v30  ;;  %v7877_v40 = vadd.f32 %v18939_v26, %v17098_v21  ;;  %11975 = vmatmul.mubr.msk.bf16.vlgmr.msra.gmra.mrb[64].mxu0 %vm8528_vm3, %v17252_v61  ;;  %v18945_v54 = vld [vmem:[#allocation80_spill] sm:$0xff]  ;;  %v17299_v13 = vpop.f32.mrb[37].mxu1 }
 0x3da   : > { %v8312_v56 = vmax.f32 %v7871_v36, 0.0  ;;  %8190 = vmatpush1.bf16.msra.mxu1 %v17240_v60  ;;  %v8314_v8 = vmax.f32 %v7944_v34, 0.0  ;;  %v7950_v38 = vadd.f32 %v18940_v7, %v17098_v21  ;;  %v7879_v23 = vadd.f32 %v18941_v52, %v17098_v21  ;;  %8688 = vmatpush1.bf16.msra.mxu0 %v8400_v41  ;;  %v18947_v41 = vld [vmem:[#allocation82_spill] sm:$0xff] }
 0x3db   : > { %v8313_v19 = vmax.f32 %v7873_v42, 0.0  ;;  %11966 = vmatprep.subr.msk.bf16.mxu1 %vm18942_vm12, %v17027_v25  ;;  %v18943_v47 = vpack.c.bf16 %v18885_v53, %v18885_v53  ;;  %v8299_v44 = vmax.f32 %v7942_v10, 0.0  ;;  %v8315_v29 = vmax.f32 %v7946_v28, 0.0  ;;  %8583 = vmatprep.mubr.bf16.mxu0 %v18893_v4  ;;  %v18946_v10 = vld [vmem:[#allocation81_spill] sm:$0xff]  ;;  %v18948_v28 = vld [vmem:[#allocation83_spill] sm:$0xff] }
 0x3dc   : > { %v8416_v24 = vpack.c.bf16 %v8312_v56, %v8296_v50  ;;  %v17294_v36 = vpack.c.bf16 %v8314_v8, %v8298_v12  ;;  %v8328_v34 = vmax.f32 %v7877_v40, 0.0  ;;  %v7952_v42 = vadd.f32 %v18945_v54, %v17098_v21  ;;  %v17307_v12 = vpop.f32.mrb[38].mxu1 }
 0x3dd   : > { %v17290_v18 = vsel %vm18944_vm6, %v18943_v47, 0  ;;  %v8417_v39 = vpack.c.bf16 %v8313_v19, %v8297_v37  ;;  %v17301_v53 = vpack.c.bf16 %v8315_v29, %v8299_v44  ;;  %v8330_v26 = vmax.f32 %v7950_v38, 0.0  ;;  %v17316_v7 = vpop.f32.mrb[39].mxu1  ;;  %v17322_v38 = vld [vmem:[%s18442_s5 + $0x8] sm:$0xff]  }
 0x3de   : > { %v7881_v50 = vadd.f32 %v18946_v10, %v17129_v17  ;;  %v7954_v56 = vadd.f32 %v18947_v41, %v17129_v17  ;;  %8192 = vmatpush1.bf16.msra.mxu1 %v17290_v18  ;;  %v8329_v37 = vmax.f32 %v7879_v23, 0.0  ;;  %v7883_v40 = vadd.f32 %v18948_v28, %v17129_v17 }
 0x3df   : > { %8689 = vmatprep.subr.bf16.mxu0 %v8417_v39  ;;  %v7956_v8 = vadd.f32 %v16861_v14, %v17129_v17  ;;  %v7887_v19 = vadd.f32 %v16863_v59, %v17147_v1  ;;  %8614 = vmatprep.subr.bf16.mxu1 %v17100_v58  ;;  %v7960_v47 = vadd.f32 %v16874_v57, %v17147_v1  ;;  %v8331_v44 = vmax.f32 %v7952_v42, 0.0 }
 0x3e0   : > { %v8344_v52 = vmax.f32 %v7881_v50, 0.0  ;;  %v8346_v23 = vmax.f32 %v7954_v56, 0.0  ;;  %8690 = vmatpush1.bf16.msra.mxu0 %v8416_v24  ;;  %v7889_v14 = vadd.f32 %v16876_v3, %v17147_v1  ;;  %v8345_v59 = vmax.f32 %v7883_v40, 0.0 }
 0x3e1   : > { %v8347_v29 = vmax.f32 %v7956_v8, 0.0  ;;  %v7962_v58 = vadd.f32 %v16882_v20, %v17147_v1  ;;  %11967 = vmatmul.mubr.msk.bf16.vlgmr.msra.gmra.mrb[48].mxu1 %vm18949_vm8, %v17057_v16  ;;  %v8360_v10 = vmax.f32 %v7887_v19, 0.0  ;;  %v8362_v24 = vmax.f32 %v7960_v47, 0.0  ;;  %11976 = vmatmul.mubr.msk.bf16.gmra.mrb[68].mxu0 %vm8528_vm3, %v17322_v38 }
 0x3e2   : > { %v8432_v39 = vpack.c.bf16 %v8344_v52, %v8328_v34  ;;  %v17332_v54 = vpack.c.bf16 %v8346_v23, %v8330_v26  ;;  %8229 = vmatprep.mubr.bf16.mxu1 %v18893_v4  ;;  %8615 = vmatpush1.bf16.msra.mxu1 %v17076_v43  ;;  %v8433_v57 = vpack.c.bf16 %v8345_v59, %v8329_v37  ;;  %v8361_v42 = vmax.f32 %v7889_v14, 0.0  ;;  %v17349_v26 = vpop.f32.mrb[40].mxu1  ;;  %v18952_v52 = vld [vmem:[#allocation48_spill] sm:$0xff] }
 0x3e3   : > { %v17336_v3 = vpack.c.bf16 %v8347_v29, %v8331_v44  ;;  %v7891_v50 = vadd.f32 %v16884_v9, %v17176_v49  ;;  %8616 = vmatprep.subr.bf16.mxu1 %v17137_v62  ;;  %v8363_v20 = vmax.f32 %v7962_v58, 0.0  ;;  %v7964_v16 = vadd.f32 %v16895_v55, %v17176_v49  ;;  %8593 = vmatprep.mubr.bf16.mxu0 %v18893_v4  ;;  %v18950_v62 = vld [vmem:[#allocation86_spill] sm:$0xff]  ;;  %v18951_v55 = vld [vmem:[#allocation87_spill] sm:$0xff]  ;;  %v17358_v28 = vpop.f32.mrb[41].mxu1  ;;  %v17371_v59 = vld [vmem:[%s18442_s5 + $0x10] sm:$0xff]  }
 0x3e4   : > { %v7893_v34 = vadd.f32 %v16900_v63, %v17176_v49  ;;  %v7966_v43 = vadd.f32 %v16902_v22, %v17176_v49  ;;  %8691 = vmatprep.subr.bf16.mxu0 %v8433_v57  ;;  %v8003_v41 = vadd.f32 %v18950_v62, %v16981_v15  ;;  %v8076_v56 = vadd.f32 %v17238_v48, %v16981_v15  ;;  %v17362_v19 = vpop.f32.mrb[42].mxu1  ;;  %v18953_v44 = vld [vmem:[#allocation54_spill] sm:$0xff]  ;;  %v18954_v57 = vld [vmem:[#allocation88_spill] sm:$0xff] }
 0x3e5   : > { %v8376_v9 = vmax.f32 %v7891_v50, 0.0  ;;  %v8005_v37 = vadd.f32 %v18951_v55, %v16981_v15  ;;  %v8378_v63 = vmax.f32 %v7964_v16, 0.0  ;;  %8692 = vmatpush1.bf16.msra.mxu0 %v8432_v39  ;;  %v8078_v8 = vadd.f32 %v17244_v45, %v16981_v15  ;;  %v17365_v48 = vpop.f32.mrb[43].mxu1  ;;  %v18955_v16 = vld [vmem:[#allocation89_spill] sm:$0xff] }
 0x3e6   : > { %v8377_v40 = vmax.f32 %v7893_v34, 0.0  ;;  %v8379_v22 = vmax.f32 %v7966_v43, 0.0  ;;  %8617 = vmatpush1.bf16.msra.mxu1 %v18952_v52  ;;  %v8268_v47 = vmax.f32 %v8003_v41, 0.0  ;;  %v8270_v14 = vmax.f32 %v8076_v56, 0.0  ;;  %v18959_v41 = vld [vmem:[#allocation93_spill] sm:$0xff] }
 0x3e7   : > { %v8448_v23 = vpack.c.bf16 %v8376_v9, %v8360_v10  ;;  %8618 = vmatprep.subr.bf16.mxu1 %v18953_v44  ;;  %v17373_v29 = vpack.c.bf16 %v8378_v63, %v8362_v24  ;;  %v8269_v39 = vmax.f32 %v8005_v37, 0.0  ;;  %v8007_v10 = vadd.f32 %v18954_v57, %v17031_v46  ;;  %v18956_v9 = vld [vmem:[#allocation46_spill] sm:$0xff]  ;;  %v18960_v56 = vld [vmem:[#allocation53_spill] sm:$0xff] }
 0x3e8   : > { %v8449_v58 = vpack.c.bf16 %v8377_v40, %v8361_v42  ;;  %v17375_v45 = vpack.c.bf16 %v8379_v22, %v8363_v20  ;;  %v8080_v50 = vadd.f32 %v17258_v0, %v17031_v46  ;;  %v8009_v34 = vadd.f32 %v18955_v16, %v17031_v46  ;;  %v18958_v42 = vld [vmem:[#allocation92_spill] sm:$0xff] }
 0x3e9   : > { %v8082_v43 = vadd.f32 %v17267_v51, %v17031_v46  ;;  %11968 = vmatmul.mubr.msk.bf16.gmra.mrb[52].mxu1 %vm18957_vm4, %v18956_v9  ;;  %v8271_v24 = vmax.f32 %v8078_v8, 0.0  ;;  %v8013_v20 = vadd.f32 %v18958_v42, %v17040_v35  ;;  %v8086_v62 = vadd.f32 %v17292_v27, %v17040_v35  ;;  %11977 = vmatmul.mubr.msk.bf16.gmra.mrb[72].mxu0 %vm8528_vm3, %v17371_v59  ;;  %v8105_v27 = vpop.f32.mrb[44].mxu1 }
 0x3ea   : > { %8693 = vmatprep.subr.bf16.mxu0 %v8449_v58  ;;  %v8015_v0 = vadd.f32 %v18959_v41, %v17040_v35  ;;  %8239 = vmatprep.mubr.bf16.mxu1 %v18893_v4  ;;  %v8284_v55 = vmax.f32 %v8007_v10, 0.0  ;;  %v8286_v51 = vmax.f32 %v8080_v50, 0.0  ;;  %v8285_v37 = vmax.f32 %v8009_v34, 0.0  ;;  %v8107_v58 = vpop.f32.mrb[45].mxu1 }
 0x3eb   : > { %8619 = vmatpush1.bf16.msra.mxu1 %v18960_v56  ;;  %v8287_v63 = vmax.f32 %v8082_v43, 0.0  ;;  %v8088_v40 = vadd.f32 %v17299_v13, %v17040_v35  ;;  %8603 = vmatprep.mubr.bf16.mxu0 %v18893_v4  ;;  %v8300_v57 = vmax.f32 %v8013_v20, 0.0  ;;  %v8090_v50 = vadd.f32 %v17307_v12, %v17082_v30  ;;  %v18962_v13 = vld [vmem:[#allocation37_spill] sm:$0xff]  ;;  %v8109_v34 = vpop.f32.mrb[46].mxu1 }
 0x3ec   : > { %8620 = vmatprep.subr.bf16.mxu1 %v17205_v5  ;;  %v17401_v22 = vpack.c.bf16 %v8284_v55, %v8268_v47  ;;  %v17403_v8 = vpack.c.bf16 %v8286_v51, %v8270_v14  ;;  %v8405_v52 = vpack.c.bf16 %v8285_v37, %v8269_v39  ;;  %8694 = vmatpush1.bf16.msra.mxu0 %v8448_v23  ;;  %v18961_v5 = vld [vmem:[#allocation42_spill] sm:$0xff]  ;;  %v8302_v47 = vmax.f32 %v8086_v62, 0.0  ;;  %v18963_v23 = vld [vmem:[#allocation36_spill] sm:$0xff]  ;;  %v8111_v9 = vpop.f32.mrb[47].mxu1  ;;  %v17422_v12 = vld [vmem:[%s18442_s5 + $0x18] sm:$0xff]  }
 0x3ed   : > { %v17405_v44 = vpack.c.bf16 %v8287_v63, %v8271_v24  ;;  %v8017_v10 = vadd.f32 %v18961_v5, %v17082_v30  ;;  %v8019_v16 = vadd.f32 %v18962_v13, %v17082_v30  ;;  %v8301_v14 = vmax.f32 %v8015_v0, 0.0 }
 0x3ee   : > { %8833 = vmatprep.subr.bf16.mxu0 %v8405_v52  ;;  %v8092_v39 = vadd.f32 %v17316_v7, %v17082_v30  ;;  %v8023_v43 = vadd.f32 %v18963_v23, %v17098_v21  ;;  %v8318_v42 = vmax.f32 %v8090_v50, 0.0  ;;  %v8096_v20 = vadd.f32 %v17349_v26, %v17098_v21  ;;  %v18964_v7 = vld [vmem:[#allocation43_spill] sm:$0xff]  ;;  %v18967_v26 = vld [vmem:[#allocation44_spill] sm:$0xff] }
 0x3ef   : > { %8621 = vmatpush1.bf16.msra.mxu1 %v17199_v33  ;;  %v8316_v24 = vmax.f32 %v8017_v10, 0.0  ;;  %v8317_v33 = vmax.f32 %v8019_v16, 0.0  ;;  %v8303_v62 = vmax.f32 %v8088_v40, 0.0  ;;  %v8025_v0 = vadd.f32 %v18964_v7, %v17098_v21 }
 0x3f0   : > { %8760 = vmatprep.subr.bf16.mxu1 %v17261_v2  ;;  %v8319_v41 = vmax.f32 %v8092_v39, 0.0  ;;  %v8098_v56 = vadd.f32 %v17358_v28, %v17098_v21  ;;  %v18965_v2 = vld [vmem:[#allocation52_spill] sm:$0xff]  ;;  %v17432_v51 = vpack.c.bf16 %v8318_v42, %v8302_v47  ;;  %v8027_v40 = vadd.f32 %v18967_v26, %v17129_v17  ;;  %v18972_v26 = vld [vmem:[#allocation51_spill] sm:$0xff] }
 0x3f1   : > { %11969 = vmatmul.mubr.msk.bf16.gmra.mrb[56].mxu1 %vm18966_vm11, %v18965_v2  ;;  %v8420_v55 = vpack.c.bf16 %v8316_v24, %v8300_v57  ;;  %v8421_v37 = vpack.c.bf16 %v8317_v33, %v8301_v14  ;;  %v8100_v52 = vadd.f32 %v17362_v19, %v17129_v17  ;;  %11978 = vmatmul.mubr.msk.bf16.gmra.mrb[76].mxu0 %vm8528_vm3, %v17422_v12  ;;  %v8332_v28 = vmax.f32 %v8023_v43, 0.0  ;;  %v18968_v57 = vld [vmem:[#allocation45_spill] sm:$0xff]  ;;  %v18969_v19 = vld [vmem:[#allocation47_spill] sm:$0xff] }
 0x3f2   : > { %8249 = vmatprep.mubr.bf16.mxu1 %v18893_v4  ;;  %v17435_v63 = vpack.c.bf16 %v8319_v41, %v8303_v62  ;;  %v8334_v5 = vmax.f32 %v8096_v20, 0.0  ;;  %v8029_v10 = vadd.f32 %v18968_v57, %v17129_v17  ;;  %v8102_v50 = vadd.f32 %v17365_v48, %v17129_v17  ;;  %8719 = vmatprep.mubr.bf16.mxu0 %v18893_v4  ;;  %v18970_v20 = vld [vmem:[#allocation49_spill] sm:$0xff] }
 0x3f3   : > { %v8333_v13 = vmax.f32 %v8025_v0, 0.0  ;;  %v8335_v16 = vmax.f32 %v8098_v56, 0.0  ;;  %v8348_v47 = vmax.f32 %v8027_v40, 0.0  ;;  %v8350_v14 = vmax.f32 %v8100_v52, 0.0  ;;  %v18971_v0 = vld [vmem:[#allocation50_spill] sm:$0xff] }
 0x3f4   : > { %v8349_v39 = vmax.f32 %v8029_v10, 0.0  ;;  %v8351_v23 = vmax.f32 %v8102_v50, 0.0  ;;  %v8033_v24 = vadd.f32 %v18969_v19, %v17147_v1  ;;  %v8106_v43 = vadd.f32 %v8105_v27, %v17147_v1 }
 0x3f5   : > { %v8436_v42 = vpack.c.bf16 %v8348_v47, %v8332_v28  ;;  %v17451_v33 = vpack.c.bf16 %v8350_v14, %v8334_v5  ;;  %v8035_v62 = vadd.f32 %v18970_v20, %v17147_v1  ;;  %v8108_v48 = vadd.f32 %v8107_v58, %v17147_v1 }
 0x3f6   : > { %v8437_v41 = vpack.c.bf16 %v8349_v39, %v8333_v13  ;;  %v8439_v7 = vpack.c.bf16 %v8351_v23, %v8335_v16  ;;  %v8037_v56 = vadd.f32 %v18971_v0, %v17176_v49  ;;  %v8110_v2 = vadd.f32 %v8109_v34, %v17176_v49 }
 0x3f7   : > { %v8039_v40 = vadd.f32 %v18972_v26, %v17176_v49  ;;  %v8112_v27 = vadd.f32 %v8111_v9, %v17176_v49  ;;  %v8364_v52 = vmax.f32 %v8033_v24, 0.0  ;;  %v8366_v28 = vmax.f32 %v8106_v43, 0.0 }
 0x3f8   : > { %v8380_v5 = vmax.f32 %v8037_v56, 0.0  ;;  %v8382_v57 = vmax.f32 %v8110_v2, 0.0  ;;  %v8365_v58 = vmax.f32 %v8035_v62, 0.0  ;;  %v8367_v10 = vmax.f32 %v8108_v48, 0.0 }
 0x3f9   : > { %11970 = vmatmul.mubr.msk.bf16.gmra.mrb[60].mxu1 %vm18973_vm7, %v17220_v31  ;;  %v8381_v50 = vmax.f32 %v8039_v40, 0.0  ;;  %v8383_v13 = vmax.f32 %v8112_v27, 0.0  ;;  %11983 = vmatmul.mubr.msk.bf16.vlgmr.msra.gmra.mrb[80].mxu0 %vm8528_vm3, %v17252_v61  ;;  %vm9970_vm5 = vcmask 556032   ;;  %vm11369_vm12 = vcmask 1042432  }
 0x3fa   : > { %8646 = vmatprep.mubr.bf16.mxu1 %v18893_v4  ;;  %v8452_v34 = vpack.c.bf16 %v8380_v5, %v8364_v52  ;;  %v8454_v16 = vpack.c.bf16 %v8382_v57, %v8366_v28  ;;  %8834 = vmatpush1.bf16.msra.mxu0 %v17401_v22  ;;  %vm19025_vm6 = vcmask 1043456  }
 0x3fb   : > { %8729 = vmatprep.mubr.bf16.mxu0 %v18893_v4  ;;  %v8453_v31 = vpack.c.bf16 %v8381_v50, %v8365_v58  ;;  %v8455_v9 = vpack.c.bf16 %v8383_v13, %v8367_v10  ;;  %8835 = vmatprep.subr.bf16.mxu0 %v8421_v37 }
 0x3fe   : > { %8836 = vmatpush1.bf16.msra.mxu0 %v8420_v55 }
 0x3ff   : > { %8837 = vmatprep.subr.bf16.mxu0 %v8437_v41 }
 0x401   : > { %11979 = vmatmul.mubr.msk.bf16.vlgmr.msra.gmra.mrb[64].mxu1 %vm8528_vm3, %v17252_v61  ;;  %11984 = vmatmul.mubr.msk.bf16.gmra.mrb[84].mxu0 %vm8528_vm3, %v17322_v38 }
 0x402   : > { %8761 = vmatpush1.bf16.msra.mxu1 %v17247_v6  ;;  %8656 = vmatprep.mubr.bf16.mxu1 %v18893_v4 }
 0x403   : > { %8762 = vmatprep.subr.bf16.mxu1 %v17301_v53  ;;  %8739 = vmatprep.mubr.bf16.mxu0 %v18893_v4 }
 0x404   : > { %8838 = vmatpush1.bf16.msra.mxu0 %v8436_v42 }
 0x405   : > { %8839 = vmatprep.subr.bf16.mxu0 %v8453_v31 }
 0x406   : > { %8763 = vmatpush1.bf16.msra.mxu1 %v17294_v36 }
 0x407   : > { %8764 = vmatprep.subr.bf16.mxu1 %v17336_v3 }
 0x408   : > { %8840 = vmatpush1.bf16.msra.mxu0 %v8452_v34 }
 0x409   : > { %11980 = vmatmul.mubr.msk.bf16.gmra.mrb[68].mxu1 %vm8528_vm3, %v17322_v38  ;;  %11985 = vmatmul.mubr.msk.bf16.gmra.mrb[88].mxu0 %vm8528_vm3, %v17371_v59 }
 0x40a   : > { %8666 = vmatprep.mubr.bf16.mxu1 %v18893_v4  ;;  %8765 = vmatpush1.bf16.msra.mxu1 %v17332_v54 }
 0x40b   : > { %8766 = vmatprep.subr.bf16.mxu1 %v17375_v45  ;;  %8749 = vmatprep.mubr.bf16.mxu0 %v18893_v4 }
 0x40e   : > { %8767 = vmatpush1.bf16.msra.mxu1 %v17373_v29 }
 0x40f   : > { %8906 = vmatprep.subr.bf16.mxu1 %v17405_v44 }
 0x411   : > { %11981 = vmatmul.mubr.msk.bf16.gmra.mrb[72].mxu1 %vm8528_vm3, %v17371_v59  ;;  %11986 = vmatmul.mubr.msk.bf16.gmra.mrb[92].mxu0 %vm8528_vm3, %v17422_v12 }
 0x412   : > { %8676 = vmatprep.mubr.bf16.mxu1 %v18893_v4  ;;  %8865 = vmatprep.mubr.bf16.mxu0 %v18893_v4 }
 0x419   : > { %11982 = vmatmul.mubr.msk.bf16.gmra.mrb[76].mxu1 %vm8528_vm3, %v17422_v12  ;;  %11991 = vmatmul.mubr.msk.bf16.vlgmr.msra.gmra.mrb[96].mxu0 %vm8528_vm3, %v17252_v61 }
 0x41a   : > { %8792 = vmatprep.mubr.bf16.mxu1 %v18893_v4  ;;  %8875 = vmatprep.mubr.bf16.mxu0 %v18893_v4 }
 0x421   : > { %11987 = vmatmul.mubr.msk.bf16.vlgmr.msra.gmra.mrb[80].mxu1 %vm8528_vm3, %v17252_v61  ;;  %11992 = vmatmul.mubr.msk.bf16.gmra.mrb[100].mxu0 %vm8528_vm3, %v17322_v38 }
 0x422   : > { %8907 = vmatpush1.bf16.msra.mxu1 %v17403_v8  ;;  %8802 = vmatprep.mubr.bf16.mxu1 %v18893_v4 }
 0x423   : > { %8908 = vmatprep.subr.bf16.mxu1 %v17435_v63  ;;  %8885 = vmatprep.mubr.bf16.mxu0 %v18893_v4 }
 0x426   : > { %8909 = vmatpush1.bf16.msra.mxu1 %v17432_v51 }
 0x427   : > { %8910 = vmatprep.subr.bf16.mxu1 %v8439_v7 }
 0x429   : > { %11988 = vmatmul.mubr.msk.bf16.gmra.mrb[84].mxu1 %vm8528_vm3, %v17322_v38  ;;  %11993 = vmatmul.mubr.msk.bf16.gmra.mrb[104].mxu0 %vm8528_vm3, %v17371_v59 }
 0x42a   : > { %8812 = vmatprep.mubr.bf16.mxu1 %v18893_v4  ;;  %8911 = vmatpush1.bf16.msra.mxu1 %v17451_v33 }
 0x42b   : > { %8912 = vmatprep.subr.bf16.mxu1 %v8455_v9  ;;  %8895 = vmatprep.mubr.bf16.mxu0 %v18893_v4 }
 0x42e   : > { %8913 = vmatpush1.bf16.msra.mxu1 %v8454_v16 }
 0x431   : > { %11989 = vmatmul.mubr.msk.bf16.gmra.mrb[88].mxu1 %vm8528_vm3, %v17371_v59  ;;  %11994 = vmatmul.mubr.msk.bf16.gmra.mrb[108].mxu0 %vm8528_vm3, %v17422_v12 }
 0x432   : > { %8822 = vmatprep.mubr.bf16.mxu1 %v18893_v4  ;;  %9011 = vmatprep.mubr.bf16.mxu0 %v18893_v4 }
 0x439   : > { %11990 = vmatmul.mubr.msk.bf16.gmra.mrb[92].mxu1 %vm8528_vm3, %v17422_v12 }
 0x43a   : > { %8938 = vmatprep.mubr.bf16.mxu1 %v18893_v4 }
 0x441   : > { %11995 = vmatmul.mubr.msk.bf16.vlgmr.msra.gmra.mrb[96].mxu1 %vm8528_vm3, %v17252_v61 }
 0x442   : > { %8948 = vmatprep.mubr.bf16.mxu1 %v18893_v4 }
 0x449   : > { %11996 = vmatmul.mubr.msk.bf16.gmra.mrb[100].mxu1 %vm8528_vm3, %v17322_v38 }
 0x44a   : > { %8958 = vmatprep.mubr.bf16.mxu1 %v18893_v4 }
 0x451   : > { %11997 = vmatmul.mubr.msk.bf16.gmra.mrb[104].mxu1 %vm8528_vm3, %v17371_v59 }
 0x452   : > { %8968 = vmatprep.mubr.bf16.mxu1 %v18893_v4 }
 0x459   : > { %11998 = vmatmul.mubr.msk.bf16.gmra.mrb[108].mxu1 %vm8528_vm3, %v17422_v12 }
 0x45a   : > { %9084 = vmatprep.mubr.bf16.mxu1 %v18893_v4 }
 0x48c   : > { %v8148_v6 = vpop.f32.mrb[48].mxu0 }
 0x48d   : > { %v8149_v36 = vadd.f32 %v8148_v6, %v16981_v15  ;;  %v8150_v53 = vpop.f32.mrb[49].mxu0 }
 0x48e   : > { %v8151_v54 = vadd.f32 %v8150_v53, %v16981_v15  ;;  %v8152_v3 = vpop.f32.mrb[50].mxu0 }
 0x48f   : > { %v8153_v29 = vadd.f32 %v8152_v3, %v17031_v46  ;;  %v8154_v45 = vpop.f32.mrb[51].mxu0  ;;  %v8272_v8 = vmax.f32 %v8149_v36, 0.0 }
 0x490   : > { %v8155_v22 = vadd.f32 %v8154_v45, %v17031_v46  ;;  %v8273_v55 = vmax.f32 %v8151_v54, 0.0 }
 0x491   : > { %v8288_v44 = vmax.f32 %v8153_v29, 0.0 }
 0x492   : > { %v8289_v51 = vmax.f32 %v8155_v22, 0.0 }
 0x493   : > { %v8408_v37 = vpack.c.bf16 %v8288_v44, %v8272_v8  ;;  %v17554_v44 = vpop.permute.xlu0 %8470 }
 0x494   : > { %v8409_v63 = vpack.c.bf16 %v8289_v51, %v8273_v55  ;;  %v8158_v47 = vpop.f32.mrb[52].mxu0 }
 0x495   : > { %v8159_v14 = vadd.f32 %v8158_v47, %v17040_v35  ;;  %v8160_v39 = vpop.f32.mrb[53].mxu0  ;;  %v17557_v47 = vpop.permute.xlu1 %8475 }
 0x496   : > { %v8161_v23 = vadd.f32 %v8160_v39, %v17040_v35  ;;  %v8162_v19 = vpop.f32.mrb[54].mxu0  ;;  %8979 = vmatprep.subr.bf16.mxu0 %v8409_v63 }
 0x497   : > { %v8163_v24 = vadd.f32 %v8162_v19, %v17082_v30  ;;  %v8164_v43 = vpop.f32.mrb[55].mxu0  ;;  %8980 = vmatpush1.bf16.msra.mxu0 %v8408_v37  ;;  %v8304_v33 = vmax.f32 %v8159_v14, 0.0 }
 0x498   : > { %v8165_v42 = vadd.f32 %v8164_v43, %v17082_v30  ;;  %v8305_v62 = vmax.f32 %v8161_v23, 0.0 }
 0x499   : > { %v8320_v20 = vmax.f32 %v8163_v24, 0.0 }
 0x49a   : > { %v8321_v48 = vmax.f32 %v8165_v42, 0.0 }
 0x49b   : > { %v8424_v41 = vpack.c.bf16 %v8320_v20, %v8304_v33 }
 0x49c   : > { %v8425_v7 = vpack.c.bf16 %v8321_v48, %v8305_v62  ;;  %v8168_v0 = vpop.f32.mrb[56].mxu0 }
 0x49d   : > { %v8169_v56 = vadd.f32 %v8168_v0, %v17098_v21  ;;  %v8170_v2 = vpop.f32.mrb[57].mxu0 }
 0x49e   : > { %v8171_v26 = vadd.f32 %v8170_v2, %v17098_v21  ;;  %v8172_v40 = vpop.f32.mrb[58].mxu0  ;;  %8981 = vmatprep.subr.bf16.mxu0 %v8425_v7 }
 0x49f   : > { %v8173_v27 = vadd.f32 %v8172_v40, %v17129_v17  ;;  %v8174_v52 = vpop.f32.mrb[59].mxu0  ;;  %8982 = vmatpush1.bf16.msra.mxu0 %v8424_v41  ;;  %v8336_v5 = vmax.f32 %v8169_v56, 0.0  ;;  %v17565_v41 = vpop.permute.xlu0 %8480 }
 0x4a0   : > { %v8175_v28 = vadd.f32 %v8174_v52, %v17129_v17  ;;  %v8337_v58 = vmax.f32 %v8171_v26, 0.0 }
 0x4a1   : > { %v8352_v57 = vmax.f32 %v8173_v27, 0.0 }
 0x4a2   : > { %v8353_v10 = vmax.f32 %v8175_v28, 0.0 }
 0x4a3   : > { %v8440_v50 = vpack.c.bf16 %v8352_v57, %v8336_v5  ;;  %v17571_v57 = vpop.permute.xlu1 %8485 }
 0x4a4   : > { %v8441_v13 = vpack.c.bf16 %v8353_v10, %v8337_v58  ;;  %v8178_v34 = vpop.f32.mrb[60].mxu0 }
 0x4a5   : > { %v8179_v16 = vadd.f32 %v8178_v34, %v17147_v1  ;;  %v8180_v31 = vpop.f32.mrb[61].mxu0 }
 0x4a6   : > { %v8181_v9 = vadd.f32 %v8180_v31, %v17147_v1  ;;  %v8182_v6 = vpop.f32.mrb[62].mxu0  ;;  %8983 = vmatprep.subr.bf16.mxu0 %v8441_v13 }
 0x4a7   : > { %v8183_v36 = vadd.f32 %v8182_v6, %v17176_v49  ;;  %v8184_v53 = vpop.f32.mrb[63].mxu0  ;;  %8984 = vmatpush1.bf16.msra.mxu0 %v8440_v50  ;;  %v8368_v3 = vmax.f32 %v8179_v16, 0.0 }
 0x4a8   : > { %v8185_v54 = vadd.f32 %v8184_v53, %v17176_v49  ;;  %v8369_v45 = vmax.f32 %v8181_v9, 0.0 }
 0x4a9   : > { %v8384_v29 = vmax.f32 %v8183_v36, 0.0 }
 0x4aa   : > { %v8385_v22 = vmax.f32 %v8185_v54, 0.0 }
 0x4ab   : > { %v8456_v8 = vpack.c.bf16 %v8384_v29, %v8368_v3 }
 0x4ac   : > { %v8457_v55 = vpack.c.bf16 %v8385_v22, %v8369_v45  ;;  %v8575_v51 = vpop.f32.mrb[64].mxu0  ;;  %v17580_v22 = vpop.permute.xlu0 %8490 }
 0x4ad   : > { %v8576_v37 = vadd.f32 %v8575_v51, %v17554_v44  ;;  %v8577_v63 = vpop.f32.mrb[65].mxu0 }
 0x4ae   : > { %8985 = vmatprep.subr.bf16.mxu0 %v8457_v55  ;;  %v8578_v14 = vadd.f32 %v8577_v63, %v17554_v44  ;;  %v8579_v39 = vpop.f32.mrb[66].mxu0 }
 0x4af   : > { %8986 = vmatpush1.bf16.msra.mxu0 %v8456_v8  ;;  %v8580_v23 = vadd.f32 %v8579_v39, %v17557_v47  ;;  %v8581_v19 = vpop.f32.mrb[67].mxu0  ;;  %v9125_v43 = vmax.f32 %v8576_v37, 0.0 }
 0x4b0   : > { %v8582_v24 = vadd.f32 %v8581_v19, %v17557_v47  ;;  %v9126_v33 = vmax.f32 %v8578_v14, 0.0 }
 0x4b1   : > { %v9141_v42 = vmax.f32 %v8580_v23, 0.0 }
 0x4b2   : > { %11999 = vmatmul.mubr.msk.bf16.vlgmr.msra.gmra.mrb[112].mxu0 %vm8528_vm3, %v17252_v61  ;;  %v9142_v20 = vmax.f32 %v8582_v24, 0.0 }
 0x4b3   : > { %9021 = vmatprep.mubr.bf16.mxu0 %v18893_v4  ;;  %v9258_v48 = vpack.c.bf16 %v9141_v42, %v9125_v43  ;;  %v17586_v42 = vpop.permute.xlu1 %8495 }
 0x4b4   : > { %v8221_v62 = vpop.f32.mrb[48].mxu1  ;;  %v9259_v56 = vpack.c.bf16 %v9142_v20, %v9126_v33  ;;  %v8585_v40 = vpop.f32.mrb[68].mxu0 }
 0x4b5   : > { %v8222_v7 = vadd.f32 %v8221_v62, %v16981_v15  ;;  %v8223_v0 = vpop.f32.mrb[49].mxu1  ;;  %v8586_v28 = vadd.f32 %v8585_v40, %v17565_v41  ;;  %v8587_v5 = vpop.f32.mrb[69].mxu0 }
 0x4b6   : > { %v8224_v2 = vadd.f32 %v8223_v0, %v16981_v15  ;;  %v8225_v26 = vpop.f32.mrb[50].mxu1  ;;  %9374 = vmatprep.subr.bf16.mxu0 %v9259_v56  ;;  %v8588_v10 = vadd.f32 %v8587_v5, %v17565_v41  ;;  %v8589_v50 = vpop.f32.mrb[70].mxu0 }
 0x4b7   : > { %v8226_v27 = vadd.f32 %v8225_v26, %v17031_v46  ;;  %v8227_v52 = vpop.f32.mrb[51].mxu1  ;;  %9375 = vmatpush1.bf16.msra.mxu0 %v9258_v48  ;;  %v8274_v13 = vmax.f32 %v8222_v7, 0.0  ;;  %v8590_v15 = vadd.f32 %v8589_v50, %v17571_v57  ;;  %v8591_v16 = vpop.f32.mrb[71].mxu0  ;;  %v9157_v53 = vmax.f32 %v8586_v28, 0.0 }
 0x4b8   : > { %v8228_v58 = vadd.f32 %v8227_v52, %v17031_v46  ;;  %v8275_v31 = vmax.f32 %v8224_v2, 0.0  ;;  %v8592_v6 = vadd.f32 %v8591_v16, %v17571_v57  ;;  %v9158_v29 = vmax.f32 %v8588_v10, 0.0  ;;  %v17595_v10 = vpop.permute.xlu0 %8500 }
 0x4b9   : > { %v8290_v34 = vmax.f32 %v8226_v27, 0.0  ;;  %v9173_v54 = vmax.f32 %v8590_v15, 0.0 }
 0x4ba   : > { %v8291_v9 = vmax.f32 %v8228_v58, 0.0  ;;  %12000 = vmatmul.mubr.msk.bf16.gmra.mrb[116].mxu0 %vm8528_vm3, %v17322_v38  ;;  %v9174_v45 = vmax.f32 %v8592_v6, 0.0 }
 0x4bb   : > { %v8410_v36 = vpack.c.bf16 %v8290_v34, %v8274_v13  ;;  %9031 = vmatprep.mubr.bf16.mxu0 %v18893_v4  ;;  %v9274_v51 = vpack.c.bf16 %v9173_v54, %v9157_v53 }
 0x4bc   : > { %v8411_v46 = vpack.c.bf16 %v8291_v9, %v8275_v31  ;;  %v8231_v3 = vpop.f32.mrb[52].mxu1  ;;  %v9275_v14 = vpack.c.bf16 %v9174_v45, %v9158_v29  ;;  %v8595_v39 = vpop.f32.mrb[72].mxu0 }
 0x4bd   : > { %v8232_v8 = vadd.f32 %v8231_v3, %v17040_v35  ;;  %v8233_v55 = vpop.f32.mrb[53].mxu1  ;;  %v8596_v24 = vadd.f32 %v8595_v39, %v17580_v22  ;;  %v8597_v43 = vpop.f32.mrb[73].mxu0 }
 0x4be   : > { %v8234_v37 = vadd.f32 %v8233_v55, %v17040_v35  ;;  %v8235_v63 = vpop.f32.mrb[54].mxu1  ;;  %9052 = vmatprep.subr.bf16.mxu1 %v8411_v46  ;;  %v8598_v20 = vadd.f32 %v8597_v43, %v17580_v22  ;;  %v8599_v62 = vpop.f32.mrb[74].mxu0  ;;  %9376 = vmatprep.subr.bf16.mxu0 %v9275_v14 }
 0x4bf   : > { %v8236_v23 = vadd.f32 %v8235_v63, %v17082_v30  ;;  %v8237_v19 = vpop.f32.mrb[55].mxu1  ;;  %9053 = vmatpush1.bf16.msra.mxu1 %v8410_v36  ;;  %v8306_v35 = vmax.f32 %v8232_v8, 0.0  ;;  %v8600_v7 = vadd.f32 %v8599_v62, %v17586_v42  ;;  %v8601_v0 = vpop.f32.mrb[75].mxu0  ;;  %9377 = vmatpush1.bf16.msra.mxu0 %v9274_v51  ;;  %v9189_v27 = vmax.f32 %v8596_v24, 0.0 }
 0x4c0   : > { %v8238_v33 = vadd.f32 %v8237_v19, %v17082_v30  ;;  %v8307_v56 = vmax.f32 %v8234_v37, 0.0  ;;  %v8602_v26 = vadd.f32 %v8601_v0, %v17586_v42  ;;  %v9190_v5 = vmax.f32 %v8598_v20, 0.0  ;;  %v17601_v46 = vpop.permute.xlu1 %8505 }
 0x4c1   : > { %v8322_v48 = vmax.f32 %v8236_v23, 0.0  ;;  %v9205_v30 = vmax.f32 %v8600_v7, 0.0 }
 0x4c2   : > { %v8323_v2 = vmax.f32 %v8238_v33, 0.0  ;;  %12001 = vmatmul.mubr.msk.bf16.gmra.mrb[120].mxu0 %vm8528_vm3, %v17371_v59  ;;  %v9206_v58 = vmax.f32 %v8602_v26, 0.0 }
 0x4c3   : > { %v8426_v40 = vpack.c.bf16 %v8322_v48, %v8306_v35  ;;  %9041 = vmatprep.mubr.bf16.mxu0 %v18893_v4  ;;  %v9290_v34 = vpack.c.bf16 %v9205_v30, %v9189_v27 }
 0x4c4   : > { %v8427_v52 = vpack.c.bf16 %v8323_v2, %v8307_v56  ;;  %v8241_v28 = vpop.f32.mrb[56].mxu1  ;;  %v9291_v31 = vpack.c.bf16 %v9206_v58, %v9190_v5  ;;  %v8605_v9 = vpop.f32.mrb[76].mxu0 }
 0x4c5   : > { %v8242_v50 = vadd.f32 %v8241_v28, %v17098_v21  ;;  %v8243_v13 = vpop.f32.mrb[57].mxu1  ;;  %v8606_v53 = vadd.f32 %v8605_v9, %v17595_v10  ;;  %v8607_v54 = vpop.f32.mrb[77].mxu0 }
 0x4c6   : > { %v8244_v15 = vadd.f32 %v8243_v13, %v17098_v21  ;;  %v8245_v16 = vpop.f32.mrb[58].mxu1  ;;  %9054 = vmatprep.subr.bf16.mxu1 %v8427_v52  ;;  %v8608_v29 = vadd.f32 %v8607_v54, %v17595_v10  ;;  %v8609_v45 = vpop.f32.mrb[78].mxu0  ;;  %9378 = vmatprep.subr.bf16.mxu0 %v9291_v31 }
 0x4c7   : > { %v8246_v6 = vadd.f32 %v8245_v16, %v17129_v17  ;;  %v8247_v36 = vpop.f32.mrb[59].mxu1  ;;  %9055 = vmatpush1.bf16.msra.mxu1 %v8426_v40  ;;  %v8338_v21 = vmax.f32 %v8242_v50, 0.0  ;;  %v8610_v55 = vadd.f32 %v8609_v45, %v17601_v46  ;;  %v8611_v51 = vpop.f32.mrb[79].mxu0  ;;  %9379 = vmatpush1.bf16.msra.mxu0 %v9290_v34  ;;  %v9221_v23 = vmax.f32 %v8606_v53, 0.0 }
 0x4c8   : > { %v8248_v3 = vadd.f32 %v8247_v36, %v17129_v17  ;;  %v8339_v37 = vmax.f32 %v8244_v15, 0.0  ;;  %v8612_v14 = vadd.f32 %v8611_v51, %v17601_v46  ;;  %v9222_v43 = vmax.f32 %v8608_v29, 0.0 }
 0x4c9   : > { %v8354_v8 = vmax.f32 %v8246_v6, 0.0  ;;  %v9237_v17 = vmax.f32 %v8610_v55, 0.0 }
 0x4ca   : > { %v8355_v63 = vmax.f32 %v8248_v3, 0.0  ;;  %12002 = vmatmul.mubr.msk.bf16.gmra.mrb[124].mxu0 %vm8528_vm3, %v17422_v12  ;;  %v9238_v33 = vmax.f32 %v8612_v14, 0.0 }
 0x4cb   : > { %v8442_v39 = vpack.c.bf16 %v8354_v8, %v8338_v21  ;;  %9406 = vmatprep.mubr.bf16.mxu0 %v18893_v4  ;;  %v9306_v35 = vpack.c.bf16 %v9237_v17, %v9221_v23 }
 0x4cc   : > { %v8443_v19 = vpack.c.bf16 %v8355_v63, %v8339_v37  ;;  %v8251_v24 = vpop.f32.mrb[60].mxu1  ;;  %v9307_v0 = vpack.c.bf16 %v9238_v33, %v9222_v43  ;;  %v8721_v56 = vpop.f32.mrb[80].mxu0 }
 0x4cd   : > { %v8252_v20 = vadd.f32 %v8251_v24, %v17147_v1  ;;  %v8253_v62 = vpop.f32.mrb[61].mxu1  ;;  %v8722_v40 = vadd.f32 %v8721_v56, %v17554_v44  ;;  %v8723_v27 = vpop.f32.mrb[81].mxu0  ;;  %v17635_v24 = vld [vmem:[%s18444_s7 + $0x8] sm:$0xff]  }
 0x4ce   : > { %v8254_v48 = vadd.f32 %v8253_v62, %v17147_v1  ;;  %v8255_v7 = vpop.f32.mrb[62].mxu1  ;;  %9056 = vmatprep.subr.bf16.mxu1 %v8443_v19  ;;  %v8724_v52 = vadd.f32 %v8723_v27, %v17554_v44  ;;  %v8725_v28 = vpop.f32.mrb[82].mxu0  ;;  %9380 = vmatprep.subr.bf16.mxu0 %v9307_v0  ;;  %v17619_v1 = vld [vmem:[%s18444_s7] sm:$0xff]  }
 0x4cf   : > { %v8256_v2 = vadd.f32 %v8255_v7, %v17176_v49  ;;  %v8257_v26 = vpop.f32.mrb[63].mxu1  ;;  %9057 = vmatpush1.bf16.msra.mxu1 %v8442_v39  ;;  %v8370_v5 = vmax.f32 %v8252_v20, 0.0  ;;  %v8726_v50 = vadd.f32 %v8725_v28, %v17557_v47  ;;  %v8727_v13 = vpop.f32.mrb[83].mxu0  ;;  %9381 = vmatpush1.bf16.msra.mxu0 %v9306_v35  ;;  %v9129_v31 = vmax.f32 %v8722_v40, 0.0 }
 0x4d0   : > { %v8258_v30 = vadd.f32 %v8257_v26, %v17176_v49  ;;  %v8371_v34 = vmax.f32 %v8254_v48, 0.0  ;;  %v8728_v16 = vadd.f32 %v8727_v13, %v17557_v47  ;;  %v9130_v53 = vmax.f32 %v8724_v52, 0.0 }
 0x4d1   : > { %v8386_v58 = vmax.f32 %v8256_v2, 0.0  ;;  %v9145_v9 = vmax.f32 %v8726_v50, 0.0 }
 0x4d2   : > { %v8387_v15 = vmax.f32 %v8258_v30, 0.0  ;;  %v9146_v54 = vmax.f32 %v8728_v16, 0.0  ;;  %12010 = vmatmul.mubr.msk.bf16.vlgmr.msra.gmra.mrb[128].mxu0 %vm8528_vm3, %v17619_v1 }
 0x4d3   : > { %v8458_v49 = vpack.c.bf16 %v8386_v58, %v8370_v5  ;;  %v9262_v45 = vpack.c.bf16 %v9145_v9, %v9129_v31  ;;  %9416 = vmatprep.mubr.bf16.mxu0 %v18893_v4 }
 0x4d4   : > { %v8459_v6 = vpack.c.bf16 %v8387_v15, %v8371_v34  ;;  %v8648_v36 = vpop.f32.mrb[64].mxu1  ;;  %v9263_v55 = vpack.c.bf16 %v9146_v54, %v9130_v53  ;;  %v8731_v51 = vpop.f32.mrb[84].mxu0 }
 0x4d5   : > { %v8649_v3 = vadd.f32 %v8648_v36, %v17554_v44  ;;  %v8650_v29 = vpop.f32.mrb[65].mxu1  ;;  %v8732_v14 = vadd.f32 %v8731_v51, %v17565_v41  ;;  %v8733_v39 = vpop.f32.mrb[85].mxu0  ;;  %v17654_v36 = vld [vmem:[%s18444_s7 + $0x10] ss:$0 sps:$4 sm:$0xff]  }
 0x4d6   : > { %9058 = vmatprep.subr.bf16.mxu1 %v8459_v6  ;;  %v8651_v21 = vadd.f32 %v8650_v29, %v17554_v44  ;;  %v8652_v8 = vpop.f32.mrb[66].mxu1  ;;  %v8734_v17 = vadd.f32 %v8733_v39, %v17565_v41  ;;  %v8735_v19 = vpop.f32.mrb[86].mxu0  ;;  %9496 = vmatprep.subr.bf16.mxu0 %v9263_v55 }
 0x4d7   : > { %9059 = vmatpush1.bf16.msra.mxu1 %v8458_v49  ;;  %v8653_v37 = vadd.f32 %v8652_v8, %v17557_v47  ;;  %v8654_v63 = vpop.f32.mrb[67].mxu1  ;;  %v9127_v43 = vmax.f32 %v8649_v3, 0.0  ;;  %v8736_v20 = vadd.f32 %v8735_v19, %v17571_v57  ;;  %v8737_v62 = vpop.f32.mrb[87].mxu0  ;;  %9497 = vmatpush1.bf16.msra.mxu0 %v9262_v45  ;;  %v9161_v56 = vmax.f32 %v8732_v14, 0.0 }
 0x4d8   : > { %v8655_v23 = vadd.f32 %v8654_v63, %v17557_v47  ;;  %v9128_v35 = vmax.f32 %v8651_v21, 0.0  ;;  %v8738_v7 = vadd.f32 %v8737_v62, %v17571_v57  ;;  %v9162_v27 = vmax.f32 %v8734_v17, 0.0 }
 0x4d9   : > { %v9143_v33 = vmax.f32 %v8653_v37, 0.0  ;;  %v9177_v2 = vmax.f32 %v8736_v20, 0.0 }
 0x4da   : > { %12003 = vmatmul.mubr.msk.bf16.vlgmr.msra.gmra.mrb[112].mxu1 %vm8528_vm3, %v17252_v61  ;;  %v9144_v48 = vmax.f32 %v8655_v23, 0.0  ;;  %v9178_v30 = vmax.f32 %v8738_v7, 0.0  ;;  %12011 = vmatmul.mubr.msk.bf16.gmra.mrb[132].mxu0 %vm8528_vm3, %v17635_v24 }
 0x4db   : > { %9094 = vmatprep.mubr.bf16.mxu1 %v18893_v4  ;;  %v9260_v0 = vpack.c.bf16 %v9143_v33, %v9127_v43  ;;  %v9278_v61 = vpack.c.bf16 %v9177_v2, %v9161_v56  ;;  %9426 = vmatprep.mubr.bf16.mxu0 %v18893_v4 }
 0x4dc   : > { %v9261_v26 = vpack.c.bf16 %v9144_v48, %v9128_v35  ;;  %v8658_v40 = vpop.f32.mrb[68].mxu1  ;;  %v9279_v50 = vpack.c.bf16 %v9178_v30, %v9162_v27  ;;  %v8741_v13 = vpop.f32.mrb[88].mxu0 }
 0x4dd   : > { %v8659_v52 = vadd.f32 %v8658_v40, %v17565_v41  ;;  %v8660_v28 = vpop.f32.mrb[69].mxu1  ;;  %v8742_v16 = vadd.f32 %v8741_v13, %v17580_v22  ;;  %v8743_v49 = vpop.f32.mrb[89].mxu0 }
 0x4de   : > { %v8661_v5 = vadd.f32 %v8660_v28, %v17565_v41  ;;  %v8662_v58 = vpop.f32.mrb[70].mxu1  ;;  %9435 = vmatprep.subr.bf16.mxu1 %v9261_v26  ;;  %v8744_v9 = vadd.f32 %v8743_v49, %v17580_v22  ;;  %v8745_v6 = vpop.f32.mrb[90].mxu0  ;;  %9498 = vmatprep.subr.bf16.mxu0 %v9279_v50 }
 0x4df   : > { %v8663_v34 = vadd.f32 %v8662_v58, %v17571_v57  ;;  %v8664_v15 = vpop.f32.mrb[71].mxu1  ;;  %9436 = vmatpush1.bf16.msra.mxu1 %v9260_v0  ;;  %v9159_v53 = vmax.f32 %v8659_v52, 0.0  ;;  %v8746_v3 = vadd.f32 %v8745_v6, %v17586_v42  ;;  %v8747_v29 = vpop.f32.mrb[91].mxu0  ;;  %9499 = vmatpush1.bf16.msra.mxu0 %v9278_v61  ;;  %v9193_v51 = vmax.f32 %v8742_v16, 0.0 }
 0x4e0   : > { %v8665_v31 = vadd.f32 %v8664_v15, %v17571_v57  ;;  %v9160_v45 = vmax.f32 %v8661_v5, 0.0  ;;  %v8748_v8 = vadd.f32 %v8747_v29, %v17586_v42  ;;  %v9194_v39 = vmax.f32 %v8744_v9, 0.0 }
 0x4e1   : > { %v9175_v54 = vmax.f32 %v8663_v34, 0.0  ;;  %v9209_v37 = vmax.f32 %v8746_v3, 0.0 }
 0x4e2   : > { %12004 = vmatmul.mubr.msk.bf16.gmra.mrb[116].mxu1 %vm8528_vm3, %v17322_v38  ;;  %v9176_v21 = vmax.f32 %v8665_v31, 0.0  ;;  %v9210_v23 = vmax.f32 %v8748_v8, 0.0  ;;  %12012 = vmatmul.mubr.msk.bf16.gmra.mrb[136].mxu0 %vm8528_vm3, %v17654_v36 }
 0x4e3   : > { %9104 = vmatprep.mubr.bf16.mxu1 %v18893_v4  ;;  %v9276_v55 = vpack.c.bf16 %v9175_v54, %v9159_v53  ;;  %v9294_v38 = vpack.c.bf16 %v9209_v37, %v9193_v51  ;;  %9528 = vmatprep.mubr.bf16.mxu0 %v18893_v4 }
 0x4e4   : > { %v9277_v63 = vpack.c.bf16 %v9176_v21, %v9160_v45  ;;  %v8668_v14 = vpop.f32.mrb[72].mxu1  ;;  %v9295_v20 = vpack.c.bf16 %v9210_v23, %v9194_v39  ;;  %v8751_v62 = vpop.f32.mrb[92].mxu0 }
 0x4e5   : > { %v8669_v17 = vadd.f32 %v8668_v14, %v17580_v22  ;;  %v8670_v19 = vpop.f32.mrb[73].mxu1  ;;  %v8752_v7 = vadd.f32 %v8751_v62, %v17595_v10  ;;  %v8753_v0 = vpop.f32.mrb[93].mxu0 }
 0x4e6   : > { %v8671_v43 = vadd.f32 %v8670_v19, %v17580_v22  ;;  %v8672_v33 = vpop.f32.mrb[74].mxu1  ;;  %9437 = vmatprep.subr.bf16.mxu1 %v9277_v63  ;;  %v8754_v2 = vadd.f32 %v8753_v0, %v17595_v10  ;;  %v8755_v26 = vpop.f32.mrb[94].mxu0  ;;  %9500 = vmatprep.subr.bf16.mxu0 %v9295_v20 }
 0x4e7   : > { %v8673_v35 = vadd.f32 %v8672_v33, %v17586_v42  ;;  %v8674_v48 = vpop.f32.mrb[75].mxu1  ;;  %9438 = vmatpush1.bf16.msra.mxu1 %v9276_v55  ;;  %v9191_v40 = vmax.f32 %v8669_v17, 0.0  ;;  %v8756_v30 = vadd.f32 %v8755_v26, %v17601_v46  ;;  %v8757_v52 = vpop.f32.mrb[95].mxu0  ;;  %9501 = vmatpush1.bf16.msra.mxu0 %v9294_v38  ;;  %v9225_v50 = vmax.f32 %v8752_v7, 0.0 }
 0x4e8   : > { %v8675_v56 = vadd.f32 %v8674_v48, %v17586_v42  ;;  %v9192_v28 = vmax.f32 %v8671_v43, 0.0  ;;  %v8758_v5 = vadd.f32 %v8757_v52, %v17601_v46  ;;  %v9226_v16 = vmax.f32 %v8754_v2, 0.0 }
 0x4e9   : > { %v9207_v27 = vmax.f32 %v8673_v35, 0.0  ;;  %v9241_v13 = vmax.f32 %v8756_v30, 0.0 }
 0x4ea   : > { %12005 = vmatmul.mubr.msk.bf16.gmra.mrb[120].mxu1 %vm8528_vm3, %v17371_v59  ;;  %v9208_v61 = vmax.f32 %v8675_v56, 0.0  ;;  %v9242_v49 = vmax.f32 %v8758_v5, 0.0 }
 0x4eb   : > { %9114 = vmatprep.mubr.bf16.mxu1 %v18893_v4  ;;  %v9292_v58 = vpack.c.bf16 %v9207_v27, %v9191_v40  ;;  %v9310_v6 = vpack.c.bf16 %v9241_v13, %v9225_v50 }
 0x4ec   : > { %v9293_v34 = vpack.c.bf16 %v9208_v61, %v9192_v28  ;;  %v8678_v15 = vpop.f32.mrb[76].mxu1  ;;  %v9311_v54 = vpack.c.bf16 %v9242_v49, %v9226_v16  ;;  %v8867_v3 = vpop.f32.mrb[96].mxu0 }
 0x4ed   : > { %v8679_v31 = vadd.f32 %v8678_v15, %v17595_v10  ;;  %v8680_v9 = vpop.f32.mrb[77].mxu1  ;;  %v8868_v21 = vadd.f32 %v8867_v3, %v17554_v44  ;;  %v8869_v8 = vpop.f32.mrb[97].mxu0 }
 0x4ee   : > { %v8681_v53 = vadd.f32 %v8680_v9, %v17595_v10  ;;  %v8682_v59 = vpop.f32.mrb[78].mxu1  ;;  %9439 = vmatprep.subr.bf16.mxu1 %v9293_v34  ;;  %v8870_v51 = vadd.f32 %v8869_v8, %v17554_v44  ;;  %v8871_v37 = vpop.f32.mrb[98].mxu0  ;;  %9502 = vmatprep.subr.bf16.mxu0 %v9311_v54 }
 0x4ef   : > { %v8683_v29 = vadd.f32 %v8682_v59, %v17601_v46  ;;  %v8684_v45 = vpop.f32.mrb[79].mxu1  ;;  %9440 = vmatpush1.bf16.msra.mxu1 %v9292_v58  ;;  %v9223_v63 = vmax.f32 %v8679_v31, 0.0  ;;  %v8872_v39 = vadd.f32 %v8871_v37, %v17557_v47  ;;  %v8873_v23 = vpop.f32.mrb[99].mxu0  ;;  %9503 = vmatpush1.bf16.msra.mxu0 %v9310_v6  ;;  %v9133_v33 = vmax.f32 %v8868_v21, 0.0 }
 0x4f0   : > { %v8685_v55 = vadd.f32 %v8684_v45, %v17601_v46  ;;  %v9224_v17 = vmax.f32 %v8681_v53, 0.0  ;;  %v8874_v38 = vadd.f32 %v8873_v23, %v17557_v47  ;;  %v9134_v48 = vmax.f32 %v8870_v51, 0.0 }
 0x4f1   : > { %v9239_v14 = vmax.f32 %v8683_v29, 0.0  ;;  %v9149_v20 = vmax.f32 %v8872_v39, 0.0 }
 0x4f2   : > { %12006 = vmatmul.mubr.msk.bf16.gmra.mrb[124].mxu1 %vm8528_vm3, %v17422_v12  ;;  %v9240_v19 = vmax.f32 %v8685_v55, 0.0  ;;  %v9150_v7 = vmax.f32 %v8874_v38, 0.0  ;;  %12016 = vmatmul.mubr.msk.bf16.vlgmr.msra.gmra.mrb[140].mxu0 %vm8528_vm3, %v17619_v1 }
 0x4f3   : > { %v9308_v43 = vpack.c.bf16 %v9239_v14, %v9223_v63  ;;  %9467 = vmatprep.mubr.bf16.mxu1 %v18893_v4  ;;  %v9266_v12 = vpack.c.bf16 %v9149_v20, %v9133_v33  ;;  %9538 = vmatprep.mubr.bf16.mxu0 %v18893_v4 }
 0x4f4   : > { %v9309_v62 = vpack.c.bf16 %v9240_v19, %v9224_v17  ;;  %v8794_v35 = vpop.f32.mrb[80].mxu1  ;;  %v9267_v40 = vpack.c.bf16 %v9150_v7, %v9134_v48  ;;  %v8877_v27 = vpop.f32.mrb[100].mxu0 }
 0x4f5   : > { %v8795_v0 = vadd.f32 %v8794_v35, %v17554_v44  ;;  %v8796_v56 = vpop.f32.mrb[81].mxu1  ;;  %v8878_v28 = vadd.f32 %v8877_v27, %v17565_v41  ;;  %v8879_v61 = vpop.f32.mrb[101].mxu0 }
 0x4f6   : > { %v8797_v2 = vadd.f32 %v8796_v56, %v17554_v44  ;;  %v8798_v26 = vpop.f32.mrb[82].mxu1  ;;  %9441 = vmatprep.subr.bf16.mxu1 %v9309_v62  ;;  %v8880_v58 = vadd.f32 %v8879_v61, %v17565_v41  ;;  %v8881_v50 = vpop.f32.mrb[102].mxu0  ;;  %9618 = vmatprep.subr.bf16.mxu0 %v9267_v40 }
 0x4f7   : > { %v8799_v30 = vadd.f32 %v8798_v26, %v17557_v47  ;;  %v8800_v52 = vpop.f32.mrb[83].mxu1  ;;  %9442 = vmatpush1.bf16.msra.mxu1 %v9308_v43  ;;  %v9131_v13 = vmax.f32 %v8795_v0, 0.0  ;;  %v8882_v15 = vadd.f32 %v8881_v50, %v17571_v57  ;;  %v8883_v16 = vpop.f32.mrb[103].mxu0  ;;  %9619 = vmatpush1.bf16.msra.mxu0 %v9266_v12  ;;  %v9165_v53 = vmax.f32 %v8878_v28, 0.0 }
 0x4f8   : > { %v8801_v5 = vadd.f32 %v8800_v52, %v17557_v47  ;;  %v9132_v49 = vmax.f32 %v8797_v2, 0.0  ;;  %v8884_v9 = vadd.f32 %v8883_v16, %v17571_v57  ;;  %v9166_v29 = vmax.f32 %v8880_v58, 0.0 }
 0x4f9   : > { %v9147_v34 = vmax.f32 %v8799_v30, 0.0  ;;  %v9181_v59 = vmax.f32 %v8882_v15, 0.0 }
 0x4fa   : > { %v9148_v31 = vmax.f32 %v8801_v5, 0.0  ;;  %12013 = vmatmul.mubr.msk.bf16.vlgmr.msra.gmra.mrb[128].mxu1 %vm8528_vm3, %v17619_v1  ;;  %v9182_v45 = vmax.f32 %v8884_v9, 0.0  ;;  %12017 = vmatmul.mubr.msk.bf16.gmra.mrb[144].mxu0 %vm8528_vm3, %v17635_v24 }
 0x4fb   : > { %v9264_v6 = vpack.c.bf16 %v9147_v34, %v9131_v13  ;;  %9477 = vmatprep.mubr.bf16.mxu1 %v18893_v4  ;;  %v9282_v55 = vpack.c.bf16 %v9181_v59, %v9165_v53  ;;  %9548 = vmatprep.mubr.bf16.mxu0 %v18893_v4 }
 0x4fc   : > { %v9265_v54 = vpack.c.bf16 %v9148_v31, %v9132_v49  ;;  %v8804_v3 = vpop.f32.mrb[84].mxu1  ;;  %v9283_v63 = vpack.c.bf16 %v9182_v45, %v9166_v29  ;;  %v8887_v14 = vpop.f32.mrb[104].mxu0 }
 0x4fd   : > { %v8805_v21 = vadd.f32 %v8804_v3, %v17565_v41  ;;  %v8806_v8 = vpop.f32.mrb[85].mxu1  ;;  %v8888_v17 = vadd.f32 %v8887_v14, %v17580_v22  ;;  %v8889_v19 = vpop.f32.mrb[105].mxu0 }
 0x4fe   : > { %v8807_v51 = vadd.f32 %v8806_v8, %v17565_v41  ;;  %v8808_v37 = vpop.f32.mrb[86].mxu1  ;;  %9557 = vmatprep.subr.bf16.mxu1 %v9265_v54  ;;  %v8890_v43 = vadd.f32 %v8889_v19, %v17580_v22  ;;  %v8891_v33 = vpop.f32.mrb[106].mxu0  ;;  %9620 = vmatprep.subr.bf16.mxu0 %v9283_v63 }
 0x4ff   : > { %v8809_v39 = vadd.f32 %v8808_v37, %v17571_v57  ;;  %v8810_v23 = vpop.f32.mrb[87].mxu1  ;;  %9558 = vmatpush1.bf16.msra.mxu1 %v9264_v6  ;;  %v9163_v20 = vmax.f32 %v8805_v21, 0.0  ;;  %v8892_v35 = vadd.f32 %v8891_v33, %v17586_v42  ;;  %v8893_v48 = vpop.f32.mrb[107].mxu0  ;;  %9621 = vmatpush1.bf16.msra.mxu0 %v9282_v55  ;;  %v9197_v2 = vmax.f32 %v8888_v17, 0.0 }
 0x500   : > { %v8811_v38 = vadd.f32 %v8810_v23, %v17571_v57  ;;  %v9164_v7 = vmax.f32 %v8807_v51, 0.0  ;;  %v8894_v56 = vadd.f32 %v8893_v48, %v17586_v42  ;;  %v9198_v30 = vmax.f32 %v8890_v43, 0.0 }
 0x501   : > { %v9179_v62 = vmax.f32 %v8809_v39, 0.0  ;;  %v9213_v26 = vmax.f32 %v8892_v35, 0.0 }
 0x502   : > { %v9180_v0 = vmax.f32 %v8811_v38, 0.0  ;;  %12014 = vmatmul.mubr.msk.bf16.gmra.mrb[132].mxu1 %vm8528_vm3, %v17635_v24  ;;  %v9214_v52 = vmax.f32 %v8894_v56, 0.0  ;;  %12018 = vmatmul.mubr.msk.bf16.gmra.mrb[148].mxu0 %vm8528_vm3, %v17654_v36 }
 0x503   : > { %v9280_v12 = vpack.c.bf16 %v9179_v62, %v9163_v20  ;;  %9487 = vmatprep.mubr.bf16.mxu1 %v18893_v4  ;;  %v9298_v5 = vpack.c.bf16 %v9213_v26, %v9197_v2  ;;  %9650 = vmatprep.mubr.bf16.mxu0 %v18893_v4 }
 0x504   : > { %v9281_v40 = vpack.c.bf16 %v9180_v0, %v9164_v7  ;;  %v8814_v27 = vpop.f32.mrb[88].mxu1  ;;  %v9299_v13 = vpack.c.bf16 %v9214_v52, %v9198_v30  ;;  %v8897_v34 = vpop.f32.mrb[108].mxu0 }
 0x505   : > { %v8815_v28 = vadd.f32 %v8814_v27, %v17580_v22  ;;  %v8816_v61 = vpop.f32.mrb[89].mxu1  ;;  %v8898_v49 = vadd.f32 %v8897_v34, %v17595_v10  ;;  %v8899_v31 = vpop.f32.mrb[109].mxu0 }
 0x506   : > { %v8817_v58 = vadd.f32 %v8816_v61, %v17580_v22  ;;  %v8818_v50 = vpop.f32.mrb[90].mxu1  ;;  %9559 = vmatprep.subr.bf16.mxu1 %v9281_v40  ;;  %v8900_v6 = vadd.f32 %v8899_v31, %v17595_v10  ;;  %v8901_v53 = vpop.f32.mrb[110].mxu0  ;;  %9622 = vmatprep.subr.bf16.mxu0 %v9299_v13 }
 0x507   : > { %v8819_v15 = vadd.f32 %v8818_v50, %v17586_v42  ;;  %v8820_v16 = vpop.f32.mrb[91].mxu1  ;;  %9560 = vmatpush1.bf16.msra.mxu1 %v9280_v12  ;;  %v9195_v59 = vmax.f32 %v8815_v28, 0.0  ;;  %v8902_v3 = vadd.f32 %v8901_v53, %v17601_v46  ;;  %v8903_v29 = vpop.f32.mrb[111].mxu0  ;;  %9623 = vmatpush1.bf16.msra.mxu0 %v9298_v5  ;;  %v9229_v51 = vmax.f32 %v8898_v49, 0.0 }
 0x508   : > { %v8821_v9 = vadd.f32 %v8820_v16, %v17586_v42  ;;  %v9196_v45 = vmax.f32 %v8817_v58, 0.0  ;;  %v8904_v8 = vadd.f32 %v8903_v29, %v17601_v46  ;;  %v9230_v39 = vmax.f32 %v8900_v6, 0.0 }
 0x509   : > { %v9211_v54 = vmax.f32 %v8819_v15, 0.0  ;;  %v9245_v37 = vmax.f32 %v8902_v3, 0.0 }
 0x50a   : > { %v9212_v21 = vmax.f32 %v8821_v9, 0.0  ;;  %12015 = vmatmul.mubr.msk.bf16.gmra.mrb[136].mxu1 %vm8528_vm3, %v17654_v36  ;;  %v9246_v23 = vmax.f32 %v8904_v8, 0.0 }
 0x50b   : > { %v9296_v55 = vpack.c.bf16 %v9211_v54, %v9195_v59  ;;  %9589 = vmatprep.mubr.bf16.mxu1 %v18893_v4  ;;  %v9314_v38 = vpack.c.bf16 %v9245_v37, %v9229_v51 }
 0x50c   : > { %v9297_v63 = vpack.c.bf16 %v9212_v21, %v9196_v45  ;;  %v8824_v14 = vpop.f32.mrb[92].mxu1  ;;  %v9315_v20 = vpack.c.bf16 %v9246_v23, %v9230_v39 }
 0x50d   : > { %v8825_v17 = vadd.f32 %v8824_v14, %v17595_v10  ;;  %v8826_v19 = vpop.f32.mrb[93].mxu1 }
 0x50e   : > { %v8827_v43 = vadd.f32 %v8826_v19, %v17595_v10  ;;  %v8828_v33 = vpop.f32.mrb[94].mxu1  ;;  %9561 = vmatprep.subr.bf16.mxu1 %v9297_v63  ;;  %9624 = vmatprep.subr.bf16.mxu0 %v9315_v20 }
 0x50f   : > { %v8829_v62 = vadd.f32 %v8828_v33, %v17601_v46  ;;  %v8830_v35 = vpop.f32.mrb[95].mxu1  ;;  %9562 = vmatpush1.bf16.msra.mxu1 %v9296_v55  ;;  %v9227_v7 = vmax.f32 %v8825_v17, 0.0  ;;  %9625 = vmatpush1.bf16.msra.mxu0 %v9314_v38 }
 0x510   : > { %v8831_v48 = vadd.f32 %v8830_v35, %v17601_v46  ;;  %v9228_v56 = vmax.f32 %v8827_v43, 0.0 }
 0x511   : > { %v9243_v0 = vmax.f32 %v8829_v62, 0.0 }
 0x512   : > { %v9244_v12 = vmax.f32 %v8831_v48, 0.0  ;;  %12022 = vmatmul.mubr.msk.bf16.vlgmr.msra.gmra.mrb[152].mxu0 %vm8528_vm3, %v17619_v1 }
 0x513   : > { %v9312_v2 = vpack.c.bf16 %v9243_v0, %v9227_v7  ;;  %9660 = vmatprep.mubr.bf16.mxu0 %v18893_v4 }
 0x514   : > { %v9313_v26 = vpack.c.bf16 %v9244_v12, %v9228_v56  ;;  %v8940_v40 = vpop.f32.mrb[96].mxu1 }
 0x515   : > { %v8941_v27 = vadd.f32 %v8940_v40, %v17554_v44  ;;  %v8942_v30 = vpop.f32.mrb[97].mxu1 }
 0x516   : > { %v8943_v52 = vadd.f32 %v8942_v30, %v17554_v44  ;;  %v8944_v28 = vpop.f32.mrb[98].mxu1  ;;  %9563 = vmatprep.subr.bf16.mxu1 %v9313_v26 }
 0x517   : > { %v8945_v61 = vadd.f32 %v8944_v28, %v17557_v47  ;;  %v8946_v5 = vpop.f32.mrb[99].mxu1  ;;  %9564 = vmatpush1.bf16.msra.mxu1 %v9312_v2  ;;  %v9135_v50 = vmax.f32 %v8941_v27, 0.0 }
 0x518   : > { %v8947_v58 = vadd.f32 %v8946_v5, %v17557_v47  ;;  %v9136_v34 = vmax.f32 %v8943_v52, 0.0 }
 0x519   : > { %v9151_v13 = vmax.f32 %v8945_v61, 0.0 }
 0x51a   : > { %v9152_v15 = vmax.f32 %v8947_v58, 0.0  ;;  %12019 = vmatmul.mubr.msk.bf16.vlgmr.msra.gmra.mrb[140].mxu1 %vm8528_vm3, %v17619_v1  ;;  %12023 = vmatmul.mubr.msk.bf16.gmra.mrb[156].mxu0 %vm8528_vm3, %v17635_v24 }
 0x51b   : > { %v9268_v16 = vpack.c.bf16 %v9151_v13, %v9135_v50  ;;  %9599 = vmatprep.mubr.bf16.mxu1 %v18893_v4  ;;  %9670 = vmatprep.mubr.bf16.mxu0 %v18893_v4 }
 0x51c   : > { %v9269_v49 = vpack.c.bf16 %v9152_v15, %v9136_v34  ;;  %v8950_v31 = vpop.f32.mrb[100].mxu1 }
 0x51d   : > { %v8951_v9 = vadd.f32 %v8950_v31, %v17565_v41  ;;  %v8952_v6 = vpop.f32.mrb[101].mxu1 }
 0x51e   : > { %v8953_v53 = vadd.f32 %v8952_v6, %v17565_v41  ;;  %v8954_v59 = vpop.f32.mrb[102].mxu1  ;;  %9679 = vmatprep.subr.bf16.mxu1 %v9269_v49 }
 0x51f   : > { %v8955_v54 = vadd.f32 %v8954_v59, %v17571_v57  ;;  %v8956_v3 = vpop.f32.mrb[103].mxu1  ;;  %9680 = vmatpush1.bf16.msra.mxu1 %v9268_v16  ;;  %v9167_v45 = vmax.f32 %v8951_v9, 0.0 }
 0x520   : > { %v8957_v29 = vadd.f32 %v8956_v3, %v17571_v57  ;;  %v9168_v8 = vmax.f32 %v8953_v53, 0.0 }
 0x521   : > { %v9183_v21 = vmax.f32 %v8955_v54, 0.0 }
 0x522   : > { %v9184_v55 = vmax.f32 %v8957_v29, 0.0  ;;  %12020 = vmatmul.mubr.msk.bf16.gmra.mrb[144].mxu1 %vm8528_vm3, %v17635_v24  ;;  %12024 = vmatmul.mubr.msk.bf16.gmra.mrb[160].mxu0 %vm8528_vm3, %v17654_v36 }
 0x523   : > { %v9284_v51 = vpack.c.bf16 %v9183_v21, %v9167_v45  ;;  %9609 = vmatprep.mubr.bf16.mxu1 %v18893_v4  ;;  %9772 = vmatprep.mubr.bf16.mxu0 %v18893_v4 }
 0x524   : > { %v9285_v37 = vpack.c.bf16 %v9184_v55, %v9168_v8  ;;  %v8960_v63 = vpop.f32.mrb[104].mxu1 }
 0x525   : > { %v8961_v14 = vadd.f32 %v8960_v63, %v17580_v22  ;;  %v8962_v39 = vpop.f32.mrb[105].mxu1 }
 0x526   : > { %v8963_v23 = vadd.f32 %v8962_v39, %v17580_v22  ;;  %v8964_v17 = vpop.f32.mrb[106].mxu1  ;;  %9681 = vmatprep.subr.bf16.mxu1 %v9285_v37 }
 0x527   : > { %v8965_v19 = vadd.f32 %v8964_v17, %v17586_v42  ;;  %v8966_v38 = vpop.f32.mrb[107].mxu1  ;;  %9682 = vmatpush1.bf16.msra.mxu1 %v9284_v51  ;;  %v9199_v33 = vmax.f32 %v8961_v14, 0.0 }
 0x528   : > { %v8967_v43 = vadd.f32 %v8966_v38, %v17586_v42  ;;  %v9200_v62 = vmax.f32 %v8963_v23, 0.0 }
 0x529   : > { %v9215_v20 = vmax.f32 %v8965_v19, 0.0 }
 0x52a   : > { %v9216_v35 = vmax.f32 %v8967_v43, 0.0  ;;  %12021 = vmatmul.mubr.msk.bf16.gmra.mrb[148].mxu1 %vm8528_vm3, %v17654_v36 }
 0x52b   : > { %v9300_v48 = vpack.c.bf16 %v9215_v20, %v9199_v33  ;;  %9711 = vmatprep.mubr.bf16.mxu1 %v18893_v4 }
 0x52c   : > { %v9301_v7 = vpack.c.bf16 %v9216_v35, %v9200_v62  ;;  %v8970_v0 = vpop.f32.mrb[108].mxu1 }
 0x52d   : > { %v8971_v56 = vadd.f32 %v8970_v0, %v17595_v10  ;;  %v8972_v12 = vpop.f32.mrb[109].mxu1 }
 0x52e   : > { %v8973_v2 = vadd.f32 %v8972_v12, %v17595_v10  ;;  %v8974_v26 = vpop.f32.mrb[110].mxu1  ;;  %9683 = vmatprep.subr.bf16.mxu1 %v9301_v7 }
 0x52f   : > { %v8975_v40 = vadd.f32 %v8974_v26, %v17601_v46  ;;  %v8976_v27 = vpop.f32.mrb[111].mxu1  ;;  %9684 = vmatpush1.bf16.msra.mxu1 %v9300_v48  ;;  %v9231_v52 = vmax.f32 %v8971_v56, 0.0 }
 0x530   : > { %v8977_v30 = vadd.f32 %v8976_v27, %v17601_v46  ;;  %v9232_v61 = vmax.f32 %v8973_v2, 0.0 }
 0x531   : > { %v9247_v28 = vmax.f32 %v8975_v40, 0.0 }
 0x532   : > { %v9248_v5 = vmax.f32 %v8977_v30, 0.0 }
 0x533   : > { %v9316_v58 = vpack.c.bf16 %v9247_v28, %v9231_v52 }
 0x534   : > { %v9317_v50 = vpack.c.bf16 %v9248_v5, %v9232_v61 }
 0x536   : > { %9685 = vmatprep.subr.bf16.mxu1 %v9317_v50 }
 0x537   : > { %9686 = vmatpush1.bf16.msra.mxu1 %v9316_v58 }
 0x53a   : > { %12025 = vmatmul.mubr.msk.bf16.vlgmr.msra.gmra.mrb[152].mxu1 %vm8528_vm3, %v17619_v1 }
 0x53b   : > { %9721 = vmatprep.mubr.bf16.mxu1 %v18893_v4 }
 0x542   : > { %12026 = vmatmul.mubr.msk.bf16.gmra.mrb[156].mxu1 %vm8528_vm3, %v17635_v24 }
 0x543   : > { %9731 = vmatprep.mubr.bf16.mxu1 %v18893_v4 }
 0x54a   : > { %12027 = vmatmul.mubr.msk.bf16.gmra.mrb[160].mxu1 %vm8528_vm3, %v17654_v36 }
 0x54b   : > { %9833 = vmatprep.mubr.bf16.mxu1 %v18893_v4 }
 0x585   : > { %v9013_v13 = vpop.f32.mrb[112].mxu0 }
 0x586   : > { %v9014_v34 = vadd.f32 %v9013_v13, %v17554_v44  ;;  %v9015_v15 = vpop.f32.mrb[113].mxu0 }
 0x587   : > { %v9016_v16 = vadd.f32 %v9015_v15, %v17554_v44  ;;  %v9017_v49 = vpop.f32.mrb[114].mxu0 }
 0x588   : > { %v9018_v31 = vadd.f32 %v9017_v49, %v17557_v47  ;;  %v9019_v9 = vpop.f32.mrb[115].mxu0  ;;  %v9137_v53 = vmax.f32 %v9014_v34, 0.0 }
 0x589   : > { %v9020_v6 = vadd.f32 %v9019_v9, %v17557_v47  ;;  %v9138_v54 = vmax.f32 %v9016_v16, 0.0 }
 0x58a   : > { %v9153_v59 = vmax.f32 %v9018_v31, 0.0 }
 0x58b   : > { %v9154_v3 = vmax.f32 %v9020_v6, 0.0 }
 0x58c   : > { %v9270_v29 = vpack.c.bf16 %v9153_v59, %v9137_v53 }
 0x58d   : > { %v9271_v45 = vpack.c.bf16 %v9154_v3, %v9138_v54  ;;  %v9023_v21 = vpop.f32.mrb[116].mxu0  ;;  %v17791_v54 = vpop.permute.xlu0 %9329 }
 0x58e   : > { %v9024_v8 = vadd.f32 %v9023_v21, %v17565_v41  ;;  %v9025_v55 = vpop.f32.mrb[117].mxu0 }
 0x58f   : > { %v9026_v51 = vadd.f32 %v9025_v55, %v17565_v41  ;;  %v9027_v37 = vpop.f32.mrb[118].mxu0  ;;  %9740 = vmatprep.subr.bf16.mxu0 %v9271_v45 }
 0x590   : > { %v9028_v63 = vadd.f32 %v9027_v37, %v17571_v57  ;;  %v9029_v14 = vpop.f32.mrb[119].mxu0  ;;  %9741 = vmatpush1.bf16.msra.mxu0 %v9270_v29  ;;  %v9169_v23 = vmax.f32 %v9024_v8, 0.0  ;;  %v17793_v29 = vpop.permute.xlu1 %9334 }
 0x591   : > { %v9030_v39 = vadd.f32 %v9029_v14, %v17571_v57  ;;  %v9170_v19 = vmax.f32 %v9026_v51, 0.0 }
 0x592   : > { %v9185_v17 = vmax.f32 %v9028_v63, 0.0 }
 0x593   : > { %v9186_v38 = vmax.f32 %v9030_v39, 0.0 }
 0x594   : > { %v9286_v43 = vpack.c.bf16 %v9185_v17, %v9169_v23  ;;  %v17802_v23 = vpop.permute.xlu0 %9339 }
 0x595   : > { %v9287_v33 = vpack.c.bf16 %v9186_v38, %v9170_v19  ;;  %v9033_v20 = vpop.f32.mrb[120].mxu0 }
 0x596   : > { %v9034_v62 = vadd.f32 %v9033_v20, %v17580_v22  ;;  %v9035_v35 = vpop.f32.mrb[121].mxu0 }
 0x597   : > { %v9036_v48 = vadd.f32 %v9035_v35, %v17580_v22  ;;  %v9037_v7 = vpop.f32.mrb[122].mxu0  ;;  %9742 = vmatprep.subr.bf16.mxu0 %v9287_v33 }
 0x598   : > { %v9038_v0 = vadd.f32 %v9037_v7, %v17586_v42  ;;  %v9039_v56 = vpop.f32.mrb[123].mxu0  ;;  %9743 = vmatpush1.bf16.msra.mxu0 %v9286_v43  ;;  %v9201_v2 = vmax.f32 %v9034_v62, 0.0 }
 0x599   : > { %v9040_v12 = vadd.f32 %v9039_v56, %v17586_v42  ;;  %v9202_v40 = vmax.f32 %v9036_v48, 0.0 }
 0x59a   : > { %v9217_v26 = vmax.f32 %v9038_v0, 0.0 }
 0x59b   : > { %v9218_v27 = vmax.f32 %v9040_v12, 0.0 }
 0x59c   : > { %v9302_v30 = vpack.c.bf16 %v9217_v26, %v9201_v2 }
 0x59d   : > { %v9303_v52 = vpack.c.bf16 %v9218_v27, %v9202_v40  ;;  %v9043_v28 = vpop.f32.mrb[124].mxu0 }
 0x59e   : > { %v9044_v61 = vadd.f32 %v9043_v28, %v17595_v10  ;;  %v9045_v5 = vpop.f32.mrb[125].mxu0 }
 0x59f   : > { %v9046_v58 = vadd.f32 %v9045_v5, %v17595_v10  ;;  %v9047_v50 = vpop.f32.mrb[126].mxu0  ;;  %9744 = vmatprep.subr.bf16.mxu0 %v9303_v52 }
 0x5a0   : > { %v9048_v13 = vadd.f32 %v9047_v50, %v17601_v46  ;;  %v9049_v34 = vpop.f32.mrb[127].mxu0  ;;  %9745 = vmatpush1.bf16.msra.mxu0 %v9302_v30  ;;  %v9233_v16 = vmax.f32 %v9044_v61, 0.0 }
 0x5a1   : > { %v9050_v15 = vadd.f32 %v9049_v34, %v17601_v46  ;;  %v9234_v31 = vmax.f32 %v9046_v58, 0.0 }
 0x5a2   : > { %v9249_v49 = vmax.f32 %v9048_v13, 0.0 }
 0x5a3   : > { %v9250_v9 = vmax.f32 %v9050_v15, 0.0 }
 0x5a4   : > { %v9318_v6 = vpack.c.bf16 %v9249_v49, %v9233_v16 }
 0x5a5   : > { %v9319_v53 = vpack.c.bf16 %v9250_v9, %v9234_v31  ;;  %v9408_v59 = vpop.f32.mrb[128].mxu0  ;;  %v18974_v9 = vld [vmem:[#allocation2_spill] sm:$0xff] }
 0x5a6   : > { %v9410_v3 = vpop.f32.mrb[129].mxu0  ;;  %v9409_v21 = vadd.f32 %v9408_v59, %v17791_v54 }
 0x5a7   : > { %9746 = vmatprep.subr.bf16.mxu0 %v9319_v53  ;;  %v9412_v45 = vpop.f32.mrb[130].mxu0  ;;  %v9411_v51 = vadd.f32 %v9410_v3, %v17791_v54 }
 0x5a8   : > { %9747 = vmatpush1.bf16.msra.mxu0 %v9318_v6  ;;  %v9413_v8 = vadd.f32 %v9412_v45, %v17793_v29  ;;  %v9414_v55 = vpop.f32.mrb[131].mxu0 }
 0x5a9   : > { %v9415_v37 = vadd.f32 %v9414_v55, %v17793_v29 }
 0x5aa   : > { %v9862_v63 = vpack.c.bf16 %v9413_v8, %v9409_v21 }
 0x5ab   : > { %12028 = vmatmul.mubr.msk.bf16.vlgmr.msra.gmra.mrb[164].mxu0 %vm8528_vm3, %v17619_v1  ;;  %v9863_v39 = vpack.c.bf16 %v9415_v37, %v9411_v51  ;;  %v17807_v1 = vpop.permute.xlu1 %9344  ;;  %v18975_v51 = vld [vmem:[#allocation6_spill] sm:$0xff] }
 0x5ac   : > { %9782 = vmatprep.mubr.bf16.mxu0 %v18893_v4 }
 0x5ad   : > { %v9086_v14 = vpop.f32.mrb[112].mxu1  ;;  %v9418_v33 = vpop.f32.mrb[132].mxu0  ;;  %9983 = vmatprep.subr.bf16.mxu0 %v9863_v39 }
 0x5ae   : > { %v9087_v17 = vadd.f32 %v9086_v14, %v17554_v44  ;;  %v9088_v19 = vpop.f32.mrb[113].mxu1  ;;  %v9420_v35 = vpop.f32.mrb[133].mxu0  ;;  %9984 = vmatpush1.bf16.msra.mxu0 %v9862_v63  ;;  %v9419_v12 = vadd.f32 %v9418_v33, %v17802_v23  ;;  %v18976_v63 = vld [vmem:[#allocation4_spill] sm:$0xff] }
 0x5af   : > { %v9089_v38 = vadd.f32 %v9088_v19, %v17554_v44  ;;  %v9090_v43 = vpop.f32.mrb[114].mxu1  ;;  %v9422_v7 = vpop.f32.mrb[134].mxu0  ;;  %v9421_v27 = vadd.f32 %v9420_v35, %v17802_v23 }
 0x5b0   : > { %v9091_v20 = vadd.f32 %v9090_v43, %v17557_v47  ;;  %v9092_v62 = vpop.f32.mrb[115].mxu1  ;;  %v9139_v0 = vmax.f32 %v9087_v17, 0.0  ;;  %v9423_v2 = vadd.f32 %v9422_v7, %v17807_v1  ;;  %v9424_v44 = vpop.f32.mrb[135].mxu0 }
 0x5b1   : > { %v9093_v48 = vadd.f32 %v9092_v62, %v17557_v47  ;;  %v9140_v26 = vmax.f32 %v9089_v38, 0.0  ;;  %v9425_v30 = vadd.f32 %v9424_v44, %v17807_v1  ;;  %v18977_v38 = vld [vmem:[#allocation8_spill] sm:$0xff] }
 0x5b2   : > { %v9155_v56 = vmax.f32 %v9091_v20, 0.0  ;;  %v9878_v28 = vpack.c.bf16 %v9423_v2, %v9419_v12  ;;  %v18978_v20 = vld [vmem:[#allocation7_spill] sm:$0xff] }
 0x5b3   : > { %v9156_v40 = vmax.f32 %v9093_v48, 0.0  ;;  %12029 = vmatmul.mubr.msk.bf16.gmra.mrb[168].mxu0 %vm8528_vm3, %v17635_v24  ;;  %v9879_v5 = vpack.c.bf16 %v9425_v30, %v9421_v27 }
 0x5b4   : > { %v9272_v52 = vpack.c.bf16 %v9155_v56, %v9139_v0  ;;  %9792 = vmatprep.mubr.bf16.mxu0 %v18893_v4  ;;  %v18980_v56 = vld [vmem:[#allocation10_spill] sm:$0xff] }
 0x5b5   : > { %v9273_v47 = vpack.c.bf16 %v9156_v40, %v9140_v26  ;;  %v9096_v61 = vpop.f32.mrb[116].mxu1  ;;  %v17819_v15 = vpop.f32.mrb[136].mxu0  ;;  %9985 = vmatprep.subr.bf16.mxu0 %v9879_v5 }
 0x5b6   : > { %v9097_v58 = vadd.f32 %v9096_v61, %v17565_v41  ;;  %v9098_v50 = vpop.f32.mrb[117].mxu1  ;;  %v17822_v24 = vpop.f32.mrb[137].mxu0  ;;  %9986 = vmatpush1.bf16.msra.mxu0 %v9878_v28 }
 0x5b7   : > { %v9099_v13 = vadd.f32 %v9098_v50, %v17565_v41  ;;  %v9100_v34 = vpop.f32.mrb[118].mxu1  ;;  %9801 = vmatprep.subr.bf16.mxu1 %v9273_v47  ;;  %9987 = vmatprep.subr.bf16.mxu0 %v18974_v9  ;;  %v9432_v6 = vpop.f32.mrb[138].mxu0 }
 0x5b8   : > { %v9101_v16 = vadd.f32 %v9100_v34, %v17571_v57  ;;  %v9102_v49 = vpop.f32.mrb[119].mxu1  ;;  %9802 = vmatpush1.bf16.msra.mxu1 %v9272_v52  ;;  %v9171_v53 = vmax.f32 %v9097_v58, 0.0  ;;  %v9433_v41 = vpop.f32.mrb[139].mxu0 }
 0x5b9   : > { %v9103_v31 = vadd.f32 %v9102_v49, %v17571_v57  ;;  %v9172_v3 = vmax.f32 %v9099_v13, 0.0 }
 0x5ba   : > { %v9187_v59 = vmax.f32 %v9101_v16, 0.0  ;;  %9988 = vmatpush1.bf16.msra.mxu0 %v18975_v51 }
 0x5bb   : > { %v9188_v45 = vmax.f32 %v9103_v31, 0.0  ;;  %12030 = vmatmul.mubr.msk.bf16.gmra.mrb[172].mxu0 %vm8528_vm3, %v17654_v36  ;;  %9989 = vmatprep.subr.bf16.mxu0 %v18976_v63 }
 0x5bc   : > { %v9288_v21 = vpack.c.bf16 %v9187_v59, %v9171_v53  ;;  %10015 = vmatprep.mubr.bf16.mxu0 %v18893_v4 }
 0x5bd   : > { %v9289_v8 = vpack.c.bf16 %v9188_v45, %v9172_v3  ;;  %v9106_v55 = vpop.f32.mrb[120].mxu1 }
 0x5be   : > { %v9107_v57 = vadd.f32 %v9106_v55, %v17580_v22  ;;  %v9108_v37 = vpop.f32.mrb[121].mxu1  ;;  %9990 = vmatpush1.bf16.msra.mxu0 %v18977_v38 }
 0x5bf   : > { %v9109_v14 = vadd.f32 %v9108_v37, %v17580_v22  ;;  %v9110_v39 = vpop.f32.mrb[122].mxu1  ;;  %9803 = vmatprep.subr.bf16.mxu1 %v9289_v8  ;;  %12038 = vmatprep.subr.msk.bf16.mxu0 %vm18979_vm1, %v18978_v20  ;;  %v17841_v22 = vld [vmem:[%s18446_s9] sm:$0xff]   ;;  %v17879_v20 = vld [vmem:[%s18446_s9 + $0x10] sm:$0xff]  }
 0x5c0   : > { %v9111_v17 = vadd.f32 %v9110_v39, %v17586_v42  ;;  %v9112_v19 = vpop.f32.mrb[123].mxu1  ;;  %9804 = vmatpush1.bf16.msra.mxu1 %v9288_v21  ;;  %v9203_v43 = vmax.f32 %v9107_v57, 0.0 }
 0x5c1   : > { %v9113_v36 = vadd.f32 %v9112_v19, %v17586_v42  ;;  %v9204_v62 = vmax.f32 %v9109_v14, 0.0  ;;  %v12565_v19 = vld [vmem:[%s18444_s7] sm:$0xff]  }
 0x5c2   : > { %v9219_v33 = vmax.f32 %v9111_v17, 0.0  ;;  %9992 = vmatpush1.bf16.msra.mxu0 %v18980_v56 }
 0x5c3   : > { %v9220_v35 = vmax.f32 %v9113_v36, 0.0 }
 0x5c4   : > { %v9304_v48 = vpack.c.bf16 %v9219_v33, %v9203_v43 }
 0x5c5   : > { %v9305_v7 = vpack.c.bf16 %v9220_v35, %v9204_v62  ;;  %v9116_v0 = vpop.f32.mrb[124].mxu1  ;;  %v9530_v26 = vpop.f32.mrb[140].mxu0  ;;  %12039 = vmatmul.mubr.msk.bf16.vlgmr.msra.gmra.mrb[176].mxu0 %vm9970_vm5, %v17841_v22 }
 0x5c6   : > { %v9117_v42 = vadd.f32 %v9116_v0, %v17595_v10  ;;  %v9118_v12 = vpop.f32.mrb[125].mxu1  ;;  %v9532_v30 = vpop.f32.mrb[141].mxu0  ;;  %10025 = vmatprep.mubr.bf16.mxu0 %v18893_v4 }
 0x5c7   : > { %v9119_v2 = vadd.f32 %v9118_v12, %v17595_v10  ;;  %v9120_v44 = vpop.f32.mrb[126].mxu1  ;;  %9805 = vmatprep.subr.bf16.mxu1 %v9305_v7  ;;  %v9534_v28 = vpop.f32.mrb[142].mxu0  ;;  %v9531_v10 = vadd.f32 %v9530_v26, %v17791_v54  ;;  %v9533_v34 = vadd.f32 %v9532_v30, %v17791_v54  ;;  %v18981_v30 = vld [vmem:[#allocation16_spill] sm:$0xff] }
 0x5c8   : > { %v9121_v40 = vadd.f32 %v9120_v44, %v17601_v46  ;;  %v9122_v27 = vpop.f32.mrb[127].mxu1  ;;  %9806 = vmatpush1.bf16.msra.mxu1 %v9304_v48  ;;  %v9235_v47 = vmax.f32 %v9117_v42, 0.0  ;;  %v9535_v5 = vadd.f32 %v9534_v28, %v17793_v29  ;;  %v9536_v58 = vpop.f32.mrb[143].mxu0  ;;  %v12566_v28 = vld [vmem:[%s18444_s7 + $0x8] sm:$0xff]  }
 0x5c9   : > { %v9123_v52 = vadd.f32 %v9122_v27, %v17601_v46  ;;  %v9236_v50 = vmax.f32 %v9119_v2, 0.0  ;;  %v9537_v16 = vadd.f32 %v9536_v58, %v17793_v29  ;;  %v17858_v46 = vld [vmem:[%s18446_s9 + $0x8] sm:$0xff]  }
 0x5ca   : > { %v9251_v61 = vmax.f32 %v9121_v40, 0.0  ;;  %v9866_v31 = vpack.c.bf16 %v9535_v5, %v9531_v10  ;;  %v18982_v5 = vld [vmem:[#allocation19_spill] sm:$0xff] }
 0x5cb   : > { %v9252_v13 = vmax.f32 %v9123_v52, 0.0  ;;  %v9867_v53 = vpack.c.bf16 %v9537_v16, %v9533_v34 }
 0x5cc   : > { %v9320_v49 = vpack.c.bf16 %v9251_v61, %v9235_v47  ;;  %v17901_v61 = vld [vmem:[%s18446_s9 + $0x18] sm:$0xff]  }
 0x5cd   : > { %v9321_v9 = vpack.c.bf16 %v9252_v13, %v9236_v50  ;;  %v9469_v6 = vpop.f32.mrb[128].mxu1  ;;  %v9540_v3 = vpop.f32.mrb[144].mxu0  ;;  %10129 = vmatprep.subr.bf16.mxu0 %v9867_v53  ;;  %12040 = vmatmul.mubr.msk.bf16.gmra.mrb[180].mxu0 %vm9970_vm5, %v17858_v46  ;;  %v18983_v50 = vld [vmem:[#allocation18_spill] sm:$0xff]  ;;  %v18984_v13 = vld [vmem:[#allocation3_spill] sm:$0xff]  ;;  %v18989_v53 = vld [vmem:[#allocation5_spill] sm:$0xff] }
 0x5ce   : > { %v9471_v59 = vpop.f32.mrb[129].mxu1  ;;  %v9470_v45 = vadd.f32 %v9469_v6, %v17791_v54  ;;  %v9542_v55 = vpop.f32.mrb[145].mxu0  ;;  %10130 = vmatpush1.bf16.msra.mxu0 %v9866_v31  ;;  %10035 = vmatprep.mubr.bf16.mxu0 %v18893_v4  ;;  %v9541_v14 = vadd.f32 %v9540_v3, %v17802_v23  ;;  %v18986_v31 = vld [vmem:[#allocation12_spill] sm:$0xff]  ;;  %v18992_v3 = vld [vmem:[#allocation14_spill] sm:$0xff] }
 0x5cf   : > { %9807 = vmatprep.subr.bf16.mxu1 %v9321_v9  ;;  %v9473_v41 = vpop.f32.mrb[130].mxu1  ;;  %v9472_v51 = vadd.f32 %v9471_v59, %v17791_v54  ;;  %v9544_v37 = vpop.f32.mrb[146].mxu0  ;;  %v9543_v38 = vadd.f32 %v9542_v55, %v17802_v23  ;;  %v18987_v9 = vld [vmem:[#allocation20_spill] sm:$0xff]  ;;  %v18990_v59 = vld [vmem:[#allocation22_spill] sm:$0xff]  ;;  %v18994_v55 = vld [vmem:[#allocation15_spill] sm:$0xff] }
 0x5d0   : > { %9808 = vmatpush1.bf16.msra.mxu1 %v9320_v49  ;;  %v9474_v21 = vadd.f32 %v9473_v41, %v17793_v29  ;;  %v9475_v8 = vpop.f32.mrb[131].mxu1  ;;  %v9545_v39 = vadd.f32 %v9544_v37, %v17807_v1  ;;  %v9546_v17 = vpop.f32.mrb[147].mxu0  ;;  %v18985_v49 = vld [vmem:[#allocation21_spill] sm:$0xff]  ;;  %v12567_v6 = vld [vmem:[%s18444_s7 + $0x10] ss:$0 sps:$4 sm:$0xff]  }
 0x5d1   : > { %v9476_v57 = vadd.f32 %v9475_v8, %v17793_v29  ;;  %v9547_v43 = vadd.f32 %v9546_v17, %v17807_v1  ;;  %v18991_v41 = vld [vmem:[#allocation13_spill] sm:$0xff] }
 0x5d2   : > { %v9864_v63 = vpack.c.bf16 %v9474_v21, %v9470_v45  ;;  %v9882_v33 = vpack.c.bf16 %v9545_v39, %v9541_v14 }
 0x5d3   : > { %12031 = vmatmul.mubr.msk.bf16.vlgmr.msra.gmra.mrb[164].mxu1 %vm8528_vm3, %v12565_v19  ;;  %v9865_v36 = vpack.c.bf16 %v9476_v57, %v9472_v51  ;;  %v9883_v35 = vpack.c.bf16 %v9547_v43, %v9543_v38 }
 0x5d4   : > { %9843 = vmatprep.mubr.bf16.mxu1 %v18893_v4 }
 0x5d5   : > { %v9479_v62 = vpop.f32.mrb[132].mxu1  ;;  %10056 = vmatprep.subr.bf16.mxu1 %v9865_v36  ;;  %v17881_v0 = vpop.f32.mrb[148].mxu0  ;;  %10131 = vmatprep.subr.bf16.mxu0 %v9883_v35 }
 0x5d6   : > { %v9481_v48 = vpop.f32.mrb[133].mxu1  ;;  %10057 = vmatpush1.bf16.msra.mxu1 %v9864_v63  ;;  %v9480_v56 = vadd.f32 %v9479_v62, %v17802_v23  ;;  %12041 = vmatmul.mubr.msk.bf16.gmra.mrb[184].mxu0 %vm9970_vm5, %v17879_v20  ;;  %v17887_v2 = vpop.f32.mrb[149].mxu0 }
 0x5d7   : > { %v9483_v7 = vpop.f32.mrb[134].mxu1  ;;  %v9482_v44 = vadd.f32 %v9481_v48, %v17802_v23  ;;  %10132 = vmatpush1.bf16.msra.mxu0 %v9882_v33  ;;  %v9554_v40 = vpop.f32.mrb[150].mxu0  ;;  %10045 = vmatprep.mubr.bf16.mxu0 %v18893_v4 }
 0x5d8   : > { %v9484_v42 = vadd.f32 %v9483_v7, %v17807_v1  ;;  %v9485_v12 = vpop.f32.mrb[135].mxu1  ;;  %10133 = vmatprep.subr.bf16.mxu0 %v18981_v30  ;;  %v9555_v52 = vpop.f32.mrb[151].mxu0 }
 0x5d9   : > { %v9486_v26 = vadd.f32 %v9485_v12, %v17807_v1 }
 0x5da   : > { %v9880_v27 = vpack.c.bf16 %v9484_v42, %v9480_v56 }
 0x5db   : > { %12032 = vmatmul.mubr.msk.bf16.gmra.mrb[168].mxu1 %vm8528_vm3, %v12566_v28  ;;  %v9881_v47 = vpack.c.bf16 %v9486_v26, %v9482_v44  ;;  %10134 = vmatpush1.bf16.msra.mxu0 %v18982_v5 }
 0x5dc   : > { %9853 = vmatprep.mubr.bf16.mxu1 %v18893_v4  ;;  %10135 = vmatprep.subr.bf16.mxu0 %v18983_v50 }
 0x5dd   : > { %v17903_v10 = vpop.f32.mrb[136].mxu1  ;;  %10058 = vmatprep.subr.bf16.mxu1 %v9881_v47 }
 0x5de   : > { %v17906_v58 = vpop.f32.mrb[137].mxu1  ;;  %10059 = vmatpush1.bf16.msra.mxu1 %v9880_v27  ;;  %12042 = vmatmul.mubr.msk.bf16.gmra.mrb[188].mxu0 %vm9970_vm5, %v17901_v61 }
 0x5df   : > { %10060 = vmatprep.subr.bf16.mxu1 %v18984_v13  ;;  %v9493_v34 = vpop.f32.mrb[138].mxu1  ;;  %10136 = vmatpush1.bf16.msra.mxu0 %v18985_v49 }
 0x5e0   : > { %v9494_v16 = vpop.f32.mrb[139].mxu1  ;;  %10161 = vmatprep.mubr.bf16.mxu0 %v18893_v4  ;;  %12048 = vmatprep.subr.msk.bf16.mxu0 %vm18988_vm9, %v18987_v9 }
 0x5e2   : > { %10061 = vmatpush1.bf16.msra.mxu1 %v18986_v31 }
 0x5e3   : > { %12033 = vmatmul.mubr.msk.bf16.gmra.mrb[172].mxu1 %vm8528_vm3, %v12567_v6  ;;  %10062 = vmatprep.subr.bf16.mxu1 %v18989_v53 }
 0x5e4   : > { %10088 = vmatprep.mubr.bf16.mxu1 %v18893_v4  ;;  %10138 = vmatpush1.bf16.msra.mxu0 %v18990_v59 }
 0x5e5   : > { %v9652_v45 = vpop.f32.mrb[152].mxu0 }
 0x5e6   : > { %10063 = vmatpush1.bf16.msra.mxu1 %v18991_v41  ;;  %v9654_v21 = vpop.f32.mrb[153].mxu0  ;;  %v9653_v51 = vadd.f32 %v9652_v45, %v17791_v54 }
 0x5e7   : > { %12043 = vmatprep.subr.msk.bf16.mxu1 %vm18993_vm15, %v18992_v3  ;;  %12049 = vmatmul.mubr.msk.bf16.vlgmr.msra.gmra.mrb[192].mxu0 %vm9970_vm5, %v17841_v22  ;;  %v9656_v8 = vpop.f32.mrb[154].mxu0  ;;  %v9655_v63 = vadd.f32 %v9654_v21, %v17791_v54  ;;  %v18995_v3 = vld [vmem:[#allocation27_spill] sm:$0xff] }
 0x5e8   : > { %10171 = vmatprep.mubr.bf16.mxu0 %v18893_v4  ;;  %v9657_v57 = vadd.f32 %v9656_v8, %v17793_v29  ;;  %v9658_v37 = vpop.f32.mrb[155].mxu0 }
 0x5e9   : > { %v9659_v14 = vadd.f32 %v9658_v37, %v17793_v29  ;;  %v18997_v37 = vld [vmem:[#allocation30_spill] sm:$0xff] }
 0x5ea   : > { %10065 = vmatpush1.bf16.msra.mxu1 %v18994_v55  ;;  %v9870_v39 = vpack.c.bf16 %v9657_v57, %v9653_v51  ;;  %v18996_v51 = vld [vmem:[#allocation17_spill] sm:$0xff] }
 0x5eb   : > { %v9871_v19 = vpack.c.bf16 %v9659_v14, %v9655_v63  ;;  %v18998_v14 = vld [vmem:[#allocation31_spill] sm:$0xff] }
 0x5ed   : > { %v9591_v17 = vpop.f32.mrb[140].mxu1  ;;  %12044 = vmatmul.mubr.msk.bf16.vlgmr.msra.gmra.mrb[176].mxu1 %vm9970_vm5, %v17841_v22  ;;  %v9662_v43 = vpop.f32.mrb[156].mxu0  ;;  %10275 = vmatprep.subr.bf16.mxu0 %v9871_v19  ;;  %v19001_v19 = vld [vmem:[#allocation33_spill] sm:$0xff] }
 0x5ee   : > { %v9593_v36 = vpop.f32.mrb[141].mxu1  ;;  %10098 = vmatprep.mubr.bf16.mxu1 %v18893_v4  ;;  %v9592_v33 = vadd.f32 %v9591_v17, %v17791_v54  ;;  %v9664_v48 = vpop.f32.mrb[157].mxu0  ;;  %10276 = vmatpush1.bf16.msra.mxu0 %v9870_v39  ;;  %v9663_v44 = vadd.f32 %v9662_v43, %v17802_v23  ;;  %v18999_v39 = vld [vmem:[#allocation25_spill] sm:$0xff]  ;;  %v19000_v17 = vld [vmem:[#allocation23_spill] sm:$0xff] }
 0x5ef   : > { %v9595_v38 = vpop.f32.mrb[142].mxu1  ;;  %12050 = vmatmul.mubr.msk.bf16.gmra.mrb[196].mxu0 %vm9970_vm5, %v17858_v46  ;;  %v9594_v7 = vadd.f32 %v9593_v36, %v17791_v54  ;;  %v9666_v42 = vpop.f32.mrb[158].mxu0  ;;  %v9665_v30 = vadd.f32 %v9664_v48, %v17802_v23  ;;  %v19002_v36 = vld [vmem:[#allocation34_spill] sm:$0xff]  ;;  %v19005_v43 = vld [vmem:[#allocation11_spill] sm:$0xff] }
 0x5f0   : > { %v9596_v62 = vadd.f32 %v9595_v38, %v17793_v29  ;;  %v9597_v35 = vpop.f32.mrb[143].mxu1  ;;  %10181 = vmatprep.mubr.bf16.mxu0 %v18893_v4  ;;  %v9667_v26 = vadd.f32 %v9666_v42, %v17807_v1  ;;  %v9668_v40 = vpop.f32.mrb[159].mxu0  ;;  %v19004_v38 = vld [vmem:[#allocation26_spill] sm:$0xff] }
 0x5f1   : > { %v9598_v56 = vadd.f32 %v9597_v35, %v17793_v29  ;;  %v9669_v52 = vadd.f32 %v9668_v40, %v17807_v1 }
 0x5f2   : > { %v9868_v12 = vpack.c.bf16 %v9596_v62, %v9592_v33  ;;  %v9886_v28 = vpack.c.bf16 %v9667_v26, %v9663_v44  ;;  %v19007_v33 = vld [vmem:[#allocation35_spill] sm:$0xff]  ;;  %v19008_v62 = vld [vmem:[#allocation9_spill] sm:$0xff] }
 0x5f3   : > { %v9869_v27 = vpack.c.bf16 %v9598_v56, %v9594_v7  ;;  %v9887_v5 = vpack.c.bf16 %v9669_v52, %v9665_v30 }
 0x5f5   : > { %v9601_v47 = vpop.f32.mrb[144].mxu1  ;;  %12045 = vmatmul.mubr.msk.bf16.gmra.mrb[180].mxu1 %vm9970_vm5, %v17858_v46  ;;  %10202 = vmatprep.subr.bf16.mxu1 %v9869_v27  ;;  %v17952_v34 = vpop.f32.mrb[160].mxu0 }
 0x5f6   : > { %v9603_v50 = vpop.f32.mrb[145].mxu1  ;;  %10203 = vmatpush1.bf16.msra.mxu1 %v9868_v12  ;;  %10108 = vmatprep.mubr.bf16.mxu1 %v18893_v4  ;;  %v9602_v16 = vadd.f32 %v9601_v47, %v17802_v23  ;;  %v17958_v9 = vpop.f32.mrb[161].mxu0 }
 0x5f7   : > { %v9605_v13 = vpop.f32.mrb[146].mxu1  ;;  %10277 = vmatprep.subr.bf16.mxu0 %v9887_v5  ;;  %12051 = vmatmul.mubr.msk.bf16.gmra.mrb[200].mxu0 %vm9970_vm5, %v17879_v20  ;;  %v9604_v6 = vadd.f32 %v9603_v50, %v17802_v23  ;;  %v9676_v59 = vpop.f32.mrb[162].mxu0 }
 0x5f8   : > { %v9606_v49 = vadd.f32 %v9605_v13, %v17807_v1  ;;  %v9607_v31 = vpop.f32.mrb[147].mxu1  ;;  %10278 = vmatpush1.bf16.msra.mxu0 %v9886_v28  ;;  %10191 = vmatprep.mubr.bf16.mxu0 %v18893_v4  ;;  %v9677_v45 = vpop.f32.mrb[163].mxu0  ;;  %v19009_v59 = vld [vmem:[#allocation29_spill] sm:$0xff] }
 0x5f9   : > { %v9608_v53 = vadd.f32 %v9607_v31, %v17807_v1  ;;  %10279 = vmatprep.subr.bf16.mxu0 %v18995_v3  ;;  %v19010_v45 = vld [vmem:[#allocation38_spill] sm:$0xff] }
 0x5fa   : > { %v9884_v41 = vpack.c.bf16 %v9606_v49, %v9602_v16 }
 0x5fb   : > { %v9885_v21 = vpack.c.bf16 %v9608_v53, %v9604_v6 }
 0x5fc   : > { %10280 = vmatpush1.bf16.msra.mxu0 %v18997_v37  ;;  %v19015_v37 = vld [vmem:[#allocation24_spill] sm:$0xff] }
 0x5fd   : > { %v17964_v8 = vpop.f32.mrb[148].mxu1  ;;  %12046 = vmatmul.mubr.msk.bf16.gmra.mrb[184].mxu1 %vm9970_vm5, %v17879_v20  ;;  %10204 = vmatprep.subr.bf16.mxu1 %v9885_v21  ;;  %v19011_v21 = vld [vmem:[#allocation32_spill] sm:$0xff] }
 0x5fe   : > { %v17968_v55 = vpop.f32.mrb[149].mxu1  ;;  %10205 = vmatpush1.bf16.msra.mxu1 %v9884_v41  ;;  %10118 = vmatprep.mubr.bf16.mxu1 %v18893_v4 }
 0x5ff   : > { %10206 = vmatprep.subr.bf16.mxu1 %v18996_v51  ;;  %v9615_v57 = vpop.f32.mrb[150].mxu1  ;;  %12052 = vmatmul.mubr.msk.bf16.gmra.mrb[204].mxu0 %vm9970_vm5, %v17901_v61  ;;  %v19012_v51 = vld [vmem:[#allocation39_spill] sm:$0xff] }
 0x600   : > { %v9616_v63 = vpop.f32.mrb[151].mxu1  ;;  %10281 = vmatprep.subr.bf16.mxu0 %v18998_v14  ;;  %10307 = vmatprep.mubr.bf16.mxu0 %v18893_v4  ;;  %v19013_v57 = vld [vmem:[#allocation28_spill] sm:$0xff] }
 0x601   : > { %10282 = vmatpush1.bf16.msra.mxu0 %v19001_v19 }
 0x602   : > { %10207 = vmatpush1.bf16.msra.mxu1 %v18999_v39  ;;  %12058 = vmatprep.subr.msk.bf16.mxu0 %vm19003_vm2, %v19002_v36 }
 0x603   : > { %10208 = vmatprep.subr.bf16.mxu1 %v19000_v17 }
 0x605   : > { %12047 = vmatmul.mubr.msk.bf16.gmra.mrb[188].mxu1 %vm9970_vm5, %v17901_v61  ;;  %10284 = vmatpush1.bf16.msra.mxu0 %v19007_v33 }
 0x606   : > { %10209 = vmatpush1.bf16.msra.mxu1 %v19004_v38  ;;  %10234 = vmatprep.mubr.bf16.mxu1 %v18893_v4 }
 0x607   : > { %12053 = vmatprep.subr.msk.bf16.mxu1 %vm19006_vm0, %v19005_v43 }
 0x608   : > { %12059 = vmatmul.mubr.msk.bf16.vlgmr.msra.gmra.mrb[208].mxu0 %vm9970_vm5, %v17841_v22 }
 0x609   : > { %10317 = vmatprep.mubr.bf16.mxu0 %v18893_v4 }
 0x60a   : > { %10211 = vmatpush1.bf16.msra.mxu1 %v19008_v62 }
 0x60d   : > { %v9713_v35 = vpop.f32.mrb[152].mxu1  ;;  %12054 = vmatmul.mubr.msk.bf16.vlgmr.msra.gmra.mrb[192].mxu1 %vm9970_vm5, %v17841_v22 }
 0x60e   : > { %v9715_v48 = vpop.f32.mrb[153].mxu1  ;;  %10244 = vmatprep.mubr.bf16.mxu1 %v18893_v4  ;;  %v9714_v56 = vadd.f32 %v9713_v35, %v17791_v54 }
 0x60f   : > { %v9717_v7 = vpop.f32.mrb[154].mxu1  ;;  %v9716_v44 = vadd.f32 %v9715_v48, %v17791_v54 }
 0x610   : > { %v9718_v42 = vadd.f32 %v9717_v7, %v17793_v29  ;;  %v9719_v12 = vpop.f32.mrb[155].mxu1  ;;  %12060 = vmatmul.mubr.msk.bf16.gmra.mrb[212].mxu0 %vm9970_vm5, %v17858_v46 }
 0x611   : > { %v9720_v26 = vadd.f32 %v9719_v12, %v17793_v29  ;;  %10327 = vmatprep.mubr.bf16.mxu0 %v18893_v4 }
 0x612   : > { %v9872_v40 = vpack.c.bf16 %v9718_v42, %v9714_v56 }
 0x613   : > { %v9873_v27 = vpack.c.bf16 %v9720_v26, %v9716_v44 }
 0x615   : > { %v9723_v30 = vpop.f32.mrb[156].mxu1  ;;  %12055 = vmatmul.mubr.msk.bf16.gmra.mrb[196].mxu1 %vm9970_vm5, %v17858_v46  ;;  %10348 = vmatprep.subr.bf16.mxu1 %v9873_v27 }
 0x616   : > { %v9725_v52 = vpop.f32.mrb[157].mxu1  ;;  %10349 = vmatpush1.bf16.msra.mxu1 %v9872_v40  ;;  %10254 = vmatprep.mubr.bf16.mxu1 %v18893_v4  ;;  %v9724_v47 = vadd.f32 %v9723_v30, %v17802_v23 }
 0x617   : > { %v9727_v28 = vpop.f32.mrb[158].mxu1  ;;  %v9726_v13 = vadd.f32 %v9725_v52, %v17802_v23 }
 0x618   : > { %v9728_v5 = vadd.f32 %v9727_v28, %v17807_v1  ;;  %v9729_v50 = vpop.f32.mrb[159].mxu1  ;;  %12061 = vmatmul.mubr.msk.bf16.gmra.mrb[216].mxu0 %vm9970_vm5, %v17879_v20  ;;  %v19016_v28 = vld [vmem:[#allocation40_spill] sm:$0xff] }
 0x619   : > { %v9730_v16 = vadd.f32 %v9729_v50, %v17807_v1  ;;  %10337 = vmatprep.mubr.bf16.mxu0 %v18893_v4  ;;  %v19017_v50 = vld [vmem:[#allocation84_spill] sm:$0xff] }
 0x61a   : > { %v9888_v49 = vpack.c.bf16 %v9728_v5, %v9724_v47 }
 0x61b   : > { %v9889_v31 = vpack.c.bf16 %v9730_v16, %v9726_v13  ;;  %v19018_v13 = vld [vmem:[#allocation85_spill] sm:$0xff]  ;;  %v19019_v16 = vld [vmem:[#allocation91_spill] sm:$0xff] }
 0x61d   : > { %v18013_v6 = vpop.f32.mrb[160].mxu1  ;;  %12056 = vmatmul.mubr.msk.bf16.gmra.mrb[200].mxu1 %vm9970_vm5, %v17879_v20  ;;  %10350 = vmatprep.subr.bf16.mxu1 %v9889_v31  ;;  %v18063_v31 = vpop.permute.xlu0 %9912 }
 0x61e   : > { %v18017_v53 = vpop.f32.mrb[161].mxu1  ;;  %10351 = vmatpush1.bf16.msra.mxu1 %v9888_v49  ;;  %10264 = vmatprep.mubr.bf16.mxu1 %v18893_v4  ;;  %v19020_v49 = vld [vmem:[#allocation90_spill] sm:$0xff] }
 0x61f   : > { %10352 = vmatprep.subr.bf16.mxu1 %v19009_v59  ;;  %v9737_v41 = vpop.f32.mrb[162].mxu1 }
 0x620   : > { %v9738_v3 = vpop.f32.mrb[163].mxu1  ;;  %12062 = vmatmul.mubr.msk.bf16.gmra.mrb[220].mxu0 %vm9970_vm5, %v17901_v61  ;;  %v19022_v41 = vld [vmem:[#allocation94_spill] sm:$0xff] }
 0x621   : > { %10453 = vmatprep.mubr.bf16.mxu0 %v18893_v4 }
 0x622   : > { %10353 = vmatpush1.bf16.msra.mxu1 %v19010_v45 }
 0x623   : > { %10354 = vmatprep.subr.bf16.mxu1 %v19011_v21  ;;  %v18067_v21 = vpop.permute.xlu1 %9917 }
 0x625   : > { %12057 = vmatmul.mubr.msk.bf16.gmra.mrb[204].mxu1 %vm9970_vm5, %v17901_v61 }
 0x626   : > { %10355 = vmatpush1.bf16.msra.mxu1 %v19012_v51  ;;  %10380 = vmatprep.mubr.bf16.mxu1 %v18893_v4 }
 0x627   : > { %12063 = vmatprep.subr.msk.bf16.mxu1 %vm19014_vm10, %v19013_v57 }
 0x62a   : > { %10357 = vmatpush1.bf16.msra.mxu1 %v19015_v37 }
 0x62d   : > { %12064 = vmatmul.mubr.msk.bf16.vlgmr.msra.gmra.mrb[208].mxu1 %vm9970_vm5, %v17841_v22 }
 0x62e   : > { %10390 = vmatprep.mubr.bf16.mxu1 %v18893_v4 }
 0x635   : > { %12065 = vmatmul.mubr.msk.bf16.gmra.mrb[212].mxu1 %vm9970_vm5, %v17858_v46 }
 0x636   : > { %10400 = vmatprep.mubr.bf16.mxu1 %v18893_v4 }
 0x63d   : > { %12066 = vmatmul.mubr.msk.bf16.gmra.mrb[216].mxu1 %vm9970_vm5, %v17879_v20 }
 0x63e   : > { %10410 = vmatprep.mubr.bf16.mxu1 %v18893_v4 }
 0x645   : > { %12067 = vmatmul.mubr.msk.bf16.gmra.mrb[220].mxu1 %vm9970_vm5, %v17901_v61 }
 0x646   : > { %10526 = vmatprep.mubr.bf16.mxu1 %v18893_v4 }
 0x67e   : > { %v9774_v63 = vpop.f32.mrb[164].mxu0 }
 0x67f   : > { %v9776_v14 = vpop.f32.mrb[165].mxu0  ;;  %v9775_v17 = vadd.f32 %v9774_v63, %v17791_v54 }
 0x680   : > { %v9778_v39 = vpop.f32.mrb[166].mxu0  ;;  %v9777_v38 = vadd.f32 %v9776_v14, %v17791_v54 }
 0x681   : > { %v9779_v19 = vadd.f32 %v9778_v39, %v17793_v29  ;;  %v9780_v36 = vpop.f32.mrb[167].mxu0 }
 0x682   : > { %v9781_v43 = vadd.f32 %v9780_v36, %v17793_v29 }
 0x683   : > { %v9874_v33 = vpack.c.bf16 %v9779_v19, %v9775_v17 }
 0x684   : > { %v9875_v62 = vpack.c.bf16 %v9781_v43, %v9777_v38  ;;  %v18075_v43 = vpop.permute.xlu0 %9922 }
 0x686   : > { %v9784_v35 = vpop.f32.mrb[168].mxu0  ;;  %10421 = vmatprep.subr.bf16.mxu0 %v9875_v62 }
 0x687   : > { %v9786_v48 = vpop.f32.mrb[169].mxu0  ;;  %10422 = vmatpush1.bf16.msra.mxu0 %v9874_v33  ;;  %v9785_v56 = vadd.f32 %v9784_v35, %v17802_v23 }
 0x688   : > { %v9788_v7 = vpop.f32.mrb[170].mxu0  ;;  %v9787_v44 = vadd.f32 %v9786_v48, %v17802_v23 }
 0x689   : > { %v9789_v42 = vadd.f32 %v9788_v7, %v17807_v1  ;;  %v9790_v12 = vpop.f32.mrb[171].mxu0  ;;  %v18078_v7 = vpop.permute.xlu1 %9927 }
 0x68a   : > { %v9791_v26 = vadd.f32 %v9790_v12, %v17807_v1 }
 0x68b   : > { %v9890_v40 = vpack.c.bf16 %v9789_v42, %v9785_v56 }
 0x68c   : > { %v9891_v27 = vpack.c.bf16 %v9791_v26, %v9787_v44 }
 0x68e   : > { %v18053_v30 = vpop.f32.mrb[172].mxu0  ;;  %10423 = vmatprep.subr.bf16.mxu0 %v9891_v27 }
 0x68f   : > { %v18055_v52 = vpop.f32.mrb[173].mxu0  ;;  %10424 = vmatpush1.bf16.msra.mxu0 %v9890_v40 }
 0x690   : > { %10425 = vmatprep.subr.bf16.mxu0 %v19016_v28  ;;  %v9798_v47 = vpop.f32.mrb[174].mxu0 }
 0x691   : > { %v9799_v5 = vpop.f32.mrb[175].mxu0 }
 0x693   : > { %10426 = vmatpush1.bf16.msra.mxu0 %v19017_v50 }
 0x694   : > { %10427 = vmatprep.subr.bf16.mxu0 %v19018_v13 }
 0x697   : > { %10428 = vmatpush1.bf16.msra.mxu0 %v19019_v16 }
 0x698   : > { %12068 = vmatprep.subr.msk.bf16.mxu0 %vm19021_vm14, %v19020_v49  ;;  %v10017_v59 = vpop.f32.mrb[176].mxu0 }
 0x699   : > { %v10018_v3 = vadd.f32 %v10017_v59, %v18063_v31  ;;  %v10019_v45 = vpop.f32.mrb[177].mxu0 }
 0x69a   : > { %v10020_v51 = vadd.f32 %v10019_v45, %v18063_v31  ;;  %v10021_v57 = vpop.f32.mrb[178].mxu0 }
 0x69b   : > { %10430 = vmatpush1.bf16.msra.mxu0 %v19022_v41  ;;  %v10022_v37 = vadd.f32 %v10021_v57, %v18067_v21  ;;  %v10023_v63 = vpop.f32.mrb[179].mxu0  ;;  %v10567_v39 = vmax.f32 %v10018_v3, 0.0 }
 0x69c   : > { %v10024_v14 = vadd.f32 %v10023_v63, %v18067_v21  ;;  %v10568_v19 = vmax.f32 %v10020_v51, 0.0  ;;  %v18090_v51 = vpop.permute.xlu0 %9932 }
 0x69d   : > { %v10583_v17 = vmax.f32 %v10022_v37, 0.0 }
 0x69e   : > { %12069 = vmatmul.mubr.msk.bf16.vlgmr.msra.gmra.mrb[224].mxu0 %vm9970_vm5, %v17841_v22  ;;  %v10584_v36 = vmax.f32 %v10024_v14, 0.0 }
 0x69f   : > { %10463 = vmatprep.mubr.bf16.mxu0 %v18893_v4  ;;  %v10696_v38 = vpack.c.bf16 %v10583_v17, %v10567_v39 }
 0x6a0   : > { %v10697_v33 = vpack.c.bf16 %v10584_v36, %v10568_v19  ;;  %v10027_v62 = vpop.f32.mrb[180].mxu0  ;;  %v18093_v19 = vpop.permute.xlu1 %9937 }
 0x6a1   : > { %v10028_v35 = vadd.f32 %v10027_v62, %v18075_v43  ;;  %v10029_v48 = vpop.f32.mrb[181].mxu0 }
 0x6a2   : > { %v10030_v56 = vadd.f32 %v10029_v48, %v18075_v43  ;;  %v10031_v42 = vpop.f32.mrb[182].mxu0  ;;  %10769 = vmatprep.subr.bf16.mxu0 %v10697_v33 }
 0x6a3   : > { %v10032_v44 = vadd.f32 %v10031_v42, %v18078_v7  ;;  %v10033_v26 = vpop.f32.mrb[183].mxu0  ;;  %10770 = vmatpush1.bf16.msra.mxu0 %v10696_v38  ;;  %v10599_v47 = vmax.f32 %v10028_v35, 0.0 }
 0x6a4   : > { %v10034_v27 = vadd.f32 %v10033_v26, %v18078_v7  ;;  %v10600_v49 = vmax.f32 %v10030_v56, 0.0 }
 0x6a5   : > { %v10615_v5 = vmax.f32 %v10032_v44, 0.0 }
 0x6a6   : > { %v9835_v12 = vpop.f32.mrb[164].mxu1  ;;  %12070 = vmatmul.mubr.msk.bf16.gmra.mrb[228].mxu0 %vm9970_vm5, %v17858_v46  ;;  %v10616_v59 = vmax.f32 %v10034_v27, 0.0 }
 0x6a7   : > { %v9837_v40 = vpop.f32.mrb[165].mxu1  ;;  %10473 = vmatprep.mubr.bf16.mxu0 %v18893_v4  ;;  %v9836_v50 = vadd.f32 %v9835_v12, %v17791_v54  ;;  %v10712_v45 = vpack.c.bf16 %v10615_v5, %v10599_v47 }
 0x6a8   : > { %v9839_v28 = vpop.f32.mrb[166].mxu1  ;;  %v9838_v41 = vadd.f32 %v9837_v40, %v17791_v54  ;;  %v10713_v37 = vpack.c.bf16 %v10616_v59, %v10600_v49 }
 0x6a9   : > { %v9840_v13 = vadd.f32 %v9839_v28, %v17793_v29  ;;  %v9841_v16 = vpop.f32.mrb[167].mxu1  ;;  %v10037_v63 = vpop.f32.mrb[184].mxu0 }
 0x6aa   : > { %v9842_v3 = vadd.f32 %v9841_v16, %v17793_v29  ;;  %v10038_v39 = vadd.f32 %v10037_v63, %v18090_v51  ;;  %v10039_v17 = vpop.f32.mrb[185].mxu0  ;;  %10771 = vmatprep.subr.bf16.mxu0 %v10713_v37 }
 0x6ab   : > { %v9876_v57 = vpack.c.bf16 %v9840_v13, %v9836_v50  ;;  %v10040_v36 = vadd.f32 %v10039_v17, %v18090_v51  ;;  %v10041_v38 = vpop.f32.mrb[186].mxu0  ;;  %10772 = vmatpush1.bf16.msra.mxu0 %v10712_v45  ;;  %v18105_v50 = vpop.permute.xlu0 %9942  ;;  %v19023_v17 = vld [vmem:[#allocation41_spill] sm:$0xff] }
 0x6ac   : > { %v9877_v14 = vpack.c.bf16 %v9842_v3, %v9838_v41  ;;  %v10042_v54 = vadd.f32 %v10041_v38, %v18093_v19  ;;  %v10043_v29 = vpop.f32.mrb[187].mxu0  ;;  %v10631_v56 = vmax.f32 %v10038_v39, 0.0  ;;  %v18108_v45 = vpop.permute.xlu1 %9947 }
 0x6ad   : > { %v10044_v35 = vadd.f32 %v10043_v29, %v18093_v19  ;;  %v10632_v40 = vmax.f32 %v10040_v36, 0.0 }
 0x6ae   : > { %v9845_v33 = vpop.f32.mrb[168].mxu1  ;;  %10494 = vmatprep.subr.bf16.mxu1 %v9877_v14  ;;  %12071 = vmatmul.mubr.msk.bf16.gmra.mrb[232].mxu0 %vm9970_vm5, %v17879_v20  ;;  %v10647_v42 = vmax.f32 %v10042_v54, 0.0 }
 0x6af   : > { %v9847_v62 = vpop.f32.mrb[169].mxu1  ;;  %10495 = vmatpush1.bf16.msra.mxu1 %v9876_v57  ;;  %10483 = vmatprep.mubr.bf16.mxu0 %v18893_v4  ;;  %v9846_v12 = vadd.f32 %v9845_v33, %v17802_v23  ;;  %v10648_v27 = vmax.f32 %v10044_v35, 0.0 }
 0x6b0   : > { %v9849_v48 = vpop.f32.mrb[170].mxu1  ;;  %v9848_v28 = vadd.f32 %v9847_v62, %v17802_v23  ;;  %v10728_v5 = vpack.c.bf16 %v10647_v42, %v10631_v56 }
 0x6b1   : > { %v9850_v44 = vadd.f32 %v9849_v48, %v17807_v1  ;;  %v9851_v26 = vpop.f32.mrb[171].mxu1  ;;  %v10729_v16 = vpack.c.bf16 %v10648_v27, %v10632_v40  ;;  %v10047_v49 = vpop.f32.mrb[188].mxu0 }
 0x6b2   : > { %v9852_v47 = vadd.f32 %v9851_v26, %v17807_v1  ;;  %v10048_v41 = vadd.f32 %v10047_v49, %v18105_v50  ;;  %v10049_v3 = vpop.f32.mrb[189].mxu0 }
 0x6b3   : > { %v9892_v13 = vpack.c.bf16 %v9850_v44, %v9846_v12  ;;  %v10050_v57 = vadd.f32 %v10049_v3, %v18105_v50  ;;  %v10051_v37 = vpop.f32.mrb[190].mxu0  ;;  %10773 = vmatprep.subr.bf16.mxu0 %v10729_v16 }
 0x6b4   : > { %v9893_v59 = vpack.c.bf16 %v9852_v47, %v9848_v28  ;;  %v10052_v23 = vadd.f32 %v10051_v37, %v18108_v45  ;;  %v10053_v1 = vpop.f32.mrb[191].mxu0  ;;  %10774 = vmatpush1.bf16.msra.mxu0 %v10728_v5  ;;  %v10663_v38 = vmax.f32 %v10048_v41, 0.0  ;;  %v18129_v28 = vld [vmem:[%s18448_s11] sm:$0xf] }
 0x6b5   : > { %v10054_v39 = vadd.f32 %v10053_v1, %v18108_v45  ;;  %v10664_v29 = vmax.f32 %v10050_v57, 0.0 }
 0x6b6   : > { %v18111_v63 = vpop.f32.mrb[172].mxu1  ;;  %10496 = vmatprep.subr.bf16.mxu1 %v9893_v59  ;;  %12072 = vmatmul.mubr.msk.bf16.gmra.mrb[236].mxu0 %vm9970_vm5, %v17901_v61  ;;  %v10679_v33 = vmax.f32 %v10052_v23, 0.0 }
 0x6b7   : > { %v18114_v14 = vpop.f32.mrb[173].mxu1  ;;  %10497 = vmatpush1.bf16.msra.mxu1 %v9892_v13  ;;  %10801 = vmatprep.mubr.bf16.mxu0 %v18893_v4  ;;  %v10680_v62 = vmax.f32 %v10054_v39, 0.0 }
 0x6b8   : > { %10498 = vmatprep.subr.bf16.mxu1 %v19023_v17  ;;  %v9859_v36 = vpop.f32.mrb[174].mxu1  ;;  %v10744_v35 = vpack.c.bf16 %v10679_v33, %v10663_v38 }
 0x6b9   : > { %v9860_v54 = vpop.f32.mrb[175].mxu1  ;;  %v10745_v48 = vpack.c.bf16 %v10680_v62, %v10664_v29 }
 0x6ba   : > { %v10163_v56 = vpop.f32.mrb[192].mxu0 }
 0x6bb   : > { %10499 = vmatpush1.bf16.msra.mxu1 %v17236_v11  ;;  %v10164_v42 = vadd.f32 %v10163_v56, %v18063_v31  ;;  %v10165_v12 = vpop.f32.mrb[193].mxu0  ;;  %10775 = vmatprep.subr.bf16.mxu0 %v10745_v48 }
 0x6bc   : > { %10500 = vmatprep.subr.bf16.mxu1 %v16986_v32  ;;  %v10166_v44 = vadd.f32 %v10165_v12, %v18063_v31  ;;  %v10167_v26 = vpop.f32.mrb[194].mxu0  ;;  %10776 = vmatpush1.bf16.msra.mxu0 %v10744_v35 }
 0x6bd   : > { %v10168_v40 = vadd.f32 %v10167_v26, %v18067_v21  ;;  %v10169_v27 = vpop.f32.mrb[195].mxu0  ;;  %v10571_v47 = vmax.f32 %v10164_v42, 0.0 }
 0x6be   : > { %v10170_v32 = vadd.f32 %v10169_v27, %v18067_v21  ;;  %v10572_v49 = vmax.f32 %v10166_v44, 0.0 }
 0x6bf   : > { %10501 = vmatpush1.bf16.msra.mxu1 %v17240_v60  ;;  %v10587_v5 = vmax.f32 %v10168_v40, 0.0  ;;  %12078 = vmatmul.mubr.msk.bf16.vlgmr.msra.gmra.mrb[240].mxu0 %vm8528_vm3, %v18129_v28 }
 0x6c0   : > { %12073 = vmatprep.subr.msk.bf16.mxu1 %vm19024_vm13, %v17027_v25  ;;  %v10090_v11 = vpop.f32.mrb[176].mxu1  ;;  %v10588_v59 = vmax.f32 %v10170_v32, 0.0  ;;  %10883 = vmatprep.mubr.bf16.mxu0 %v18893_v4 }
 0x6c1   : > { %v10091_v13 = vadd.f32 %v10090_v11, %v18063_v31  ;;  %v10092_v16 = vpop.f32.mrb[177].mxu1  ;;  %v10700_v60 = vpack.c.bf16 %v10587_v5, %v10571_v47 }
 0x6c2   : > { %v10093_v41 = vadd.f32 %v10092_v16, %v18063_v31  ;;  %v10094_v3 = vpop.f32.mrb[178].mxu1  ;;  %v10701_v37 = vpack.c.bf16 %v10588_v59, %v10572_v49  ;;  %v10173_v23 = vpop.f32.mrb[196].mxu0 }
 0x6c3   : > { %10503 = vmatpush1.bf16.msra.mxu1 %v17290_v18  ;;  %v10095_v25 = vadd.f32 %v10094_v3, %v18067_v21  ;;  %v10096_v57 = vpop.f32.mrb[179].mxu1  ;;  %v10174_v39 = vadd.f32 %v10173_v23, %v18075_v43  ;;  %v10175_v17 = vpop.f32.mrb[197].mxu0  ;;  %v10569_v36 = vmax.f32 %v10091_v13, 0.0 }
 0x6c4   : > { %v10097_v1 = vadd.f32 %v10096_v57, %v18067_v21  ;;  %v10176_v33 = vadd.f32 %v10175_v17, %v18075_v43  ;;  %v10177_v54 = vpop.f32.mrb[198].mxu0  ;;  %10851 = vmatprep.subr.bf16.mxu0 %v10701_v37  ;;  %v10570_v18 = vmax.f32 %v10093_v41, 0.0 }
 0x6c5   : > { %v10585_v38 = vmax.f32 %v10095_v25, 0.0  ;;  %v10178_v62 = vadd.f32 %v10177_v54, %v18078_v7  ;;  %v10179_v35 = vpop.f32.mrb[199].mxu0  ;;  %10852 = vmatpush1.bf16.msra.mxu0 %v10700_v60  ;;  %v10603_v44 = vmax.f32 %v10174_v39, 0.0 }
 0x6c6   : > { %12074 = vmatmul.mubr.msk.bf16.vlgmr.msra.gmra.mrb[224].mxu1 %vm9970_vm5, %v17841_v22  ;;  %v10586_v29 = vmax.f32 %v10097_v1, 0.0  ;;  %v10180_v56 = vadd.f32 %v10179_v35, %v18078_v7  ;;  %v10604_v32 = vmax.f32 %v10176_v33, 0.0 }
 0x6c7   : > { %10536 = vmatprep.mubr.bf16.mxu1 %v18893_v4  ;;  %v10698_v48 = vpack.c.bf16 %v10585_v38, %v10569_v36  ;;  %v10619_v26 = vmax.f32 %v10178_v62, 0.0 }
 0x6c8   : > { %v10699_v42 = vpack.c.bf16 %v10586_v29, %v10570_v18  ;;  %v10100_v12 = vpop.f32.mrb[180].mxu1  ;;  %v10620_v22 = vmax.f32 %v10180_v56, 0.0 }
 0x6c9   : > { %v10101_v40 = vadd.f32 %v10100_v12, %v18075_v43  ;;  %v10102_v27 = vpop.f32.mrb[181].mxu1  ;;  %v10716_v5 = vpack.c.bf16 %v10619_v26, %v10603_v44 }
 0x6ca   : > { %v10103_v11 = vadd.f32 %v10102_v27, %v18075_v43  ;;  %v10104_v47 = vpop.f32.mrb[182].mxu1  ;;  %10810 = vmatprep.subr.bf16.mxu1 %v10699_v42  ;;  %v10717_v49 = vpack.c.bf16 %v10620_v22, %v10604_v32  ;;  %v10183_v59 = vpop.f32.mrb[200].mxu0 }
 0x6cb   : > { %v10105_v13 = vadd.f32 %v10104_v47, %v18078_v7  ;;  %v10106_v16 = vpop.f32.mrb[183].mxu1  ;;  %10811 = vmatpush1.bf16.msra.mxu1 %v10698_v48  ;;  %v10184_v3 = vadd.f32 %v10183_v59, %v18090_v51  ;;  %v10185_v60 = vpop.f32.mrb[201].mxu0  ;;  %v10601_v25 = vmax.f32 %v10101_v40, 0.0 }
 0x6cc   : > { %v10107_v41 = vadd.f32 %v10106_v16, %v18078_v7  ;;  %v10186_v37 = vadd.f32 %v10185_v60, %v18090_v51  ;;  %v10187_v23 = vpop.f32.mrb[202].mxu0  ;;  %10853 = vmatprep.subr.bf16.mxu0 %v10717_v49  ;;  %v10602_v1 = vmax.f32 %v10103_v11, 0.0 }
 0x6cd   : > { %v10617_v57 = vmax.f32 %v10105_v13, 0.0  ;;  %v10188_v17 = vadd.f32 %v10187_v23, %v18093_v19  ;;  %v10189_v36 = vpop.f32.mrb[203].mxu0  ;;  %10854 = vmatpush1.bf16.msra.mxu0 %v10716_v5  ;;  %v10635_v29 = vmax.f32 %v10184_v3, 0.0 }
 0x6ce   : > { %12075 = vmatmul.mubr.msk.bf16.gmra.mrb[228].mxu1 %vm9970_vm5, %v17858_v46  ;;  %v10618_v39 = vmax.f32 %v10107_v41, 0.0  ;;  %v10190_v33 = vadd.f32 %v10189_v36, %v18093_v19  ;;  %v10636_v56 = vmax.f32 %v10186_v37, 0.0 }
 0x6cf   : > { %10546 = vmatprep.mubr.bf16.mxu1 %v18893_v4  ;;  %v10714_v38 = vpack.c.bf16 %v10617_v57, %v10601_v25  ;;  %v10651_v62 = vmax.f32 %v10188_v17, 0.0 }
 0x6d0   : > { %v10715_v54 = vpack.c.bf16 %v10618_v39, %v10602_v1  ;;  %v10110_v18 = vpop.f32.mrb[184].mxu1  ;;  %v10652_v46 = vmax.f32 %v10190_v33, 0.0 }
 0x6d1   : > { %v10111_v35 = vadd.f32 %v10110_v18, %v18090_v51  ;;  %v10112_v48 = vpop.f32.mrb[185].mxu1  ;;  %v10732_v44 = vpack.c.bf16 %v10651_v62, %v10635_v29 }
 0x6d2   : > { %v10113_v42 = vadd.f32 %v10112_v48, %v18090_v51  ;;  %v10114_v12 = vpop.f32.mrb[186].mxu1  ;;  %10812 = vmatprep.subr.bf16.mxu1 %v10715_v54  ;;  %v10733_v27 = vpack.c.bf16 %v10652_v46, %v10636_v56  ;;  %v10193_v32 = vpop.f32.mrb[204].mxu0 }
 0x6d3   : > { %v10115_v26 = vadd.f32 %v10114_v12, %v18093_v19  ;;  %v10116_v40 = vpop.f32.mrb[187].mxu1  ;;  %10813 = vmatpush1.bf16.msra.mxu1 %v10714_v38  ;;  %v10194_v11 = vadd.f32 %v10193_v32, %v18105_v50  ;;  %v10195_v47 = vpop.f32.mrb[205].mxu0  ;;  %v10633_v5 = vmax.f32 %v10111_v35, 0.0 }
 0x6d4   : > { %v10117_v22 = vadd.f32 %v10116_v40, %v18093_v19  ;;  %v10196_v16 = vadd.f32 %v10195_v47, %v18105_v50  ;;  %v10197_v49 = vpop.f32.mrb[206].mxu0  ;;  %10855 = vmatprep.subr.bf16.mxu0 %v10733_v27  ;;  %v10634_v59 = vmax.f32 %v10113_v42, 0.0 }
 0x6d5   : > { %v10649_v13 = vmax.f32 %v10115_v26, 0.0  ;;  %v10198_v3 = vadd.f32 %v10197_v49, %v18108_v45  ;;  %v10199_v60 = vpop.f32.mrb[207].mxu0  ;;  %10856 = vmatpush1.bf16.msra.mxu0 %v10732_v44  ;;  %v10667_v1 = vmax.f32 %v10194_v11, 0.0 }
 0x6d6   : > { %12076 = vmatmul.mubr.msk.bf16.gmra.mrb[232].mxu1 %vm9970_vm5, %v17879_v20  ;;  %v10650_v41 = vmax.f32 %v10117_v22, 0.0  ;;  %v10200_v57 = vadd.f32 %v10199_v60, %v18108_v45  ;;  %v10668_v38 = vmax.f32 %v10196_v16, 0.0 }
 0x6d7   : > { %10556 = vmatprep.mubr.bf16.mxu1 %v18893_v4  ;;  %v10730_v25 = vpack.c.bf16 %v10649_v13, %v10633_v5  ;;  %v10683_v39 = vmax.f32 %v10198_v3, 0.0 }
 0x6d8   : > { %v10731_v37 = vpack.c.bf16 %v10650_v41, %v10634_v59  ;;  %v10120_v23 = vpop.f32.mrb[188].mxu1  ;;  %v10684_v20 = vmax.f32 %v10200_v57, 0.0 }
 0x6d9   : > { %v10121_v17 = vadd.f32 %v10120_v23, %v18105_v50  ;;  %v10122_v36 = vpop.f32.mrb[189].mxu1  ;;  %v10748_v18 = vpack.c.bf16 %v10683_v39, %v10667_v1 }
 0x6da   : > { %v10123_v33 = vadd.f32 %v10122_v36, %v18105_v50  ;;  %v10124_v54 = vpop.f32.mrb[190].mxu1  ;;  %10814 = vmatprep.subr.bf16.mxu1 %v10731_v37  ;;  %v10749_v35 = vpack.c.bf16 %v10684_v20, %v10668_v38 }
 0x6db   : > { %v10125_v29 = vadd.f32 %v10124_v54, %v18108_v45  ;;  %v10126_v62 = vpop.f32.mrb[191].mxu1  ;;  %10815 = vmatpush1.bf16.msra.mxu1 %v10730_v25  ;;  %v10665_v56 = vmax.f32 %v10121_v17, 0.0  ;;  %v10309_v42 = vpop.f32.mrb[208].mxu0 }
 0x6dc   : > { %v10127_v48 = vadd.f32 %v10126_v62, %v18108_v45  ;;  %10857 = vmatprep.subr.bf16.mxu0 %v10749_v35  ;;  %v10666_v12 = vmax.f32 %v10123_v33, 0.0  ;;  %v10310_v26 = vadd.f32 %v10309_v42, %v18063_v31  ;;  %v10311_v40 = vpop.f32.mrb[209].mxu0 }
 0x6dd   : > { %v10681_v46 = vmax.f32 %v10125_v29, 0.0  ;;  %10858 = vmatpush1.bf16.msra.mxu0 %v10748_v18  ;;  %v10312_v32 = vadd.f32 %v10311_v40, %v18063_v31  ;;  %v10313_v22 = vpop.f32.mrb[210].mxu0 }
 0x6de   : > { %12077 = vmatmul.mubr.msk.bf16.gmra.mrb[236].mxu1 %vm9970_vm5, %v17901_v61  ;;  %v10682_v44 = vmax.f32 %v10127_v48, 0.0  ;;  %v10314_v5 = vadd.f32 %v10313_v22, %v18067_v21  ;;  %v10315_v13 = vpop.f32.mrb[211].mxu0  ;;  %v10575_v3 = vmax.f32 %v10310_v26, 0.0 }
 0x6df   : > { %v10746_v27 = vpack.c.bf16 %v10681_v46, %v10665_v56  ;;  %10842 = vmatprep.mubr.bf16.mxu1 %v18893_v4  ;;  %v10316_v49 = vadd.f32 %v10315_v13, %v18067_v21  ;;  %v10576_v37 = vmax.f32 %v10312_v32, 0.0 }
 0x6e0   : > { %v10747_v11 = vpack.c.bf16 %v10682_v44, %v10666_v12  ;;  %v10236_v47 = vpop.f32.mrb[192].mxu1  ;;  %12080 = vmatmul.mubr.msk.bf16.vlgmr.msra.gmra.mrb[244].mxu0 %vm8528_vm3, %v18129_v28  ;;  %v10591_v60 = vmax.f32 %v10314_v5, 0.0 }
 0x6e1   : > { %v10237_v16 = vadd.f32 %v10236_v47, %v18063_v31  ;;  %v10238_v61 = vpop.f32.mrb[193].mxu1  ;;  %10965 = vmatprep.mubr.bf16.mxu0 %v18893_v4  ;;  %v10592_v23 = vmax.f32 %v10316_v49, 0.0 }
 0x6e2   : > { %v10239_v59 = vadd.f32 %v10238_v61, %v18063_v31  ;;  %v10240_v41 = vpop.f32.mrb[194].mxu1  ;;  %10816 = vmatprep.subr.bf16.mxu1 %v10747_v11  ;;  %v10704_v39 = vpack.c.bf16 %v10591_v60, %v10575_v3 }
 0x6e3   : > { %v10241_v25 = vadd.f32 %v10240_v41, %v18067_v21  ;;  %v10242_v57 = vpop.f32.mrb[195].mxu1  ;;  %10817 = vmatpush1.bf16.msra.mxu1 %v10746_v27  ;;  %v10573_v17 = vmax.f32 %v10237_v16, 0.0  ;;  %v10705_v38 = vpack.c.bf16 %v10592_v23, %v10576_v37  ;;  %v10319_v20 = vpop.f32.mrb[212].mxu0 }
 0x6e4   : > { %v10243_v1 = vadd.f32 %v10242_v57, %v18067_v21  ;;  %v10574_v33 = vmax.f32 %v10239_v59, 0.0  ;;  %v10320_v18 = vadd.f32 %v10319_v20, %v18075_v43  ;;  %v10321_v29 = vpop.f32.mrb[213].mxu0 }
 0x6e5   : > { %v10589_v36 = vmax.f32 %v10241_v25, 0.0  ;;  %v10322_v35 = vadd.f32 %v10321_v29, %v18075_v43  ;;  %v10323_v48 = vpop.f32.mrb[214].mxu0  ;;  %10933 = vmatprep.subr.bf16.mxu0 %v10705_v38 }
 0x6e6   : > { %v10590_v54 = vmax.f32 %v10243_v1, 0.0  ;;  %12079 = vmatmul.mubr.msk.bf16.vlgmr.msra.gmra.mrb[240].mxu1 %vm8528_vm3, %v18129_v28  ;;  %v10324_v42 = vadd.f32 %v10323_v48, %v18078_v7  ;;  %v10325_v12 = vpop.f32.mrb[215].mxu0  ;;  %10934 = vmatpush1.bf16.msra.mxu0 %v10704_v39  ;;  %v10607_v22 = vmax.f32 %v10320_v18, 0.0 }
 0x6e7   : > { %v10702_v62 = vpack.c.bf16 %v10589_v36, %v10573_v17  ;;  %10924 = vmatprep.mubr.bf16.mxu1 %v18893_v4  ;;  %v10326_v40 = vadd.f32 %v10325_v12, %v18078_v7  ;;  %v10608_v13 = vmax.f32 %v10322_v35, 0.0 }
 0x6e8   : > { %v10703_v56 = vpack.c.bf16 %v10590_v54, %v10574_v33  ;;  %v10246_v46 = vpop.f32.mrb[196].mxu1  ;;  %v10623_v11 = vmax.f32 %v10324_v42, 0.0 }
 0x6e9   : > { %v10247_v44 = vadd.f32 %v10246_v46, %v18075_v43  ;;  %v10248_v26 = vpop.f32.mrb[197].mxu1  ;;  %v10624_v16 = vmax.f32 %v10326_v40, 0.0 }
 0x6ea   : > { %v10249_v27 = vadd.f32 %v10248_v26, %v18075_v43  ;;  %v10250_v32 = vpop.f32.mrb[198].mxu1  ;;  %10892 = vmatprep.subr.bf16.mxu1 %v10703_v56  ;;  %v10720_v49 = vpack.c.bf16 %v10623_v11, %v10607_v22 }
 0x6eb   : > { %v10251_v47 = vadd.f32 %v10250_v32, %v18078_v7  ;;  %v10252_v5 = vpop.f32.mrb[199].mxu1  ;;  %10893 = vmatpush1.bf16.msra.mxu1 %v10702_v62  ;;  %v10605_v59 = vmax.f32 %v10247_v44, 0.0  ;;  %v10721_v3 = vpack.c.bf16 %v10624_v16, %v10608_v13  ;;  %v10329_v60 = vpop.f32.mrb[216].mxu0 }
 0x6ec   : > { %v10253_v61 = vadd.f32 %v10252_v5, %v18078_v7  ;;  %v10606_v25 = vmax.f32 %v10249_v27, 0.0  ;;  %v10330_v37 = vadd.f32 %v10329_v60, %v18090_v51  ;;  %v10331_v23 = vpop.f32.mrb[217].mxu0 }
 0x6ed   : > { %v10621_v41 = vmax.f32 %v10251_v47, 0.0  ;;  %v10332_v39 = vadd.f32 %v10331_v23, %v18090_v51  ;;  %v10333_v17 = vpop.f32.mrb[218].mxu0  ;;  %10935 = vmatprep.subr.bf16.mxu0 %v10721_v3 }
 0x6ee   : > { %v10622_v57 = vmax.f32 %v10253_v61, 0.0  ;;  %v10334_v20 = vadd.f32 %v10333_v17, %v18093_v19  ;;  %v10335_v33 = vpop.f32.mrb[219].mxu0  ;;  %10936 = vmatpush1.bf16.msra.mxu0 %v10720_v49  ;;  %v10639_v48 = vmax.f32 %v10330_v37, 0.0 }
 0x6ef   : > { %v10718_v1 = vpack.c.bf16 %v10621_v41, %v10605_v59  ;;  %v10336_v29 = vadd.f32 %v10335_v33, %v18093_v19  ;;  %v10640_v12 = vmax.f32 %v10332_v39, 0.0 }
 0x6f0   : > { %v10719_v36 = vpack.c.bf16 %v10622_v57, %v10606_v25  ;;  %v10256_v38 = vpop.f32.mrb[200].mxu1  ;;  %v10655_v56 = vmax.f32 %v10334_v20, 0.0 }
 0x6f1   : > { %v10257_v54 = vadd.f32 %v10256_v38, %v18090_v51  ;;  %v10258_v18 = vpop.f32.mrb[201].mxu1  ;;  %v10656_v44 = vmax.f32 %v10336_v29, 0.0 }
 0x6f2   : > { %v10259_v62 = vadd.f32 %v10258_v18, %v18090_v51  ;;  %v10260_v35 = vpop.f32.mrb[202].mxu1  ;;  %10894 = vmatprep.subr.bf16.mxu1 %v10719_v36  ;;  %v10736_v40 = vpack.c.bf16 %v10655_v56, %v10639_v48 }
 0x6f3   : > { %v10261_v46 = vadd.f32 %v10260_v35, %v18093_v19  ;;  %v10262_v42 = vpop.f32.mrb[203].mxu1  ;;  %10895 = vmatpush1.bf16.msra.mxu1 %v10718_v1  ;;  %v10637_v27 = vmax.f32 %v10257_v54, 0.0  ;;  %v10737_v22 = vpack.c.bf16 %v10656_v44, %v10640_v12  ;;  %v10339_v11 = vpop.f32.mrb[220].mxu0 }
 0x6f4   : > { %v10263_v26 = vadd.f32 %v10262_v42, %v18093_v19  ;;  %v10638_v47 = vmax.f32 %v10259_v62, 0.0  ;;  %v10340_v13 = vadd.f32 %v10339_v11, %v18105_v50  ;;  %v10341_v16 = vpop.f32.mrb[221].mxu0 }
 0x6f5   : > { %v10653_v32 = vmax.f32 %v10261_v46, 0.0  ;;  %v10342_v49 = vadd.f32 %v10341_v16, %v18105_v50  ;;  %v10343_v59 = vpop.f32.mrb[222].mxu0  ;;  %10937 = vmatprep.subr.bf16.mxu0 %v10737_v22 }
 0x6f6   : > { %v10654_v5 = vmax.f32 %v10263_v26, 0.0  ;;  %v10344_v60 = vadd.f32 %v10343_v59, %v18108_v45  ;;  %v10345_v25 = vpop.f32.mrb[223].mxu0  ;;  %10938 = vmatpush1.bf16.msra.mxu0 %v10736_v40  ;;  %v10671_v17 = vmax.f32 %v10340_v13, 0.0 }
 0x6f7   : > { %v10734_v61 = vpack.c.bf16 %v10653_v32, %v10637_v27  ;;  %v10346_v23 = vadd.f32 %v10345_v25, %v18108_v45  ;;  %v10672_v33 = vmax.f32 %v10342_v49, 0.0 }
 0x6f8   : > { %v10735_v41 = vpack.c.bf16 %v10654_v5, %v10638_v47  ;;  %v10266_v3 = vpop.f32.mrb[204].mxu1  ;;  %v10687_v36 = vmax.f32 %v10344_v60, 0.0 }
 0x6f9   : > { %v10267_v57 = vadd.f32 %v10266_v3, %v18105_v50  ;;  %v10268_v37 = vpop.f32.mrb[205].mxu1  ;;  %v10688_v54 = vmax.f32 %v10346_v23, 0.0 }
 0x6fa   : > { %v10269_v1 = vadd.f32 %v10268_v37, %v18105_v50  ;;  %v10270_v39 = vpop.f32.mrb[206].mxu1  ;;  %10896 = vmatprep.subr.bf16.mxu1 %v10735_v41  ;;  %v10752_v29 = vpack.c.bf16 %v10687_v36, %v10671_v17 }
 0x6fb   : > { %v10271_v38 = vadd.f32 %v10270_v39, %v18108_v45  ;;  %v10272_v20 = vpop.f32.mrb[207].mxu1  ;;  %10897 = vmatpush1.bf16.msra.mxu1 %v10734_v61  ;;  %v10669_v62 = vmax.f32 %v10267_v57, 0.0  ;;  %v10753_v48 = vpack.c.bf16 %v10688_v54, %v10672_v33 }
 0x6fc   : > { %v10273_v18 = vadd.f32 %v10272_v20, %v18108_v45  ;;  %v10670_v56 = vmax.f32 %v10269_v1, 0.0 }
 0x6fd   : > { %v10685_v35 = vmax.f32 %v10271_v38, 0.0  ;;  %10939 = vmatprep.subr.bf16.mxu0 %v10753_v48 }
 0x6fe   : > { %v10686_v46 = vmax.f32 %v10273_v18, 0.0  ;;  %10940 = vmatpush1.bf16.msra.mxu0 %v10752_v29 }
 0x6ff   : > { %v10750_v42 = vpack.c.bf16 %v10685_v35, %v10669_v62 }
 0x700   : > { %v10751_v12 = vpack.c.bf16 %v10686_v46, %v10670_v56  ;;  %v10382_v44 = vpop.f32.mrb[208].mxu1 }
 0x701   : > { %v10383_v26 = vadd.f32 %v10382_v44, %v18063_v31  ;;  %v10384_v40 = vpop.f32.mrb[209].mxu1  ;;  %12082 = vmatmul.mubr.msk.bf16.vlgmr.msra.gmra.mrb[248].mxu0 %vm8528_vm3, %v18129_v28 }
 0x702   : > { %v10385_v27 = vadd.f32 %v10384_v40, %v18063_v31  ;;  %v10386_v32 = vpop.f32.mrb[210].mxu1  ;;  %10898 = vmatprep.subr.bf16.mxu1 %v10751_v12  ;;  %11047 = vmatprep.mubr.bf16.mxu0 %v18893_v4 }
 0x703   : > { %v10387_v22 = vadd.f32 %v10386_v32, %v18067_v21  ;;  %v10388_v11 = vpop.f32.mrb[211].mxu1  ;;  %10899 = vmatpush1.bf16.msra.mxu1 %v10750_v42  ;;  %v10577_v5 = vmax.f32 %v10383_v26, 0.0 }
 0x704   : > { %v10389_v47 = vadd.f32 %v10388_v11, %v18067_v21  ;;  %v10578_v16 = vmax.f32 %v10385_v27, 0.0 }
 0x705   : > { %v10593_v13 = vmax.f32 %v10387_v22, 0.0 }
 0x706   : > { %v10594_v61 = vmax.f32 %v10389_v47, 0.0  ;;  %12081 = vmatmul.mubr.msk.bf16.vlgmr.msra.gmra.mrb[244].mxu1 %vm8528_vm3, %v18129_v28 }
 0x707   : > { %v10706_v49 = vpack.c.bf16 %v10593_v13, %v10577_v5  ;;  %11006 = vmatprep.mubr.bf16.mxu1 %v18893_v4 }
 0x708   : > { %v10707_v59 = vpack.c.bf16 %v10594_v61, %v10578_v16  ;;  %v10392_v41 = vpop.f32.mrb[212].mxu1 }
 0x709   : > { %v10393_v3 = vadd.f32 %v10392_v41, %v18075_v43  ;;  %v10394_v60 = vpop.f32.mrb[213].mxu1 }
 0x70a   : > { %v10395_v25 = vadd.f32 %v10394_v60, %v18075_v43  ;;  %v10396_v57 = vpop.f32.mrb[214].mxu1  ;;  %10974 = vmatprep.subr.bf16.mxu1 %v10707_v59 }
 0x70b   : > { %v10397_v37 = vadd.f32 %v10396_v57, %v18078_v7  ;;  %v10398_v23 = vpop.f32.mrb[215].mxu1  ;;  %10975 = vmatpush1.bf16.msra.mxu1 %v10706_v49  ;;  %v10609_v39 = vmax.f32 %v10393_v3, 0.0 }
 0x70c   : > { %v10399_v1 = vadd.f32 %v10398_v23, %v18078_v7  ;;  %v10610_v36 = vmax.f32 %v10395_v25, 0.0 }
 0x70d   : > { %v10625_v17 = vmax.f32 %v10397_v37, 0.0 }
 0x70e   : > { %v10626_v38 = vmax.f32 %v10399_v1, 0.0 }
 0x70f   : > { %v10722_v20 = vpack.c.bf16 %v10625_v17, %v10609_v39 }
 0x710   : > { %v10723_v33 = vpack.c.bf16 %v10626_v38, %v10610_v36  ;;  %v10402_v54 = vpop.f32.mrb[216].mxu1 }
 0x711   : > { %v10403_v18 = vadd.f32 %v10402_v54, %v18090_v51  ;;  %v10404_v29 = vpop.f32.mrb[217].mxu1 }
 0x712   : > { %v10405_v62 = vadd.f32 %v10404_v29, %v18090_v51  ;;  %v10406_v35 = vpop.f32.mrb[218].mxu1  ;;  %10976 = vmatprep.subr.bf16.mxu1 %v10723_v33 }
 0x713   : > { %v10407_v48 = vadd.f32 %v10406_v35, %v18093_v19  ;;  %v10408_v56 = vpop.f32.mrb[219].mxu1  ;;  %10977 = vmatpush1.bf16.msra.mxu1 %v10722_v20  ;;  %v10641_v42 = vmax.f32 %v10403_v18, 0.0 }
 0x714   : > { %v10409_v46 = vadd.f32 %v10408_v56, %v18093_v19  ;;  %v10642_v44 = vmax.f32 %v10405_v62, 0.0 }
 0x715   : > { %v10657_v12 = vmax.f32 %v10407_v48, 0.0 }
 0x716   : > { %v10658_v26 = vmax.f32 %v10409_v46, 0.0 }
 0x717   : > { %v10738_v40 = vpack.c.bf16 %v10657_v12, %v10641_v42 }
 0x718   : > { %v10739_v27 = vpack.c.bf16 %v10658_v26, %v10642_v44  ;;  %v10412_v32 = vpop.f32.mrb[220].mxu1 }
 0x719   : > { %v10413_v22 = vadd.f32 %v10412_v32, %v18105_v50  ;;  %v10414_v11 = vpop.f32.mrb[221].mxu1 }
 0x71a   : > { %v10415_v47 = vadd.f32 %v10414_v11, %v18105_v50  ;;  %v10416_v5 = vpop.f32.mrb[222].mxu1  ;;  %10978 = vmatprep.subr.bf16.mxu1 %v10739_v27 }
 0x71b   : > { %v10417_v13 = vadd.f32 %v10416_v5, %v18108_v45  ;;  %v10418_v16 = vpop.f32.mrb[223].mxu1  ;;  %10979 = vmatpush1.bf16.msra.mxu1 %v10738_v40  ;;  %v10673_v49 = vmax.f32 %v10413_v22, 0.0 }
 0x71c   : > { %v10419_v61 = vadd.f32 %v10418_v16, %v18108_v45  ;;  %v10674_v41 = vmax.f32 %v10415_v47, 0.0  ;;  %v18251_v16 = vpop.permute.xlu1 %9349 }
 0x71d   : > { %v10689_v59 = vmax.f32 %v10417_v13, 0.0 }
 0x71e   : > { %v10690_v3 = vmax.f32 %v10419_v61, 0.0 }
 0x71f   : > { %v10754_v60 = vpack.c.bf16 %v10689_v59, %v10673_v49  ;;  %v9429_v59 = vadd.f32 %v17819_v15, %v18251_v16 }
 0x720   : > { %v10755_v25 = vpack.c.bf16 %v10690_v3, %v10674_v41 }
 0x722   : > { %10980 = vmatprep.subr.bf16.mxu1 %v10755_v25 }
 0x723   : > { %10981 = vmatpush1.bf16.msra.mxu1 %v10754_v60  ;;  %v9431_v60 = vadd.f32 %v17822_v24, %v18251_v16 }
 0x726   : > { %12083 = vmatmul.mubr.msk.bf16.vlgmr.msra.gmra.mrb[248].mxu1 %vm8528_vm3, %v18129_v28 }
 0x727   : > { %11088 = vmatprep.mubr.bf16.mxu1 %v18893_v4 }
 0x771   : > { %v10455_v57 = vpop.f32.mrb[224].mxu0 }
 0x772   : > { %v10456_v37 = vadd.f32 %v10455_v57, %v18063_v31  ;;  %v10457_v23 = vpop.f32.mrb[225].mxu0 }
 0x773   : > { %v10458_v1 = vadd.f32 %v10457_v23, %v18063_v31  ;;  %v10459_v39 = vpop.f32.mrb[226].mxu0 }
 0x774   : > { %v10460_v17 = vadd.f32 %v10459_v39, %v18067_v21  ;;  %v10461_v36 = vpop.f32.mrb[227].mxu0  ;;  %v10579_v20 = vmax.f32 %v10456_v37, 0.0  ;;  %v12102_v39 = vmul.f32 -1.442695, %v9429_v59 }
 0x775   : > { %v10462_v38 = vadd.f32 %v10461_v36, %v18067_v21  ;;  %v10580_v54 = vmax.f32 %v10458_v1, 0.0  ;;  %v12103_v36 = vmul.f32 -1.442695, %v9431_v60 }
 0x776   : > { %v10595_v33 = vmax.f32 %v10460_v17, 0.0  ;;  %12425 = vpow2.f32 %v12102_v39 }
 0x777   : > { %v10596_v18 = vmax.f32 %v10462_v38, 0.0  ;;  %12427 = vpow2.f32 %v12103_v36 }
 0x778   : > { %v10708_v29 = vpack.c.bf16 %v10595_v33, %v10579_v20 }
 0x779   : > { %v10709_v62 = vpack.c.bf16 %v10596_v18, %v10580_v54  ;;  %v10465_v35 = vpop.f32.mrb[228].mxu0 }
 0x77a   : > { %v10466_v4 = vadd.f32 %v10465_v35, %v18075_v43  ;;  %v10467_v48 = vpop.f32.mrb[229].mxu0 }
 0x77b   : > { %v10468_v56 = vadd.f32 %v10467_v48, %v18075_v43  ;;  %v10469_v46 = vpop.f32.mrb[230].mxu0  ;;  %11015 = vmatprep.subr.bf16.mxu0 %v10709_v62 }
 0x77c   : > { %v10470_v42 = vadd.f32 %v10469_v46, %v18078_v7  ;;  %v10471_v12 = vpop.f32.mrb[231].mxu0  ;;  %11016 = vmatpush1.bf16.msra.mxu0 %v10708_v29  ;;  %v10611_v26 = vmax.f32 %v10466_v4, 0.0 }
 0x77d   : > { %v10472_v44 = vadd.f32 %v10471_v12, %v18078_v7  ;;  %v10612_v27 = vmax.f32 %v10468_v56, 0.0  ;;  %v18264_v12 = vpop.permute.xlu0 %10763 }
 0x77e   : > { %v10627_v40 = vmax.f32 %v10470_v42, 0.0 }
 0x77f   : > { %v10628_v32 = vmax.f32 %v10472_v44, 0.0 }
 0x780   : > { %v10724_v22 = vpack.c.bf16 %v10627_v40, %v10611_v26 }
 0x781   : > { %v10725_v11 = vpack.c.bf16 %v10628_v32, %v10612_v27  ;;  %v10475_v47 = vpop.f32.mrb[232].mxu0 }
 0x782   : > { %v10476_v5 = vadd.f32 %v10475_v47, %v18090_v51  ;;  %v10477_v13 = vpop.f32.mrb[233].mxu0 }
 0x783   : > { %v10478_v61 = vadd.f32 %v10477_v13, %v18090_v51  ;;  %v10479_v49 = vpop.f32.mrb[234].mxu0  ;;  %11017 = vmatprep.subr.bf16.mxu0 %v10725_v11 }
 0x784   : > { %v10480_v41 = vadd.f32 %v10479_v49, %v18093_v19  ;;  %v10481_v3 = vpop.f32.mrb[235].mxu0  ;;  %11018 = vmatpush1.bf16.msra.mxu0 %v10724_v22  ;;  %v10643_v57 = vmax.f32 %v10476_v5, 0.0  ;;  %v12426_v22 = vpop.eup %12425 }
 0x785   : > { %v10482_v25 = vadd.f32 %v10481_v3, %v18093_v19  ;;  %v10644_v23 = vmax.f32 %v10478_v61, 0.0  ;;  %v12428_v5 = vpop.eup %12427  ;;  %v11241_v49 = vadd.f32 1.0, %v12426_v22 }
 0x786   : > { %v10659_v37 = vmax.f32 %v10480_v41, 0.0  ;;  %v11242_v3 = vadd.f32 1.0, %v12428_v5 }
 0x787   : > { %v10660_v1 = vmax.f32 %v10482_v25, 0.0 }
 0x788   : > { %v10740_v17 = vpack.c.bf16 %v10659_v37, %v10643_v57 }
 0x789   : > { %v10741_v38 = vpack.c.bf16 %v10660_v1, %v10644_v23  ;;  %v10485_v20 = vpop.f32.mrb[236].mxu0 }
 0x78a   : > { %v10486_v15 = vadd.f32 %v10485_v20, %v18105_v50  ;;  %v10487_v33 = vpop.f32.mrb[237].mxu0 }
 0x78b   : > { %v10488_v54 = vadd.f32 %v10487_v33, %v18105_v50  ;;  %v10489_v18 = vpop.f32.mrb[238].mxu0  ;;  %11019 = vmatprep.subr.bf16.mxu0 %v10741_v38 }
 0x78c   : > { %v10490_v24 = vadd.f32 %v10489_v18, %v18108_v45  ;;  %v10491_v29 = vpop.f32.mrb[239].mxu0  ;;  %11020 = vmatpush1.bf16.msra.mxu0 %v10740_v17  ;;  %v10675_v35 = vmax.f32 %v10486_v15, 0.0 }
 0x78d   : > { %v10492_v62 = vadd.f32 %v10491_v29, %v18108_v45  ;;  %v10676_v48 = vmax.f32 %v10488_v54, 0.0  ;;  %v9551_v54 = vadd.f32 %v17881_v0, %v18251_v16  ;;  %v9553_v29 = vadd.f32 %v17887_v2, %v18251_v16 }
 0x78e   : > { %v10691_v4 = vmax.f32 %v10490_v24, 0.0 }
 0x78f   : > { %v10692_v56 = vmax.f32 %v10492_v62, 0.0  ;;  %v12106_v0 = vmul.f32 -1.442695, %v9551_v54 }
 0x790   : > { %v10756_v46 = vpack.c.bf16 %v10691_v4, %v10675_v35 }
 0x791   : > { %v10757_v42 = vpack.c.bf16 %v10692_v56, %v10676_v48 }
 0x792   : > { %v10803_v44 = vpop.f32.mrb[240].mxu0 }
 0x793   : > { %11021 = vmatprep.subr.bf16.mxu0 %v10757_v42  ;;  %v10804_v26 = vadd.f32 %v10803_v44, %v18264_v12  ;;  %v10805_v40 = vpop.f32.mrb[241].mxu0 }
 0x794   : > { %11022 = vmatpush1.bf16.msra.mxu0 %v10756_v46  ;;  %v10806_v27 = vadd.f32 %v10805_v40, %v18264_v12  ;;  %v10807_v32 = vpop.f32.mrb[242].mxu0  ;;  %v12107_v40 = vmul.f32 -1.442695, %v9553_v29 }
 0x795   : > { %v12086_v11 = vmul.f32 -1.442695, %v10804_v26  ;;  %v10808_v47 = vpop.f32.mrb[243].mxu0 }
 0x796   : > { %v12087_v13 = vmul.f32 -1.442695, %v10806_v27 }
 0x797   : > { %12084 = vmatmul.mubr.msk.bf16.vlgmr.msra.gmra.mrb[252].mxu0 %vm8528_vm3, %v18129_v28  ;;  %12429 = vpow2.f32 %v12086_v11 }
 0x798   : > { %12431 = vpow2.f32 %v12087_v13  ;;  %v9492_v13 = vadd.f32 %v17906_v58, %v18251_v16 }
 0x799   : > { %v10528_v61 = vpop.f32.mrb[224].mxu1  ;;  %12433 = vrcp.f32 %v11241_v49 }
 0x79a   : > { %v10529_v59 = vadd.f32 %v10528_v61, %v18063_v31  ;;  %v10530_v41 = vpop.f32.mrb[225].mxu1  ;;  %12435 = vrcp.f32 %v11242_v3 }
 0x79b   : > { %v10531_v60 = vadd.f32 %v10530_v41, %v18063_v31  ;;  %v10532_v25 = vpop.f32.mrb[226].mxu1 }
 0x79c   : > { %v10533_v57 = vadd.f32 %v10532_v25, %v18067_v21  ;;  %v10534_v37 = vpop.f32.mrb[227].mxu1  ;;  %v10581_v1 = vmax.f32 %v10529_v59, 0.0  ;;  %v11305_v59 = vld [vmem:[%s18286_s15] sm:$0x77] }
 0x79d   : > { %v10535_v23 = vadd.f32 %v10534_v37, %v18067_v21  ;;  %v10582_v39 = vmax.f32 %v10531_v60, 0.0 }
 0x79e   : > { %v10597_v28 = vmax.f32 %v10533_v57, 0.0 }
 0x79f   : > { %v10598_v17 = vmax.f32 %v10535_v23, 0.0  ;;  %v11321_v23 = vcombine.high %v11305_v59, %v11305_v59 }
 0x7a0   : > { %v10710_v36 = vpack.c.bf16 %v10597_v28, %v10581_v1  ;;  %v12105_v1 = vmul.f32 -1.442695, %v9492_v13 }
 0x7a1   : > { %v10711_v38 = vpack.c.bf16 %v10598_v17, %v10582_v39  ;;  %v10538_v20 = vpop.f32.mrb[228].mxu1  ;;  %v12430_v31 = vpop.eup %12429 }
 0x7a2   : > { %v10539_v15 = vadd.f32 %v10538_v20, %v18075_v43  ;;  %v10540_v33 = vpop.f32.mrb[229].mxu1  ;;  %v12432_v24 = vpop.eup %12431  ;;  %v11145_v4 = vadd.f32 1.0, %v12430_v31 }
 0x7a3   : > { %v10541_v18 = vadd.f32 %v10540_v33, %v18075_v43  ;;  %v10542_v21 = vpop.f32.mrb[230].mxu1  ;;  %11056 = vmatprep.subr.bf16.mxu1 %v10711_v38  ;;  %v11146_v56 = vadd.f32 1.0, %v12432_v24  ;;  %v12434_v26 = vpop.eup %12433 }
 0x7a4   : > { %v10543_v62 = vadd.f32 %v10542_v21, %v18078_v7  ;;  %v10544_v35 = vpop.f32.mrb[231].mxu1  ;;  %11057 = vmatpush1.bf16.msra.mxu1 %v10710_v36  ;;  %v10613_v46 = vmax.f32 %v10539_v15, 0.0  ;;  %12437 = vrcp.f32 %v11145_v4  ;;  %v12436_v2 = vpop.eup %12435  ;;  %v11289_v5 = vmul.f32 1.5707964, %v12434_v26 }
 0x7a5   : > { %v10545_v48 = vadd.f32 %v10544_v35, %v18078_v7  ;;  %v10614_v43 = vmax.f32 %v10541_v18, 0.0  ;;  %12439 = vrcp.f32 %v11146_v56  ;;  %v9490_v7 = vadd.f32 %v17903_v10, %v18251_v16 }
 0x7a6   : > { %v10629_v42 = vmax.f32 %v10543_v62, 0.0  ;;  %12441 = vpow2.f32 %v12106_v0  ;;  %v11290_v41 = vmul.f32 1.5707964, %v12436_v2  ;;  %v11498_v58 = vrot.slane %v11289_v5, 5 }
 0x7a7   : > { %v10630_v44 = vmax.f32 %v10545_v48, 0.0  ;;  %12443 = vpow2.f32 %v12107_v40  ;;  %v12104_v60 = vmul.f32 -1.442695, %v9490_v7 }
 0x7a8   : > { %v10726_v27 = vpack.c.bf16 %v10629_v42, %v10613_v46  ;;  %v11499_v17 = vrot.slane %v11290_v41, 5 }
 0x7a9   : > { %v10727_v32 = vpack.c.bf16 %v10630_v44, %v10614_v43  ;;  %v10548_v22 = vpop.f32.mrb[232].mxu1  ;;  %12445 = vpow2.f32 %v12104_v60 }
 0x7aa   : > { %v10549_v11 = vadd.f32 %v10548_v22, %v18090_v51  ;;  %v10550_v47 = vpop.f32.mrb[233].mxu1  ;;  %12447 = vpow2.f32 %v12105_v1 }
 0x7ab   : > { %v10551_v61 = vadd.f32 %v10550_v47, %v18090_v51  ;;  %v10552_v49 = vpop.f32.mrb[234].mxu1  ;;  %11058 = vmatprep.subr.bf16.mxu1 %v10727_v32 }
 0x7ac   : > { %v10553_v3 = vadd.f32 %v10552_v49, %v18093_v19  ;;  %v10554_v10 = vpop.f32.mrb[235].mxu1  ;;  %11059 = vmatpush1.bf16.msra.mxu1 %v10726_v27  ;;  %v10645_v57 = vmax.f32 %v10549_v11, 0.0 }
 0x7ad   : > { %v10555_v25 = vadd.f32 %v10554_v10, %v18093_v19  ;;  %v10646_v28 = vmax.f32 %v10551_v61, 0.0 }
 0x7ae   : > { %v10661_v37 = vmax.f32 %v10553_v3, 0.0  ;;  %v12438_v39 = vpop.eup %12437 }
 0x7af   : > { %v10662_v51 = vmax.f32 %v10555_v25, 0.0  ;;  %v12440_v38 = vpop.eup %12439  ;;  %v11337_v33 = vsub.f32 %v12438_v39, %v11305_v59  ;;  %v18298_v31 = vsel %vm11369_vm12, %v12438_v39, %v11498_v58 }
 0x7b0   : > { %v10742_v36 = vpack.c.bf16 %v10661_v37, %v10645_v57  ;;  %v11338_v18 = vsub.f32 %v12440_v38, %v11321_v23  ;;  %v18302_v21 = vsel %vm11369_vm12, %v12440_v38, %v11499_v17  ;;  %v12442_v46 = vpop.eup %12441 }
 0x7b1   : > { %v10743_v20 = vpack.c.bf16 %v10662_v51, %v10646_v28  ;;  %v10558_v15 = vpop.f32.mrb[236].mxu1  ;;  %v11353_v62 = vmul.f32 %v11337_v33, %v11337_v33  ;;  %v12444_v40 = vpop.eup %12443  ;;  %v11245_v61 = vadd.f32 1.0, %v12442_v46 }
 0x7b2   : > { %v10559_v19 = vadd.f32 %v10558_v15, %v18105_v50  ;;  %v10560_v54 = vpop.f32.mrb[237].mxu1  ;;  %v11354_v48 = vmul.f32 %v11338_v18, %v11338_v18  ;;  %v11246_v41 = vadd.f32 1.0, %v12444_v40 }
 0x7b3   : > { %v10561_v24 = vadd.f32 %v10560_v54, %v18105_v50  ;;  %v10562_v29 = vpop.f32.mrb[238].mxu1  ;;  %11060 = vmatprep.subr.bf16.mxu1 %v10743_v20  ;;  %v10885_v56 = vpop.f32.mrb[244].mxu0  ;;  %v11370_v43 = vsel %vm11369_vm12, %v11353_v62, 0.0  ;;  %v9673_v62 = vadd.f32 %v17952_v34, %v18251_v16 }
 0x7b4   : > { %v10563_v35 = vadd.f32 %v10562_v29, %v18108_v45  ;;  %v10564_v4 = vpop.f32.mrb[239].mxu1  ;;  %11061 = vmatpush1.bf16.msra.mxu1 %v10742_v36  ;;  %v10677_v42 = vmax.f32 %v10559_v19, 0.0  ;;  %v10886_v44 = vadd.f32 %v10885_v56, %v18264_v12  ;;  %v10887_v26 = vpop.f32.mrb[245].mxu0  ;;  %v11371_v27 = vrot.slane %v11370_v43, 4  ;;  %v12568_v19 = vld [vmem:[%s18448_s11] sm:$0xf] }
 0x7b5   : > { %v10565_v0 = vadd.f32 %v10564_v4, %v18108_v45  ;;  %v11377_v2 = vsel %vm11369_vm12, %v11354_v48, 0.0  ;;  %v10888_v7 = vadd.f32 %v10887_v26, %v18264_v12  ;;  %v10889_v32 = vpop.f32.mrb[246].mxu0  ;;  %v10678_v22 = vmax.f32 %v10561_v24, 0.0  ;;  %v12446_v28 = vpop.eup %12445 }
 0x7b6   : > { %v10693_v50 = vmax.f32 %v10563_v35, 0.0  ;;  %v11378_v47 = vrot.slane %v11377_v2, 4  ;;  %v12090_v5 = vmul.f32 -1.442695, %v10886_v44  ;;  %v10890_v13 = vpop.f32.mrb[247].mxu0  ;;  %v11372_v49 = vadd.f32 %v11371_v27, %v11370_v43  ;;  %v12448_v36 = vpop.eup %12447 }
 0x7b7   : > { %v10694_v11 = vmax.f32 %v10565_v0, 0.0  ;;  %v12091_v59 = vmul.f32 -1.442695, %v10888_v7  ;;  %v11243_v33 = vadd.f32 1.0, %v12446_v28  ;;  %v11244_v18 = vadd.f32 1.0, %v12448_v36 }
 0x7b8   : > { %v10758_v45 = vpack.c.bf16 %v10693_v50, %v10677_v42  ;;  %v11379_v60 = vadd.f32 %v11378_v47, %v11377_v2  ;;  %12449 = vpow2.f32 %v12090_v5  ;;  %v11373_v25 = vrot.slane %v11372_v49, 2  ;;  %v11307_v7 = vld [vmem:[%s18286_s15 + $0x10] sm:$0x77] }
 0x7b9   : > { %v10759_v3 = vpack.c.bf16 %v10694_v11, %v10678_v22  ;;  %v10844_v10 = vpop.f32.mrb[240].mxu1  ;;  %12451 = vpow2.f32 %v12091_v59  ;;  %v12110_v43 = vmul.f32 -1.442695, %v9673_v62  ;;  %v9614_v2 = vadd.f32 %v17968_v55, %v18251_v16  ;;  %v11306_v59 = vld [vmem:[%s18286_s15 + $0x8] sm:$0x77] }
 0x7ba   : > { %v10845_v57 = vadd.f32 %v10844_v10, %v18264_v12  ;;  %v10846_v37 = vpop.f32.mrb[241].mxu1  ;;  %v11380_v23 = vrot.slane %v11379_v60, 2  ;;  %12453 = vrcp.f32 %v11245_v61  ;;  %v11374_v51 = vadd.f32 %v11373_v25, %v11372_v49 }
 0x7bb   : > { %11062 = vmatprep.subr.bf16.mxu1 %v10759_v3  ;;  %v10847_v58 = vadd.f32 %v10846_v37, %v18264_v12  ;;  %v10848_v1 = vpop.f32.mrb[242].mxu1  ;;  %12455 = vrcp.f32 %v11246_v41  ;;  %v12109_v61 = vmul.f32 -1.442695, %v9614_v2 }
 0x7bc   : > { %11063 = vmatpush1.bf16.msra.mxu1 %v10758_v45  ;;  %v12088_v39 = vmul.f32 -1.442695, %v10845_v57  ;;  %v10849_v17 = vpop.f32.mrb[243].mxu1  ;;  %v11381_v38 = vadd.f32 %v11380_v23, %v11379_v60  ;;  %v11375_v15 = vrot.slane %v11374_v51, 1  ;;  %v11322_v57 = vcombine.high %v11306_v59, %v11306_v59 }
 0x7bd   : > { %v12089_v20 = vmul.f32 -1.442695, %v10847_v58 }
 0x7be   : > { %12457 = vpow2.f32 %v12088_v39  ;;  %v11382_v54 = vrot.slane %v11381_v38, 1  ;;  %v11376_v24 = vadd.f32 %v11375_v15, %v11374_v51 }
 0x7bf   : > { %12085 = vmatmul.mubr.msk.bf16.vlgmr.msra.gmra.mrb[252].mxu1 %vm8528_vm3, %v12568_v19  ;;  %12459 = vpow2.f32 %v12089_v20  ;;  %vm19026_vm3 = vmmov %vm19025_vm6 }
 0x7c0   : > { %v11383_v29 = vadd.f32 %v11382_v54, %v11381_v38  ;;  %v11546_v35 = vsel %vm19025_vm6, %v18298_v31, %v11376_v24  ;;  %12461 = vrcp.f32 %v11243_v33  ;;  %v9675_v31 = vadd.f32 %v17958_v9, %v18251_v16  ;;  %vm19027_vm8 = vmmov %vm19026_vm3 }
 0x7c1   : > { %11562 = vst [vmem:[%s18321_s14] sm:$0x1f] %v11546_v35  ;;  %12463 = vrcp.f32 %v11244_v18  ;;  %v11323_v9 = vcombine.high %v11307_v7, %v11307_v7  ;;  %vm19028_vm4 = vmmov %vm19026_vm3 }
 0x7c2   : > { %v12450_v4 = vpop.eup %12449  ;;  %v11547_v48 = vsel %vm19026_vm3, %v18302_v21, %v11383_v29  ;;  %v9612_v21 = vadd.f32 %v17964_v8, %v18251_v16  ;;  %v12111_v11 = vmul.f32 -1.442695, %v9675_v31  ;;  %vm19029_vm11 = vmmov %vm19026_vm3 }
 0x7c3   : > { %v12452_v56 = vpop.eup %12451  ;;  %11563 = vst [vmem:[%s18321_s14 + $0x8] sm:$0x1f] %v11547_v48  ;;  %v11149_v46 = vadd.f32 1.0, %v12450_v4  ;;  %vm19030_vm7 = vmmov %vm19026_vm3 }
 0x7c4   : > { %v11150_v42 = vadd.f32 1.0, %v12452_v56  ;;  %v12454_v0 = vpop.eup %12453  ;;  %v12108_v5 = vmul.f32 -1.442695, %v9612_v21  ;;  %vm19031_vm1 = vmmov %vm19026_vm3 }
 0x7c5   : > { %12465 = vrcp.f32 %v11149_v46  ;;  %v12456_v44 = vpop.eup %12455  ;;  %v11293_v27 = vmul.f32 1.5707964, %v12454_v0  ;;  %vm19032_vm5 = vmmov %vm19031_vm1 }
 0x7c6   : > { %12467 = vrcp.f32 %v11150_v42  ;;  %v11294_v32 = vmul.f32 1.5707964, %v12456_v44  ;;  %vm19033_vm9 = vmmov %vm19031_vm1 }
 0x7c7   : > { %12469 = vpow2.f32 %v12110_v43  ;;  %v11502_v13 = vrot.slane %v11293_v27, 5  ;;  %vm19034_vm15 = vmmov %vm19031_vm1 }
 0x7c8   : > { %v12458_v34 = vpop.eup %12457  ;;  %v11503_v49 = vrot.slane %v11294_v32, 5  ;;  %vm19035_vm2 = vmmov %vm19031_vm1 }
 0x7c9   : > { %v12460_v26 = vpop.eup %12459  ;;  %v11147_v40 = vadd.f32 1.0, %v12458_v34  ;;  %vm19036_vm0 = vmmov %vm19031_vm1 }
 0x7ca   : > { %v11148_v50 = vadd.f32 1.0, %v12460_v26  ;;  %v12462_v22 = vpop.eup %12461  ;;  %vm19037_vm10 = vmmov %vm19036_vm0 }
 0x7cb   : > { %12471 = vrcp.f32 %v11147_v40  ;;  %v12464_v47 = vpop.eup %12463  ;;  %v11291_v8 = vmul.f32 1.5707964, %v12462_v22  ;;  %vm19038_vm14 = vmmov %vm19036_vm0 }
 0x7cc   : > { %12473 = vrcp.f32 %v11148_v50  ;;  %v11292_v3 = vmul.f32 1.5707964, %v12464_v47  ;;  %vm19039_vm13 = vmmov %vm19036_vm0 }
 0x7cd   : > { %12475 = vpow2.f32 %v12111_v11  ;;  %v11500_v58 = vrot.slane %v11291_v8, 5  ;;  %vm19040_vm6 = vmmov %vm19036_vm0 }
 0x7ce   : > { %12477 = vpow2.f32 %v12108_v5  ;;  %v11501_v51 = vrot.slane %v11292_v3, 5 }
 0x7cf   : > { %v12466_v45 = vpop.eup %12465  ;;  %12479 = vpow2.f32 %v12109_v61 }
 0x7d0   : > { %v12468_v41 = vpop.eup %12467  ;;  %v11341_v10 = vsub.f32 %v12466_v45, %v11307_v7  ;;  %v18340_v55 = vsel %vm11369_vm12, %v12466_v45, %v11502_v13 }
 0x7d1   : > { %v11342_v60 = vsub.f32 %v12468_v41, %v11323_v9  ;;  %v18343_v25 = vsel %vm11369_vm12, %v12468_v41, %v11503_v49  ;;  %v12470_v23 = vpop.eup %12469 }
 0x7d2   : > { %v11357_v37 = vmul.f32 %v11341_v10, %v11341_v10  ;;  %v11249_v56 = vadd.f32 1.0, %v12470_v23 }
 0x7d3   : > { %v11358_v1 = vmul.f32 %v11342_v60, %v11342_v60 }
 0x7d4   : > { %v11398_v39 = vsel %vm11369_vm12, %v11357_v37, 0.0  ;;  %v10967_v33 = vpop.f32.mrb[248].mxu0 }
 0x7d5   : > { %v12472_v28 = vpop.eup %12471  ;;  %v11399_v20 = vrot.slane %v11398_v39, 4  ;;  %v11405_v15 = vsel %vm11369_vm12, %v11358_v1, 0.0  ;;  %v10968_v24 = vadd.f32 %v10967_v33, %v18264_v12  ;;  %v10969_v29 = vpop.f32.mrb[249].mxu0 }
 0x7d6   : > { %v12474_v17 = vpop.eup %12473  ;;  %v11339_v36 = vsub.f32 %v12472_v28, %v11306_v59  ;;  %v18347_v38 = vsel %vm11369_vm12, %v12472_v28, %v11500_v58  ;;  %v11406_v18 = vrot.slane %v11405_v15, 4  ;;  %v10970_v4 = vadd.f32 %v10969_v29, %v18264_v12  ;;  %v10971_v48 = vpop.f32.mrb[250].mxu0 }
 0x7d7   : > { %v11340_v19 = vsub.f32 %v12474_v17, %v11322_v57  ;;  %v18351_v54 = vsel %vm11369_vm12, %v12474_v17, %v11501_v51  ;;  %v11400_v35 = vadd.f32 %v11399_v20, %v11398_v39  ;;  %v12094_v43 = vmul.f32 -1.442695, %v10968_v24  ;;  %v10972_v44 = vpop.f32.mrb[251].mxu0  ;;  %v12476_v50 = vpop.eup %12475 }
 0x7d8   : > { %v11355_v62 = vmul.f32 %v11339_v36, %v11339_v36  ;;  %v11407_v0 = vadd.f32 %v11406_v18, %v11405_v15  ;;  %v12095_v21 = vmul.f32 -1.442695, %v10970_v4  ;;  %v12478_v11 = vpop.eup %12477  ;;  %v11250_v59 = vadd.f32 1.0, %v12476_v50 }
 0x7d9   : > { %v11356_v46 = vmul.f32 %v11340_v19, %v11340_v19  ;;  %v10926_v42 = vpop.f32.mrb[244].mxu1  ;;  %v11401_v26 = vrot.slane %v11400_v35, 2  ;;  %12481 = vpow2.f32 %v12094_v43  ;;  %v12480_v61 = vpop.eup %12479  ;;  %v11247_v10 = vadd.f32 1.0, %v12478_v11 }
 0x7da   : > { %v11384_v34 = vsel %vm11369_vm12, %v11355_v62, 0.0  ;;  %v10927_v31 = vadd.f32 %v10926_v42, %v18264_v12  ;;  %v10928_v40 = vpop.f32.mrb[245].mxu1  ;;  %v11408_v7 = vrot.slane %v11407_v0, 2  ;;  %12483 = vpow2.f32 %v12095_v21  ;;  %v11308_v21 = vld [vmem:[%s18286_s15 + $0x18] sm:$0x77] }
 0x7db   : > { %v11385_v27 = vrot.slane %v11384_v34, 4  ;;  %v11391_v2 = vsel %vm11369_vm12, %v11356_v46, 0.0  ;;  %v10929_v32 = vadd.f32 %v10928_v40, %v18264_v12  ;;  %v10930_v22 = vpop.f32.mrb[246].mxu1  ;;  %v11402_v5 = vadd.f32 %v11401_v26, %v11400_v35 }
 0x7dc   : > { %v11392_v47 = vrot.slane %v11391_v2, 4  ;;  %v12092_v9 = vmul.f32 -1.442695, %v10927_v31  ;;  %v10931_v13 = vpop.f32.mrb[247].mxu1  ;;  %v11409_v8 = vadd.f32 %v11408_v7, %v11407_v0  ;;  %v11248_v37 = vadd.f32 1.0, %v12480_v61 }
 0x7dd   : > { %v11386_v45 = vadd.f32 %v11385_v27, %v11384_v34  ;;  %v12093_v49 = vmul.f32 -1.442695, %v10929_v32  ;;  %v11403_v3 = vrot.slane %v11402_v5, 1  ;;  %v9734_v48 = vadd.f32 %v18013_v6, %v18251_v16  ;;  %v11309_v34 = vld [vmem:[%s18286_s15 + $0x20] sm:$0x77] }
 0x7de   : > { %v11393_v41 = vadd.f32 %v11392_v47, %v11391_v2  ;;  %12485 = vpow2.f32 %v12092_v9  ;;  %v11410_v57 = vrot.slane %v11409_v8, 1  ;;  %v11325_v50 = vcombine.high %v11309_v34, %v11309_v34 }
 0x7df   : > { %v11387_v60 = vrot.slane %v11386_v45, 2  ;;  %12487 = vpow2.f32 %v12093_v49  ;;  %v11404_v58 = vadd.f32 %v11403_v3, %v11402_v5  ;;  %v12112_v44 = vmul.f32 -1.442695, %v9734_v48 }
 0x7e0   : > { %v11394_v23 = vrot.slane %v11393_v41, 2  ;;  %12489 = vrcp.f32 %v11249_v56  ;;  %v11411_v28 = vadd.f32 %v11410_v57, %v11409_v8 }
 0x7e1   : > { %v11388_v1 = vadd.f32 %v11387_v60, %v11386_v45  ;;  %12491 = vrcp.f32 %v11250_v59  ;;  %v11550_v39 = vsel %vm19027_vm8, %v18340_v55, %v11404_v58 }
 0x7e2   : > { %v11395_v51 = vadd.f32 %v11394_v23, %v11393_v41  ;;  %12493 = vrcp.f32 %v11247_v10  ;;  %11566 = vst [vmem:[%s18321_s14 + $0x20] sm:$0x1f] %v11550_v39  ;;  %v11551_v36 = vsel %vm19028_vm4, %v18343_v25, %v11411_v28 }
 0x7e3   : > { %v11389_v17 = vrot.slane %v11388_v1, 1  ;;  %12495 = vrcp.f32 %v11248_v37  ;;  %11567 = vst [vmem:[%s18321_s14 + $0x28] sm:$0x1f] %v11551_v36  ;;  %v12482_v33 = vpop.eup %12481 }
 0x7e4   : > { %v11396_v20 = vrot.slane %v11395_v51, 1  ;;  %v12484_v18 = vpop.eup %12483  ;;  %v11153_v29 = vadd.f32 1.0, %v12482_v33 }
 0x7e5   : > { %v11390_v15 = vadd.f32 %v11389_v17, %v11388_v1  ;;  %v11154_v35 = vadd.f32 1.0, %v12484_v18 }
 0x7e6   : > { %v11397_v19 = vadd.f32 %v11396_v20, %v11395_v51  ;;  %12497 = vrcp.f32 %v11153_v29 }
 0x7e7   : > { %v11548_v24 = vsel %vm19029_vm11, %v18347_v38, %v11390_v15  ;;  %12499 = vrcp.f32 %v11154_v35  ;;  %v9736_v38 = vadd.f32 %v18017_v53, %v18251_v16  ;;  %v11324_v53 = vcombine.high %v11308_v21, %v11308_v21 }
 0x7e8   : > { %v12486_v62 = vpop.eup %12485  ;;  %11564 = vst [vmem:[%s18321_s14 + $0x10] sm:$0x1f] %v11548_v24  ;;  %v11549_v55 = vsel %vm19030_vm7, %v18351_v54, %v11397_v19 }
 0x7e9   : > { %v12488_v4 = vpop.eup %12487  ;;  %11565 = vst [vmem:[%s18321_s14 + $0x18] sm:$0x1f] %v11549_v55  ;;  %v11151_v25 = vadd.f32 1.0, %v12486_v62  ;;  %v12113_v31 = vmul.f32 -1.442695, %v9736_v38 }
 0x7ea   : > { %v11152_v56 = vadd.f32 1.0, %v12488_v4  ;;  %v12490_v46 = vpop.eup %12489 }
 0x7eb   : > { %12501 = vrcp.f32 %v11151_v25  ;;  %v12492_v42 = vpop.eup %12491  ;;  %v11297_v43 = vmul.f32 1.5707964, %v12490_v46 }
 0x7ec   : > { %12503 = vrcp.f32 %v11152_v56  ;;  %v12494_v54 = vpop.eup %12493  ;;  %v11298_v26 = vmul.f32 1.5707964, %v12492_v42 }
 0x7ed   : > { %v12496_v0 = vpop.eup %12495  ;;  %v11295_v40 = vmul.f32 1.5707964, %v12494_v54  ;;  %v11506_v27 = vrot.slane %v11297_v43, 5  ;;  %12505 = vpow2.f32 %v12112_v44 }
 0x7ee   : > { %v11296_v6 = vmul.f32 1.5707964, %v12496_v0  ;;  %v11507_v7 = vrot.slane %v11298_v26, 5  ;;  %12507 = vpow2.f32 %v12113_v31 }
 0x7ef   : > { %v11504_v22 = vrot.slane %v11295_v40, 5 }
 0x7f0   : > { %v12498_v2 = vpop.eup %12497  ;;  %v11505_v9 = vrot.slane %v11296_v6, 5 }
 0x7f1   : > { %v12500_v32 = vpop.eup %12499  ;;  %v11345_v11 = vsub.f32 %v12498_v2, %v11309_v34  ;;  %v11538_v47 = vsel %vm11369_vm12, %v12498_v2, %v11506_v27 }
 0x7f2   : > { %v11346_v13 = vsub.f32 %v12500_v32, %v11325_v50  ;;  %v11539_v61 = vsel %vm11369_vm12, %v12500_v32, %v11507_v7 }
 0x7f3   : > { %v11361_v59 = vmul.f32 %v11345_v11, %v11345_v11 }
 0x7f4   : > { %v11362_v10 = vmul.f32 %v11346_v13, %v11346_v13 }
 0x7f5   : > { %v12502_v5 = vpop.eup %12501  ;;  %v11426_v57 = vsel %vm11369_vm12, %v11361_v59, 0.0 }
 0x7f6   : > { %v12504_v45 = vpop.eup %12503  ;;  %v11343_v8 = vsub.f32 %v12502_v5, %v11308_v21  ;;  %v11536_v49 = vsel %vm11369_vm12, %v12502_v5, %v11504_v22  ;;  %v11427_v23 = vrot.slane %v11426_v57, 4  ;;  %v11433_v1 = vsel %vm11369_vm12, %v11362_v10, 0.0 }
 0x7f7   : > { %v11344_v41 = vsub.f32 %v12504_v45, %v11324_v53  ;;  %v11537_v3 = vsel %vm11369_vm12, %v12504_v45, %v11505_v9  ;;  %v11434_v39 = vrot.slane %v11433_v1, 4  ;;  %v12506_v18 = vpop.eup %12505 }
 0x7f8   : > { %v11359_v60 = vmul.f32 %v11343_v8, %v11343_v8  ;;  %v11428_v15 = vadd.f32 %v11427_v23, %v11426_v57  ;;  %v12508_v35 = vpop.eup %12507  ;;  %v11251_v38 = vadd.f32 1.0, %v12506_v18 }
 0x7f9   : > { %v11360_v37 = vmul.f32 %v11344_v41, %v11344_v41  ;;  %v11008_v58 = vpop.f32.mrb[248].mxu1  ;;  %v11435_v62 = vadd.f32 %v11434_v39, %v11433_v1  ;;  %v11252_v0 = vadd.f32 1.0, %v12508_v35  ;;  %v11310_v41 = vld [vmem:[%s18286_s15 + $0x28] sm:$0x77] }
 0x7fa   : > { %v11412_v28 = vsel %vm11369_vm12, %v11359_v60, 0.0  ;;  %v11009_v51 = vadd.f32 %v11008_v58, %v18264_v12  ;;  %v11010_v17 = vpop.f32.mrb[249].mxu1  ;;  %v11429_v25 = vrot.slane %v11428_v15, 2  ;;  %v11326_v60 = vcombine.high %v11310_v41, %v11310_v41 }
 0x7fb   : > { %v11413_v36 = vrot.slane %v11412_v28, 4  ;;  %v11419_v20 = vsel %vm11369_vm12, %v11360_v37, 0.0  ;;  %v11011_v33 = vadd.f32 %v11010_v17, %v18264_v12  ;;  %v11012_v19 = vpop.f32.mrb[250].mxu1  ;;  %v11436_v46 = vrot.slane %v11435_v62, 2 }
 0x7fc   : > { %v11420_v24 = vrot.slane %v11419_v20, 4  ;;  %v12096_v29 = vmul.f32 -1.442695, %v11009_v51  ;;  %v11013_v55 = vpop.f32.mrb[251].mxu1  ;;  %v11430_v54 = vadd.f32 %v11429_v25, %v11428_v15 }
 0x7fd   : > { %v11414_v4 = vadd.f32 %v11413_v36, %v11412_v28  ;;  %v12097_v48 = vmul.f32 -1.442695, %v11011_v33  ;;  %v11437_v44 = vadd.f32 %v11436_v46, %v11435_v62  ;;  %v9797_v46 = vadd.f32 %v18055_v52, %v18251_v16 }
 0x7fe   : > { %v11421_v56 = vadd.f32 %v11420_v24, %v11419_v20  ;;  %12509 = vpow2.f32 %v12096_v29  ;;  %v11431_v26 = vrot.slane %v11430_v54, 1 }
 0x7ff   : > { %v11415_v42 = vrot.slane %v11414_v4, 2  ;;  %12511 = vpow2.f32 %v12097_v48  ;;  %v11438_v40 = vrot.slane %v11437_v44, 1 }
 0x800   : > { %v11422_v43 = vrot.slane %v11421_v56, 2  ;;  %12513 = vrcp.f32 %v11251_v38  ;;  %v11432_v6 = vadd.f32 %v11431_v26, %v11430_v54 }
 0x801   : > { %v11416_v34 = vadd.f32 %v11415_v42, %v11414_v4  ;;  %12515 = vrcp.f32 %v11252_v0  ;;  %v11439_v27 = vadd.f32 %v11438_v40, %v11437_v44  ;;  %v12115_v42 = vmul.f32 -1.442695, %v9797_v46 }
 0x802   : > { %v11423_v31 = vadd.f32 %v11422_v43, %v11421_v56  ;;  %v11554_v7 = vsel %vm19031_vm1, %v11538_v47, %v11432_v6  ;;  %v9795_v56 = vadd.f32 %v18053_v30, %v18251_v16 }
 0x803   : > { %v11417_v21 = vrot.slane %v11416_v34, 1  ;;  %11570 = vst [vmem:[%s18321_s14 + $0x40] sm:$0x1f] %v11554_v7  ;;  %v11555_v32 = vsel %vm19032_vm5, %v11539_v61, %v11439_v27 }
 0x804   : > { %v11424_v50 = vrot.slane %v11423_v31, 1  ;;  %11571 = vst [vmem:[%s18321_s14 + $0x48] sm:$0x1f] %v11555_v32  ;;  %v12114_v38 = vmul.f32 -1.442695, %v9795_v56 }
 0x805   : > { %v11418_v2 = vadd.f32 %v11417_v21, %v11416_v34 }
 0x806   : > { %v11425_v53 = vadd.f32 %v11424_v50, %v11423_v31 }
 0x807   : > { %v11552_v22 = vsel %vm19033_vm9, %v11536_v49, %v11418_v2 }
 0x808   : > { %v12510_v11 = vpop.eup %12509  ;;  %11568 = vst [vmem:[%s18321_s14 + $0x30] sm:$0x1f] %v11552_v22  ;;  %v11553_v5 = vsel %vm19034_vm15, %v11537_v3, %v11425_v53 }
 0x809   : > { %v12512_v9 = vpop.eup %12511  ;;  %11569 = vst [vmem:[%s18321_s14 + $0x38] sm:$0x1f] %v11553_v5  ;;  %v11155_v13 = vadd.f32 1.0, %v12510_v11  ;;  %v11311_v11 = vld [vmem:[%s18286_s15 + $0x30] sm:$0x77]  ;;  %v9856_v5 = vadd.f32 %v18111_v63, %v18251_v16 }
 0x80a   : > { %v11156_v45 = vadd.f32 1.0, %v12512_v9  ;;  %v12514_v8 = vpop.eup %12513 }
 0x80b   : > { %12517 = vrcp.f32 %v11155_v13  ;;  %v12516_v47 = vpop.eup %12515  ;;  %v11299_v59 = vmul.f32 1.5707964, %v12514_v8  ;;  %v9858_v13 = vadd.f32 %v18114_v14, %v18251_v16 }
 0x80c   : > { %12519 = vrcp.f32 %v11156_v45  ;;  %v11300_v10 = vmul.f32 1.5707964, %v12516_v47  ;;  %v11327_v45 = vcombine.high %v11311_v11, %v11311_v11 }
 0x80d   : > { %v11508_v61 = vrot.slane %v11299_v59, 5  ;;  %12521 = vpow2.f32 %v12114_v38  ;;  %v12116_v59 = vmul.f32 -1.442695, %v9856_v5 }
 0x80e   : > { %v11509_v49 = vrot.slane %v11300_v10, 5  ;;  %12523 = vpow2.f32 %v12115_v42 }
 0x815   : > { %v12518_v57 = vpop.eup %12517 }
 0x816   : > { %v12520_v37 = vpop.eup %12519  ;;  %v11347_v23 = vsub.f32 %v12518_v57, %v11310_v41  ;;  %v11540_v58 = vsel %vm11369_vm12, %v12518_v57, %v11508_v61 }
 0x817   : > { %v11348_v3 = vsub.f32 %v12520_v37, %v11326_v60  ;;  %v11541_v1 = vsel %vm11369_vm12, %v12520_v37, %v11509_v49  ;;  %v12522_v26 = vpop.eup %12521  ;;  %v12117_v60 = vmul.f32 -1.442695, %v9858_v13 }
 0x818   : > { %v11363_v28 = vmul.f32 %v11347_v23, %v11347_v23  ;;  %v12524_v21 = vpop.eup %12523  ;;  %v11253_v30 = vadd.f32 1.0, %v12522_v26 }
 0x819   : > { %v11364_v51 = vmul.f32 %v11348_v3, %v11348_v3  ;;  %v11254_v52 = vadd.f32 1.0, %v12524_v21 }
 0x81a   : > { %v11440_v39 = vsel %vm11369_vm12, %v11363_v28, 0.0 }
 0x81b   : > { %v11441_v17 = vrot.slane %v11440_v39, 4  ;;  %v11447_v36 = vsel %vm11369_vm12, %v11364_v51, 0.0 }
 0x81c   : > { %v11448_v20 = vrot.slane %v11447_v36, 4 }
 0x81d   : > { %v11442_v15 = vadd.f32 %v11441_v17, %v11440_v39 }
 0x81e   : > { %v11449_v33 = vadd.f32 %v11448_v20, %v11447_v36 }
 0x81f   : > { %v11443_v19 = vrot.slane %v11442_v15, 2 }
 0x820   : > { %v11450_v18 = vrot.slane %v11449_v33, 2 }
 0x821   : > { %v11444_v24 = vadd.f32 %v11443_v19, %v11442_v15 }
 0x822   : > { %v11451_v29 = vadd.f32 %v11450_v18, %v11449_v33 }
 0x823   : > { %v11445_v62 = vrot.slane %v11444_v24, 1 }
 0x824   : > { %v11452_v55 = vrot.slane %v11451_v29, 1 }
 0x825   : > { %v11446_v35 = vadd.f32 %v11445_v62, %v11444_v24 }
 0x826   : > { %v11453_v4 = vadd.f32 %v11452_v55, %v11451_v29 }
 0x827   : > { %v11556_v25 = vsel %vm19035_vm2, %v11540_v58, %v11446_v35 }
 0x828   : > { %11572 = vst [vmem:[%s18321_s14 + $0x50] sm:$0x1f] %v11556_v25  ;;  %v11557_v48 = vsel %vm19036_vm0, %v11541_v1, %v11453_v4 }
 0x829   : > { %11573 = vst [vmem:[%s18321_s14 + $0x58] sm:$0x1f] %v11557_v48 }
 0x86a   : > { %v11049_v54 = vpop.f32.mrb[252].mxu0 }
 0x86b   : > { %v11050_v0 = vadd.f32 %v11049_v54, %v18264_v12  ;;  %v11051_v43 = vpop.f32.mrb[253].mxu0 }
 0x86c   : > { %v11052_v44 = vadd.f32 %v11051_v43, %v18264_v12  ;;  %v11053_v34 = vpop.f32.mrb[254].mxu0 }
 0x86d   : > { %v12098_v31 = vmul.f32 -1.442695, %v11050_v0  ;;  %v11054_v40 = vpop.f32.mrb[255].mxu0 }
 0x86e   : > { %v12099_v6 = vmul.f32 -1.442695, %v11052_v44  ;;  %v11312_v40 = vld [vmem:[%s18286_s15 + $0x38] sm:$0x77] }
 0x86f   : > { %12525 = vpow2.f32 %v12098_v31 }
 0x870   : > { %12527 = vpow2.f32 %v12099_v6  ;;  %v11328_v6 = vcombine.high %v11312_v40, %v11312_v40 }
 0x871   : > { %12529 = vrcp.f32 %v11253_v30 }
 0x872   : > { %12531 = vrcp.f32 %v11254_v52 }
 0x879   : > { %v12526_v50 = vpop.eup %12525 }
 0x87a   : > { %v12528_v27 = vpop.eup %12527  ;;  %v11157_v2 = vadd.f32 1.0, %v12526_v50 }
 0x87b   : > { %v11158_v7 = vadd.f32 1.0, %v12528_v27  ;;  %v12530_v53 = vpop.eup %12529 }
 0x87c   : > { %12533 = vrcp.f32 %v11157_v2  ;;  %v12532_v32 = vpop.eup %12531  ;;  %v11301_v22 = vmul.f32 1.5707964, %v12530_v53 }
 0x87d   : > { %12535 = vrcp.f32 %v11158_v7  ;;  %v11302_v9 = vmul.f32 1.5707964, %v12532_v32 }
 0x87e   : > { %v11510_v8 = vrot.slane %v11301_v22, 5  ;;  %12537 = vpow2.f32 %v12116_v59 }
 0x87f   : > { %v11511_v41 = vrot.slane %v11302_v9, 5  ;;  %12539 = vpow2.f32 %v12117_v60 }
 0x886   : > { %v12534_v47 = vpop.eup %12533 }
 0x887   : > { %v12536_v10 = vpop.eup %12535  ;;  %v11349_v61 = vsub.f32 %v12534_v47, %v11311_v11  ;;  %v11542_v57 = vsel %vm11369_vm12, %v12534_v47, %v11510_v8 }
 0x888   : > { %v11350_v49 = vsub.f32 %v12536_v10, %v11327_v45  ;;  %v11543_v37 = vsel %vm11369_vm12, %v12536_v10, %v11511_v41  ;;  %v12538_v24 = vpop.eup %12537 }
 0x889   : > { %v11365_v23 = vmul.f32 %v11349_v61, %v11349_v61  ;;  %v12540_v35 = vpop.eup %12539  ;;  %v11255_v56 = vadd.f32 1.0, %v12538_v24 }
 0x88a   : > { %v11366_v63 = vmul.f32 %v11350_v49, %v11350_v49  ;;  %v11256_v38 = vadd.f32 1.0, %v12540_v35 }
 0x88b   : > { %v11454_v58 = vsel %vm11369_vm12, %v11365_v23, 0.0 }
 0x88c   : > { %v11455_v14 = vrot.slane %v11454_v58, 4  ;;  %v11461_v16 = vsel %vm11369_vm12, %v11366_v63, 0.0 }
 0x88d   : > { %v11462_v3 = vrot.slane %v11461_v16, 4 }
 0x88e   : > { %v11456_v1 = vadd.f32 %v11455_v14, %v11454_v58 }
 0x88f   : > { %v11463_v28 = vadd.f32 %v11462_v3, %v11461_v16 }
 0x890   : > { %v11457_v51 = vrot.slane %v11456_v1, 2 }
 0x891   : > { %v11464_v17 = vrot.slane %v11463_v28, 2 }
 0x892   : > { %v11090_v39 = vpop.f32.mrb[252].mxu1  ;;  %v11458_v36 = vadd.f32 %v11457_v51, %v11456_v1 }
 0x893   : > { %v11091_v20 = vadd.f32 %v11090_v39, %v18264_v12  ;;  %v11092_v15 = vpop.f32.mrb[253].mxu1  ;;  %v11465_v33 = vadd.f32 %v11464_v17, %v11463_v28 }
 0x894   : > { %v11093_v19 = vadd.f32 %v11092_v15, %v18264_v12  ;;  %v11094_v18 = vpop.f32.mrb[254].mxu1  ;;  %v11459_v29 = vrot.slane %v11458_v36, 1 }
 0x895   : > { %v12100_v62 = vmul.f32 -1.442695, %v11091_v20  ;;  %v11095_v55 = vpop.f32.mrb[255].mxu1  ;;  %v11466_v4 = vrot.slane %v11465_v33, 1 }
 0x896   : > { %v12101_v25 = vmul.f32 -1.442695, %v11093_v19  ;;  %v11460_v48 = vadd.f32 %v11459_v29, %v11458_v36 }
 0x897   : > { %12541 = vpow2.f32 %v12100_v62  ;;  %v11467_v46 = vadd.f32 %v11466_v4, %v11465_v33 }
 0x898   : > { %12543 = vpow2.f32 %v12101_v25  ;;  %v11558_v42 = vsel %vm19037_vm10, %v11542_v57, %v11460_v48 }
 0x899   : > { %11574 = vst [vmem:[%s18321_s14 + $0x60] sm:$0x1f] %v11558_v42  ;;  %v11559_v12 = vsel %vm19038_vm14, %v11543_v37, %v11467_v46  ;;  %12545 = vrcp.f32 %v11255_v56 }
 0x89a   : > { %11575 = vst [vmem:[%s18321_s14 + $0x68] sm:$0x1f] %v11559_v12  ;;  %12547 = vrcp.f32 %v11256_v38 }
 0x8a1   : > { %v12542_v54 = vpop.eup %12541 }
 0x8a2   : > { %v12544_v0 = vpop.eup %12543  ;;  %v11159_v43 = vadd.f32 1.0, %v12542_v54 }
 0x8a3   : > { %v11160_v44 = vadd.f32 1.0, %v12544_v0  ;;  %v12546_v34 = vpop.eup %12545 }
 0x8a4   : > { %12549 = vrcp.f32 %v11159_v43  ;;  %v12548_v26 = vpop.eup %12547  ;;  %v11303_v31 = vmul.f32 1.5707964, %v12546_v34 }
 0x8a5   : > { %12551 = vrcp.f32 %v11160_v44  ;;  %v11304_v21 = vmul.f32 1.5707964, %v12548_v26 }
 0x8a6   : > { %v11512_v30 = vrot.slane %v11303_v31, 5 }
 0x8a7   : > { %v11513_v50 = vrot.slane %v11304_v21, 5 }
 0x8ae   : > { %v12550_v52 = vpop.eup %12549 }
 0x8af   : > { %v12552_v27 = vpop.eup %12551  ;;  %v11351_v2 = vsub.f32 %v12550_v52, %v11312_v40  ;;  %v11544_v7 = vsel %vm11369_vm12, %v12550_v52, %v11512_v30 }
 0x8b0   : > { %v11352_v53 = vsub.f32 %v12552_v27, %v11328_v6  ;;  %v11545_v32 = vsel %vm11369_vm12, %v12552_v27, %v11513_v50 }
 0x8b1   : > { %v11367_v22 = vmul.f32 %v11351_v2, %v11351_v2 }
 0x8b2   : > { %v11368_v11 = vmul.f32 %v11352_v53, %v11352_v53 }
 0x8b3   : > { %v11468_v5 = vsel %vm11369_vm12, %v11367_v22, 0.0 }
 0x8b4   : > { %v11469_v9 = vrot.slane %v11468_v5, 4  ;;  %v11475_v13 = vsel %vm11369_vm12, %v11368_v11, 0.0 }
 0x8b5   : > { %v11476_v45 = vrot.slane %v11475_v13, 4 }
 0x8b6   : > { %v11470_v8 = vadd.f32 %v11469_v9, %v11468_v5 }
 0x8b7   : > { %v11477_v47 = vadd.f32 %v11476_v45, %v11475_v13 }
 0x8b8   : > { %v11471_v59 = vrot.slane %v11470_v8, 2 }
 0x8b9   : > { %v11478_v41 = vrot.slane %v11477_v47, 2 }
 0x8ba   : > { %v11472_v10 = vadd.f32 %v11471_v59, %v11470_v8 }
 0x8bb   : > { %v11479_v60 = vadd.f32 %v11478_v41, %v11477_v47 }
 0x8bc   : > { %v11473_v61 = vrot.slane %v11472_v10, 1 }
 0x8bd   : > { %v11480_v57 = vrot.slane %v11479_v60, 1 }
 0x8be   : > { %v11474_v49 = vadd.f32 %v11473_v61, %v11472_v10 }
 0x8bf   : > { %v11481_v37 = vadd.f32 %v11480_v57, %v11479_v60 }
 0x8c0   : > { %v11560_v23 = vsel %vm19039_vm13, %v11544_v7, %v11474_v49 }
 0x8c1   : > { %11576 = vst [vmem:[%s18321_s14 + $0x70] sm:$0x1f] %v11560_v23  ;;  %v11561_v63 = vsel %vm19040_vm6, %v11545_v32, %v11481_v37 }
 0x8c2   : > { %11577 = vst [vmem:[%s18321_s14 + $0x78] sm:$0x1f] %v11561_v63 }
 0x8c3 PF: > { %s23_s25 = sadd.s32 1, %s12575_s25  }
 0x8c4   : > { %p20_p4 = scmp.ge.s32.totalorder %s23_s25, 5  }
 0x8c6   :  { %22 = sbr.rel (!%p20_p4) target bundleno = 1 (0x1), region = 108 }

</bundles_post_ra>
